<compile_context>
chip_gen: v7x
topology: tpu7x:2x2x1
jax: 0.10.0
libtpu: 0.0.40
codegen_flags: <defaults>
</compile_context>

<pallas_src>
import math

import jax
import jax.numpy as jnp
from jax import lax
from jax.experimental import pallas as pl
from jax.experimental.pallas import tpu as pltpu  # noqa: F401

# ---------------- synthetic "t5-base-japanese"-like config (small) ----------
VOCAB = 128
D_MODEL = 32
N_HEADS = 4
D_KV = 8                      # head dim; N_HEADS * D_KV == inner dim
D_FF = 64
N_LAYERS = 2                  # encoder layers == decoder layers
NUM_BUCKETS = 32
MAX_DISTANCE = 128
LN_EPS = 1e-6
NEG_INF = -1e9


# ====================== traced helpers used inside kernels ==================
def _rms(x2, w2):
    """T5 RMSNorm. x2: (M, D) f32, w2: (1, D)."""
    var = jnp.mean(x2 * x2, axis=-1, keepdims=True)
    return x2 * lax.rsqrt(var + LN_EPS) * w2


def _mha(x2, m2, wq, wk, wv, wo, pos, mask, b, tq, tk):
    """Multi-head attention fused inside a kernel.

    x2:   (b*tq, D)  query-side activations (already RMSNormed)
    m2:   (b*tk, D)  key/value-side activations
    wq/wk/wv: (H, D, D_KV) ; wo: (H, D_KV, D)
    pos:  (H, tq, tk) relative-position bias or None (cross-attention)
    mask: (b, tq, tk) or (b, 1, tk) additive mask
    returns (b*tq, D)  — sum over heads of ctx_h @ Wo_h (== concat + o-proj).
    T5 attention has NO 1/sqrt(d_k) scaling.
    """
    out = jnp.zeros((b * tq, D_MODEL), jnp.float32)
    for h in range(N_HEADS):
        qh = jnp.dot(x2, wq[h], preferred_element_type=jnp.float32).reshape(b, tq, D_KV)
        kh = jnp.dot(m2, wk[h], preferred_element_type=jnp.float32).reshape(b, tk, D_KV)
        vh = jnp.dot(m2, wv[h], preferred_element_type=jnp.float32).reshape(b, tk, D_KV)
        s = jnp.einsum('bqd,bkd->bqk', qh, kh, preferred_element_type=jnp.float32)
        if pos is not None:
            s = s + pos[h][None, :, :]
        s = s + mask
        mx = jnp.max(s, axis=-1, keepdims=True)
        p = jnp.exp(s - mx)
        denom = jnp.sum(p, axis=-1, keepdims=True)
        p = p * pl.reciprocal(denom, approx=True)
        ctx = jnp.einsum('bqk,bkd->bqd', p, vh, preferred_element_type=jnp.float32)
        out = out + jnp.dot(ctx.reshape(b * tq, D_KV), wo[h],
                            preferred_element_type=jnp.float32)
    return out


# =============================== Pallas kernels ==============================
def _make_encoder_kernel(b, te):
    def kernel(x_ref, pos_ref, mask_ref,
               ln1_ref, wq_ref, wk_ref, wv_ref, wo_ref,
               ln2_ref, wi_ref, wf_ref, lnf_ref, out_ref):
        h2 = x_ref[...]                       # (B*TE, D)
        pos = pos_ref[...]                    # (H, TE, TE)
        mask = mask_ref[...]                  # (B, 1, TE) additive
        for l in range(N_LAYERS):
            n2 = _rms(h2, ln1_ref[l])
            h2 = h2 + _mha(n2, n2, wq_ref[l], wk_ref[l], wv_ref[l], wo_ref[l],
                           pos, mask, b, te, te)
            n2 = _rms(h2, ln2_ref[l])
            ff = jnp.maximum(jnp.dot(n2, wi_ref[l],
                                     preferred_element_type=jnp.float32), 0.0)
            h2 = h2 + jnp.dot(ff, wf_ref[l], preferred_element_type=jnp.float32)
        out_ref[...] = _rms(h2, lnf_ref[...])
    return kernel


def _make_decoder_kernel(b, td, te):
    def kernel(x_ref, enc_ref, pos_ref, smask_ref, cmask_ref,
               ln1_ref, sq_ref, sk_ref, sv_ref, so_ref,
               ln2_ref, cq_ref, ck_ref, cv_ref, co_ref,
               ln3_ref, wi_ref, wf_ref, lnf_ref, out_ref):
        h2 = x_ref[...]                       # (B*TD, D)
        enc2 = enc_ref[...]                   # (B*TE, D)
        pos = pos_ref[...]                    # (H, TD, TD)
        smask = smask_ref[...]                # (B, TD, TD) causal+pad additive
        cmask = cmask_ref[...]                # (B, 1, TE) encoder pad additive
        for l in range(N_LAYERS):
            n2 = _rms(h2, ln1_ref[l])
            h2 = h2 + _mha(n2, n2, sq_ref[l], sk_ref[l], sv_ref[l], so_ref[l],
                           pos, smask, b, td, td)
            n2 = _rms(h2, ln2_ref[l])
            h2 = h2 + _mha(n2, enc2, cq_ref[l], ck_ref[l], cv_ref[l], co_ref[l],
                           None, cmask, b, td, te)
            n2 = _rms(h2, ln3_ref[l])
            ff = jnp.maximum(jnp.dot(n2, wi_ref[l],
                                     preferred_element_type=jnp.float32), 0.0)
            h2 = h2 + jnp.dot(ff, wf_ref[l], preferred_element_type=jnp.float32)
        out_ref[...] = _rms(h2, lnf_ref[...])
    return kernel


def _lmhead_ce_kernel(x_ref, emb_ref, lab_ref, logits_ref, loss_ref):
    # Tied LM head (T5 rescales by d_model**-0.5 when embeddings are tied)
    x = x_ref[...] * (D_MODEL ** -0.5)                      # (N, D)
    logits = jnp.dot(x, emb_ref[...].T,                     # (N, V), V lane-dense
                     preferred_element_type=jnp.float32)
    logits_ref[...] = logits
    # Cross-entropy with ignore_index = -100, reduced to scalar in-kernel.
    labels = lab_ref[...]                                   # (N, 1) int32
    mx = jnp.max(logits, axis=-1, keepdims=True)
    lse = jnp.log(jnp.sum(jnp.exp(logits - mx), axis=-1, keepdims=True)) + mx
    n, v = logits.shape
    iota = lax.broadcasted_iota(jnp.int32, (n, v), 1)
    picked = jnp.sum(jnp.where(iota == labels, logits, 0.0),
                     axis=-1, keepdims=True)
    valid = (labels != -100).astype(jnp.float32)
    nll = (lse - picked) * valid                            # (N, 1)
    snll = jnp.sum(nll, axis=0, keepdims=True)              # (1, 1)
    sval = jnp.sum(valid, axis=0, keepdims=True)            # (1, 1)
    loss_ref[...] = snll / jnp.maximum(sval, 1.0)


# =============================== T5 glue / model =============================
def _relative_position_bucket(rel_pos, bidirectional,
                              num_buckets=NUM_BUCKETS, max_distance=MAX_DISTANCE):
    relative_buckets = jnp.zeros_like(rel_pos)
    if bidirectional:
        num_buckets //= 2
        relative_buckets = relative_buckets + (rel_pos > 0).astype(jnp.int32) * num_buckets
        rel_pos = jnp.abs(rel_pos)
    else:
        rel_pos = -jnp.minimum(rel_pos, 0)
    max_exact = num_buckets // 2
    is_small = rel_pos < max_exact
    rel_safe = jnp.maximum(rel_pos, 1).astype(jnp.float32)   # avoid log(0)
    rel_large = max_exact + (
        jnp.log(rel_safe / max_exact)
        / math.log(max_distance / max_exact)
        * (num_buckets - max_exact)
    ).astype(jnp.int32)
    rel_large = jnp.minimum(rel_large, num_buckets - 1)
    return relative_buckets + jnp.where(is_small, rel_pos, rel_large)


def compute_bias(rel_bias_w, tq, tk, bidirectional):
    ctx = jnp.arange(tq, dtype=jnp.int32)[:, None]
    mem = jnp.arange(tk, dtype=jnp.int32)[None, :]
    bucket = _relative_position_bucket(mem - ctx, bidirectional)
    values = rel_bias_w[bucket]                          # (Tq, Tk, H)
    return jnp.transpose(values, (2, 0, 1))              # (H, Tq, Tk)


def t5_forward(params, input_ids, attention_mask=None, decoder_input_ids=None,
               decoder_attention_mask=None, labels=None):
    b, te = input_ids.shape
    td = decoder_input_ids.shape[1]
    if attention_mask is None:
        attention_mask = jnp.ones((b, te), jnp.int32)
    if decoder_attention_mask is None:
        decoder_attention_mask = jnp.ones((b, td), jnp.int32)

    # ---- additive masks (kept un-broadcast; combined inside the kernels) ----
    enc_mask_add = ((1.0 - attention_mask.astype(jnp.float32)) * NEG_INF)[:, None, :]   # (B,1,TE)
    causal = (jnp.arange(td)[None, :] <= jnp.arange(td)[:, None]).astype(jnp.float32)
    dec_comb = causal[None, :, :] * decoder_attention_mask[:, None, :].astype(jnp.float32)
    dec_mask_add = (1.0 - dec_comb) * NEG_INF                                            # (B,TD,TD)

    # ---- relative position bias (layer 0, shared across layers, as in T5) ----
    enc_pos = compute_bias(params['enc_rel_bias'], te, te, bidirectional=True)    # (H,TE,TE)
    dec_pos = compute_bias(params['dec_rel_bias'], td, td, bidirectional=False)   # (H,TD,TD)

    # ---- embedding gathers (glue) ----
    x_enc = params['shared'][input_ids].reshape(b * te, D_MODEL)
    x_dec = params['shared'][decoder_input_ids].reshape(b * td, D_MODEL)

    # ---- fused encoder stack (one pallas_call) ----
    ep = params['encoder']
    enc_out2 = pl.pallas_call(
        _make_encoder_kernel(b, te),
        out_shape=jax.ShapeDtypeStruct((b * te, D_MODEL), jnp.float32),
    )(x_enc, enc_pos, enc_mask_add,
      ep['ln_self'], ep['wq'], ep['wk'], ep['wv'], ep['wo'],
      ep['ln_ff'], ep['wi'], ep['wf'], params['enc_final_ln'])

    # ---- fused decoder stack (one pallas_call) ----
    dp = params['decoder']
    dec_out2 = pl.pallas_call(
        _make_decoder_kernel(b, td, te),
        out_shape=jax.ShapeDtypeStruct((b * td, D_MODEL), jnp.float32),
    )(x_dec, enc_out2, dec_pos, dec_mask_add, enc_mask_add,
      dp['ln_self'], dp['sq'], dp['sk'], dp['sv'], dp['so'],
      dp['ln_cross'], dp['cq'], dp['ck'], dp['cv'], dp['co'],
      dp['ln_ff'], dp['wi'], dp['wf'], params['dec_final_ln'])

    # ---- fused tied LM head + cross-entropy (one pallas_call) ----
    labels2 = labels.reshape(b * td, 1).astype(jnp.int32)
    logits2, loss11 = pl.pallas_call(
        _lmhead_ce_kernel,
        out_shape=(jax.ShapeDtypeStruct((b * td, VOCAB), jnp.float32),
                   jax.ShapeDtypeStruct((1, 1), jnp.float32)),
    )(dec_out2, params['shared'], labels2)

    logits = logits2.reshape(b, td, VOCAB)
    loss = loss11[0, 0]
    return loss, logits


# =============================== parameter init ==============================
def init_params(key):
    # TODO(synk): deterministic synthetic init — no pretrained checkpoint load.
    keys = iter(jax.random.split(key, 64))

    def nrm(shape, scale=0.02):
        return scale * jax.random.normal(next(keys), shape, dtype=jnp.float32)

    L, H, D, DK, FF = N_LAYERS, N_HEADS, D_MODEL, D_KV, D_FF
    ones_ln = lambda: jnp.ones((L, 1, D), jnp.float32)

    encoder = {
        'ln_self': ones_ln(),
        'wq': nrm((L, H, D, DK)), 'wk': nrm((L, H, D, DK)),
        'wv': nrm((L, H, D, DK)), 'wo': nrm((L, H, DK, D)),
        'ln_ff': ones_ln(),
        'wi': nrm((L, D, FF)), 'wf': nrm((L, FF, D)),
    }
    decoder = {
        'ln_self': ones_ln(),
        'sq': nrm((L, H, D, DK)), 'sk': nrm((L, H, D, DK)),
        'sv': nrm((L, H, D, DK)), 'so': nrm((L, H, DK, D)),
        'ln_cross': ones_ln(),
        'cq': nrm((L, H, D, DK)), 'ck': nrm((L, H, D, DK)),
        'cv': nrm((L, H, D, DK)), 'co': nrm((L, H, DK, D)),
        'ln_ff': ones_ln(),
        'wi': nrm((L, D, FF)), 'wf': nrm((L, FF, D)),
    }
    return {
        'shared': nrm((VOCAB, D_MODEL), scale=1.0),
        'enc_rel_bias': nrm((NUM_BUCKETS, N_HEADS)),
        'dec_rel_bias': nrm((NUM_BUCKETS, N_HEADS)),
        'encoder': encoder,
        'decoder': decoder,
        'enc_final_ln': jnp.ones((1, D_MODEL), jnp.float32),
        'dec_final_ln': jnp.ones((1, D_MODEL), jnp.float32),
    }


# ==================================== main ===================================
if __name__ == "__main__":
    B, TE, TD = 2, 8, 8
    key = jax.random.PRNGKey(0)
    kp, k1, k2, k3 = jax.random.split(key, 4)
    params = init_params(kp)

    input_ids = jax.random.randint(k1, (B, TE), 0, VOCAB, dtype=jnp.int32)
    decoder_input_ids = jax.random.randint(k2, (B, TD), 0, VOCAB, dtype=jnp.int32)
    labels = jax.random.randint(k3, (B, TD), 0, VOCAB, dtype=jnp.int32)
    labels = labels.at[:, -1].set(-100)                 # exercise ignore_index
    attention_mask = jnp.ones((B, TE), dtype=jnp.int32).at[1, -2:].set(0)
    decoder_attention_mask = jnp.ones((B, TD), dtype=jnp.int32)

    fwd = jax.jit(t5_forward)
    loss, logits = fwd(params, input_ids, attention_mask,
                       decoder_input_ids, decoder_attention_mask, labels)
    jax.block_until_ready((loss, logits))

    assert logits.shape == (B, TD, VOCAB)
    assert bool(jnp.isfinite(loss))
    print("KERNEL_OK")
</pallas_src>

<mosaic_0001>
module attributes {stable_mosaic.version = 11 : i64} {
  func.func @kernel(%arg0: memref<16x32xf32, #tpu.memory_space<vmem>>, %arg1: memref<4x8x8xf32, #tpu.memory_space<vmem>>, %arg2: memref<2x1x8xf32, #tpu.memory_space<vmem>>, %arg3: memref<2x1x32xf32, #tpu.memory_space<vmem>>, %arg4: memref<2x4x32x8xf32, #tpu.memory_space<vmem>>, %arg5: memref<2x4x32x8xf32, #tpu.memory_space<vmem>>, %arg6: memref<2x4x32x8xf32, #tpu.memory_space<vmem>>, %arg7: memref<2x4x8x32xf32, #tpu.memory_space<vmem>>, %arg8: memref<2x1x32xf32, #tpu.memory_space<vmem>>, %arg9: memref<2x32x64xf32, #tpu.memory_space<vmem>>, %arg10: memref<2x64x32xf32, #tpu.memory_space<vmem>>, %arg11: memref<1x32xf32, #tpu.memory_space<vmem>>, %arg12: memref<16x32xf32, #tpu.memory_space<vmem>>) attributes {dimension_semantics = [], scalar_prefetch = 0 : i64, scratch_operands = 0 : i64, tpu.core_type = #tpu.core_type<tc>} {
    %c0 = arith.constant 0 : index
    %c0_0 = arith.constant 0 : index
    %0 = vector.load %arg0[%c0, %c0_0] : memref<16x32xf32, #tpu.memory_space<vmem>>, vector<16x32xf32>
    %c0_1 = arith.constant 0 : index
    %c0_2 = arith.constant 0 : index
    %c0_3 = arith.constant 0 : index
    %1 = vector.load %arg1[%c0_1, %c0_2, %c0_3] : memref<4x8x8xf32, #tpu.memory_space<vmem>>, vector<4x8x8xf32>
    %c0_4 = arith.constant 0 : index
    %c0_5 = arith.constant 0 : index
    %c0_6 = arith.constant 0 : index
    %2 = vector.load %arg2[%c0_4, %c0_5, %c0_6] : memref<2x1x8xf32, #tpu.memory_space<vmem>>, vector<2x1x8xf32>
    %c0_7 = arith.constant 0 : index
    %c0_8 = arith.constant 0 : index
    %c0_9 = arith.constant 0 : index
    %3 = vector.load %arg3[%c0_7, %c0_8, %c0_9] : memref<2x1x32xf32, #tpu.memory_space<vmem>>, vector<1x1x32xf32>
    %4 = vector.shape_cast %3 : vector<1x1x32xf32> to vector<1x32xf32>
    %5 = arith.mulf %0, %0 : vector<16x32xf32>
    %cst = arith.constant dense<0.000000e+00> : vector<16xf32>
    %6 = vector.multi_reduction <add>, %5, %cst [1] : vector<16x32xf32> to vector<16xf32>
    %7 = vector.shape_cast %6 : vector<16xf32> to vector<16x1xf32>
    %cst_10 = arith.constant 3.200000e+01 : f32
    %8 = vector.broadcast %cst_10 : f32 to vector<16x1xf32>
    %9 = arith.divf %7, %8 : vector<16x1xf32>
    %cst_11 = arith.constant 9.99999997E-7 : f32
    %10 = vector.broadcast %cst_11 : f32 to vector<16x1xf32>
    %11 = arith.addf %9, %10 : vector<16x1xf32>
    %12 = math.rsqrt %11 : vector<16x1xf32>
    %13 = vector.broadcast %12 : vector<16x1xf32> to vector<16x32xf32>
    %14 = arith.mulf %0, %13 : vector<16x32xf32>
    %15 = vector.broadcast %4 : vector<1x32xf32> to vector<16x32xf32>
    %16 = arith.mulf %14, %15 : vector<16x32xf32>
    %c0_12 = arith.constant 0 : index
    %c0_13 = arith.constant 0 : index
    %c0_14 = arith.constant 0 : index
    %c0_15 = arith.constant 0 : index
    %17 = vector.load %arg4[%c0_12, %c0_13, %c0_14, %c0_15] : memref<2x4x32x8xf32, #tpu.memory_space<vmem>>, vector<1x4x32x8xf32>
    %18 = vector.shape_cast %17 : vector<1x4x32x8xf32> to vector<4x32x8xf32>
    %c0_16 = arith.constant 0 : index
    %c0_17 = arith.constant 0 : index
    %c0_18 = arith.constant 0 : index
    %c0_19 = arith.constant 0 : index
    %19 = vector.load %arg5[%c0_16, %c0_17, %c0_18, %c0_19] : memref<2x4x32x8xf32, #tpu.memory_space<vmem>>, vector<1x4x32x8xf32>
    %20 = vector.shape_cast %19 : vector<1x4x32x8xf32> to vector<4x32x8xf32>
    %c0_20 = arith.constant 0 : index
    %c0_21 = arith.constant 0 : index
    %c0_22 = arith.constant 0 : index
    %c0_23 = arith.constant 0 : index
    %21 = vector.load %arg6[%c0_20, %c0_21, %c0_22, %c0_23] : memref<2x4x32x8xf32, #tpu.memory_space<vmem>>, vector<1x4x32x8xf32>
    %22 = vector.shape_cast %21 : vector<1x4x32x8xf32> to vector<4x32x8xf32>
    %c0_24 = arith.constant 0 : index
    %c0_25 = arith.constant 0 : index
    %c0_26 = arith.constant 0 : index
    %c0_27 = arith.constant 0 : index
    %23 = vector.load %arg7[%c0_24, %c0_25, %c0_26, %c0_27] : memref<2x4x8x32xf32, #tpu.memory_space<vmem>>, vector<1x4x8x32xf32>
    %24 = vector.shape_cast %23 : vector<1x4x8x32xf32> to vector<4x8x32xf32>
    %cst_28 = arith.constant 0.000000e+00 : f32
    %25 = vector.broadcast %cst_28 : f32 to vector<16x32xf32>
    %26 = vector.extract_strided_slice %18 {offsets = [0, 0, 0], sizes = [1, 32, 8], strides = [1, 1, 1]} : vector<4x32x8xf32> to vector<1x32x8xf32>
    %27 = vector.shape_cast %26 : vector<1x32x8xf32> to vector<32x8xf32>
    %cst_29 = arith.constant dense<0.000000e+00> : vector<16x8xf32>
    %28 = tpu.matmul %16, %27, %cst_29 {dimension_numbers = #tpu.dot_dimension_numbers<[1], [0], [0], [1], [0, 0, 1, 1], [], []>} : vector<16x32xf32>, vector<32x8xf32>, vector<16x8xf32> -> vector<16x8xf32>
    %29 = vector.shape_cast %28 : vector<16x8xf32> to vector<2x8x8xf32>
    %30 = vector.extract_strided_slice %20 {offsets = [0, 0, 0], sizes = [1, 32, 8], strides = [1, 1, 1]} : vector<4x32x8xf32> to vector<1x32x8xf32>
    %31 = vector.shape_cast %30 : vector<1x32x8xf32> to vector<32x8xf32>
    %cst_30 = arith.constant dense<0.000000e+00> : vector<16x8xf32>
    %32 = tpu.matmul %16, %31, %cst_30 {dimension_numbers = #tpu.dot_dimension_numbers<[1], [0], [0], [1], [0, 0, 1, 1], [], []>} : vector<16x32xf32>, vector<32x8xf32>, vector<16x8xf32> -> vector<16x8xf32>
    %33 = vector.shape_cast %32 : vector<16x8xf32> to vector<2x8x8xf32>
    %34 = vector.extract_strided_slice %22 {offsets = [0, 0, 0], sizes = [1, 32, 8], strides = [1, 1, 1]} : vector<4x32x8xf32> to vector<1x32x8xf32>
    %35 = vector.shape_cast %34 : vector<1x32x8xf32> to vector<32x8xf32>
    %cst_31 = arith.constant dense<0.000000e+00> : vector<16x8xf32>
    %36 = tpu.matmul %16, %35, %cst_31 {dimension_numbers = #tpu.dot_dimension_numbers<[1], [0], [0], [1], [0, 0, 1, 1], [], []>} : vector<16x32xf32>, vector<32x8xf32>, vector<16x8xf32> -> vector<16x8xf32>
    %37 = vector.shape_cast %36 : vector<16x8xf32> to vector<2x8x8xf32>
    "tpu.trace_start"() <{level = 10 : i32, message = "bqd,bkd->bqk"}> : () -> ()
    %cst_32 = arith.constant dense<0.000000e+00> : vector<2x8x8xf32>
    %38 = tpu.matmul %29, %33, %cst_32 {dimension_numbers = #tpu.dot_dimension_numbers<[2], [2], [1], [1], [0, 0, 0, 1, 1, 1], [0], [0]>} : vector<2x8x8xf32>, vector<2x8x8xf32>, vector<2x8x8xf32> -> vector<2x8x8xf32>
    "tpu.trace_stop"() : () -> ()
    %39 = vector.extract_strided_slice %1 {offsets = [0, 0, 0], sizes = [1, 8, 8], strides = [1, 1, 1]} : vector<4x8x8xf32> to vector<1x8x8xf32>
    %40 = vector.shape_cast %39 : vector<1x8x8xf32> to vector<8x8xf32>
    %41 = vector.shape_cast %40 : vector<8x8xf32> to vector<1x8x8xf32>
    %42 = vector.broadcast %41 : vector<1x8x8xf32> to vector<2x8x8xf32>
    %43 = arith.addf %38, %42 : vector<2x8x8xf32>
    %44 = vector.broadcast %2 : vector<2x1x8xf32> to vector<2x8x8xf32>
    %45 = arith.addf %43, %44 : vector<2x8x8xf32>
    %cst_33 = arith.constant dense<0xFF800000> : vector<2x8xf32>
    %46 = vector.multi_reduction <maximumf>, %45, %cst_33 [2] : vector<2x8x8xf32> to vector<2x8xf32>
    %47 = vector.shape_cast %46 : vector<2x8xf32> to vector<2x8x1xf32>
    %48 = vector.broadcast %47 : vector<2x8x1xf32> to vector<2x8x8xf32>
    %49 = arith.subf %45, %48 : vector<2x8x8xf32>
    %50 = math.exp %49 : vector<2x8x8xf32>
    %cst_34 = arith.constant dense<0.000000e+00> : vector<2x8xf32>
    %51 = vector.multi_reduction <add>, %50, %cst_34 [2] : vector<2x8x8xf32> to vector<2x8xf32>
    %52 = vector.shape_cast %51 : vector<2x8xf32> to vector<2x8x1xf32>
    %53 = tpu.reciprocal %52 {approx = true} : vector<2x8x1xf32> -> vector<2x8x1xf32>
    %54 = vector.broadcast %53 : vector<2x8x1xf32> to vector<2x8x8xf32>
    %55 = arith.mulf %50, %54 : vector<2x8x8xf32>
    "tpu.trace_start"() <{level = 10 : i32, message = "bqk,bkd->bqd"}> : () -> ()
    %cst_35 = arith.constant dense<0.000000e+00> : vector<2x8x8xf32>
    %56 = tpu.matmul %55, %37, %cst_35 {dimension_numbers = #tpu.dot_dimension_numbers<[2], [1], [1], [2], [0, 0, 0, 1, 1, 2], [0], [0]>} : vector<2x8x8xf32>, vector<2x8x8xf32>, vector<2x8x8xf32> -> vector<2x8x8xf32>
    "tpu.trace_stop"() : () -> ()
    %57 = vector.shape_cast %56 : vector<2x8x8xf32> to vector<16x8xf32>
    %58 = vector.extract_strided_slice %24 {offsets = [0, 0, 0], sizes = [1, 8, 32], strides = [1, 1, 1]} : vector<4x8x32xf32> to vector<1x8x32xf32>
    %59 = vector.shape_cast %58 : vector<1x8x32xf32> to vector<8x32xf32>
    %cst_36 = arith.constant dense<0.000000e+00> : vector<16x32xf32>
    %60 = tpu.matmul %57, %59, %cst_36 {dimension_numbers = #tpu.dot_dimension_numbers<[1], [0], [0], [1], [0, 0, 1, 1], [], []>} : vector<16x8xf32>, vector<8x32xf32>, vector<16x32xf32> -> vector<16x32xf32>
    %61 = arith.addf %25, %60 : vector<16x32xf32>
    %62 = vector.extract_strided_slice %18 {offsets = [1, 0, 0], sizes = [1, 32, 8], strides = [1, 1, 1]} : vector<4x32x8xf32> to vector<1x32x8xf32>
    %63 = vector.shape_cast %62 : vector<1x32x8xf32> to vector<32x8xf32>
    %cst_37 = arith.constant dense<0.000000e+00> : vector<16x8xf32>
    %64 = tpu.matmul %16, %63, %cst_37 {dimension_numbers = #tpu.dot_dimension_numbers<[1], [0], [0], [1], [0, 0, 1, 1], [], []>} : vector<16x32xf32>, vector<32x8xf32>, vector<16x8xf32> -> vector<16x8xf32>
    %65 = vector.shape_cast %64 : vector<16x8xf32> to vector<2x8x8xf32>
    %66 = vector.extract_strided_slice %20 {offsets = [1, 0, 0], sizes = [1, 32, 8], strides = [1, 1, 1]} : vector<4x32x8xf32> to vector<1x32x8xf32>
    %67 = vector.shape_cast %66 : vector<1x32x8xf32> to vector<32x8xf32>
    %cst_38 = arith.constant dense<0.000000e+00> : vector<16x8xf32>
    %68 = tpu.matmul %16, %67, %cst_38 {dimension_numbers = #tpu.dot_dimension_numbers<[1], [0], [0], [1], [0, 0, 1, 1], [], []>} : vector<16x32xf32>, vector<32x8xf32>, vector<16x8xf32> -> vector<16x8xf32>
    %69 = vector.shape_cast %68 : vector<16x8xf32> to vector<2x8x8xf32>
    %70 = vector.extract_strided_slice %22 {offsets = [1, 0, 0], sizes = [1, 32, 8], strides = [1, 1, 1]} : vector<4x32x8xf32> to vector<1x32x8xf32>
    %71 = vector.shape_cast %70 : vector<1x32x8xf32> to vector<32x8xf32>
    %cst_39 = arith.constant dense<0.000000e+00> : vector<16x8xf32>
    %72 = tpu.matmul %16, %71, %cst_39 {dimension_numbers = #tpu.dot_dimension_numbers<[1], [0], [0], [1], [0, 0, 1, 1], [], []>} : vector<16x32xf32>, vector<32x8xf32>, vector<16x8xf32> -> vector<16x8xf32>
    %73 = vector.shape_cast %72 : vector<16x8xf32> to vector<2x8x8xf32>
    "tpu.trace_start"() <{level = 10 : i32, message = "bqd,bkd->bqk"}> : () -> ()
    %cst_40 = arith.constant dense<0.000000e+00> : vector<2x8x8xf32>
    %74 = tpu.matmul %65, %69, %cst_40 {dimension_numbers = #tpu.dot_dimension_numbers<[2], [2], [1], [1], [0, 0, 0, 1, 1, 1], [0], [0]>} : vector<2x8x8xf32>, vector<2x8x8xf32>, vector<2x8x8xf32> -> vector<2x8x8xf32>
    "tpu.trace_stop"() : () -> ()
    %75 = vector.extract_strided_slice %1 {offsets = [1, 0, 0], sizes = [1, 8, 8], strides = [1, 1, 1]} : vector<4x8x8xf32> to vector<1x8x8xf32>
    %76 = vector.shape_cast %75 : vector<1x8x8xf32> to vector<8x8xf32>
    %77 = vector.shape_cast %76 : vector<8x8xf32> to vector<1x8x8xf32>
    %78 = vector.broadcast %77 : vector<1x8x8xf32> to vector<2x8x8xf32>
    %79 = arith.addf %74, %78 : vector<2x8x8xf32>
    %80 = vector.broadcast %2 : vector<2x1x8xf32> to vector<2x8x8xf32>
    %81 = arith.addf %79, %80 : vector<2x8x8xf32>
    %cst_41 = arith.constant dense<0xFF800000> : vector<2x8xf32>
    %82 = vector.multi_reduction <maximumf>, %81, %cst_41 [2] : vector<2x8x8xf32> to vector<2x8xf32>
    %83 = vector.shape_cast %82 : vector<2x8xf32> to vector<2x8x1xf32>
    %84 = vector.broadcast %83 : vector<2x8x1xf32> to vector<2x8x8xf32>
    %85 = arith.subf %81, %84 : vector<2x8x8xf32>
    %86 = math.exp %85 : vector<2x8x8xf32>
    %cst_42 = arith.constant dense<0.000000e+00> : vector<2x8xf32>
    %87 = vector.multi_reduction <add>, %86, %cst_42 [2] : vector<2x8x8xf32> to vector<2x8xf32>
    %88 = vector.shape_cast %87 : vector<2x8xf32> to vector<2x8x1xf32>
    %89 = tpu.reciprocal %88 {approx = true} : vector<2x8x1xf32> -> vector<2x8x1xf32>
    %90 = vector.broadcast %89 : vector<2x8x1xf32> to vector<2x8x8xf32>
    %91 = arith.mulf %86, %90 : vector<2x8x8xf32>
    "tpu.trace_start"() <{level = 10 : i32, message = "bqk,bkd->bqd"}> : () -> ()
    %cst_43 = arith.constant dense<0.000000e+00> : vector<2x8x8xf32>
    %92 = tpu.matmul %91, %73, %cst_43 {dimension_numbers = #tpu.dot_dimension_numbers<[2], [1], [1], [2], [0, 0, 0, 1, 1, 2], [0], [0]>} : vector<2x8x8xf32>, vector<2x8x8xf32>, vector<2x8x8xf32> -> vector<2x8x8xf32>
    "tpu.trace_stop"() : () -> ()
    %93 = vector.shape_cast %92 : vector<2x8x8xf32> to vector<16x8xf32>
    %94 = vector.extract_strided_slice %24 {offsets = [1, 0, 0], sizes = [1, 8, 32], strides = [1, 1, 1]} : vector<4x8x32xf32> to vector<1x8x32xf32>
    %95 = vector.shape_cast %94 : vector<1x8x32xf32> to vector<8x32xf32>
    %cst_44 = arith.constant dense<0.000000e+00> : vector<16x32xf32>
    %96 = tpu.matmul %93, %95, %cst_44 {dimension_numbers = #tpu.dot_dimension_numbers<[1], [0], [0], [1], [0, 0, 1, 1], [], []>} : vector<16x8xf32>, vector<8x32xf32>, vector<16x32xf32> -> vector<16x32xf32>
    %97 = arith.addf %61, %96 : vector<16x32xf32>
    %98 = vector.extract_strided_slice %18 {offsets = [2, 0, 0], sizes = [1, 32, 8], strides = [1, 1, 1]} : vector<4x32x8xf32> to vector<1x32x8xf32>
    %99 = vector.shape_cast %98 : vector<1x32x8xf32> to vector<32x8xf32>
    %cst_45 = arith.constant dense<0.000000e+00> : vector<16x8xf32>
    %100 = tpu.matmul %16, %99, %cst_45 {dimension_numbers = #tpu.dot_dimension_numbers<[1], [0], [0], [1], [0, 0, 1, 1], [], []>} : vector<16x32xf32>, vector<32x8xf32>, vector<16x8xf32> -> vector<16x8xf32>
    %101 = vector.shape_cast %100 : vector<16x8xf32> to vector<2x8x8xf32>
    %102 = vector.extract_strided_slice %20 {offsets = [2, 0, 0], sizes = [1, 32, 8], strides = [1, 1, 1]} : vector<4x32x8xf32> to vector<1x32x8xf32>
    %103 = vector.shape_cast %102 : vector<1x32x8xf32> to vector<32x8xf32>
    %cst_46 = arith.constant dense<0.000000e+00> : vector<16x8xf32>
    %104 = tpu.matmul %16, %103, %cst_46 {dimension_numbers = #tpu.dot_dimension_numbers<[1], [0], [0], [1], [0, 0, 1, 1], [], []>} : vector<16x32xf32>, vector<32x8xf32>, vector<16x8xf32> -> vector<16x8xf32>
    %105 = vector.shape_cast %104 : vector<16x8xf32> to vector<2x8x8xf32>
    %106 = vector.extract_strided_slice %22 {offsets = [2, 0, 0], sizes = [1, 32, 8], strides = [1, 1, 1]} : vector<4x32x8xf32> to vector<1x32x8xf32>
    %107 = vector.shape_cast %106 : vector<1x32x8xf32> to vector<32x8xf32>
    %cst_47 = arith.constant dense<0.000000e+00> : vector<16x8xf32>
    %108 = tpu.matmul %16, %107, %cst_47 {dimension_numbers = #tpu.dot_dimension_numbers<[1], [0], [0], [1], [0, 0, 1, 1], [], []>} : vector<16x32xf32>, vector<32x8xf32>, vector<16x8xf32> -> vector<16x8xf32>
    %109 = vector.shape_cast %108 : vector<16x8xf32> to vector<2x8x8xf32>
    "tpu.trace_start"() <{level = 10 : i32, message = "bqd,bkd->bqk"}> : () -> ()
    %cst_48 = arith.constant dense<0.000000e+00> : vector<2x8x8xf32>
    %110 = tpu.matmul %101, %105, %cst_48 {dimension_numbers = #tpu.dot_dimension_numbers<[2], [2], [1], [1], [0, 0, 0, 1, 1, 1], [0], [0]>} : vector<2x8x8xf32>, vector<2x8x8xf32>, vector<2x8x8xf32> -> vector<2x8x8xf32>
    "tpu.trace_stop"() : () -> ()
    %111 = vector.extract_strided_slice %1 {offsets = [2, 0, 0], sizes = [1, 8, 8], strides = [1, 1, 1]} : vector<4x8x8xf32> to vector<1x8x8xf32>
    %112 = vector.shape_cast %111 : vector<1x8x8xf32> to vector<8x8xf32>
    %113 = vector.shape_cast %112 : vector<8x8xf32> to vector<1x8x8xf32>
    %114 = vector.broadcast %113 : vector<1x8x8xf32> to vector<2x8x8xf32>
    %115 = arith.addf %110, %114 : vector<2x8x8xf32>
    %116 = vector.broadcast %2 : vector<2x1x8xf32> to vector<2x8x8xf32>
    %117 = arith.addf %115, %116 : vector<2x8x8xf32>
    %cst_49 = arith.constant dense<0xFF800000> : vector<2x8xf32>
    %118 = vector.multi_reduction <maximumf>, %117, %cst_49 [2] : vector<2x8x8xf32> to vector<2x8xf32>
    %119 = vector.shape_cast %118 : vector<2x8xf32> to vector<2x8x1xf32>
    %120 = vector.broadcast %119 : vector<2x8x1xf32> to vector<2x8x8xf32>
    %121 = arith.subf %117, %120 : vector<2x8x8xf32>
    %122 = math.exp %121 : vector<2x8x8xf32>
    %cst_50 = arith.constant dense<0.000000e+00> : vector<2x8xf32>
    %123 = vector.multi_reduction <add>, %122, %cst_50 [2] : vector<2x8x8xf32> to vector<2x8xf32>
    %124 = vector.shape_cast %123 : vector<2x8xf32> to vector<2x8x1xf32>
    %125 = tpu.reciprocal %124 {approx = true} : vector<2x8x1xf32> -> vector<2x8x1xf32>
    %126 = vector.broadcast %125 : vector<2x8x1xf32> to vector<2x8x8xf32>
    %127 = arith.mulf %122, %126 : vector<2x8x8xf32>
    "tpu.trace_start"() <{level = 10 : i32, message = "bqk,bkd->bqd"}> : () -> ()
    %cst_51 = arith.constant dense<0.000000e+00> : vector<2x8x8xf32>
    %128 = tpu.matmul %127, %109, %cst_51 {dimension_numbers = #tpu.dot_dimension_numbers<[2], [1], [1], [2], [0, 0, 0, 1, 1, 2], [0], [0]>} : vector<2x8x8xf32>, vector<2x8x8xf32>, vector<2x8x8xf32> -> vector<2x8x8xf32>
    "tpu.trace_stop"() : () -> ()
    %129 = vector.shape_cast %128 : vector<2x8x8xf32> to vector<16x8xf32>
    %130 = vector.extract_strided_slice %24 {offsets = [2, 0, 0], sizes = [1, 8, 32], strides = [1, 1, 1]} : vector<4x8x32xf32> to vector<1x8x32xf32>
    %131 = vector.shape_cast %130 : vector<1x8x32xf32> to vector<8x32xf32>
    %cst_52 = arith.constant dense<0.000000e+00> : vector<16x32xf32>
    %132 = tpu.matmul %129, %131, %cst_52 {dimension_numbers = #tpu.dot_dimension_numbers<[1], [0], [0], [1], [0, 0, 1, 1], [], []>} : vector<16x8xf32>, vector<8x32xf32>, vector<16x32xf32> -> vector<16x32xf32>
    %133 = arith.addf %97, %132 : vector<16x32xf32>
    %134 = vector.extract_strided_slice %18 {offsets = [3, 0, 0], sizes = [1, 32, 8], strides = [1, 1, 1]} : vector<4x32x8xf32> to vector<1x32x8xf32>
    %135 = vector.shape_cast %134 : vector<1x32x8xf32> to vector<32x8xf32>
    %cst_53 = arith.constant dense<0.000000e+00> : vector<16x8xf32>
    %136 = tpu.matmul %16, %135, %cst_53 {dimension_numbers = #tpu.dot_dimension_numbers<[1], [0], [0], [1], [0, 0, 1, 1], [], []>} : vector<16x32xf32>, vector<32x8xf32>, vector<16x8xf32> -> vector<16x8xf32>
    %137 = vector.shape_cast %136 : vector<16x8xf32> to vector<2x8x8xf32>
    %138 = vector.extract_strided_slice %20 {offsets = [3, 0, 0], sizes = [1, 32, 8], strides = [1, 1, 1]} : vector<4x32x8xf32> to vector<1x32x8xf32>
    %139 = vector.shape_cast %138 : vector<1x32x8xf32> to vector<32x8xf32>
    %cst_54 = arith.constant dense<0.000000e+00> : vector<16x8xf32>
    %140 = tpu.matmul %16, %139, %cst_54 {dimension_numbers = #tpu.dot_dimension_numbers<[1], [0], [0], [1], [0, 0, 1, 1], [], []>} : vector<16x32xf32>, vector<32x8xf32>, vector<16x8xf32> -> vector<16x8xf32>
    %141 = vector.shape_cast %140 : vector<16x8xf32> to vector<2x8x8xf32>
    %142 = vector.extract_strided_slice %22 {offsets = [3, 0, 0], sizes = [1, 32, 8], strides = [1, 1, 1]} : vector<4x32x8xf32> to vector<1x32x8xf32>
    %143 = vector.shape_cast %142 : vector<1x32x8xf32> to vector<32x8xf32>
    %cst_55 = arith.constant dense<0.000000e+00> : vector<16x8xf32>
    %144 = tpu.matmul %16, %143, %cst_55 {dimension_numbers = #tpu.dot_dimension_numbers<[1], [0], [0], [1], [0, 0, 1, 1], [], []>} : vector<16x32xf32>, vector<32x8xf32>, vector<16x8xf32> -> vector<16x8xf32>
    %145 = vector.shape_cast %144 : vector<16x8xf32> to vector<2x8x8xf32>
    "tpu.trace_start"() <{level = 10 : i32, message = "bqd,bkd->bqk"}> : () -> ()
    %cst_56 = arith.constant dense<0.000000e+00> : vector<2x8x8xf32>
    %146 = tpu.matmul %137, %141, %cst_56 {dimension_numbers = #tpu.dot_dimension_numbers<[2], [2], [1], [1], [0, 0, 0, 1, 1, 1], [0], [0]>} : vector<2x8x8xf32>, vector<2x8x8xf32>, vector<2x8x8xf32> -> vector<2x8x8xf32>
    "tpu.trace_stop"() : () -> ()
    %147 = vector.extract_strided_slice %1 {offsets = [3, 0, 0], sizes = [1, 8, 8], strides = [1, 1, 1]} : vector<4x8x8xf32> to vector<1x8x8xf32>
    %148 = vector.shape_cast %147 : vector<1x8x8xf32> to vector<8x8xf32>
    %149 = vector.shape_cast %148 : vector<8x8xf32> to vector<1x8x8xf32>
    %150 = vector.broadcast %149 : vector<1x8x8xf32> to vector<2x8x8xf32>
    %151 = arith.addf %146, %150 : vector<2x8x8xf32>
    %152 = vector.broadcast %2 : vector<2x1x8xf32> to vector<2x8x8xf32>
    %153 = arith.addf %151, %152 : vector<2x8x8xf32>
    %cst_57 = arith.constant dense<0xFF800000> : vector<2x8xf32>
    %154 = vector.multi_reduction <maximumf>, %153, %cst_57 [2] : vector<2x8x8xf32> to vector<2x8xf32>
    %155 = vector.shape_cast %154 : vector<2x8xf32> to vector<2x8x1xf32>
    %156 = vector.broadcast %155 : vector<2x8x1xf32> to vector<2x8x8xf32>
    %157 = arith.subf %153, %156 : vector<2x8x8xf32>
    %158 = math.exp %157 : vector<2x8x8xf32>
    %cst_58 = arith.constant dense<0.000000e+00> : vector<2x8xf32>
    %159 = vector.multi_reduction <add>, %158, %cst_58 [2] : vector<2x8x8xf32> to vector<2x8xf32>
    %160 = vector.shape_cast %159 : vector<2x8xf32> to vector<2x8x1xf32>
    %161 = tpu.reciprocal %160 {approx = true} : vector<2x8x1xf32> -> vector<2x8x1xf32>
    %162 = vector.broadcast %161 : vector<2x8x1xf32> to vector<2x8x8xf32>
    %163 = arith.mulf %158, %162 : vector<2x8x8xf32>
    "tpu.trace_start"() <{level = 10 : i32, message = "bqk,bkd->bqd"}> : () -> ()
    %cst_59 = arith.constant dense<0.000000e+00> : vector<2x8x8xf32>
    %164 = tpu.matmul %163, %145, %cst_59 {dimension_numbers = #tpu.dot_dimension_numbers<[2], [1], [1], [2], [0, 0, 0, 1, 1, 2], [0], [0]>} : vector<2x8x8xf32>, vector<2x8x8xf32>, vector<2x8x8xf32> -> vector<2x8x8xf32>
    "tpu.trace_stop"() : () -> ()
    %165 = vector.shape_cast %164 : vector<2x8x8xf32> to vector<16x8xf32>
    %166 = vector.extract_strided_slice %24 {offsets = [3, 0, 0], sizes = [1, 8, 32], strides = [1, 1, 1]} : vector<4x8x32xf32> to vector<1x8x32xf32>
    %167 = vector.shape_cast %166 : vector<1x8x32xf32> to vector<8x32xf32>
    %cst_60 = arith.constant dense<0.000000e+00> : vector<16x32xf32>
    %168 = tpu.matmul %165, %167, %cst_60 {dimension_numbers = #tpu.dot_dimension_numbers<[1], [0], [0], [1], [0, 0, 1, 1], [], []>} : vector<16x8xf32>, vector<8x32xf32>, vector<16x32xf32> -> vector<16x32xf32>
    %169 = arith.addf %133, %168 : vector<16x32xf32>
    %170 = arith.addf %0, %169 : vector<16x32xf32>
    %c0_61 = arith.constant 0 : index
    %c0_62 = arith.constant 0 : index
    %c0_63 = arith.constant 0 : index
    %171 = vector.load %arg8[%c0_61, %c0_62, %c0_63] : memref<2x1x32xf32, #tpu.memory_space<vmem>>, vector<1x1x32xf32>
    %172 = vector.shape_cast %171 : vector<1x1x32xf32> to vector<1x32xf32>
    %173 = arith.mulf %170, %170 : vector<16x32xf32>
    %cst_64 = arith.constant dense<0.000000e+00> : vector<16xf32>
    %174 = vector.multi_reduction <add>, %173, %cst_64 [1] : vector<16x32xf32> to vector<16xf32>
    %175 = vector.shape_cast %174 : vector<16xf32> to vector<16x1xf32>
    %cst_65 = arith.constant 3.200000e+01 : f32
    %176 = vector.broadcast %cst_65 : f32 to vector<16x1xf32>
    %177 = arith.divf %175, %176 : vector<16x1xf32>
    %cst_66 = arith.constant 9.99999997E-7 : f32
    %178 = vector.broadcast %cst_66 : f32 to vector<16x1xf32>
    %179 = arith.addf %177, %178 : vector<16x1xf32>
    %180 = math.rsqrt %179 : vector<16x1xf32>
    %181 = vector.broadcast %180 : vector<16x1xf32> to vector<16x32xf32>
    %182 = arith.mulf %170, %181 : vector<16x32xf32>
    %183 = vector.broadcast %172 : vector<1x32xf32> to vector<16x32xf32>
    %184 = arith.mulf %182, %183 : vector<16x32xf32>
    %c0_67 = arith.constant 0 : index
    %c0_68 = arith.constant 0 : index
    %c0_69 = arith.constant 0 : index
    %185 = vector.load %arg9[%c0_67, %c0_68, %c0_69] : memref<2x32x64xf32, #tpu.memory_space<vmem>>, vector<1x32x64xf32>
    %186 = vector.shape_cast %185 : vector<1x32x64xf32> to vector<32x64xf32>
    %cst_70 = arith.constant dense<0.000000e+00> : vector<16x64xf32>
    %187 = tpu.matmul %184, %186, %cst_70 {dimension_numbers = #tpu.dot_dimension_numbers<[1], [0], [0], [1], [0, 0, 1, 1], [], []>} : vector<16x32xf32>, vector<32x64xf32>, vector<16x64xf32> -> vector<16x64xf32>
    %cst_71 = arith.constant 0.000000e+00 : f32
    %188 = vector.broadcast %cst_71 : f32 to vector<16x64xf32>
    %189 = arith.maximumf %187, %188 : vector<16x64xf32>
    %c0_72 = arith.constant 0 : index
    %c0_73 = arith.constant 0 : index
    %c0_74 = arith.constant 0 : index
    %190 = vector.load %arg10[%c0_72, %c0_73, %c0_74] : memref<2x64x32xf32, #tpu.memory_space<vmem>>, vector<1x64x32xf32>
    %191 = vector.shape_cast %190 : vector<1x64x32xf32> to vector<64x32xf32>
    %cst_75 = arith.constant dense<0.000000e+00> : vector<16x32xf32>
    %192 = tpu.matmul %189, %191, %cst_75 {dimension_numbers = #tpu.dot_dimension_numbers<[1], [0], [0], [1], [0, 0, 1, 1], [], []>} : vector<16x64xf32>, vector<64x32xf32>, vector<16x32xf32> -> vector<16x32xf32>
    %193 = arith.addf %170, %192 : vector<16x32xf32>
    %c1 = arith.constant 1 : index
    %c0_76 = arith.constant 0 : index
    %c0_77 = arith.constant 0 : index
    %194 = vector.load %arg3[%c1, %c0_76, %c0_77] : memref<2x1x32xf32, #tpu.memory_space<vmem>>, vector<1x1x32xf32>
    %195 = vector.shape_cast %194 : vector<1x1x32xf32> to vector<1x32xf32>
    %196 = arith.mulf %193, %193 : vector<16x32xf32>
    %cst_78 = arith.constant dense<0.000000e+00> : vector<16xf32>
    %197 = vector.multi_reduction <add>, %196, %cst_78 [1] : vector<16x32xf32> to vector<16xf32>
    %198 = vector.shape_cast %197 : vector<16xf32> to vector<16x1xf32>
    %cst_79 = arith.constant 3.200000e+01 : f32
    %199 = vector.broadcast %cst_79 : f32 to vector<16x1xf32>
    %200 = arith.divf %198, %199 : vector<16x1xf32>
    %cst_80 = arith.constant 9.99999997E-7 : f32
    %201 = vector.broadcast %cst_80 : f32 to vector<16x1xf32>
    %202 = arith.addf %200, %201 : vector<16x1xf32>
    %203 = math.rsqrt %202 : vector<16x1xf32>
    %204 = vector.broadcast %203 : vector<16x1xf32> to vector<16x32xf32>
    %205 = arith.mulf %193, %204 : vector<16x32xf32>
    %206 = vector.broadcast %195 : vector<1x32xf32> to vector<16x32xf32>
    %207 = arith.mulf %205, %206 : vector<16x32xf32>
    %c1_81 = arith.constant 1 : index
    %c0_82 = arith.constant 0 : index
    %c0_83 = arith.constant 0 : index
    %c0_84 = arith.constant 0 : index
    %208 = vector.load %arg4[%c1_81, %c0_82, %c0_83, %c0_84] : memref<2x4x32x8xf32, #tpu.memory_space<vmem>>, vector<1x4x32x8xf32>
    %209 = vector.shape_cast %208 : vector<1x4x32x8xf32> to vector<4x32x8xf32>
    %c1_85 = arith.constant 1 : index
    %c0_86 = arith.constant 0 : index
    %c0_87 = arith.constant 0 : index
    %c0_88 = arith.constant 0 : index
    %210 = vector.load %arg5[%c1_85, %c0_86, %c0_87, %c0_88] : memref<2x4x32x8xf32, #tpu.memory_space<vmem>>, vector<1x4x32x8xf32>
    %211 = vector.shape_cast %210 : vector<1x4x32x8xf32> to vector<4x32x8xf32>
    %c1_89 = arith.constant 1 : index
    %c0_90 = arith.constant 0 : index
    %c0_91 = arith.constant 0 : index
    %c0_92 = arith.constant 0 : index
    %212 = vector.load %arg6[%c1_89, %c0_90, %c0_91, %c0_92] : memref<2x4x32x8xf32, #tpu.memory_space<vmem>>, vector<1x4x32x8xf32>
    %213 = vector.shape_cast %212 : vector<1x4x32x8xf32> to vector<4x32x8xf32>
    %c1_93 = arith.constant 1 : index
    %c0_94 = arith.constant 0 : index
    %c0_95 = arith.constant 0 : index
    %c0_96 = arith.constant 0 : index
    %214 = vector.load %arg7[%c1_93, %c0_94, %c0_95, %c0_96] : memref<2x4x8x32xf32, #tpu.memory_space<vmem>>, vector<1x4x8x32xf32>
    %215 = vector.shape_cast %214 : vector<1x4x8x32xf32> to vector<4x8x32xf32>
    %cst_97 = arith.constant 0.000000e+00 : f32
    %216 = vector.broadcast %cst_97 : f32 to vector<16x32xf32>
    %217 = vector.extract_strided_slice %209 {offsets = [0, 0, 0], sizes = [1, 32, 8], strides = [1, 1, 1]} : vector<4x32x8xf32> to vector<1x32x8xf32>
    %218 = vector.shape_cast %217 : vector<1x32x8xf32> to vector<32x8xf32>
    %cst_98 = arith.constant dense<0.000000e+00> : vector<16x8xf32>
    %219 = tpu.matmul %207, %218, %cst_98 {dimension_numbers = #tpu.dot_dimension_numbers<[1], [0], [0], [1], [0, 0, 1, 1], [], []>} : vector<16x32xf32>, vector<32x8xf32>, vector<16x8xf32> -> vector<16x8xf32>
    %220 = vector.shape_cast %219 : vector<16x8xf32> to vector<2x8x8xf32>
    %221 = vector.extract_strided_slice %211 {offsets = [0, 0, 0], sizes = [1, 32, 8], strides = [1, 1, 1]} : vector<4x32x8xf32> to vector<1x32x8xf32>
    %222 = vector.shape_cast %221 : vector<1x32x8xf32> to vector<32x8xf32>
    %cst_99 = arith.constant dense<0.000000e+00> : vector<16x8xf32>
    %223 = tpu.matmul %207, %222, %cst_99 {dimension_numbers = #tpu.dot_dimension_numbers<[1], [0], [0], [1], [0, 0, 1, 1], [], []>} : vector<16x32xf32>, vector<32x8xf32>, vector<16x8xf32> -> vector<16x8xf32>
    %224 = vector.shape_cast %223 : vector<16x8xf32> to vector<2x8x8xf32>
    %225 = vector.extract_strided_slice %213 {offsets = [0, 0, 0], sizes = [1, 32, 8], strides = [1, 1, 1]} : vector<4x32x8xf32> to vector<1x32x8xf32>
    %226 = vector.shape_cast %225 : vector<1x32x8xf32> to vector<32x8xf32>
    %cst_100 = arith.constant dense<0.000000e+00> : vector<16x8xf32>
    %227 = tpu.matmul %207, %226, %cst_100 {dimension_numbers = #tpu.dot_dimension_numbers<[1], [0], [0], [1], [0, 0, 1, 1], [], []>} : vector<16x32xf32>, vector<32x8xf32>, vector<16x8xf32> -> vector<16x8xf32>
    %228 = vector.shape_cast %227 : vector<16x8xf32> to vector<2x8x8xf32>
    "tpu.trace_start"() <{level = 10 : i32, message = "bqd,bkd->bqk"}> : () -> ()
    %cst_101 = arith.constant dense<0.000000e+00> : vector<2x8x8xf32>
    %229 = tpu.matmul %220, %224, %cst_101 {dimension_numbers = #tpu.dot_dimension_numbers<[2], [2], [1], [1], [0, 0, 0, 1, 1, 1], [0], [0]>} : vector<2x8x8xf32>, vector<2x8x8xf32>, vector<2x8x8xf32> -> vector<2x8x8xf32>
    "tpu.trace_stop"() : () -> ()
    %230 = vector.extract_strided_slice %1 {offsets = [0, 0, 0], sizes = [1, 8, 8], strides = [1, 1, 1]} : vector<4x8x8xf32> to vector<1x8x8xf32>
    %231 = vector.shape_cast %230 : vector<1x8x8xf32> to vector<8x8xf32>
    %232 = vector.shape_cast %231 : vector<8x8xf32> to vector<1x8x8xf32>
    %233 = vector.broadcast %232 : vector<1x8x8xf32> to vector<2x8x8xf32>
    %234 = arith.addf %229, %233 : vector<2x8x8xf32>
    %235 = vector.broadcast %2 : vector<2x1x8xf32> to vector<2x8x8xf32>
    %236 = arith.addf %234, %235 : vector<2x8x8xf32>
    %cst_102 = arith.constant dense<0xFF800000> : vector<2x8xf32>
    %237 = vector.multi_reduction <maximumf>, %236, %cst_102 [2] : vector<2x8x8xf32> to vector<2x8xf32>
    %238 = vector.shape_cast %237 : vector<2x8xf32> to vector<2x8x1xf32>
    %239 = vector.broadcast %238 : vector<2x8x1xf32> to vector<2x8x8xf32>
    %240 = arith.subf %236, %239 : vector<2x8x8xf32>
    %241 = math.exp %240 : vector<2x8x8xf32>
    %cst_103 = arith.constant dense<0.000000e+00> : vector<2x8xf32>
    %242 = vector.multi_reduction <add>, %241, %cst_103 [2] : vector<2x8x8xf32> to vector<2x8xf32>
    %243 = vector.shape_cast %242 : vector<2x8xf32> to vector<2x8x1xf32>
    %244 = tpu.reciprocal %243 {approx = true} : vector<2x8x1xf32> -> vector<2x8x1xf32>
    %245 = vector.broadcast %244 : vector<2x8x1xf32> to vector<2x8x8xf32>
    %246 = arith.mulf %241, %245 : vector<2x8x8xf32>
    "tpu.trace_start"() <{level = 10 : i32, message = "bqk,bkd->bqd"}> : () -> ()
    %cst_104 = arith.constant dense<0.000000e+00> : vector<2x8x8xf32>
    %247 = tpu.matmul %246, %228, %cst_104 {dimension_numbers = #tpu.dot_dimension_numbers<[2], [1], [1], [2], [0, 0, 0, 1, 1, 2], [0], [0]>} : vector<2x8x8xf32>, vector<2x8x8xf32>, vector<2x8x8xf32> -> vector<2x8x8xf32>
    "tpu.trace_stop"() : () -> ()
    %248 = vector.shape_cast %247 : vector<2x8x8xf32> to vector<16x8xf32>
    %249 = vector.extract_strided_slice %215 {offsets = [0, 0, 0], sizes = [1, 8, 32], strides = [1, 1, 1]} : vector<4x8x32xf32> to vector<1x8x32xf32>
    %250 = vector.shape_cast %249 : vector<1x8x32xf32> to vector<8x32xf32>
    %cst_105 = arith.constant dense<0.000000e+00> : vector<16x32xf32>
    %251 = tpu.matmul %248, %250, %cst_105 {dimension_numbers = #tpu.dot_dimension_numbers<[1], [0], [0], [1], [0, 0, 1, 1], [], []>} : vector<16x8xf32>, vector<8x32xf32>, vector<16x32xf32> -> vector<16x32xf32>
    %252 = arith.addf %216, %251 : vector<16x32xf32>
    %253 = vector.extract_strided_slice %209 {offsets = [1, 0, 0], sizes = [1, 32, 8], strides = [1, 1, 1]} : vector<4x32x8xf32> to vector<1x32x8xf32>
    %254 = vector.shape_cast %253 : vector<1x32x8xf32> to vector<32x8xf32>
    %cst_106 = arith.constant dense<0.000000e+00> : vector<16x8xf32>
    %255 = tpu.matmul %207, %254, %cst_106 {dimension_numbers = #tpu.dot_dimension_numbers<[1], [0], [0], [1], [0, 0, 1, 1], [], []>} : vector<16x32xf32>, vector<32x8xf32>, vector<16x8xf32> -> vector<16x8xf32>
    %256 = vector.shape_cast %255 : vector<16x8xf32> to vector<2x8x8xf32>
    %257 = vector.extract_strided_slice %211 {offsets = [1, 0, 0], sizes = [1, 32, 8], strides = [1, 1, 1]} : vector<4x32x8xf32> to vector<1x32x8xf32>
    %258 = vector.shape_cast %257 : vector<1x32x8xf32> to vector<32x8xf32>
    %cst_107 = arith.constant dense<0.000000e+00> : vector<16x8xf32>
    %259 = tpu.matmul %207, %258, %cst_107 {dimension_numbers = #tpu.dot_dimension_numbers<[1], [0], [0], [1], [0, 0, 1, 1], [], []>} : vector<16x32xf32>, vector<32x8xf32>, vector<16x8xf32> -> vector<16x8xf32>
    %260 = vector.shape_cast %259 : vector<16x8xf32> to vector<2x8x8xf32>
    %261 = vector.extract_strided_slice %213 {offsets = [1, 0, 0], sizes = [1, 32, 8], strides = [1, 1, 1]} : vector<4x32x8xf32> to vector<1x32x8xf32>
    %262 = vector.shape_cast %261 : vector<1x32x8xf32> to vector<32x8xf32>
    %cst_108 = arith.constant dense<0.000000e+00> : vector<16x8xf32>
    %263 = tpu.matmul %207, %262, %cst_108 {dimension_numbers = #tpu.dot_dimension_numbers<[1], [0], [0], [1], [0, 0, 1, 1], [], []>} : vector<16x32xf32>, vector<32x8xf32>, vector<16x8xf32> -> vector<16x8xf32>
    %264 = vector.shape_cast %263 : vector<16x8xf32> to vector<2x8x8xf32>
    "tpu.trace_start"() <{level = 10 : i32, message = "bqd,bkd->bqk"}> : () -> ()
    %cst_109 = arith.constant dense<0.000000e+00> : vector<2x8x8xf32>
    %265 = tpu.matmul %256, %260, %cst_109 {dimension_numbers = #tpu.dot_dimension_numbers<[2], [2], [1], [1], [0, 0, 0, 1, 1, 1], [0], [0]>} : vector<2x8x8xf32>, vector<2x8x8xf32>, vector<2x8x8xf32> -> vector<2x8x8xf32>
    "tpu.trace_stop"() : () -> ()
    %266 = vector.extract_strided_slice %1 {offsets = [1, 0, 0], sizes = [1, 8, 8], strides = [1, 1, 1]} : vector<4x8x8xf32> to vector<1x8x8xf32>
    %267 = vector.shape_cast %266 : vector<1x8x8xf32> to vector<8x8xf32>
    %268 = vector.shape_cast %267 : vector<8x8xf32> to vector<1x8x8xf32>
    %269 = vector.broadcast %268 : vector<1x8x8xf32> to vector<2x8x8xf32>
    %270 = arith.addf %265, %269 : vector<2x8x8xf32>
    %271 = vector.broadcast %2 : vector<2x1x8xf32> to vector<2x8x8xf32>
    %272 = arith.addf %270, %271 : vector<2x8x8xf32>
    %cst_110 = arith.constant dense<0xFF800000> : vector<2x8xf32>
    %273 = vector.multi_reduction <maximumf>, %272, %cst_110 [2] : vector<2x8x8xf32> to vector<2x8xf32>
    %274 = vector.shape_cast %273 : vector<2x8xf32> to vector<2x8x1xf32>
    %275 = vector.broadcast %274 : vector<2x8x1xf32> to vector<2x8x8xf32>
    %276 = arith.subf %272, %275 : vector<2x8x8xf32>
    %277 = math.exp %276 : vector<2x8x8xf32>
    %cst_111 = arith.constant dense<0.000000e+00> : vector<2x8xf32>
    %278 = vector.multi_reduction <add>, %277, %cst_111 [2] : vector<2x8x8xf32> to vector<2x8xf32>
    %279 = vector.shape_cast %278 : vector<2x8xf32> to vector<2x8x1xf32>
    %280 = tpu.reciprocal %279 {approx = true} : vector<2x8x1xf32> -> vector<2x8x1xf32>
    %281 = vector.broadcast %280 : vector<2x8x1xf32> to vector<2x8x8xf32>
    %282 = arith.mulf %277, %281 : vector<2x8x8xf32>
    "tpu.trace_start"() <{level = 10 : i32, message = "bqk,bkd->bqd"}> : () -> ()
    %cst_112 = arith.constant dense<0.000000e+00> : vector<2x8x8xf32>
    %283 = tpu.matmul %282, %264, %cst_112 {dimension_numbers = #tpu.dot_dimension_numbers<[2], [1], [1], [2], [0, 0, 0, 1, 1, 2], [0], [0]>} : vector<2x8x8xf32>, vector<2x8x8xf32>, vector<2x8x8xf32> -> vector<2x8x8xf32>
    "tpu.trace_stop"() : () -> ()
    %284 = vector.shape_cast %283 : vector<2x8x8xf32> to vector<16x8xf32>
    %285 = vector.extract_strided_slice %215 {offsets = [1, 0, 0], sizes = [1, 8, 32], strides = [1, 1, 1]} : vector<4x8x32xf32> to vector<1x8x32xf32>
    %286 = vector.shape_cast %285 : vector<1x8x32xf32> to vector<8x32xf32>
    %cst_113 = arith.constant dense<0.000000e+00> : vector<16x32xf32>
    %287 = tpu.matmul %284, %286, %cst_113 {dimension_numbers = #tpu.dot_dimension_numbers<[1], [0], [0], [1], [0, 0, 1, 1], [], []>} : vector<16x8xf32>, vector<8x32xf32>, vector<16x32xf32> -> vector<16x32xf32>
    %288 = arith.addf %252, %287 : vector<16x32xf32>
    %289 = vector.extract_strided_slice %209 {offsets = [2, 0, 0], sizes = [1, 32, 8], strides = [1, 1, 1]} : vector<4x32x8xf32> to vector<1x32x8xf32>
    %290 = vector.shape_cast %289 : vector<1x32x8xf32> to vector<32x8xf32>
    %cst_114 = arith.constant dense<0.000000e+00> : vector<16x8xf32>
    %291 = tpu.matmul %207, %290, %cst_114 {dimension_numbers = #tpu.dot_dimension_numbers<[1], [0], [0], [1], [0, 0, 1, 1], [], []>} : vector<16x32xf32>, vector<32x8xf32>, vector<16x8xf32> -> vector<16x8xf32>
    %292 = vector.shape_cast %291 : vector<16x8xf32> to vector<2x8x8xf32>
    %293 = vector.extract_strided_slice %211 {offsets = [2, 0, 0], sizes = [1, 32, 8], strides = [1, 1, 1]} : vector<4x32x8xf32> to vector<1x32x8xf32>
    %294 = vector.shape_cast %293 : vector<1x32x8xf32> to vector<32x8xf32>
    %cst_115 = arith.constant dense<0.000000e+00> : vector<16x8xf32>
    %295 = tpu.matmul %207, %294, %cst_115 {dimension_numbers = #tpu.dot_dimension_numbers<[1], [0], [0], [1], [0, 0, 1, 1], [], []>} : vector<16x32xf32>, vector<32x8xf32>, vector<16x8xf32> -> vector<16x8xf32>
    %296 = vector.shape_cast %295 : vector<16x8xf32> to vector<2x8x8xf32>
    %297 = vector.extract_strided_slice %213 {offsets = [2, 0, 0], sizes = [1, 32, 8], strides = [1, 1, 1]} : vector<4x32x8xf32> to vector<1x32x8xf32>
    %298 = vector.shape_cast %297 : vector<1x32x8xf32> to vector<32x8xf32>
    %cst_116 = arith.constant dense<0.000000e+00> : vector<16x8xf32>
    %299 = tpu.matmul %207, %298, %cst_116 {dimension_numbers = #tpu.dot_dimension_numbers<[1], [0], [0], [1], [0, 0, 1, 1], [], []>} : vector<16x32xf32>, vector<32x8xf32>, vector<16x8xf32> -> vector<16x8xf32>
    %300 = vector.shape_cast %299 : vector<16x8xf32> to vector<2x8x8xf32>
    "tpu.trace_start"() <{level = 10 : i32, message = "bqd,bkd->bqk"}> : () -> ()
    %cst_117 = arith.constant dense<0.000000e+00> : vector<2x8x8xf32>
    %301 = tpu.matmul %292, %296, %cst_117 {dimension_numbers = #tpu.dot_dimension_numbers<[2], [2], [1], [1], [0, 0, 0, 1, 1, 1], [0], [0]>} : vector<2x8x8xf32>, vector<2x8x8xf32>, vector<2x8x8xf32> -> vector<2x8x8xf32>
    "tpu.trace_stop"() : () -> ()
    %302 = vector.extract_strided_slice %1 {offsets = [2, 0, 0], sizes = [1, 8, 8], strides = [1, 1, 1]} : vector<4x8x8xf32> to vector<1x8x8xf32>
    %303 = vector.shape_cast %302 : vector<1x8x8xf32> to vector<8x8xf32>
    %304 = vector.shape_cast %303 : vector<8x8xf32> to vector<1x8x8xf32>
    %305 = vector.broadcast %304 : vector<1x8x8xf32> to vector<2x8x8xf32>
    %306 = arith.addf %301, %305 : vector<2x8x8xf32>
    %307 = vector.broadcast %2 : vector<2x1x8xf32> to vector<2x8x8xf32>
    %308 = arith.addf %306, %307 : vector<2x8x8xf32>
    %cst_118 = arith.constant dense<0xFF800000> : vector<2x8xf32>
    %309 = vector.multi_reduction <maximumf>, %308, %cst_118 [2] : vector<2x8x8xf32> to vector<2x8xf32>
    %310 = vector.shape_cast %309 : vector<2x8xf32> to vector<2x8x1xf32>
    %311 = vector.broadcast %310 : vector<2x8x1xf32> to vector<2x8x8xf32>
    %312 = arith.subf %308, %311 : vector<2x8x8xf32>
    %313 = math.exp %312 : vector<2x8x8xf32>
    %cst_119 = arith.constant dense<0.000000e+00> : vector<2x8xf32>
    %314 = vector.multi_reduction <add>, %313, %cst_119 [2] : vector<2x8x8xf32> to vector<2x8xf32>
    %315 = vector.shape_cast %314 : vector<2x8xf32> to vector<2x8x1xf32>
    %316 = tpu.reciprocal %315 {approx = true} : vector<2x8x1xf32> -> vector<2x8x1xf32>
    %317 = vector.broadcast %316 : vector<2x8x1xf32> to vector<2x8x8xf32>
    %318 = arith.mulf %313, %317 : vector<2x8x8xf32>
    "tpu.trace_start"() <{level = 10 : i32, message = "bqk,bkd->bqd"}> : () -> ()
    %cst_120 = arith.constant dense<0.000000e+00> : vector<2x8x8xf32>
    %319 = tpu.matmul %318, %300, %cst_120 {dimension_numbers = #tpu.dot_dimension_numbers<[2], [1], [1], [2], [0, 0, 0, 1, 1, 2], [0], [0]>} : vector<2x8x8xf32>, vector<2x8x8xf32>, vector<2x8x8xf32> -> vector<2x8x8xf32>
    "tpu.trace_stop"() : () -> ()
    %320 = vector.shape_cast %319 : vector<2x8x8xf32> to vector<16x8xf32>
    %321 = vector.extract_strided_slice %215 {offsets = [2, 0, 0], sizes = [1, 8, 32], strides = [1, 1, 1]} : vector<4x8x32xf32> to vector<1x8x32xf32>
    %322 = vector.shape_cast %321 : vector<1x8x32xf32> to vector<8x32xf32>
    %cst_121 = arith.constant dense<0.000000e+00> : vector<16x32xf32>
    %323 = tpu.matmul %320, %322, %cst_121 {dimension_numbers = #tpu.dot_dimension_numbers<[1], [0], [0], [1], [0, 0, 1, 1], [], []>} : vector<16x8xf32>, vector<8x32xf32>, vector<16x32xf32> -> vector<16x32xf32>
    %324 = arith.addf %288, %323 : vector<16x32xf32>
    %325 = vector.extract_strided_slice %209 {offsets = [3, 0, 0], sizes = [1, 32, 8], strides = [1, 1, 1]} : vector<4x32x8xf32> to vector<1x32x8xf32>
    %326 = vector.shape_cast %325 : vector<1x32x8xf32> to vector<32x8xf32>
    %cst_122 = arith.constant dense<0.000000e+00> : vector<16x8xf32>
    %327 = tpu.matmul %207, %326, %cst_122 {dimension_numbers = #tpu.dot_dimension_numbers<[1], [0], [0], [1], [0, 0, 1, 1], [], []>} : vector<16x32xf32>, vector<32x8xf32>, vector<16x8xf32> -> vector<16x8xf32>
    %328 = vector.shape_cast %327 : vector<16x8xf32> to vector<2x8x8xf32>
    %329 = vector.extract_strided_slice %211 {offsets = [3, 0, 0], sizes = [1, 32, 8], strides = [1, 1, 1]} : vector<4x32x8xf32> to vector<1x32x8xf32>
    %330 = vector.shape_cast %329 : vector<1x32x8xf32> to vector<32x8xf32>
    %cst_123 = arith.constant dense<0.000000e+00> : vector<16x8xf32>
    %331 = tpu.matmul %207, %330, %cst_123 {dimension_numbers = #tpu.dot_dimension_numbers<[1], [0], [0], [1], [0, 0, 1, 1], [], []>} : vector<16x32xf32>, vector<32x8xf32>, vector<16x8xf32> -> vector<16x8xf32>
    %332 = vector.shape_cast %331 : vector<16x8xf32> to vector<2x8x8xf32>
    %333 = vector.extract_strided_slice %213 {offsets = [3, 0, 0], sizes = [1, 32, 8], strides = [1, 1, 1]} : vector<4x32x8xf32> to vector<1x32x8xf32>
    %334 = vector.shape_cast %333 : vector<1x32x8xf32> to vector<32x8xf32>
    %cst_124 = arith.constant dense<0.000000e+00> : vector<16x8xf32>
    %335 = tpu.matmul %207, %334, %cst_124 {dimension_numbers = #tpu.dot_dimension_numbers<[1], [0], [0], [1], [0, 0, 1, 1], [], []>} : vector<16x32xf32>, vector<32x8xf32>, vector<16x8xf32> -> vector<16x8xf32>
    %336 = vector.shape_cast %335 : vector<16x8xf32> to vector<2x8x8xf32>
    "tpu.trace_start"() <{level = 10 : i32, message = "bqd,bkd->bqk"}> : () -> ()
    %cst_125 = arith.constant dense<0.000000e+00> : vector<2x8x8xf32>
    %337 = tpu.matmul %328, %332, %cst_125 {dimension_numbers = #tpu.dot_dimension_numbers<[2], [2], [1], [1], [0, 0, 0, 1, 1, 1], [0], [0]>} : vector<2x8x8xf32>, vector<2x8x8xf32>, vector<2x8x8xf32> -> vector<2x8x8xf32>
    "tpu.trace_stop"() : () -> ()
    %338 = vector.extract_strided_slice %1 {offsets = [3, 0, 0], sizes = [1, 8, 8], strides = [1, 1, 1]} : vector<4x8x8xf32> to vector<1x8x8xf32>
    %339 = vector.shape_cast %338 : vector<1x8x8xf32> to vector<8x8xf32>
    %340 = vector.shape_cast %339 : vector<8x8xf32> to vector<1x8x8xf32>
    %341 = vector.broadcast %340 : vector<1x8x8xf32> to vector<2x8x8xf32>
    %342 = arith.addf %337, %341 : vector<2x8x8xf32>
    %343 = vector.broadcast %2 : vector<2x1x8xf32> to vector<2x8x8xf32>
    %344 = arith.addf %342, %343 : vector<2x8x8xf32>
    %cst_126 = arith.constant dense<0xFF800000> : vector<2x8xf32>
    %345 = vector.multi_reduction <maximumf>, %344, %cst_126 [2] : vector<2x8x8xf32> to vector<2x8xf32>
    %346 = vector.shape_cast %345 : vector<2x8xf32> to vector<2x8x1xf32>
    %347 = vector.broadcast %346 : vector<2x8x1xf32> to vector<2x8x8xf32>
    %348 = arith.subf %344, %347 : vector<2x8x8xf32>
    %349 = math.exp %348 : vector<2x8x8xf32>
    %cst_127 = arith.constant dense<0.000000e+00> : vector<2x8xf32>
    %350 = vector.multi_reduction <add>, %349, %cst_127 [2] : vector<2x8x8xf32> to vector<2x8xf32>
    %351 = vector.shape_cast %350 : vector<2x8xf32> to vector<2x8x1xf32>
    %352 = tpu.reciprocal %351 {approx = true} : vector<2x8x1xf32> -> vector<2x8x1xf32>
    %353 = vector.broadcast %352 : vector<2x8x1xf32> to vector<2x8x8xf32>
    %354 = arith.mulf %349, %353 : vector<2x8x8xf32>
    "tpu.trace_start"() <{level = 10 : i32, message = "bqk,bkd->bqd"}> : () -> ()
    %cst_128 = arith.constant dense<0.000000e+00> : vector<2x8x8xf32>
    %355 = tpu.matmul %354, %336, %cst_128 {dimension_numbers = #tpu.dot_dimension_numbers<[2], [1], [1], [2], [0, 0, 0, 1, 1, 2], [0], [0]>} : vector<2x8x8xf32>, vector<2x8x8xf32>, vector<2x8x8xf32> -> vector<2x8x8xf32>
    "tpu.trace_stop"() : () -> ()
    %356 = vector.shape_cast %355 : vector<2x8x8xf32> to vector<16x8xf32>
    %357 = vector.extract_strided_slice %215 {offsets = [3, 0, 0], sizes = [1, 8, 32], strides = [1, 1, 1]} : vector<4x8x32xf32> to vector<1x8x32xf32>
    %358 = vector.shape_cast %357 : vector<1x8x32xf32> to vector<8x32xf32>
    %cst_129 = arith.constant dense<0.000000e+00> : vector<16x32xf32>
    %359 = tpu.matmul %356, %358, %cst_129 {dimension_numbers = #tpu.dot_dimension_numbers<[1], [0], [0], [1], [0, 0, 1, 1], [], []>} : vector<16x8xf32>, vector<8x32xf32>, vector<16x32xf32> -> vector<16x32xf32>
    %360 = arith.addf %324, %359 : vector<16x32xf32>
    %361 = arith.addf %193, %360 : vector<16x32xf32>
    %c1_130 = arith.constant 1 : index
    %c0_131 = arith.constant 0 : index
    %c0_132 = arith.constant 0 : index
    %362 = vector.load %arg8[%c1_130, %c0_131, %c0_132] : memref<2x1x32xf32, #tpu.memory_space<vmem>>, vector<1x1x32xf32>
    %363 = vector.shape_cast %362 : vector<1x1x32xf32> to vector<1x32xf32>
    %364 = arith.mulf %361, %361 : vector<16x32xf32>
    %cst_133 = arith.constant dense<0.000000e+00> : vector<16xf32>
    %365 = vector.multi_reduction <add>, %364, %cst_133 [1] : vector<16x32xf32> to vector<16xf32>
    %366 = vector.shape_cast %365 : vector<16xf32> to vector<16x1xf32>
    %cst_134 = arith.constant 3.200000e+01 : f32
    %367 = vector.broadcast %cst_134 : f32 to vector<16x1xf32>
    %368 = arith.divf %366, %367 : vector<16x1xf32>
    %cst_135 = arith.constant 9.99999997E-7 : f32
    %369 = vector.broadcast %cst_135 : f32 to vector<16x1xf32>
    %370 = arith.addf %368, %369 : vector<16x1xf32>
    %371 = math.rsqrt %370 : vector<16x1xf32>
    %372 = vector.broadcast %371 : vector<16x1xf32> to vector<16x32xf32>
    %373 = arith.mulf %361, %372 : vector<16x32xf32>
    %374 = vector.broadcast %363 : vector<1x32xf32> to vector<16x32xf32>
    %375 = arith.mulf %373, %374 : vector<16x32xf32>
    %c1_136 = arith.constant 1 : index
    %c0_137 = arith.constant 0 : index
    %c0_138 = arith.constant 0 : index
    %376 = vector.load %arg9[%c1_136, %c0_137, %c0_138] : memref<2x32x64xf32, #tpu.memory_space<vmem>>, vector<1x32x64xf32>
    %377 = vector.shape_cast %376 : vector<1x32x64xf32> to vector<32x64xf32>
    %cst_139 = arith.constant dense<0.000000e+00> : vector<16x64xf32>
    %378 = tpu.matmul %375, %377, %cst_139 {dimension_numbers = #tpu.dot_dimension_numbers<[1], [0], [0], [1], [0, 0, 1, 1], [], []>} : vector<16x32xf32>, vector<32x64xf32>, vector<16x64xf32> -> vector<16x64xf32>
    %cst_140 = arith.constant 0.000000e+00 : f32
    %379 = vector.broadcast %cst_140 : f32 to vector<16x64xf32>
    %380 = arith.maximumf %378, %379 : vector<16x64xf32>
    %c1_141 = arith.constant 1 : index
    %c0_142 = arith.constant 0 : index
    %c0_143 = arith.constant 0 : index
    %381 = vector.load %arg10[%c1_141, %c0_142, %c0_143] : memref<2x64x32xf32, #tpu.memory_space<vmem>>, vector<1x64x32xf32>
    %382 = vector.shape_cast %381 : vector<1x64x32xf32> to vector<64x32xf32>
    %cst_144 = arith.constant dense<0.000000e+00> : vector<16x32xf32>
    %383 = tpu.matmul %380, %382, %cst_144 {dimension_numbers = #tpu.dot_dimension_numbers<[1], [0], [0], [1], [0, 0, 1, 1], [], []>} : vector<16x64xf32>, vector<64x32xf32>, vector<16x32xf32> -> vector<16x32xf32>
    %384 = arith.addf %361, %383 : vector<16x32xf32>
    %c0_145 = arith.constant 0 : index
    %c0_146 = arith.constant 0 : index
    %385 = vector.load %arg11[%c0_145, %c0_146] : memref<1x32xf32, #tpu.memory_space<vmem>>, vector<1x32xf32>
    %386 = arith.mulf %384, %384 : vector<16x32xf32>
    %cst_147 = arith.constant dense<0.000000e+00> : vector<16xf32>
    %387 = vector.multi_reduction <add>, %386, %cst_147 [1] : vector<16x32xf32> to vector<16xf32>
    %388 = vector.shape_cast %387 : vector<16xf32> to vector<16x1xf32>
    %cst_148 = arith.constant 3.200000e+01 : f32
    %389 = vector.broadcast %cst_148 : f32 to vector<16x1xf32>
    %390 = arith.divf %388, %389 : vector<16x1xf32>
    %cst_149 = arith.constant 9.99999997E-7 : f32
    %391 = vector.broadcast %cst_149 : f32 to vector<16x1xf32>
    %392 = arith.addf %390, %391 : vector<16x1xf32>
    %393 = math.rsqrt %392 : vector<16x1xf32>
    %394 = vector.broadcast %393 : vector<16x1xf32> to vector<16x32xf32>
    %395 = arith.mulf %384, %394 : vector<16x32xf32>
    %396 = vector.broadcast %385 : vector<1x32xf32> to vector<16x32xf32>
    %397 = arith.mulf %395, %396 : vector<16x32xf32>
    %c0_150 = arith.constant 0 : index
    %c0_151 = arith.constant 0 : index
    %398 = vector.load %arg12[%c0_150, %c0_151] : memref<16x32xf32, #tpu.memory_space<vmem>>, vector<16x32xf32>
    tpu.vector_store %arg12[%c0_150, %c0_151], %397 {strides = array<i32>} : memref<16x32xf32, #tpu.memory_space<vmem>>, vector<16x32xf32>,
    return
  }
}

module attributes {stable_mosaic.version = 11 : i64} {
  func.func @_lmhead_ce_kernel(%arg0: memref<16x32xf32, #tpu.memory_space<vmem>>, %arg1: memref<128x32xf32, #tpu.memory_space<vmem>>, %arg2: memref<16x1xi32, #tpu.memory_space<vmem>>, %arg3: memref<16x128xf32, #tpu.memory_space<vmem>>, %arg4: memref<1x1xf32, #tpu.memory_space<vmem>>) attributes {dimension_semantics = [], scalar_prefetch = 0 : i64, scratch_operands = 0 : i64, tpu.core_type = #tpu.core_type<tc>} {
    %c0 = arith.constant 0 : index
    %c0_0 = arith.constant 0 : index
    %0 = vector.load %arg0[%c0, %c0_0] : memref<16x32xf32, #tpu.memory_space<vmem>>, vector<16x32xf32>
    %cst = arith.constant 0.176776692 : f32
    %1 = vector.broadcast %cst : f32 to vector<16x32xf32>
    %2 = arith.mulf %0, %1 : vector<16x32xf32>
    %c0_1 = arith.constant 0 : index
    %c0_2 = arith.constant 0 : index
    %3 = vector.load %arg1[%c0_1, %c0_2] : memref<128x32xf32, #tpu.memory_space<vmem>>, vector<128x32xf32>
    %4 = tpu.transpose %3, [1, 0] : vector<128x32xf32> -> vector<32x128xf32>
    %cst_3 = arith.constant dense<0.000000e+00> : vector<16x128xf32>
    %5 = tpu.matmul %2, %4, %cst_3 {dimension_numbers = #tpu.dot_dimension_numbers<[1], [0], [0], [1], [0, 0, 1, 1], [], []>} : vector<16x32xf32>, vector<32x128xf32>, vector<16x128xf32> -> vector<16x128xf32>
    %c0_4 = arith.constant 0 : index
    %c0_5 = arith.constant 0 : index
    %6 = vector.load %arg3[%c0_4, %c0_5] : memref<16x128xf32, #tpu.memory_space<vmem>>, vector<16x128xf32>
    tpu.vector_store %arg3[%c0_4, %c0_5], %5 {strides = array<i32>} : memref<16x128xf32, #tpu.memory_space<vmem>>, vector<16x128xf32>,
    %c0_6 = arith.constant 0 : index
    %c0_7 = arith.constant 0 : index
    %7 = vector.load %arg2[%c0_6, %c0_7] : memref<16x1xi32, #tpu.memory_space<vmem>>, vector<16x1xi32>
    %cst_8 = arith.constant dense<0xFF800000> : vector<16xf32>
    %8 = vector.multi_reduction <maximumf>, %5, %cst_8 [1] : vector<16x128xf32> to vector<16xf32>
    %9 = vector.shape_cast %8 : vector<16xf32> to vector<16x1xf32>
    %10 = vector.broadcast %9 : vector<16x1xf32> to vector<16x128xf32>
    %11 = arith.subf %5, %10 : vector<16x128xf32>
    %12 = math.exp %11 : vector<16x128xf32>
    %cst_9 = arith.constant dense<0.000000e+00> : vector<16xf32>
    %13 = vector.multi_reduction <add>, %12, %cst_9 [1] : vector<16x128xf32> to vector<16xf32>
    %14 = vector.shape_cast %13 : vector<16xf32> to vector<16x1xf32>
    %15 = math.log %14 : vector<16x1xf32>
    %16 = arith.addf %15, %9 : vector<16x1xf32>
    %17 = tpu.iota {dimensions = array<i32: 1>} : vector<16x128xi32>
    %18 = vector.broadcast %7 : vector<16x1xi32> to vector<16x128xi32>
    %19 = arith.cmpi eq, %17, %18 : vector<16x128xi32>
    %cst_10 = arith.constant 0.000000e+00 : f32
    %20 = vector.broadcast %cst_10 : f32 to vector<16x128xf32>
    %21 = arith.select %19, %5, %20 : vector<16x128xi1>, vector<16x128xf32>
    %cst_11 = arith.constant dense<0.000000e+00> : vector<16xf32>
    %22 = vector.multi_reduction <add>, %21, %cst_11 [1] : vector<16x128xf32> to vector<16xf32>
    %23 = vector.shape_cast %22 : vector<16xf32> to vector<16x1xf32>
    %c-100_i32 = arith.constant -100 : i32
    %24 = vector.broadcast %c-100_i32 : i32 to vector<16x1xi32>
    %25 = arith.cmpi ne, %7, %24 : vector<16x1xi32>
    %26 = arith.extui %25 : vector<16x1xi1> to vector<16x1xi32>
    %27 = arith.sitofp %26 : vector<16x1xi32> to vector<16x1xf32>
    %28 = arith.subf %16, %23 : vector<16x1xf32>
    %29 = arith.mulf %28, %27 : vector<16x1xf32>
    %cst_12 = arith.constant dense<0.000000e+00> : vector<1xf32>
    %30 = vector.multi_reduction <add>, %29, %cst_12 [0] : vector<16x1xf32> to vector<1xf32>
    %31 = vector.shape_cast %30 : vector<1xf32> to vector<1x1xf32>
    %cst_13 = arith.constant dense<0.000000e+00> : vector<1xf32>
    %32 = vector.multi_reduction <add>, %27, %cst_13 [0] : vector<16x1xf32> to vector<1xf32>
    %33 = vector.shape_cast %32 : vector<1xf32> to vector<1x1xf32>
    %cst_14 = arith.constant 1.000000e+00 : f32
    %34 = vector.broadcast %cst_14 : f32 to vector<1x1xf32>
    %35 = arith.maximumf %33, %34 : vector<1x1xf32>
    %36 = arith.divf %31, %35 : vector<1x1xf32>
    %c0_15 = arith.constant 0 : index
    %c0_16 = arith.constant 0 : index
    %37 = vector.load %arg4[%c0_15, %c0_16] : memref<1x1xf32, #tpu.memory_space<vmem>>, vector<1x1xf32>
    tpu.vector_store %arg4[%c0_15, %c0_16], %36 {strides = array<i32>} : memref<1x1xf32, #tpu.memory_space<vmem>>, vector<1x1xf32>,
    return
  }
}

module attributes {stable_mosaic.version = 11 : i64} {
  func.func @kernel(%arg0: memref<16x32xf32, #tpu.memory_space<vmem>>, %arg1: memref<16x32xf32, #tpu.memory_space<vmem>>, %arg2: memref<4x8x8xf32, #tpu.memory_space<vmem>>, %arg3: memref<2x8x8xf32, #tpu.memory_space<vmem>>, %arg4: memref<2x1x8xf32, #tpu.memory_space<vmem>>, %arg5: memref<2x1x32xf32, #tpu.memory_space<vmem>>, %arg6: memref<2x4x32x8xf32, #tpu.memory_space<vmem>>, %arg7: memref<2x4x32x8xf32, #tpu.memory_space<vmem>>, %arg8: memref<2x4x32x8xf32, #tpu.memory_space<vmem>>, %arg9: memref<2x4x8x32xf32, #tpu.memory_space<vmem>>, %arg10: memref<2x1x32xf32, #tpu.memory_space<vmem>>, %arg11: memref<2x4x32x8xf32, #tpu.memory_space<vmem>>, %arg12: memref<2x4x32x8xf32, #tpu.memory_space<vmem>>, %arg13: memref<2x4x32x8xf32, #tpu.memory_space<vmem>>, %arg14: memref<2x4x8x32xf32, #tpu.memory_space<vmem>>, %arg15: memref<2x1x32xf32, #tpu.memory_space<vmem>>, %arg16: memref<2x32x64xf32, #tpu.memory_space<vmem>>, %arg17: memref<2x64x32xf32, #tpu.memory_space<vmem>>, %arg18: memref<1x32xf32, #tpu.memory_space<vmem>>, %arg19: memref<16x32xf32, #tpu.memory_space<vmem>>) attributes {dimension_semantics = [], scalar_prefetch = 0 : i64, scratch_operands = 0 : i64, tpu.core_type = #tpu.core_type<tc>} {
    %c0 = arith.constant 0 : index
    %c0_0 = arith.constant 0 : index
    %0 = vector.load %arg0[%c0, %c0_0] : memref<16x32xf32, #tpu.memory_space<vmem>>, vector<16x32xf32>
    %c0_1 = arith.constant 0 : index
    %c0_2 = arith.constant 0 : index
    %1 = vector.load %arg1[%c0_1, %c0_2] : memref<16x32xf32, #tpu.memory_space<vmem>>, vector<16x32xf32>
    %c0_3 = arith.constant 0 : index
    %c0_4 = arith.constant 0 : index
    %c0_5 = arith.constant 0 : index
    %2 = vector.load %arg2[%c0_3, %c0_4, %c0_5] : memref<4x8x8xf32, #tpu.memory_space<vmem>>, vector<4x8x8xf32>
    %c0_6 = arith.constant 0 : index
    %c0_7 = arith.constant 0 : index
    %c0_8 = arith.constant 0 : index
    %3 = vector.load %arg3[%c0_6, %c0_7, %c0_8] : memref<2x8x8xf32, #tpu.memory_space<vmem>>, vector<2x8x8xf32>
    %c0_9 = arith.constant 0 : index
    %c0_10 = arith.constant 0 : index
    %c0_11 = arith.constant 0 : index
    %4 = vector.load %arg4[%c0_9, %c0_10, %c0_11] : memref<2x1x8xf32, #tpu.memory_space<vmem>>, vector<2x1x8xf32>
    %c0_12 = arith.constant 0 : index
    %c0_13 = arith.constant 0 : index
    %c0_14 = arith.constant 0 : index
    %5 = vector.load %arg5[%c0_12, %c0_13, %c0_14] : memref<2x1x32xf32, #tpu.memory_space<vmem>>, vector<1x1x32xf32>
    %6 = vector.shape_cast %5 : vector<1x1x32xf32> to vector<1x32xf32>
    %7 = arith.mulf %0, %0 : vector<16x32xf32>
    %cst = arith.constant dense<0.000000e+00> : vector<16xf32>
    %8 = vector.multi_reduction <add>, %7, %cst [1] : vector<16x32xf32> to vector<16xf32>
    %9 = vector.shape_cast %8 : vector<16xf32> to vector<16x1xf32>
    %cst_15 = arith.constant 3.200000e+01 : f32
    %10 = vector.broadcast %cst_15 : f32 to vector<16x1xf32>
    %11 = arith.divf %9, %10 : vector<16x1xf32>
    %cst_16 = arith.constant 9.99999997E-7 : f32
    %12 = vector.broadcast %cst_16 : f32 to vector<16x1xf32>
    %13 = arith.addf %11, %12 : vector<16x1xf32>
    %14 = math.rsqrt %13 : vector<16x1xf32>
    %15 = vector.broadcast %14 : vector<16x1xf32> to vector<16x32xf32>
    %16 = arith.mulf %0, %15 : vector<16x32xf32>
    %17 = vector.broadcast %6 : vector<1x32xf32> to vector<16x32xf32>
    %18 = arith.mulf %16, %17 : vector<16x32xf32>
    %c0_17 = arith.constant 0 : index
    %c0_18 = arith.constant 0 : index
    %c0_19 = arith.constant 0 : index
    %c0_20 = arith.constant 0 : index
    %19 = vector.load %arg6[%c0_17, %c0_18, %c0_19, %c0_20] : memref<2x4x32x8xf32, #tpu.memory_space<vmem>>, vector<1x4x32x8xf32>
    %20 = vector.shape_cast %19 : vector<1x4x32x8xf32> to vector<4x32x8xf32>
    %c0_21 = arith.constant 0 : index
    %c0_22 = arith.constant 0 : index
    %c0_23 = arith.constant 0 : index
    %c0_24 = arith.constant 0 : index
    %21 = vector.load %arg7[%c0_21, %c0_22, %c0_23, %c0_24] : memref<2x4x32x8xf32, #tpu.memory_space<vmem>>, vector<1x4x32x8xf32>
    %22 = vector.shape_cast %21 : vector<1x4x32x8xf32> to vector<4x32x8xf32>
    %c0_25 = arith.constant 0 : index
    %c0_26 = arith.constant 0 : index
    %c0_27 = arith.constant 0 : index
    %c0_28 = arith.constant 0 : index
    %23 = vector.load %arg8[%c0_25, %c0_26, %c0_27, %c0_28] : memref<2x4x32x8xf32, #tpu.memory_space<vmem>>, vector<1x4x32x8xf32>
    %24 = vector.shape_cast %23 : vector<1x4x32x8xf32> to vector<4x32x8xf32>
    %c0_29 = arith.constant 0 : index
    %c0_30 = arith.constant 0 : index
    %c0_31 = arith.constant 0 : index
    %c0_32 = arith.constant 0 : index
    %25 = vector.load %arg9[%c0_29, %c0_30, %c0_31, %c0_32] : memref<2x4x8x32xf32, #tpu.memory_space<vmem>>, vector<1x4x8x32xf32>
    %26 = vector.shape_cast %25 : vector<1x4x8x32xf32> to vector<4x8x32xf32>
    %cst_33 = arith.constant 0.000000e+00 : f32
    %27 = vector.broadcast %cst_33 : f32 to vector<16x32xf32>
    %28 = vector.extract_strided_slice %20 {offsets = [0, 0, 0], sizes = [1, 32, 8], strides = [1, 1, 1]} : vector<4x32x8xf32> to vector<1x32x8xf32>
    %29 = vector.shape_cast %28 : vector<1x32x8xf32> to vector<32x8xf32>
    %cst_34 = arith.constant dense<0.000000e+00> : vector<16x8xf32>
    %30 = tpu.matmul %18, %29, %cst_34 {dimension_numbers = #tpu.dot_dimension_numbers<[1], [0], [0], [1], [0, 0, 1, 1], [], []>} : vector<16x32xf32>, vector<32x8xf32>, vector<16x8xf32> -> vector<16x8xf32>
    %31 = vector.shape_cast %30 : vector<16x8xf32> to vector<2x8x8xf32>
    %32 = vector.extract_strided_slice %22 {offsets = [0, 0, 0], sizes = [1, 32, 8], strides = [1, 1, 1]} : vector<4x32x8xf32> to vector<1x32x8xf32>
    %33 = vector.shape_cast %32 : vector<1x32x8xf32> to vector<32x8xf32>
    %cst_35 = arith.constant dense<0.000000e+00> : vector<16x8xf32>
    %34 = tpu.matmul %18, %33, %cst_35 {dimension_numbers = #tpu.dot_dimension_numbers<[1], [0], [0], [1], [0, 0, 1, 1], [], []>} : vector<16x32xf32>, vector<32x8xf32>, vector<16x8xf32> -> vector<16x8xf32>
    %35 = vector.shape_cast %34 : vector<16x8xf32> to vector<2x8x8xf32>
    %36 = vector.extract_strided_slice %24 {offsets = [0, 0, 0], sizes = [1, 32, 8], strides = [1, 1, 1]} : vector<4x32x8xf32> to vector<1x32x8xf32>
    %37 = vector.shape_cast %36 : vector<1x32x8xf32> to vector<32x8xf32>
    %cst_36 = arith.constant dense<0.000000e+00> : vector<16x8xf32>
    %38 = tpu.matmul %18, %37, %cst_36 {dimension_numbers = #tpu.dot_dimension_numbers<[1], [0], [0], [1], [0, 0, 1, 1], [], []>} : vector<16x32xf32>, vector<32x8xf32>, vector<16x8xf32> -> vector<16x8xf32>
    %39 = vector.shape_cast %38 : vector<16x8xf32> to vector<2x8x8xf32>
    "tpu.trace_start"() <{level = 10 : i32, message = "bqd,bkd->bqk"}> : () -> ()
    %cst_37 = arith.constant dense<0.000000e+00> : vector<2x8x8xf32>
    %40 = tpu.matmul %31, %35, %cst_37 {dimension_numbers = #tpu.dot_dimension_numbers<[2], [2], [1], [1], [0, 0, 0, 1, 1, 1], [0], [0]>} : vector<2x8x8xf32>, vector<2x8x8xf32>, vector<2x8x8xf32> -> vector<2x8x8xf32>
    "tpu.trace_stop"() : () -> ()
    %41 = vector.extract_strided_slice %2 {offsets = [0, 0, 0], sizes = [1, 8, 8], strides = [1, 1, 1]} : vector<4x8x8xf32> to vector<1x8x8xf32>
    %42 = vector.shape_cast %41 : vector<1x8x8xf32> to vector<8x8xf32>
    %43 = vector.shape_cast %42 : vector<8x8xf32> to vector<1x8x8xf32>
    %44 = vector.broadcast %43 : vector<1x8x8xf32> to vector<2x8x8xf32>
    %45 = arith.addf %40, %44 : vector<2x8x8xf32>
    %46 = arith.addf %45, %3 : vector<2x8x8xf32>
    %cst_38 = arith.constant dense<0xFF800000> : vector<2x8xf32>
    %47 = vector.multi_reduction <maximumf>, %46, %cst_38 [2] : vector<2x8x8xf32> to vector<2x8xf32>
    %48 = vector.shape_cast %47 : vector<2x8xf32> to vector<2x8x1xf32>
    %49 = vector.broadcast %48 : vector<2x8x1xf32> to vector<2x8x8xf32>
    %50 = arith.subf %46, %49 : vector<2x8x8xf32>
    %51 = math.exp %50 : vector<2x8x8xf32>
    %cst_39 = arith.constant dense<0.000000e+00> : vector<2x8xf32>
    %52 = vector.multi_reduction <add>, %51, %cst_39 [2] : vector<2x8x8xf32> to vector<2x8xf32>
    %53 = vector.shape_cast %52 : vector<2x8xf32> to vector<2x8x1xf32>
    %54 = tpu.reciprocal %53 {approx = true} : vector<2x8x1xf32> -> vector<2x8x1xf32>
    %55 = vector.broadcast %54 : vector<2x8x1xf32> to vector<2x8x8xf32>
    %56 = arith.mulf %51, %55 : vector<2x8x8xf32>
    "tpu.trace_start"() <{level = 10 : i32, message = "bqk,bkd->bqd"}> : () -> ()
    %cst_40 = arith.constant dense<0.000000e+00> : vector<2x8x8xf32>
    %57 = tpu.matmul %56, %39, %cst_40 {dimension_numbers = #tpu.dot_dimension_numbers<[2], [1], [1], [2], [0, 0, 0, 1, 1, 2], [0], [0]>} : vector<2x8x8xf32>, vector<2x8x8xf32>, vector<2x8x8xf32> -> vector<2x8x8xf32>
    "tpu.trace_stop"() : () -> ()
    %58 = vector.shape_cast %57 : vector<2x8x8xf32> to vector<16x8xf32>
    %59 = vector.extract_strided_slice %26 {offsets = [0, 0, 0], sizes = [1, 8, 32], strides = [1, 1, 1]} : vector<4x8x32xf32> to vector<1x8x32xf32>
    %60 = vector.shape_cast %59 : vector<1x8x32xf32> to vector<8x32xf32>
    %cst_41 = arith.constant dense<0.000000e+00> : vector<16x32xf32>
    %61 = tpu.matmul %58, %60, %cst_41 {dimension_numbers = #tpu.dot_dimension_numbers<[1], [0], [0], [1], [0, 0, 1, 1], [], []>} : vector<16x8xf32>, vector<8x32xf32>, vector<16x32xf32> -> vector<16x32xf32>
    %62 = arith.addf %27, %61 : vector<16x32xf32>
    %63 = vector.extract_strided_slice %20 {offsets = [1, 0, 0], sizes = [1, 32, 8], strides = [1, 1, 1]} : vector<4x32x8xf32> to vector<1x32x8xf32>
    %64 = vector.shape_cast %63 : vector<1x32x8xf32> to vector<32x8xf32>
    %cst_42 = arith.constant dense<0.000000e+00> : vector<16x8xf32>
    %65 = tpu.matmul %18, %64, %cst_42 {dimension_numbers = #tpu.dot_dimension_numbers<[1], [0], [0], [1], [0, 0, 1, 1], [], []>} : vector<16x32xf32>, vector<32x8xf32>, vector<16x8xf32> -> vector<16x8xf32>
    %66 = vector.shape_cast %65 : vector<16x8xf32> to vector<2x8x8xf32>
    %67 = vector.extract_strided_slice %22 {offsets = [1, 0, 0], sizes = [1, 32, 8], strides = [1, 1, 1]} : vector<4x32x8xf32> to vector<1x32x8xf32>
    %68 = vector.shape_cast %67 : vector<1x32x8xf32> to vector<32x8xf32>
    %cst_43 = arith.constant dense<0.000000e+00> : vector<16x8xf32>
    %69 = tpu.matmul %18, %68, %cst_43 {dimension_numbers = #tpu.dot_dimension_numbers<[1], [0], [0], [1], [0, 0, 1, 1], [], []>} : vector<16x32xf32>, vector<32x8xf32>, vector<16x8xf32> -> vector<16x8xf32>
    %70 = vector.shape_cast %69 : vector<16x8xf32> to vector<2x8x8xf32>
    %71 = vector.extract_strided_slice %24 {offsets = [1, 0, 0], sizes = [1, 32, 8], strides = [1, 1, 1]} : vector<4x32x8xf32> to vector<1x32x8xf32>
    %72 = vector.shape_cast %71 : vector<1x32x8xf32> to vector<32x8xf32>
    %cst_44 = arith.constant dense<0.000000e+00> : vector<16x8xf32>
    %73 = tpu.matmul %18, %72, %cst_44 {dimension_numbers = #tpu.dot_dimension_numbers<[1], [0], [0], [1], [0, 0, 1, 1], [], []>} : vector<16x32xf32>, vector<32x8xf32>, vector<16x8xf32> -> vector<16x8xf32>
    %74 = vector.shape_cast %73 : vector<16x8xf32> to vector<2x8x8xf32>
    "tpu.trace_start"() <{level = 10 : i32, message = "bqd,bkd->bqk"}> : () -> ()
    %cst_45 = arith.constant dense<0.000000e+00> : vector<2x8x8xf32>
    %75 = tpu.matmul %66, %70, %cst_45 {dimension_numbers = #tpu.dot_dimension_numbers<[2], [2], [1], [1], [0, 0, 0, 1, 1, 1], [0], [0]>} : vector<2x8x8xf32>, vector<2x8x8xf32>, vector<2x8x8xf32> -> vector<2x8x8xf32>
    "tpu.trace_stop"() : () -> ()
    %76 = vector.extract_strided_slice %2 {offsets = [1, 0, 0], sizes = [1, 8, 8], strides = [1, 1, 1]} : vector<4x8x8xf32> to vector<1x8x8xf32>
    %77 = vector.shape_cast %76 : vector<1x8x8xf32> to vector<8x8xf32>
    %78 = vector.shape_cast %77 : vector<8x8xf32> to vector<1x8x8xf32>
    %79 = vector.broadcast %78 : vector<1x8x8xf32> to vector<2x8x8xf32>
    %80 = arith.addf %75, %79 : vector<2x8x8xf32>
    %81 = arith.addf %80, %3 : vector<2x8x8xf32>
    %cst_46 = arith.constant dense<0xFF800000> : vector<2x8xf32>
    %82 = vector.multi_reduction <maximumf>, %81, %cst_46 [2] : vector<2x8x8xf32> to vector<2x8xf32>
    %83 = vector.shape_cast %82 : vector<2x8xf32> to vector<2x8x1xf32>
    %84 = vector.broadcast %83 : vector<2x8x1xf32> to vector<2x8x8xf32>
    %85 = arith.subf %81, %84 : vector<2x8x8xf32>
    %86 = math.exp %85 : vector<2x8x8xf32>
    %cst_47 = arith.constant dense<0.000000e+00> : vector<2x8xf32>
    %87 = vector.multi_reduction <add>, %86, %cst_47 [2] : vector<2x8x8xf32> to vector<2x8xf32>
    %88 = vector.shape_cast %87 : vector<2x8xf32> to vector<2x8x1xf32>
    %89 = tpu.reciprocal %88 {approx = true} : vector<2x8x1xf32> -> vector<2x8x1xf32>
    %90 = vector.broadcast %89 : vector<2x8x1xf32> to vector<2x8x8xf32>
    %91 = arith.mulf %86, %90 : vector<2x8x8xf32>
    "tpu.trace_start"() <{level = 10 : i32, message = "bqk,bkd->bqd"}> : () -> ()
    %cst_48 = arith.constant dense<0.000000e+00> : vector<2x8x8xf32>
    %92 = tpu.matmul %91, %74, %cst_48 {dimension_numbers = #tpu.dot_dimension_numbers<[2], [1], [1], [2], [0, 0, 0, 1, 1, 2], [0], [0]>} : vector<2x8x8xf32>, vector<2x8x8xf32>, vector<2x8x8xf32> -> vector<2x8x8xf32>
    "tpu.trace_stop"() : () -> ()
    %93 = vector.shape_cast %92 : vector<2x8x8xf32> to vector<16x8xf32>
    %94 = vector.extract_strided_slice %26 {offsets = [1, 0, 0], sizes = [1, 8, 32], strides = [1, 1, 1]} : vector<4x8x32xf32> to vector<1x8x32xf32>
    %95 = vector.shape_cast %94 : vector<1x8x32xf32> to vector<8x32xf32>
    %cst_49 = arith.constant dense<0.000000e+00> : vector<16x32xf32>
    %96 = tpu.matmul %93, %95, %cst_49 {dimension_numbers = #tpu.dot_dimension_numbers<[1], [0], [0], [1], [0, 0, 1, 1], [], []>} : vector<16x8xf32>, vector<8x32xf32>, vector<16x32xf32> -> vector<16x32xf32>
    %97 = arith.addf %62, %96 : vector<16x32xf32>
    %98 = vector.extract_strided_slice %20 {offsets = [2, 0, 0], sizes = [1, 32, 8], strides = [1, 1, 1]} : vector<4x32x8xf32> to vector<1x32x8xf32>
    %99 = vector.shape_cast %98 : vector<1x32x8xf32> to vector<32x8xf32>
    %cst_50 = arith.constant dense<0.000000e+00> : vector<16x8xf32>
    %100 = tpu.matmul %18, %99, %cst_50 {dimension_numbers = #tpu.dot_dimension_numbers<[1], [0], [0], [1], [0, 0, 1, 1], [], []>} : vector<16x32xf32>, vector<32x8xf32>, vector<16x8xf32> -> vector<16x8xf32>
    %101 = vector.shape_cast %100 : vector<16x8xf32> to vector<2x8x8xf32>
    %102 = vector.extract_strided_slice %22 {offsets = [2, 0, 0], sizes = [1, 32, 8], strides = [1, 1, 1]} : vector<4x32x8xf32> to vector<1x32x8xf32>
    %103 = vector.shape_cast %102 : vector<1x32x8xf32> to vector<32x8xf32>
    %cst_51 = arith.constant dense<0.000000e+00> : vector<16x8xf32>
    %104 = tpu.matmul %18, %103, %cst_51 {dimension_numbers = #tpu.dot_dimension_numbers<[1], [0], [0], [1], [0, 0, 1, 1], [], []>} : vector<16x32xf32>, vector<32x8xf32>, vector<16x8xf32> -> vector<16x8xf32>
    %105 = vector.shape_cast %104 : vector<16x8xf32> to vector<2x8x8xf32>
    %106 = vector.extract_strided_slice %24 {offsets = [2, 0, 0], sizes = [1, 32, 8], strides = [1, 1, 1]} : vector<4x32x8xf32> to vector<1x32x8xf32>
    %107 = vector.shape_cast %106 : vector<1x32x8xf32> to vector<32x8xf32>
    %cst_52 = arith.constant dense<0.000000e+00> : vector<16x8xf32>
    %108 = tpu.matmul %18, %107, %cst_52 {dimension_numbers = #tpu.dot_dimension_numbers<[1], [0], [0], [1], [0, 0, 1, 1], [], []>} : vector<16x32xf32>, vector<32x8xf32>, vector<16x8xf32> -> vector<16x8xf32>
    %109 = vector.shape_cast %108 : vector<16x8xf32> to vector<2x8x8xf32>
    "tpu.trace_start"() <{level = 10 : i32, message = "bqd,bkd->bqk"}> : () -> ()
    %cst_53 = arith.constant dense<0.000000e+00> : vector<2x8x8xf32>
    %110 = tpu.matmul %101, %105, %cst_53 {dimension_numbers = #tpu.dot_dimension_numbers<[2], [2], [1], [1], [0, 0, 0, 1, 1, 1], [0], [0]>} : vector<2x8x8xf32>, vector<2x8x8xf32>, vector<2x8x8xf32> -> vector<2x8x8xf32>
    "tpu.trace_stop"() : () -> ()
    %111 = vector.extract_strided_slice %2 {offsets = [2, 0, 0], sizes = [1, 8, 8], strides = [1, 1, 1]} : vector<4x8x8xf32> to vector<1x8x8xf32>
    %112 = vector.shape_cast %111 : vector<1x8x8xf32> to vector<8x8xf32>
    %113 = vector.shape_cast %112 : vector<8x8xf32> to vector<1x8x8xf32>
    %114 = vector.broadcast %113 : vector<1x8x8xf32> to vector<2x8x8xf32>
    %115 = arith.addf %110, %114 : vector<2x8x8xf32>
    %116 = arith.addf %115, %3 : vector<2x8x8xf32>
    %cst_54 = arith.constant dense<0xFF800000> : vector<2x8xf32>
    %117 = vector.multi_reduction <maximumf>, %116, %cst_54 [2] : vector<2x8x8xf32> to vector<2x8xf32>
    %118 = vector.shape_cast %117 : vector<2x8xf32> to vector<2x8x1xf32>
    %119 = vector.broadcast %118 : vector<2x8x1xf32> to vector<2x8x8xf32>
    %120 = arith.subf %116, %119 : vector<2x8x8xf32>
    %121 = math.exp %120 : vector<2x8x8xf32>
    %cst_55 = arith.constant dense<0.000000e+00> : vector<2x8xf32>
    %122 = vector.multi_reduction <add>, %121, %cst_55 [2] : vector<2x8x8xf32> to vector<2x8xf32>
    %123 = vector.shape_cast %122 : vector<2x8xf32> to vector<2x8x1xf32>
    %124 = tpu.reciprocal %123 {approx = true} : vector<2x8x1xf32> -> vector<2x8x1xf32>
    %125 = vector.broadcast %124 : vector<2x8x1xf32> to vector<2x8x8xf32>
    %126 = arith.mulf %121, %125 : vector<2x8x8xf32>
    "tpu.trace_start"() <{level = 10 : i32, message = "bqk,bkd->bqd"}> : () -> ()
    %cst_56 = arith.constant dense<0.000000e+00> : vector<2x8x8xf32>
    %127 = tpu.matmul %126, %109, %cst_56 {dimension_numbers = #tpu.dot_dimension_numbers<[2], [1], [1], [2], [0, 0, 0, 1, 1, 2], [0], [0]>} : vector<2x8x8xf32>, vector<2x8x8xf32>, vector<2x8x8xf32> -> vector<2x8x8xf32>
    "tpu.trace_stop"() : () -> ()
    %128 = vector.shape_cast %127 : vector<2x8x8xf32> to vector<16x8xf32>
    %129 = vector.extract_strided_slice %26 {offsets = [2, 0, 0], sizes = [1, 8, 32], strides = [1, 1, 1]} : vector<4x8x32xf32> to vector<1x8x32xf32>
    %130 = vector.shape_cast %129 : vector<1x8x32xf32> to vector<8x32xf32>
    %cst_57 = arith.constant dense<0.000000e+00> : vector<16x32xf32>
    %131 = tpu.matmul %128, %130, %cst_57 {dimension_numbers = #tpu.dot_dimension_numbers<[1], [0], [0], [1], [0, 0, 1, 1], [], []>} : vector<16x8xf32>, vector<8x32xf32>, vector<16x32xf32> -> vector<16x32xf32>
    %132 = arith.addf %97, %131 : vector<16x32xf32>
    %133 = vector.extract_strided_slice %20 {offsets = [3, 0, 0], sizes = [1, 32, 8], strides = [1, 1, 1]} : vector<4x32x8xf32> to vector<1x32x8xf32>
    %134 = vector.shape_cast %133 : vector<1x32x8xf32> to vector<32x8xf32>
    %cst_58 = arith.constant dense<0.000000e+00> : vector<16x8xf32>
    %135 = tpu.matmul %18, %134, %cst_58 {dimension_numbers = #tpu.dot_dimension_numbers<[1], [0], [0], [1], [0, 0, 1, 1], [], []>} : vector<16x32xf32>, vector<32x8xf32>, vector<16x8xf32> -> vector<16x8xf32>
    %136 = vector.shape_cast %135 : vector<16x8xf32> to vector<2x8x8xf32>
    %137 = vector.extract_strided_slice %22 {offsets = [3, 0, 0], sizes = [1, 32, 8], strides = [1, 1, 1]} : vector<4x32x8xf32> to vector<1x32x8xf32>
    %138 = vector.shape_cast %137 : vector<1x32x8xf32> to vector<32x8xf32>
    %cst_59 = arith.constant dense<0.000000e+00> : vector<16x8xf32>
    %139 = tpu.matmul %18, %138, %cst_59 {dimension_numbers = #tpu.dot_dimension_numbers<[1], [0], [0], [1], [0, 0, 1, 1], [], []>} : vector<16x32xf32>, vector<32x8xf32>, vector<16x8xf32> -> vector<16x8xf32>
    %140 = vector.shape_cast %139 : vector<16x8xf32> to vector<2x8x8xf32>
    %141 = vector.extract_strided_slice %24 {offsets = [3, 0, 0], sizes = [1, 32, 8], strides = [1, 1, 1]} : vector<4x32x8xf32> to vector<1x32x8xf32>
    %142 = vector.shape_cast %141 : vector<1x32x8xf32> to vector<32x8xf32>
    %cst_60 = arith.constant dense<0.000000e+00> : vector<16x8xf32>
    %143 = tpu.matmul %18, %142, %cst_60 {dimension_numbers = #tpu.dot_dimension_numbers<[1], [0], [0], [1], [0, 0, 1, 1], [], []>} : vector<16x32xf32>, vector<32x8xf32>, vector<16x8xf32> -> vector<16x8xf32>
    %144 = vector.shape_cast %143 : vector<16x8xf32> to vector<2x8x8xf32>
    "tpu.trace_start"() <{level = 10 : i32, message = "bqd,bkd->bqk"}> : () -> ()
    %cst_61 = arith.constant dense<0.000000e+00> : vector<2x8x8xf32>
    %145 = tpu.matmul %136, %140, %cst_61 {dimension_numbers = #tpu.dot_dimension_numbers<[2], [2], [1], [1], [0, 0, 0, 1, 1, 1], [0], [0]>} : vector<2x8x8xf32>, vector<2x8x8xf32>, vector<2x8x8xf32> -> vector<2x8x8xf32>
    "tpu.trace_stop"() : () -> ()
    %146 = vector.extract_strided_slice %2 {offsets = [3, 0, 0], sizes = [1, 8, 8], strides = [1, 1, 1]} : vector<4x8x8xf32> to vector<1x8x8xf32>
    %147 = vector.shape_cast %146 : vector<1x8x8xf32> to vector<8x8xf32>
    %148 = vector.shape_cast %147 : vector<8x8xf32> to vector<1x8x8xf32>
    %149 = vector.broadcast %148 : vector<1x8x8xf32> to vector<2x8x8xf32>
    %150 = arith.addf %145, %149 : vector<2x8x8xf32>
    %151 = arith.addf %150, %3 : vector<2x8x8xf32>
    %cst_62 = arith.constant dense<0xFF800000> : vector<2x8xf32>
    %152 = vector.multi_reduction <maximumf>, %151, %cst_62 [2] : vector<2x8x8xf32> to vector<2x8xf32>
    %153 = vector.shape_cast %152 : vector<2x8xf32> to vector<2x8x1xf32>
    %154 = vector.broadcast %153 : vector<2x8x1xf32> to vector<2x8x8xf32>
    %155 = arith.subf %151, %154 : vector<2x8x8xf32>
    %156 = math.exp %155 : vector<2x8x8xf32>
    %cst_63 = arith.constant dense<0.000000e+00> : vector<2x8xf32>
    %157 = vector.multi_reduction <add>, %156, %cst_63 [2] : vector<2x8x8xf32> to vector<2x8xf32>
    %158 = vector.shape_cast %157 : vector<2x8xf32> to vector<2x8x1xf32>
    %159 = tpu.reciprocal %158 {approx = true} : vector<2x8x1xf32> -> vector<2x8x1xf32>
    %160 = vector.broadcast %159 : vector<2x8x1xf32> to vector<2x8x8xf32>
    %161 = arith.mulf %156, %160 : vector<2x8x8xf32>
    "tpu.trace_start"() <{level = 10 : i32, message = "bqk,bkd->bqd"}> : () -> ()
    %cst_64 = arith.constant dense<0.000000e+00> : vector<2x8x8xf32>
    %162 = tpu.matmul %161, %144, %cst_64 {dimension_numbers = #tpu.dot_dimension_numbers<[2], [1], [1], [2], [0, 0, 0, 1, 1, 2], [0], [0]>} : vector<2x8x8xf32>, vector<2x8x8xf32>, vector<2x8x8xf32> -> vector<2x8x8xf32>
    "tpu.trace_stop"() : () -> ()
    %163 = vector.shape_cast %162 : vector<2x8x8xf32> to vector<16x8xf32>
    %164 = vector.extract_strided_slice %26 {offsets = [3, 0, 0], sizes = [1, 8, 32], strides = [1, 1, 1]} : vector<4x8x32xf32> to vector<1x8x32xf32>
    %165 = vector.shape_cast %164 : vector<1x8x32xf32> to vector<8x32xf32>
    %cst_65 = arith.constant dense<0.000000e+00> : vector<16x32xf32>
    %166 = tpu.matmul %163, %165, %cst_65 {dimension_numbers = #tpu.dot_dimension_numbers<[1], [0], [0], [1], [0, 0, 1, 1], [], []>} : vector<16x8xf32>, vector<8x32xf32>, vector<16x32xf32> -> vector<16x32xf32>
    %167 = arith.addf %132, %166 : vector<16x32xf32>
    %168 = arith.addf %0, %167 : vector<16x32xf32>
    %c0_66 = arith.constant 0 : index
    %c0_67 = arith.constant 0 : index
    %c0_68 = arith.constant 0 : index
    %169 = vector.load %arg10[%c0_66, %c0_67, %c0_68] : memref<2x1x32xf32, #tpu.memory_space<vmem>>, vector<1x1x32xf32>
    %170 = vector.shape_cast %169 : vector<1x1x32xf32> to vector<1x32xf32>
    %171 = arith.mulf %168, %168 : vector<16x32xf32>
    %cst_69 = arith.constant dense<0.000000e+00> : vector<16xf32>
    %172 = vector.multi_reduction <add>, %171, %cst_69 [1] : vector<16x32xf32> to vector<16xf32>
    %173 = vector.shape_cast %172 : vector<16xf32> to vector<16x1xf32>
    %cst_70 = arith.constant 3.200000e+01 : f32
    %174 = vector.broadcast %cst_70 : f32 to vector<16x1xf32>
    %175 = arith.divf %173, %174 : vector<16x1xf32>
    %cst_71 = arith.constant 9.99999997E-7 : f32
    %176 = vector.broadcast %cst_71 : f32 to vector<16x1xf32>
    %177 = arith.addf %175, %176 : vector<16x1xf32>
    %178 = math.rsqrt %177 : vector<16x1xf32>
    %179 = vector.broadcast %178 : vector<16x1xf32> to vector<16x32xf32>
    %180 = arith.mulf %168, %179 : vector<16x32xf32>
    %181 = vector.broadcast %170 : vector<1x32xf32> to vector<16x32xf32>
    %182 = arith.mulf %180, %181 : vector<16x32xf32>
    %c0_72 = arith.constant 0 : index
    %c0_73 = arith.constant 0 : index
    %c0_74 = arith.constant 0 : index
    %c0_75 = arith.constant 0 : index
    %183 = vector.load %arg11[%c0_72, %c0_73, %c0_74, %c0_75] : memref<2x4x32x8xf32, #tpu.memory_space<vmem>>, vector<1x4x32x8xf32>
    %184 = vector.shape_cast %183 : vector<1x4x32x8xf32> to vector<4x32x8xf32>
    %c0_76 = arith.constant 0 : index
    %c0_77 = arith.constant 0 : index
    %c0_78 = arith.constant 0 : index
    %c0_79 = arith.constant 0 : index
    %185 = vector.load %arg12[%c0_76, %c0_77, %c0_78, %c0_79] : memref<2x4x32x8xf32, #tpu.memory_space<vmem>>, vector<1x4x32x8xf32>
    %186 = vector.shape_cast %185 : vector<1x4x32x8xf32> to vector<4x32x8xf32>
    %c0_80 = arith.constant 0 : index
    %c0_81 = arith.constant 0 : index
    %c0_82 = arith.constant 0 : index
    %c0_83 = arith.constant 0 : index
    %187 = vector.load %arg13[%c0_80, %c0_81, %c0_82, %c0_83] : memref<2x4x32x8xf32, #tpu.memory_space<vmem>>, vector<1x4x32x8xf32>
    %188 = vector.shape_cast %187 : vector<1x4x32x8xf32> to vector<4x32x8xf32>
    %c0_84 = arith.constant 0 : index
    %c0_85 = arith.constant 0 : index
    %c0_86 = arith.constant 0 : index
    %c0_87 = arith.constant 0 : index
    %189 = vector.load %arg14[%c0_84, %c0_85, %c0_86, %c0_87] : memref<2x4x8x32xf32, #tpu.memory_space<vmem>>, vector<1x4x8x32xf32>
    %190 = vector.shape_cast %189 : vector<1x4x8x32xf32> to vector<4x8x32xf32>
    %cst_88 = arith.constant 0.000000e+00 : f32
    %191 = vector.broadcast %cst_88 : f32 to vector<16x32xf32>
    %192 = vector.extract_strided_slice %184 {offsets = [0, 0, 0], sizes = [1, 32, 8], strides = [1, 1, 1]} : vector<4x32x8xf32> to vector<1x32x8xf32>
    %193 = vector.shape_cast %192 : vector<1x32x8xf32> to vector<32x8xf32>
    %cst_89 = arith.constant dense<0.000000e+00> : vector<16x8xf32>
    %194 = tpu.matmul %182, %193, %cst_89 {dimension_numbers = #tpu.dot_dimension_numbers<[1], [0], [0], [1], [0, 0, 1, 1], [], []>} : vector<16x32xf32>, vector<32x8xf32>, vector<16x8xf32> -> vector<16x8xf32>
    %195 = vector.shape_cast %194 : vector<16x8xf32> to vector<2x8x8xf32>
    %196 = vector.extract_strided_slice %186 {offsets = [0, 0, 0], sizes = [1, 32, 8], strides = [1, 1, 1]} : vector<4x32x8xf32> to vector<1x32x8xf32>
    %197 = vector.shape_cast %196 : vector<1x32x8xf32> to vector<32x8xf32>
    %cst_90 = arith.constant dense<0.000000e+00> : vector<16x8xf32>
    %198 = tpu.matmul %1, %197, %cst_90 {dimension_numbers = #tpu.dot_dimension_numbers<[1], [0], [0], [1], [0, 0, 1, 1], [], []>} : vector<16x32xf32>, vector<32x8xf32>, vector<16x8xf32> -> vector<16x8xf32>
    %199 = vector.shape_cast %198 : vector<16x8xf32> to vector<2x8x8xf32>
    %200 = vector.extract_strided_slice %188 {offsets = [0, 0, 0], sizes = [1, 32, 8], strides = [1, 1, 1]} : vector<4x32x8xf32> to vector<1x32x8xf32>
    %201 = vector.shape_cast %200 : vector<1x32x8xf32> to vector<32x8xf32>
    %cst_91 = arith.constant dense<0.000000e+00> : vector<16x8xf32>
    %202 = tpu.matmul %1, %201, %cst_91 {dimension_numbers = #tpu.dot_dimension_numbers<[1], [0], [0], [1], [0, 0, 1, 1], [], []>} : vector<16x32xf32>, vector<32x8xf32>, vector<16x8xf32> -> vector<16x8xf32>
    %203 = vector.shape_cast %202 : vector<16x8xf32> to vector<2x8x8xf32>
    "tpu.trace_start"() <{level = 10 : i32, message = "bqd,bkd->bqk"}> : () -> ()
    %cst_92 = arith.constant dense<0.000000e+00> : vector<2x8x8xf32>
    %204 = tpu.matmul %195, %199, %cst_92 {dimension_numbers = #tpu.dot_dimension_numbers<[2], [2], [1], [1], [0, 0, 0, 1, 1, 1], [0], [0]>} : vector<2x8x8xf32>, vector<2x8x8xf32>, vector<2x8x8xf32> -> vector<2x8x8xf32>
    "tpu.trace_stop"() : () -> ()
    %205 = vector.broadcast %4 : vector<2x1x8xf32> to vector<2x8x8xf32>
    %206 = arith.addf %204, %205 : vector<2x8x8xf32>
    %cst_93 = arith.constant dense<0xFF800000> : vector<2x8xf32>
    %207 = vector.multi_reduction <maximumf>, %206, %cst_93 [2] : vector<2x8x8xf32> to vector<2x8xf32>
    %208 = vector.shape_cast %207 : vector<2x8xf32> to vector<2x8x1xf32>
    %209 = vector.broadcast %208 : vector<2x8x1xf32> to vector<2x8x8xf32>
    %210 = arith.subf %206, %209 : vector<2x8x8xf32>
    %211 = math.exp %210 : vector<2x8x8xf32>
    %cst_94 = arith.constant dense<0.000000e+00> : vector<2x8xf32>
    %212 = vector.multi_reduction <add>, %211, %cst_94 [2] : vector<2x8x8xf32> to vector<2x8xf32>
    %213 = vector.shape_cast %212 : vector<2x8xf32> to vector<2x8x1xf32>
    %214 = tpu.reciprocal %213 {approx = true} : vector<2x8x1xf32> -> vector<2x8x1xf32>
    %215 = vector.broadcast %214 : vector<2x8x1xf32> to vector<2x8x8xf32>
    %216 = arith.mulf %211, %215 : vector<2x8x8xf32>
    "tpu.trace_start"() <{level = 10 : i32, message = "bqk,bkd->bqd"}> : () -> ()
    %cst_95 = arith.constant dense<0.000000e+00> : vector<2x8x8xf32>
    %217 = tpu.matmul %216, %203, %cst_95 {dimension_numbers = #tpu.dot_dimension_numbers<[2], [1], [1], [2], [0, 0, 0, 1, 1, 2], [0], [0]>} : vector<2x8x8xf32>, vector<2x8x8xf32>, vector<2x8x8xf32> -> vector<2x8x8xf32>
    "tpu.trace_stop"() : () -> ()
    %218 = vector.shape_cast %217 : vector<2x8x8xf32> to vector<16x8xf32>
    %219 = vector.extract_strided_slice %190 {offsets = [0, 0, 0], sizes = [1, 8, 32], strides = [1, 1, 1]} : vector<4x8x32xf32> to vector<1x8x32xf32>
    %220 = vector.shape_cast %219 : vector<1x8x32xf32> to vector<8x32xf32>
    %cst_96 = arith.constant dense<0.000000e+00> : vector<16x32xf32>
    %221 = tpu.matmul %218, %220, %cst_96 {dimension_numbers = #tpu.dot_dimension_numbers<[1], [0], [0], [1], [0, 0, 1, 1], [], []>} : vector<16x8xf32>, vector<8x32xf32>, vector<16x32xf32> -> vector<16x32xf32>
    %222 = arith.addf %191, %221 : vector<16x32xf32>
    %223 = vector.extract_strided_slice %184 {offsets = [1, 0, 0], sizes = [1, 32, 8], strides = [1, 1, 1]} : vector<4x32x8xf32> to vector<1x32x8xf32>
    %224 = vector.shape_cast %223 : vector<1x32x8xf32> to vector<32x8xf32>
    %cst_97 = arith.constant dense<0.000000e+00> : vector<16x8xf32>
    %225 = tpu.matmul %182, %224, %cst_97 {dimension_numbers = #tpu.dot_dimension_numbers<[1], [0], [0], [1], [0, 0, 1, 1], [], []>} : vector<16x32xf32>, vector<32x8xf32>, vector<16x8xf32> -> vector<16x8xf32>
    %226 = vector.shape_cast %225 : vector<16x8xf32> to vector<2x8x8xf32>
    %227 = vector.extract_strided_slice %186 {offsets = [1, 0, 0], sizes = [1, 32, 8], strides = [1, 1, 1]} : vector<4x32x8xf32> to vector<1x32x8xf32>
    %228 = vector.shape_cast %227 : vector<1x32x8xf32> to vector<32x8xf32>
    %cst_98 = arith.constant dense<0.000000e+00> : vector<16x8xf32>
    %229 = tpu.matmul %1, %228, %cst_98 {dimension_numbers = #tpu.dot_dimension_numbers<[1], [0], [0], [1], [0, 0, 1, 1], [], []>} : vector<16x32xf32>, vector<32x8xf32>, vector<16x8xf32> -> vector<16x8xf32>
    %230 = vector.shape_cast %229 : vector<16x8xf32> to vector<2x8x8xf32>
    %231 = vector.extract_strided_slice %188 {offsets = [1, 0, 0], sizes = [1, 32, 8], strides = [1, 1, 1]} : vector<4x32x8xf32> to vector<1x32x8xf32>
    %232 = vector.shape_cast %231 : vector<1x32x8xf32> to vector<32x8xf32>
    %cst_99 = arith.constant dense<0.000000e+00> : vector<16x8xf32>
    %233 = tpu.matmul %1, %232, %cst_99 {dimension_numbers = #tpu.dot_dimension_numbers<[1], [0], [0], [1], [0, 0, 1, 1], [], []>} : vector<16x32xf32>, vector<32x8xf32>, vector<16x8xf32> -> vector<16x8xf32>
    %234 = vector.shape_cast %233 : vector<16x8xf32> to vector<2x8x8xf32>
    "tpu.trace_start"() <{level = 10 : i32, message = "bqd,bkd->bqk"}> : () -> ()
    %cst_100 = arith.constant dense<0.000000e+00> : vector<2x8x8xf32>
    %235 = tpu.matmul %226, %230, %cst_100 {dimension_numbers = #tpu.dot_dimension_numbers<[2], [2], [1], [1], [0, 0, 0, 1, 1, 1], [0], [0]>} : vector<2x8x8xf32>, vector<2x8x8xf32>, vector<2x8x8xf32> -> vector<2x8x8xf32>
    "tpu.trace_stop"() : () -> ()
    %236 = vector.broadcast %4 : vector<2x1x8xf32> to vector<2x8x8xf32>
    %237 = arith.addf %235, %236 : vector<2x8x8xf32>
    %cst_101 = arith.constant dense<0xFF800000> : vector<2x8xf32>
    %238 = vector.multi_reduction <maximumf>, %237, %cst_101 [2] : vector<2x8x8xf32> to vector<2x8xf32>
    %239 = vector.shape_cast %238 : vector<2x8xf32> to vector<2x8x1xf32>
    %240 = vector.broadcast %239 : vector<2x8x1xf32> to vector<2x8x8xf32>
    %241 = arith.subf %237, %240 : vector<2x8x8xf32>
    %242 = math.exp %241 : vector<2x8x8xf32>
    %cst_102 = arith.constant dense<0.000000e+00> : vector<2x8xf32>
    %243 = vector.multi_reduction <add>, %242, %cst_102 [2] : vector<2x8x8xf32> to vector<2x8xf32>
    %244 = vector.shape_cast %243 : vector<2x8xf32> to vector<2x8x1xf32>
    %245 = tpu.reciprocal %244 {approx = true} : vector<2x8x1xf32> -> vector<2x8x1xf32>
    %246 = vector.broadcast %245 : vector<2x8x1xf32> to vector<2x8x8xf32>
    %247 = arith.mulf %242, %246 : vector<2x8x8xf32>
    "tpu.trace_start"() <{level = 10 : i32, message = "bqk,bkd->bqd"}> : () -> ()
    %cst_103 = arith.constant dense<0.000000e+00> : vector<2x8x8xf32>
    %248 = tpu.matmul %247, %234, %cst_103 {dimension_numbers = #tpu.dot_dimension_numbers<[2], [1], [1], [2], [0, 0, 0, 1, 1, 2], [0], [0]>} : vector<2x8x8xf32>, vector<2x8x8xf32>, vector<2x8x8xf32> -> vector<2x8x8xf32>
    "tpu.trace_stop"() : () -> ()
    %249 = vector.shape_cast %248 : vector<2x8x8xf32> to vector<16x8xf32>
    %250 = vector.extract_strided_slice %190 {offsets = [1, 0, 0], sizes = [1, 8, 32], strides = [1, 1, 1]} : vector<4x8x32xf32> to vector<1x8x32xf32>
    %251 = vector.shape_cast %250 : vector<1x8x32xf32> to vector<8x32xf32>
    %cst_104 = arith.constant dense<0.000000e+00> : vector<16x32xf32>
    %252 = tpu.matmul %249, %251, %cst_104 {dimension_numbers = #tpu.dot_dimension_numbers<[1], [0], [0], [1], [0, 0, 1, 1], [], []>} : vector<16x8xf32>, vector<8x32xf32>, vector<16x32xf32> -> vector<16x32xf32>
    %253 = arith.addf %222, %252 : vector<16x32xf32>
    %254 = vector.extract_strided_slice %184 {offsets = [2, 0, 0], sizes = [1, 32, 8], strides = [1, 1, 1]} : vector<4x32x8xf32> to vector<1x32x8xf32>
    %255 = vector.shape_cast %254 : vector<1x32x8xf32> to vector<32x8xf32>
    %cst_105 = arith.constant dense<0.000000e+00> : vector<16x8xf32>
    %256 = tpu.matmul %182, %255, %cst_105 {dimension_numbers = #tpu.dot_dimension_numbers<[1], [0], [0], [1], [0, 0, 1, 1], [], []>} : vector<16x32xf32>, vector<32x8xf32>, vector<16x8xf32> -> vector<16x8xf32>
    %257 = vector.shape_cast %256 : vector<16x8xf32> to vector<2x8x8xf32>
    %258 = vector.extract_strided_slice %186 {offsets = [2, 0, 0], sizes = [1, 32, 8], strides = [1, 1, 1]} : vector<4x32x8xf32> to vector<1x32x8xf32>
    %259 = vector.shape_cast %258 : vector<1x32x8xf32> to vector<32x8xf32>
    %cst_106 = arith.constant dense<0.000000e+00> : vector<16x8xf32>
    %260 = tpu.matmul %1, %259, %cst_106 {dimension_numbers = #tpu.dot_dimension_numbers<[1], [0], [0], [1], [0, 0, 1, 1], [], []>} : vector<16x32xf32>, vector<32x8xf32>, vector<16x8xf32> -> vector<16x8xf32>
    %261 = vector.shape_cast %260 : vector<16x8xf32> to vector<2x8x8xf32>
    %262 = vector.extract_strided_slice %188 {offsets = [2, 0, 0], sizes = [1, 32, 8], strides = [1, 1, 1]} : vector<4x32x8xf32> to vector<1x32x8xf32>
    %263 = vector.shape_cast %262 : vector<1x32x8xf32> to vector<32x8xf32>
    %cst_107 = arith.constant dense<0.000000e+00> : vector<16x8xf32>
    %264 = tpu.matmul %1, %263, %cst_107 {dimension_numbers = #tpu.dot_dimension_numbers<[1], [0], [0], [1], [0, 0, 1, 1], [], []>} : vector<16x32xf32>, vector<32x8xf32>, vector<16x8xf32> -> vector<16x8xf32>
    %265 = vector.shape_cast %264 : vector<16x8xf32> to vector<2x8x8xf32>
    "tpu.trace_start"() <{level = 10 : i32, message = "bqd,bkd->bqk"}> : () -> ()
    %cst_108 = arith.constant dense<0.000000e+00> : vector<2x8x8xf32>
    %266 = tpu.matmul %257, %261, %cst_108 {dimension_numbers = #tpu.dot_dimension_numbers<[2], [2], [1], [1], [0, 0, 0, 1, 1, 1], [0], [0]>} : vector<2x8x8xf32>, vector<2x8x8xf32>, vector<2x8x8xf32> -> vector<2x8x8xf32>
    "tpu.trace_stop"() : () -> ()
    %267 = vector.broadcast %4 : vector<2x1x8xf32> to vector<2x8x8xf32>
    %268 = arith.addf %266, %267 : vector<2x8x8xf32>
    %cst_109 = arith.constant dense<0xFF800000> : vector<2x8xf32>
    %269 = vector.multi_reduction <maximumf>, %268, %cst_109 [2] : vector<2x8x8xf32> to vector<2x8xf32>
    %270 = vector.shape_cast %269 : vector<2x8xf32> to vector<2x8x1xf32>
    %271 = vector.broadcast %270 : vector<2x8x1xf32> to vector<2x8x8xf32>
    %272 = arith.subf %268, %271 : vector<2x8x8xf32>
    %273 = math.exp %272 : vector<2x8x8xf32>
    %cst_110 = arith.constant dense<0.000000e+00> : vector<2x8xf32>
    %274 = vector.multi_reduction <add>, %273, %cst_110 [2] : vector<2x8x8xf32> to vector<2x8xf32>
    %275 = vector.shape_cast %274 : vector<2x8xf32> to vector<2x8x1xf32>
    %276 = tpu.reciprocal %275 {approx = true} : vector<2x8x1xf32> -> vector<2x8x1xf32>
    %277 = vector.broadcast %276 : vector<2x8x1xf32> to vector<2x8x8xf32>
    %278 = arith.mulf %273, %277 : vector<2x8x8xf32>
    "tpu.trace_start"() <{level = 10 : i32, message = "bqk,bkd->bqd"}> : () -> ()
    %cst_111 = arith.constant dense<0.000000e+00> : vector<2x8x8xf32>
    %279 = tpu.matmul %278, %265, %cst_111 {dimension_numbers = #tpu.dot_dimension_numbers<[2], [1], [1], [2], [0, 0, 0, 1, 1, 2], [0], [0]>} : vector<2x8x8xf32>, vector<2x8x8xf32>, vector<2x8x8xf32> -> vector<2x8x8xf32>
    "tpu.trace_stop"() : () -> ()
    %280 = vector.shape_cast %279 : vector<2x8x8xf32> to vector<16x8xf32>
    %281 = vector.extract_strided_slice %190 {offsets = [2, 0, 0], sizes = [1, 8, 32], strides = [1, 1, 1]} : vector<4x8x32xf32> to vector<1x8x32xf32>
    %282 = vector.shape_cast %281 : vector<1x8x32xf32> to vector<8x32xf32>
    %cst_112 = arith.constant dense<0.000000e+00> : vector<16x32xf32>
    %283 = tpu.matmul %280, %282, %cst_112 {dimension_numbers = #tpu.dot_dimension_numbers<[1], [0], [0], [1], [0, 0, 1, 1], [], []>} : vector<16x8xf32>, vector<8x32xf32>, vector<16x32xf32> -> vector<16x32xf32>
    %284 = arith.addf %253, %283 : vector<16x32xf32>
    %285 = vector.extract_strided_slice %184 {offsets = [3, 0, 0], sizes = [1, 32, 8], strides = [1, 1, 1]} : vector<4x32x8xf32> to vector<1x32x8xf32>
    %286 = vector.shape_cast %285 : vector<1x32x8xf32> to vector<32x8xf32>
    %cst_113 = arith.constant dense<0.000000e+00> : vector<16x8xf32>
    %287 = tpu.matmul %182, %286, %cst_113 {dimension_numbers = #tpu.dot_dimension_numbers<[1], [0], [0], [1], [0, 0, 1, 1], [], []>} : vector<16x32xf32>, vector<32x8xf32>, vector<16x8xf32> -> vector<16x8xf32>
    %288 = vector.shape_cast %287 : vector<16x8xf32> to vector<2x8x8xf32>
    %289 = vector.extract_strided_slice %186 {offsets = [3, 0, 0], sizes = [1, 32, 8], strides = [1, 1, 1]} : vector<4x32x8xf32> to vector<1x32x8xf32>
    %290 = vector.shape_cast %289 : vector<1x32x8xf32> to vector<32x8xf32>
    %cst_114 = arith.constant dense<0.000000e+00> : vector<16x8xf32>
    %291 = tpu.matmul %1, %290, %cst_114 {dimension_numbers = #tpu.dot_dimension_numbers<[1], [0], [0], [1], [0, 0, 1, 1], [], []>} : vector<16x32xf32>, vector<32x8xf32>, vector<16x8xf32> -> vector<16x8xf32>
    %292 = vector.shape_cast %291 : vector<16x8xf32> to vector<2x8x8xf32>
    %293 = vector.extract_strided_slice %188 {offsets = [3, 0, 0], sizes = [1, 32, 8], strides = [1, 1, 1]} : vector<4x32x8xf32> to vector<1x32x8xf32>
    %294 = vector.shape_cast %293 : vector<1x32x8xf32> to vector<32x8xf32>
    %cst_115 = arith.constant dense<0.000000e+00> : vector<16x8xf32>
    %295 = tpu.matmul %1, %294, %cst_115 {dimension_numbers = #tpu.dot_dimension_numbers<[1], [0], [0], [1], [0, 0, 1, 1], [], []>} : vector<16x32xf32>, vector<32x8xf32>, vector<16x8xf32> -> vector<16x8xf32>
    %296 = vector.shape_cast %295 : vector<16x8xf32> to vector<2x8x8xf32>
    "tpu.trace_start"() <{level = 10 : i32, message = "bqd,bkd->bqk"}> : () -> ()
    %cst_116 = arith.constant dense<0.000000e+00> : vector<2x8x8xf32>
    %297 = tpu.matmul %288, %292, %cst_116 {dimension_numbers = #tpu.dot_dimension_numbers<[2], [2], [1], [1], [0, 0, 0, 1, 1, 1], [0], [0]>} : vector<2x8x8xf32>, vector<2x8x8xf32>, vector<2x8x8xf32> -> vector<2x8x8xf32>
    "tpu.trace_stop"() : () -> ()
    %298 = vector.broadcast %4 : vector<2x1x8xf32> to vector<2x8x8xf32>
    %299 = arith.addf %297, %298 : vector<2x8x8xf32>
    %cst_117 = arith.constant dense<0xFF800000> : vector<2x8xf32>
    %300 = vector.multi_reduction <maximumf>, %299, %cst_117 [2] : vector<2x8x8xf32> to vector<2x8xf32>
    %301 = vector.shape_cast %300 : vector<2x8xf32> to vector<2x8x1xf32>
    %302 = vector.broadcast %301 : vector<2x8x1xf32> to vector<2x8x8xf32>
    %303 = arith.subf %299, %302 : vector<2x8x8xf32>
    %304 = math.exp %303 : vector<2x8x8xf32>
    %cst_118 = arith.constant dense<0.000000e+00> : vector<2x8xf32>
    %305 = vector.multi_reduction <add>, %304, %cst_118 [2] : vector<2x8x8xf32> to vector<2x8xf32>
    %306 = vector.shape_cast %305 : vector<2x8xf32> to vector<2x8x1xf32>
    %307 = tpu.reciprocal %306 {approx = true} : vector<2x8x1xf32> -> vector<2x8x1xf32>
    %308 = vector.broadcast %307 : vector<2x8x1xf32> to vector<2x8x8xf32>
    %309 = arith.mulf %304, %308 : vector<2x8x8xf32>
    "tpu.trace_start"() <{level = 10 : i32, message = "bqk,bkd->bqd"}> : () -> ()
    %cst_119 = arith.constant dense<0.000000e+00> : vector<2x8x8xf32>
    %310 = tpu.matmul %309, %296, %cst_119 {dimension_numbers = #tpu.dot_dimension_numbers<[2], [1], [1], [2], [0, 0, 0, 1, 1, 2], [0], [0]>} : vector<2x8x8xf32>, vector<2x8x8xf32>, vector<2x8x8xf32> -> vector<2x8x8xf32>
    "tpu.trace_stop"() : () -> ()
    %311 = vector.shape_cast %310 : vector<2x8x8xf32> to vector<16x8xf32>
    %312 = vector.extract_strided_slice %190 {offsets = [3, 0, 0], sizes = [1, 8, 32], strides = [1, 1, 1]} : vector<4x8x32xf32> to vector<1x8x32xf32>
    %313 = vector.shape_cast %312 : vector<1x8x32xf32> to vector<8x32xf32>
    %cst_120 = arith.constant dense<0.000000e+00> : vector<16x32xf32>
    %314 = tpu.matmul %311, %313, %cst_120 {dimension_numbers = #tpu.dot_dimension_numbers<[1], [0], [0], [1], [0, 0, 1, 1], [], []>} : vector<16x8xf32>, vector<8x32xf32>, vector<16x32xf32> -> vector<16x32xf32>
    %315 = arith.addf %284, %314 : vector<16x32xf32>
    %316 = arith.addf %168, %315 : vector<16x32xf32>
    %c0_121 = arith.constant 0 : index
    %c0_122 = arith.constant 0 : index
    %c0_123 = arith.constant 0 : index
    %317 = vector.load %arg15[%c0_121, %c0_122, %c0_123] : memref<2x1x32xf32, #tpu.memory_space<vmem>>, vector<1x1x32xf32>
    %318 = vector.shape_cast %317 : vector<1x1x32xf32> to vector<1x32xf32>
    %319 = arith.mulf %316, %316 : vector<16x32xf32>
    %cst_124 = arith.constant dense<0.000000e+00> : vector<16xf32>
    %320 = vector.multi_reduction <add>, %319, %cst_124 [1] : vector<16x32xf32> to vector<16xf32>
    %321 = vector.shape_cast %320 : vector<16xf32> to vector<16x1xf32>
    %cst_125 = arith.constant 3.200000e+01 : f32
    %322 = vector.broadcast %cst_125 : f32 to vector<16x1xf32>
    %323 = arith.divf %321, %322 : vector<16x1xf32>
    %cst_126 = arith.constant 9.99999997E-7 : f32
    %324 = vector.broadcast %cst_126 : f32 to vector<16x1xf32>
    %325 = arith.addf %323, %324 : vector<16x1xf32>
    %326 = math.rsqrt %325 : vector<16x1xf32>
    %327 = vector.broadcast %326 : vector<16x1xf32> to vector<16x32xf32>
    %328 = arith.mulf %316, %327 : vector<16x32xf32>
    %329 = vector.broadcast %318 : vector<1x32xf32> to vector<16x32xf32>
    %330 = arith.mulf %328, %329 : vector<16x32xf32>
    %c0_127 = arith.constant 0 : index
    %c0_128 = arith.constant 0 : index
    %c0_129 = arith.constant 0 : index
    %331 = vector.load %arg16[%c0_127, %c0_128, %c0_129] : memref<2x32x64xf32, #tpu.memory_space<vmem>>, vector<1x32x64xf32>
    %332 = vector.shape_cast %331 : vector<1x32x64xf32> to vector<32x64xf32>
    %cst_130 = arith.constant dense<0.000000e+00> : vector<16x64xf32>
    %333 = tpu.matmul %330, %332, %cst_130 {dimension_numbers = #tpu.dot_dimension_numbers<[1], [0], [0], [1], [0, 0, 1, 1], [], []>} : vector<16x32xf32>, vector<32x64xf32>, vector<16x64xf32> -> vector<16x64xf32>
    %cst_131 = arith.constant 0.000000e+00 : f32
    %334 = vector.broadcast %cst_131 : f32 to vector<16x64xf32>
    %335 = arith.maximumf %333, %334 : vector<16x64xf32>
    %c0_132 = arith.constant 0 : index
    %c0_133 = arith.constant 0 : index
    %c0_134 = arith.constant 0 : index
    %336 = vector.load %arg17[%c0_132, %c0_133, %c0_134] : memref<2x64x32xf32, #tpu.memory_space<vmem>>, vector<1x64x32xf32>
    %337 = vector.shape_cast %336 : vector<1x64x32xf32> to vector<64x32xf32>
    %cst_135 = arith.constant dense<0.000000e+00> : vector<16x32xf32>
    %338 = tpu.matmul %335, %337, %cst_135 {dimension_numbers = #tpu.dot_dimension_numbers<[1], [0], [0], [1], [0, 0, 1, 1], [], []>} : vector<16x64xf32>, vector<64x32xf32>, vector<16x32xf32> -> vector<16x32xf32>
    %339 = arith.addf %316, %338 : vector<16x32xf32>
    %c1 = arith.constant 1 : index
    %c0_136 = arith.constant 0 : index
    %c0_137 = arith.constant 0 : index
    %340 = vector.load %arg5[%c1, %c0_136, %c0_137] : memref<2x1x32xf32, #tpu.memory_space<vmem>>, vector<1x1x32xf32>
    %341 = vector.shape_cast %340 : vector<1x1x32xf32> to vector<1x32xf32>
    %342 = arith.mulf %339, %339 : vector<16x32xf32>
    %cst_138 = arith.constant dense<0.000000e+00> : vector<16xf32>
    %343 = vector.multi_reduction <add>, %342, %cst_138 [1] : vector<16x32xf32> to vector<16xf32>
    %344 = vector.shape_cast %343 : vector<16xf32> to vector<16x1xf32>
    %cst_139 = arith.constant 3.200000e+01 : f32
    %345 = vector.broadcast %cst_139 : f32 to vector<16x1xf32>
    %346 = arith.divf %344, %345 : vector<16x1xf32>
    %cst_140 = arith.constant 9.99999997E-7 : f32
    %347 = vector.broadcast %cst_140 : f32 to vector<16x1xf32>
    %348 = arith.addf %346, %347 : vector<16x1xf32>
    %349 = math.rsqrt %348 : vector<16x1xf32>
    %350 = vector.broadcast %349 : vector<16x1xf32> to vector<16x32xf32>
    %351 = arith.mulf %339, %350 : vector<16x32xf32>
    %352 = vector.broadcast %341 : vector<1x32xf32> to vector<16x32xf32>
    %353 = arith.mulf %351, %352 : vector<16x32xf32>
    %c1_141 = arith.constant 1 : index
    %c0_142 = arith.constant 0 : index
    %c0_143 = arith.constant 0 : index
    %c0_144 = arith.constant 0 : index
    %354 = vector.load %arg6[%c1_141, %c0_142, %c0_143, %c0_144] : memref<2x4x32x8xf32, #tpu.memory_space<vmem>>, vector<1x4x32x8xf32>
    %355 = vector.shape_cast %354 : vector<1x4x32x8xf32> to vector<4x32x8xf32>
    %c1_145 = arith.constant 1 : index
    %c0_146 = arith.constant 0 : index
    %c0_147 = arith.constant 0 : index
    %c0_148 = arith.constant 0 : index
    %356 = vector.load %arg7[%c1_145, %c0_146, %c0_147, %c0_148] : memref<2x4x32x8xf32, #tpu.memory_space<vmem>>, vector<1x4x32x8xf32>
    %357 = vector.shape_cast %356 : vector<1x4x32x8xf32> to vector<4x32x8xf32>
    %c1_149 = arith.constant 1 : index
    %c0_150 = arith.constant 0 : index
    %c0_151 = arith.constant 0 : index
    %c0_152 = arith.constant 0 : index
    %358 = vector.load %arg8[%c1_149, %c0_150, %c0_151, %c0_152] : memref<2x4x32x8xf32, #tpu.memory_space<vmem>>, vector<1x4x32x8xf32>
    %359 = vector.shape_cast %358 : vector<1x4x32x8xf32> to vector<4x32x8xf32>
    %c1_153 = arith.constant 1 : index
    %c0_154 = arith.constant 0 : index
    %c0_155 = arith.constant 0 : index
    %c0_156 = arith.constant 0 : index
    %360 = vector.load %arg9[%c1_153, %c0_154, %c0_155, %c0_156] : memref<2x4x8x32xf32, #tpu.memory_space<vmem>>, vector<1x4x8x32xf32>
    %361 = vector.shape_cast %360 : vector<1x4x8x32xf32> to vector<4x8x32xf32>
    %cst_157 = arith.constant 0.000000e+00 : f32
    %362 = vector.broadcast %cst_157 : f32 to vector<16x32xf32>
    %363 = vector.extract_strided_slice %355 {offsets = [0, 0, 0], sizes = [1, 32, 8], strides = [1, 1, 1]} : vector<4x32x8xf32> to vector<1x32x8xf32>
    %364 = vector.shape_cast %363 : vector<1x32x8xf32> to vector<32x8xf32>
    %cst_158 = arith.constant dense<0.000000e+00> : vector<16x8xf32>
    %365 = tpu.matmul %353, %364, %cst_158 {dimension_numbers = #tpu.dot_dimension_numbers<[1], [0], [0], [1], [0, 0, 1, 1], [], []>} : vector<16x32xf32>, vector<32x8xf32>, vector<16x8xf32> -> vector<16x8xf32>
    %366 = vector.shape_cast %365 : vector<16x8xf32> to vector<2x8x8xf32>
    %367 = vector.extract_strided_slice %357 {offsets = [0, 0, 0], sizes = [1, 32, 8], strides = [1, 1, 1]} : vector<4x32x8xf32> to vector<1x32x8xf32>
    %368 = vector.shape_cast %367 : vector<1x32x8xf32> to vector<32x8xf32>
    %cst_159 = arith.constant dense<0.000000e+00> : vector<16x8xf32>
    %369 = tpu.matmul %353, %368, %cst_159 {dimension_numbers = #tpu.dot_dimension_numbers<[1], [0], [0], [1], [0, 0, 1, 1], [], []>} : vector<16x32xf32>, vector<32x8xf32>, vector<16x8xf32> -> vector<16x8xf32>
    %370 = vector.shape_cast %369 : vector<16x8xf32> to vector<2x8x8xf32>
    %371 = vector.extract_strided_slice %359 {offsets = [0, 0, 0], sizes = [1, 32, 8], strides = [1, 1, 1]} : vector<4x32x8xf32> to vector<1x32x8xf32>
    %372 = vector.shape_cast %371 : vector<1x32x8xf32> to vector<32x8xf32>
    %cst_160 = arith.constant dense<0.000000e+00> : vector<16x8xf32>
    %373 = tpu.matmul %353, %372, %cst_160 {dimension_numbers = #tpu.dot_dimension_numbers<[1], [0], [0], [1], [0, 0, 1, 1], [], []>} : vector<16x32xf32>, vector<32x8xf32>, vector<16x8xf32> -> vector<16x8xf32>
    %374 = vector.shape_cast %373 : vector<16x8xf32> to vector<2x8x8xf32>
    "tpu.trace_start"() <{level = 10 : i32, message = "bqd,bkd->bqk"}> : () -> ()
    %cst_161 = arith.constant dense<0.000000e+00> : vector<2x8x8xf32>
    %375 = tpu.matmul %366, %370, %cst_161 {dimension_numbers = #tpu.dot_dimension_numbers<[2], [2], [1], [1], [0, 0, 0, 1, 1, 1], [0], [0]>} : vector<2x8x8xf32>, vector<2x8x8xf32>, vector<2x8x8xf32> -> vector<2x8x8xf32>
    "tpu.trace_stop"() : () -> ()
    %376 = vector.extract_strided_slice %2 {offsets = [0, 0, 0], sizes = [1, 8, 8], strides = [1, 1, 1]} : vector<4x8x8xf32> to vector<1x8x8xf32>
    %377 = vector.shape_cast %376 : vector<1x8x8xf32> to vector<8x8xf32>
    %378 = vector.shape_cast %377 : vector<8x8xf32> to vector<1x8x8xf32>
    %379 = vector.broadcast %378 : vector<1x8x8xf32> to vector<2x8x8xf32>
    %380 = arith.addf %375, %379 : vector<2x8x8xf32>
    %381 = arith.addf %380, %3 : vector<2x8x8xf32>
    %cst_162 = arith.constant dense<0xFF800000> : vector<2x8xf32>
    %382 = vector.multi_reduction <maximumf>, %381, %cst_162 [2] : vector<2x8x8xf32> to vector<2x8xf32>
    %383 = vector.shape_cast %382 : vector<2x8xf32> to vector<2x8x1xf32>
    %384 = vector.broadcast %383 : vector<2x8x1xf32> to vector<2x8x8xf32>
    %385 = arith.subf %381, %384 : vector<2x8x8xf32>
    %386 = math.exp %385 : vector<2x8x8xf32>
    %cst_163 = arith.constant dense<0.000000e+00> : vector<2x8xf32>
    %387 = vector.multi_reduction <add>, %386, %cst_163 [2] : vector<2x8x8xf32> to vector<2x8xf32>
    %388 = vector.shape_cast %387 : vector<2x8xf32> to vector<2x8x1xf32>
    %389 = tpu.reciprocal %388 {approx = true} : vector<2x8x1xf32> -> vector<2x8x1xf32>
    %390 = vector.broadcast %389 : vector<2x8x1xf32> to vector<2x8x8xf32>
    %391 = arith.mulf %386, %390 : vector<2x8x8xf32>
    "tpu.trace_start"() <{level = 10 : i32, message = "bqk,bkd->bqd"}> : () -> ()
    %cst_164 = arith.constant dense<0.000000e+00> : vector<2x8x8xf32>
    %392 = tpu.matmul %391, %374, %cst_164 {dimension_numbers = #tpu.dot_dimension_numbers<[2], [1], [1], [2], [0, 0, 0, 1, 1, 2], [0], [0]>} : vector<2x8x8xf32>, vector<2x8x8xf32>, vector<2x8x8xf32> -> vector<2x8x8xf32>
    "tpu.trace_stop"() : () -> ()
    %393 = vector.shape_cast %392 : vector<2x8x8xf32> to vector<16x8xf32>
    %394 = vector.extract_strided_slice %361 {offsets = [0, 0, 0], sizes = [1, 8, 32], strides = [1, 1, 1]} : vector<4x8x32xf32> to vector<1x8x32xf32>
    %395 = vector.shape_cast %394 : vector<1x8x32xf32> to vector<8x32xf32>
    %cst_165 = arith.constant dense<0.000000e+00> : vector<16x32xf32>
    %396 = tpu.matmul %393, %395, %cst_165 {dimension_numbers = #tpu.dot_dimension_numbers<[1], [0], [0], [1], [0, 0, 1, 1], [], []>} : vector<16x8xf32>, vector<8x32xf32>, vector<16x32xf32> -> vector<16x32xf32>
    %397 = arith.addf %362, %396 : vector<16x32xf32>
    %398 = vector.extract_strided_slice %355 {offsets = [1, 0, 0], sizes = [1, 32, 8], strides = [1, 1, 1]} : vector<4x32x8xf32> to vector<1x32x8xf32>
    %399 = vector.shape_cast %398 : vector<1x32x8xf32> to vector<32x8xf32>
    %cst_166 = arith.constant dense<0.000000e+00> : vector<16x8xf32>
    %400 = tpu.matmul %353, %399, %cst_166 {dimension_numbers = #tpu.dot_dimension_numbers<[1], [0], [0], [1], [0, 0, 1, 1], [], []>} : vector<16x32xf32>, vector<32x8xf32>, vector<16x8xf32> -> vector<16x8xf32>
    %401 = vector.shape_cast %400 : vector<16x8xf32> to vector<2x8x8xf32>
    %402 = vector.extract_strided_slice %357 {offsets = [1, 0, 0], sizes = [1, 32, 8], strides = [1, 1, 1]} : vector<4x32x8xf32> to vector<1x32x8xf32>
    %403 = vector.shape_cast %402 : vector<1x32x8xf32> to vector<32x8xf32>
    %cst_167 = arith.constant dense<0.000000e+00> : vector<16x8xf32>
    %404 = tpu.matmul %353, %403, %cst_167 {dimension_numbers = #tpu.dot_dimension_numbers<[1], [0], [0], [1], [0, 0, 1, 1], [], []>} : vector<16x32xf32>, vector<32x8xf32>, vector<16x8xf32> -> vector<16x8xf32>
    %405 = vector.shape_cast %404 : vector<16x8xf32> to vector<2x8x8xf32>
    %406 = vector.extract_strided_slice %359 {offsets = [1, 0, 0], sizes = [1, 32, 8], strides = [1, 1, 1]} : vector<4x32x8xf32> to vector<1x32x8xf32>
    %407 = vector.shape_cast %406 : vector<1x32x8xf32> to vector<32x8xf32>
    %cst_168 = arith.constant dense<0.000000e+00> : vector<16x8xf32>
    %408 = tpu.matmul %353, %407, %cst_168 {dimension_numbers = #tpu.dot_dimension_numbers<[1], [0], [0], [1], [0, 0, 1, 1], [], []>} : vector<16x32xf32>, vector<32x8xf32>, vector<16x8xf32> -> vector<16x8xf32>
    %409 = vector.shape_cast %408 : vector<16x8xf32> to vector<2x8x8xf32>
    "tpu.trace_start"() <{level = 10 : i32, message = "bqd,bkd->bqk"}> : () -> ()
    %cst_169 = arith.constant dense<0.000000e+00> : vector<2x8x8xf32>
    %410 = tpu.matmul %401, %405, %cst_169 {dimension_numbers = #tpu.dot_dimension_numbers<[2], [2], [1], [1], [0, 0, 0, 1, 1, 1], [0], [0]>} : vector<2x8x8xf32>, vector<2x8x8xf32>, vector<2x8x8xf32> -> vector<2x8x8xf32>
    "tpu.trace_stop"() : () -> ()
    %411 = vector.extract_strided_slice %2 {offsets = [1, 0, 0], sizes = [1, 8, 8], strides = [1, 1, 1]} : vector<4x8x8xf32> to vector<1x8x8xf32>
    %412 = vector.shape_cast %411 : vector<1x8x8xf32> to vector<8x8xf32>
    %413 = vector.shape_cast %412 : vector<8x8xf32> to vector<1x8x8xf32>
    %414 = vector.broadcast %413 : vector<1x8x8xf32> to vector<2x8x8xf32>
    %415 = arith.addf %410, %414 : vector<2x8x8xf32>
    %416 = arith.addf %415, %3 : vector<2x8x8xf32>
    %cst_170 = arith.constant dense<0xFF800000> : vector<2x8xf32>
    %417 = vector.multi_reduction <maximumf>, %416, %cst_170 [2] : vector<2x8x8xf32> to vector<2x8xf32>
    %418 = vector.shape_cast %417 : vector<2x8xf32> to vector<2x8x1xf32>
    %419 = vector.broadcast %418 : vector<2x8x1xf32> to vector<2x8x8xf32>
    %420 = arith.subf %416, %419 : vector<2x8x8xf32>
    %421 = math.exp %420 : vector<2x8x8xf32>
    %cst_171 = arith.constant dense<0.000000e+00> : vector<2x8xf32>
    %422 = vector.multi_reduction <add>, %421, %cst_171 [2] : vector<2x8x8xf32> to vector<2x8xf32>
    %423 = vector.shape_cast %422 : vector<2x8xf32> to vector<2x8x1xf32>
    %424 = tpu.reciprocal %423 {approx = true} : vector<2x8x1xf32> -> vector<2x8x1xf32>
    %425 = vector.broadcast %424 : vector<2x8x1xf32> to vector<2x8x8xf32>
    %426 = arith.mulf %421, %425 : vector<2x8x8xf32>
    "tpu.trace_start"() <{level = 10 : i32, message = "bqk,bkd->bqd"}> : () -> ()
    %cst_172 = arith.constant dense<0.000000e+00> : vector<2x8x8xf32>
    %427 = tpu.matmul %426, %409, %cst_172 {dimension_numbers = #tpu.dot_dimension_numbers<[2], [1], [1], [2], [0, 0, 0, 1, 1, 2], [0], [0]>} : vector<2x8x8xf32>, vector<2x8x8xf32>, vector<2x8x8xf32> -> vector<2x8x8xf32>
    "tpu.trace_stop"() : () -> ()
    %428 = vector.shape_cast %427 : vector<2x8x8xf32> to vector<16x8xf32>
    %429 = vector.extract_strided_slice %361 {offsets = [1, 0, 0], sizes = [1, 8, 32], strides = [1, 1, 1]} : vector<4x8x32xf32> to vector<1x8x32xf32>
    %430 = vector.shape_cast %429 : vector<1x8x32xf32> to vector<8x32xf32>
    %cst_173 = arith.constant dense<0.000000e+00> : vector<16x32xf32>
    %431 = tpu.matmul %428, %430, %cst_173 {dimension_numbers = #tpu.dot_dimension_numbers<[1], [0], [0], [1], [0, 0, 1, 1], [], []>} : vector<16x8xf32>, vector<8x32xf32>, vector<16x32xf32> -> vector<16x32xf32>
    %432 = arith.addf %397, %431 : vector<16x32xf32>
    %433 = vector.extract_strided_slice %355 {offsets = [2, 0, 0], sizes = [1, 32, 8], strides = [1, 1, 1]} : vector<4x32x8xf32> to vector<1x32x8xf32>
    %434 = vector.shape_cast %433 : vector<1x32x8xf32> to vector<32x8xf32>
    %cst_174 = arith.constant dense<0.000000e+00> : vector<16x8xf32>
    %435 = tpu.matmul %353, %434, %cst_174 {dimension_numbers = #tpu.dot_dimension_numbers<[1], [0], [0], [1], [0, 0, 1, 1], [], []>} : vector<16x32xf32>, vector<32x8xf32>, vector<16x8xf32> -> vector<16x8xf32>
    %436 = vector.shape_cast %435 : vector<16x8xf32> to vector<2x8x8xf32>
    %437 = vector.extract_strided_slice %357 {offsets = [2, 0, 0], sizes = [1, 32, 8], strides = [1, 1, 1]} : vector<4x32x8xf32> to vector<1x32x8xf32>
    %438 = vector.shape_cast %437 : vector<1x32x8xf32> to vector<32x8xf32>
    %cst_175 = arith.constant dense<0.000000e+00> : vector<16x8xf32>
    %439 = tpu.matmul %353, %438, %cst_175 {dimension_numbers = #tpu.dot_dimension_numbers<[1], [0], [0], [1], [0, 0, 1, 1], [], []>} : vector<16x32xf32>, vector<32x8xf32>, vector<16x8xf32> -> vector<16x8xf32>
    %440 = vector.shape_cast %439 : vector<16x8xf32> to vector<2x8x8xf32>
    %441 = vector.extract_strided_slice %359 {offsets = [2, 0, 0], sizes = [1, 32, 8], strides = [1, 1, 1]} : vector<4x32x8xf32> to vector<1x32x8xf32>
    %442 = vector.shape_cast %441 : vector<1x32x8xf32> to vector<32x8xf32>
    %cst_176 = arith.constant dense<0.000000e+00> : vector<16x8xf32>
    %443 = tpu.matmul %353, %442, %cst_176 {dimension_numbers = #tpu.dot_dimension_numbers<[1], [0], [0], [1], [0, 0, 1, 1], [], []>} : vector<16x32xf32>, vector<32x8xf32>, vector<16x8xf32> -> vector<16x8xf32>
    %444 = vector.shape_cast %443 : vector<16x8xf32> to vector<2x8x8xf32>
    "tpu.trace_start"() <{level = 10 : i32, message = "bqd,bkd->bqk"}> : () -> ()
    %cst_177 = arith.constant dense<0.000000e+00> : vector<2x8x8xf32>
    %445 = tpu.matmul %436, %440, %cst_177 {dimension_numbers = #tpu.dot_dimension_numbers<[2], [2], [1], [1], [0, 0, 0, 1, 1, 1], [0], [0]>} : vector<2x8x8xf32>, vector<2x8x8xf32>, vector<2x8x8xf32> -> vector<2x8x8xf32>
    "tpu.trace_stop"() : () -> ()
    %446 = vector.extract_strided_slice %2 {offsets = [2, 0, 0], sizes = [1, 8, 8], strides = [1, 1, 1]} : vector<4x8x8xf32> to vector<1x8x8xf32>
    %447 = vector.shape_cast %446 : vector<1x8x8xf32> to vector<8x8xf32>
    %448 = vector.shape_cast %447 : vector<8x8xf32> to vector<1x8x8xf32>
    %449 = vector.broadcast %448 : vector<1x8x8xf32> to vector<2x8x8xf32>
    %450 = arith.addf %445, %449 : vector<2x8x8xf32>
    %451 = arith.addf %450, %3 : vector<2x8x8xf32>
    %cst_178 = arith.constant dense<0xFF800000> : vector<2x8xf32>
    %452 = vector.multi_reduction <maximumf>, %451, %cst_178 [2] : vector<2x8x8xf32> to vector<2x8xf32>
    %453 = vector.shape_cast %452 : vector<2x8xf32> to vector<2x8x1xf32>
    %454 = vector.broadcast %453 : vector<2x8x1xf32> to vector<2x8x8xf32>
    %455 = arith.subf %451, %454 : vector<2x8x8xf32>
    %456 = math.exp %455 : vector<2x8x8xf32>
    %cst_179 = arith.constant dense<0.000000e+00> : vector<2x8xf32>
    %457 = vector.multi_reduction <add>, %456, %cst_179 [2] : vector<2x8x8xf32> to vector<2x8xf32>
    %458 = vector.shape_cast %457 : vector<2x8xf32> to vector<2x8x1xf32>
    %459 = tpu.reciprocal %458 {approx = true} : vector<2x8x1xf32> -> vector<2x8x1xf32>
    %460 = vector.broadcast %459 : vector<2x8x1xf32> to vector<2x8x8xf32>
    %461 = arith.mulf %456, %460 : vector<2x8x8xf32>
    "tpu.trace_start"() <{level = 10 : i32, message = "bqk,bkd->bqd"}> : () -> ()
    %cst_180 = arith.constant dense<0.000000e+00> : vector<2x8x8xf32>
    %462 = tpu.matmul %461, %444, %cst_180 {dimension_numbers = #tpu.dot_dimension_numbers<[2], [1], [1], [2], [0, 0, 0, 1, 1, 2], [0], [0]>} : vector<2x8x8xf32>, vector<2x8x8xf32>, vector<2x8x8xf32> -> vector<2x8x8xf32>
    "tpu.trace_stop"() : () -> ()
    %463 = vector.shape_cast %462 : vector<2x8x8xf32> to vector<16x8xf32>
    %464 = vector.extract_strided_slice %361 {offsets = [2, 0, 0], sizes = [1, 8, 32], strides = [1, 1, 1]} : vector<4x8x32xf32> to vector<1x8x32xf32>
    %465 = vector.shape_cast %464 : vector<1x8x32xf32> to vector<8x32xf32>
    %cst_181 = arith.constant dense<0.000000e+00> : vector<16x32xf32>
    %466 = tpu.matmul %463, %465, %cst_181 {dimension_numbers = #tpu.dot_dimension_numbers<[1], [0], [0], [1], [0, 0, 1, 1], [], []>} : vector<16x8xf32>, vector<8x32xf32>, vector<16x32xf32> -> vector<16x32xf32>
    %467 = arith.addf %432, %466 : vector<16x32xf32>
    %468 = vector.extract_strided_slice %355 {offsets = [3, 0, 0], sizes = [1, 32, 8], strides = [1, 1, 1]} : vector<4x32x8xf32> to vector<1x32x8xf32>
    %469 = vector.shape_cast %468 : vector<1x32x8xf32> to vector<32x8xf32>
    %cst_182 = arith.constant dense<0.000000e+00> : vector<16x8xf32>
    %470 = tpu.matmul %353, %469, %cst_182 {dimension_numbers = #tpu.dot_dimension_numbers<[1], [0], [0], [1], [0, 0, 1, 1], [], []>} : vector<16x32xf32>, vector<32x8xf32>, vector<16x8xf32> -> vector<16x8xf32>
    %471 = vector.shape_cast %470 : vector<16x8xf32> to vector<2x8x8xf32>
    %472 = vector.extract_strided_slice %357 {offsets = [3, 0, 0], sizes = [1, 32, 8], strides = [1, 1, 1]} : vector<4x32x8xf32> to vector<1x32x8xf32>
    %473 = vector.shape_cast %472 : vector<1x32x8xf32> to vector<32x8xf32>
    %cst_183 = arith.constant dense<0.000000e+00> : vector<16x8xf32>
    %474 = tpu.matmul %353, %473, %cst_183 {dimension_numbers = #tpu.dot_dimension_numbers<[1], [0], [0], [1], [0, 0, 1, 1], [], []>} : vector<16x32xf32>, vector<32x8xf32>, vector<16x8xf32> -> vector<16x8xf32>
    %475 = vector.shape_cast %474 : vector<16x8xf32> to vector<2x8x8xf32>
    %476 = vector.extract_strided_slice %359 {offsets = [3, 0, 0], sizes = [1, 32, 8], strides = [1, 1, 1]} : vector<4x32x8xf32> to vector<1x32x8xf32>
    %477 = vector.shape_cast %476 : vector<1x32x8xf32> to vector<32x8xf32>
    %cst_184 = arith.constant dense<0.000000e+00> : vector<16x8xf32>
    %478 = tpu.matmul %353, %477, %cst_184 {dimension_numbers = #tpu.dot_dimension_numbers<[1], [0], [0], [1], [0, 0, 1, 1], [], []>} : vector<16x32xf32>, vector<32x8xf32>, vector<16x8xf32> -> vector<16x8xf32>
    %479 = vector.shape_cast %478 : vector<16x8xf32> to vector<2x8x8xf32>
    "tpu.trace_start"() <{level = 10 : i32, message = "bqd,bkd->bqk"}> : () -> ()
    %cst_185 = arith.constant dense<0.000000e+00> : vector<2x8x8xf32>
    %480 = tpu.matmul %471, %475, %cst_185 {dimension_numbers = #tpu.dot_dimension_numbers<[2], [2], [1], [1], [0, 0, 0, 1, 1, 1], [0], [0]>} : vector<2x8x8xf32>, vector<2x8x8xf32>, vector<2x8x8xf32> -> vector<2x8x8xf32>
    "tpu.trace_stop"() : () -> ()
    %481 = vector.extract_strided_slice %2 {offsets = [3, 0, 0], sizes = [1, 8, 8], strides = [1, 1, 1]} : vector<4x8x8xf32> to vector<1x8x8xf32>
    %482 = vector.shape_cast %481 : vector<1x8x8xf32> to vector<8x8xf32>
    %483 = vector.shape_cast %482 : vector<8x8xf32> to vector<1x8x8xf32>
    %484 = vector.broadcast %483 : vector<1x8x8xf32> to vector<2x8x8xf32>
    %485 = arith.addf %480, %484 : vector<2x8x8xf32>
    %486 = arith.addf %485, %3 : vector<2x8x8xf32>
    %cst_186 = arith.constant dense<0xFF800000> : vector<2x8xf32>
    %487 = vector.multi_reduction <maximumf>, %486, %cst_186 [2] : vector<2x8x8xf32> to vector<2x8xf32>
    %488 = vector.shape_cast %487 : vector<2x8xf32> to vector<2x8x1xf32>
    %489 = vector.broadcast %488 : vector<2x8x1xf32> to vector<2x8x8xf32>
    %490 = arith.subf %486, %489 : vector<2x8x8xf32>
    %491 = math.exp %490 : vector<2x8x8xf32>
    %cst_187 = arith.constant dense<0.000000e+00> : vector<2x8xf32>
    %492 = vector.multi_reduction <add>, %491, %cst_187 [2] : vector<2x8x8xf32> to vector<2x8xf32>
    %493 = vector.shape_cast %492 : vector<2x8xf32> to vector<2x8x1xf32>
    %494 = tpu.reciprocal %493 {approx = true} : vector<2x8x1xf32> -> vector<2x8x1xf32>
    %495 = vector.broadcast %494 : vector<2x8x1xf32> to vector<2x8x8xf32>
    %496 = arith.mulf %491, %495 : vector<2x8x8xf32>
    "tpu.trace_start"() <{level = 10 : i32, message = "bqk,bkd->bqd"}> : () -> ()
    %cst_188 = arith.constant dense<0.000000e+00> : vector<2x8x8xf32>
    %497 = tpu.matmul %496, %479, %cst_188 {dimension_numbers = #tpu.dot_dimension_numbers<[2], [1], [1], [2], [0, 0, 0, 1, 1, 2], [0], [0]>} : vector<2x8x8xf32>, vector<2x8x8xf32>, vector<2x8x8xf32> -> vector<2x8x8xf32>
    "tpu.trace_stop"() : () -> ()
    %498 = vector.shape_cast %497 : vector<2x8x8xf32> to vector<16x8xf32>
    %499 = vector.extract_strided_slice %361 {offsets = [3, 0, 0], sizes = [1, 8, 32], strides = [1, 1, 1]} : vector<4x8x32xf32> to vector<1x8x32xf32>
    %500 = vector.shape_cast %499 : vector<1x8x32xf32> to vector<8x32xf32>
    %cst_189 = arith.constant dense<0.000000e+00> : vector<16x32xf32>
    %501 = tpu.matmul %498, %500, %cst_189 {dimension_numbers = #tpu.dot_dimension_numbers<[1], [0], [0], [1], [0, 0, 1, 1], [], []>} : vector<16x8xf32>, vector<8x32xf32>, vector<16x32xf32> -> vector<16x32xf32>
    %502 = arith.addf %467, %501 : vector<16x32xf32>
    %503 = arith.addf %339, %502 : vector<16x32xf32>
    %c1_190 = arith.constant 1 : index
    %c0_191 = arith.constant 0 : index
    %c0_192 = arith.constant 0 : index
    %504 = vector.load %arg10[%c1_190, %c0_191, %c0_192] : memref<2x1x32xf32, #tpu.memory_space<vmem>>, vector<1x1x32xf32>
    %505 = vector.shape_cast %504 : vector<1x1x32xf32> to vector<1x32xf32>
    %506 = arith.mulf %503, %503 : vector<16x32xf32>
    %cst_193 = arith.constant dense<0.000000e+00> : vector<16xf32>
    %507 = vector.multi_reduction <add>, %506, %cst_193 [1] : vector<16x32xf32> to vector<16xf32>
    %508 = vector.shape_cast %507 : vector<16xf32> to vector<16x1xf32>
    %cst_194 = arith.constant 3.200000e+01 : f32
    %509 = vector.broadcast %cst_194 : f32 to vector<16x1xf32>
    %510 = arith.divf %508, %509 : vector<16x1xf32>
    %cst_195 = arith.constant 9.99999997E-7 : f32
    %511 = vector.broadcast %cst_195 : f32 to vector<16x1xf32>
    %512 = arith.addf %510, %511 : vector<16x1xf32>
    %513 = math.rsqrt %512 : vector<16x1xf32>
    %514 = vector.broadcast %513 : vector<16x1xf32> to vector<16x32xf32>
    %515 = arith.mulf %503, %514 : vector<16x32xf32>
    %516 = vector.broadcast %505 : vector<1x32xf32> to vector<16x32xf32>
    %517 = arith.mulf %515, %516 : vector<16x32xf32>
    %c1_196 = arith.constant 1 : index
    %c0_197 = arith.constant 0 : index
    %c0_198 = arith.constant 0 : index
    %c0_199 = arith.constant 0 : index
    %518 = vector.load %arg11[%c1_196, %c0_197, %c0_198, %c0_199] : memref<2x4x32x8xf32, #tpu.memory_space<vmem>>, vector<1x4x32x8xf32>
    %519 = vector.shape_cast %518 : vector<1x4x32x8xf32> to vector<4x32x8xf32>
    %c1_200 = arith.constant 1 : index
    %c0_201 = arith.constant 0 : index
    %c0_202 = arith.constant 0 : index
    %c0_203 = arith.constant 0 : index
    %520 = vector.load %arg12[%c1_200, %c0_201, %c0_202, %c0_203] : memref<2x4x32x8xf32, #tpu.memory_space<vmem>>, vector<1x4x32x8xf32>
    %521 = vector.shape_cast %520 : vector<1x4x32x8xf32> to vector<4x32x8xf32>
    %c1_204 = arith.constant 1 : index
    %c0_205 = arith.constant 0 : index
    %c0_206 = arith.constant 0 : index
    %c0_207 = arith.constant 0 : index
    %522 = vector.load %arg13[%c1_204, %c0_205, %c0_206, %c0_207] : memref<2x4x32x8xf32, #tpu.memory_space<vmem>>, vector<1x4x32x8xf32>
    %523 = vector.shape_cast %522 : vector<1x4x32x8xf32> to vector<4x32x8xf32>
    %c1_208 = arith.constant 1 : index
    %c0_209 = arith.constant 0 : index
    %c0_210 = arith.constant 0 : index
    %c0_211 = arith.constant 0 : index
    %524 = vector.load %arg14[%c1_208, %c0_209, %c0_210, %c0_211] : memref<2x4x8x32xf32, #tpu.memory_space<vmem>>, vector<1x4x8x32xf32>
    %525 = vector.shape_cast %524 : vector<1x4x8x32xf32> to vector<4x8x32xf32>
    %cst_212 = arith.constant 0.000000e+00 : f32
    %526 = vector.broadcast %cst_212 : f32 to vector<16x32xf32>
    %527 = vector.extract_strided_slice %519 {offsets = [0, 0, 0], sizes = [1, 32, 8], strides = [1, 1, 1]} : vector<4x32x8xf32> to vector<1x32x8xf32>
    %528 = vector.shape_cast %527 : vector<1x32x8xf32> to vector<32x8xf32>
    %cst_213 = arith.constant dense<0.000000e+00> : vector<16x8xf32>
    %529 = tpu.matmul %517, %528, %cst_213 {dimension_numbers = #tpu.dot_dimension_numbers<[1], [0], [0], [1], [0, 0, 1, 1], [], []>} : vector<16x32xf32>, vector<32x8xf32>, vector<16x8xf32> -> vector<16x8xf32>
    %530 = vector.shape_cast %529 : vector<16x8xf32> to vector<2x8x8xf32>
    %531 = vector.extract_strided_slice %521 {offsets = [0, 0, 0], sizes = [1, 32, 8], strides = [1, 1, 1]} : vector<4x32x8xf32> to vector<1x32x8xf32>
    %532 = vector.shape_cast %531 : vector<1x32x8xf32> to vector<32x8xf32>
    %cst_214 = arith.constant dense<0.000000e+00> : vector<16x8xf32>
    %533 = tpu.matmul %1, %532, %cst_214 {dimension_numbers = #tpu.dot_dimension_numbers<[1], [0], [0], [1], [0, 0, 1, 1], [], []>} : vector<16x32xf32>, vector<32x8xf32>, vector<16x8xf32> -> vector<16x8xf32>
    %534 = vector.shape_cast %533 : vector<16x8xf32> to vector<2x8x8xf32>
    %535 = vector.extract_strided_slice %523 {offsets = [0, 0, 0], sizes = [1, 32, 8], strides = [1, 1, 1]} : vector<4x32x8xf32> to vector<1x32x8xf32>
    %536 = vector.shape_cast %535 : vector<1x32x8xf32> to vector<32x8xf32>
    %cst_215 = arith.constant dense<0.000000e+00> : vector<16x8xf32>
    %537 = tpu.matmul %1, %536, %cst_215 {dimension_numbers = #tpu.dot_dimension_numbers<[1], [0], [0], [1], [0, 0, 1, 1], [], []>} : vector<16x32xf32>, vector<32x8xf32>, vector<16x8xf32> -> vector<16x8xf32>
    %538 = vector.shape_cast %537 : vector<16x8xf32> to vector<2x8x8xf32>
    "tpu.trace_start"() <{level = 10 : i32, message = "bqd,bkd->bqk"}> : () -> ()
    %cst_216 = arith.constant dense<0.000000e+00> : vector<2x8x8xf32>
    %539 = tpu.matmul %530, %534, %cst_216 {dimension_numbers = #tpu.dot_dimension_numbers<[2], [2], [1], [1], [0, 0, 0, 1, 1, 1], [0], [0]>} : vector<2x8x8xf32>, vector<2x8x8xf32>, vector<2x8x8xf32> -> vector<2x8x8xf32>
    "tpu.trace_stop"() : () -> ()
    %540 = vector.broadcast %4 : vector<2x1x8xf32> to vector<2x8x8xf32>
    %541 = arith.addf %539, %540 : vector<2x8x8xf32>
    %cst_217 = arith.constant dense<0xFF800000> : vector<2x8xf32>
    %542 = vector.multi_reduction <maximumf>, %541, %cst_217 [2] : vector<2x8x8xf32> to vector<2x8xf32>
    %543 = vector.shape_cast %542 : vector<2x8xf32> to vector<2x8x1xf32>
    %544 = vector.broadcast %543 : vector<2x8x1xf32> to vector<2x8x8xf32>
    %545 = arith.subf %541, %544 : vector<2x8x8xf32>
    %546 = math.exp %545 : vector<2x8x8xf32>
    %cst_218 = arith.constant dense<0.000000e+00> : vector<2x8xf32>
    %547 = vector.multi_reduction <add>, %546, %cst_218 [2] : vector<2x8x8xf32> to vector<2x8xf32>
    %548 = vector.shape_cast %547 : vector<2x8xf32> to vector<2x8x1xf32>
    %549 = tpu.reciprocal %548 {approx = true} : vector<2x8x1xf32> -> vector<2x8x1xf32>
    %550 = vector.broadcast %549 : vector<2x8x1xf32> to vector<2x8x8xf32>
    %551 = arith.mulf %546, %550 : vector<2x8x8xf32>
    "tpu.trace_start"() <{level = 10 : i32, message = "bqk,bkd->bqd"}> : () -> ()
    %cst_219 = arith.constant dense<0.000000e+00> : vector<2x8x8xf32>
    %552 = tpu.matmul %551, %538, %cst_219 {dimension_numbers = #tpu.dot_dimension_numbers<[2], [1], [1], [2], [0, 0, 0, 1, 1, 2], [0], [0]>} : vector<2x8x8xf32>, vector<2x8x8xf32>, vector<2x8x8xf32> -> vector<2x8x8xf32>
    "tpu.trace_stop"() : () -> ()
    %553 = vector.shape_cast %552 : vector<2x8x8xf32> to vector<16x8xf32>
    %554 = vector.extract_strided_slice %525 {offsets = [0, 0, 0], sizes = [1, 8, 32], strides = [1, 1, 1]} : vector<4x8x32xf32> to vector<1x8x32xf32>
    %555 = vector.shape_cast %554 : vector<1x8x32xf32> to vector<8x32xf32>
    %cst_220 = arith.constant dense<0.000000e+00> : vector<16x32xf32>
    %556 = tpu.matmul %553, %555, %cst_220 {dimension_numbers = #tpu.dot_dimension_numbers<[1], [0], [0], [1], [0, 0, 1, 1], [], []>} : vector<16x8xf32>, vector<8x32xf32>, vector<16x32xf32> -> vector<16x32xf32>
    %557 = arith.addf %526, %556 : vector<16x32xf32>
    %558 = vector.extract_strided_slice %519 {offsets = [1, 0, 0], sizes = [1, 32, 8], strides = [1, 1, 1]} : vector<4x32x8xf32> to vector<1x32x8xf32>
    %559 = vector.shape_cast %558 : vector<1x32x8xf32> to vector<32x8xf32>
    %cst_221 = arith.constant dense<0.000000e+00> : vector<16x8xf32>
    %560 = tpu.matmul %517, %559, %cst_221 {dimension_numbers = #tpu.dot_dimension_numbers<[1], [0], [0], [1], [0, 0, 1, 1], [], []>} : vector<16x32xf32>, vector<32x8xf32>, vector<16x8xf32> -> vector<16x8xf32>
    %561 = vector.shape_cast %560 : vector<16x8xf32> to vector<2x8x8xf32>
    %562 = vector.extract_strided_slice %521 {offsets = [1, 0, 0], sizes = [1, 32, 8], strides = [1, 1, 1]} : vector<4x32x8xf32> to vector<1x32x8xf32>
    %563 = vector.shape_cast %562 : vector<1x32x8xf32> to vector<32x8xf32>
    %cst_222 = arith.constant dense<0.000000e+00> : vector<16x8xf32>
    %564 = tpu.matmul %1, %563, %cst_222 {dimension_numbers = #tpu.dot_dimension_numbers<[1], [0], [0], [1], [0, 0, 1, 1], [], []>} : vector<16x32xf32>, vector<32x8xf32>, vector<16x8xf32> -> vector<16x8xf32>
    %565 = vector.shape_cast %564 : vector<16x8xf32> to vector<2x8x8xf32>
    %566 = vector.extract_strided_slice %523 {offsets = [1, 0, 0], sizes = [1, 32, 8], strides = [1, 1, 1]} : vector<4x32x8xf32> to vector<1x32x8xf32>
    %567 = vector.shape_cast %566 : vector<1x32x8xf32> to vector<32x8xf32>
    %cst_223 = arith.constant dense<0.000000e+00> : vector<16x8xf32>
    %568 = tpu.matmul %1, %567, %cst_223 {dimension_numbers = #tpu.dot_dimension_numbers<[1], [0], [0], [1], [0, 0, 1, 1], [], []>} : vector<16x32xf32>, vector<32x8xf32>, vector<16x8xf32> -> vector<16x8xf32>
    %569 = vector.shape_cast %568 : vector<16x8xf32> to vector<2x8x8xf32>
    "tpu.trace_start"() <{level = 10 : i32, message = "bqd,bkd->bqk"}> : () -> ()
    %cst_224 = arith.constant dense<0.000000e+00> : vector<2x8x8xf32>
    %570 = tpu.matmul %561, %565, %cst_224 {dimension_numbers = #tpu.dot_dimension_numbers<[2], [2], [1], [1], [0, 0, 0, 1, 1, 1], [0], [0]>} : vector<2x8x8xf32>, vector<2x8x8xf32>, vector<2x8x8xf32> -> vector<2x8x8xf32>
    "tpu.trace_stop"() : () -> ()
    %571 = vector.broadcast %4 : vector<2x1x8xf32> to vector<2x8x8xf32>
    %572 = arith.addf %570, %571 : vector<2x8x8xf32>
    %cst_225 = arith.constant dense<0xFF800000> : vector<2x8xf32>
    %573 = vector.multi_reduction <maximumf>, %572, %cst_225 [2] : vector<2x8x8xf32> to vector<2x8xf32>
    %574 = vector.shape_cast %573 : vector<2x8xf32> to vector<2x8x1xf32>
    %575 = vector.broadcast %574 : vector<2x8x1xf32> to vector<2x8x8xf32>
    %576 = arith.subf %572, %575 : vector<2x8x8xf32>
    %577 = math.exp %576 : vector<2x8x8xf32>
    %cst_226 = arith.constant dense<0.000000e+00> : vector<2x8xf32>
    %578 = vector.multi_reduction <add>, %577, %cst_226 [2] : vector<2x8x8xf32> to vector<2x8xf32>
    %579 = vector.shape_cast %578 : vector<2x8xf32> to vector<2x8x1xf32>
    %580 = tpu.reciprocal %579 {approx = true} : vector<2x8x1xf32> -> vector<2x8x1xf32>
    %581 = vector.broadcast %580 : vector<2x8x1xf32> to vector<2x8x8xf32>
    %582 = arith.mulf %577, %581 : vector<2x8x8xf32>
    "tpu.trace_start"() <{level = 10 : i32, message = "bqk,bkd->bqd"}> : () -> ()
    %cst_227 = arith.constant dense<0.000000e+00> : vector<2x8x8xf32>
    %583 = tpu.matmul %582, %569, %cst_227 {dimension_numbers = #tpu.dot_dimension_numbers<[2], [1], [1], [2], [0, 0, 0, 1, 1, 2], [0], [0]>} : vector<2x8x8xf32>, vector<2x8x8xf32>, vector<2x8x8xf32> -> vector<2x8x8xf32>
    "tpu.trace_stop"() : () -> ()
    %584 = vector.shape_cast %583 : vector<2x8x8xf32> to vector<16x8xf32>
    %585 = vector.extract_strided_slice %525 {offsets = [1, 0, 0], sizes = [1, 8, 32], strides = [1, 1, 1]} : vector<4x8x32xf32> to vector<1x8x32xf32>
    %586 = vector.shape_cast %585 : vector<1x8x32xf32> to vector<8x32xf32>
    %cst_228 = arith.constant dense<0.000000e+00> : vector<16x32xf32>
    %587 = tpu.matmul %584, %586, %cst_228 {dimension_numbers = #tpu.dot_dimension_numbers<[1], [0], [0], [1], [0, 0, 1, 1], [], []>} : vector<16x8xf32>, vector<8x32xf32>, vector<16x32xf32> -> vector<16x32xf32>
    %588 = arith.addf %557, %587 : vector<16x32xf32>
    %589 = vector.extract_strided_slice %519 {offsets = [2, 0, 0], sizes = [1, 32, 8], strides = [1, 1, 1]} : vector<4x32x8xf32> to vector<1x32x8xf32>
    %590 = vector.shape_cast %589 : vector<1x32x8xf32> to vector<32x8xf32>
    %cst_229 = arith.constant dense<0.000000e+00> : vector<16x8xf32>
    %591 = tpu.matmul %517, %590, %cst_229 {dimension_numbers = #tpu.dot_dimension_numbers<[1], [0], [0], [1], [0, 0, 1, 1], [], []>} : vector<16x32xf32>, vector<32x8xf32>, vector<16x8xf32> -> vector<16x8xf32>
    %592 = vector.shape_cast %591 : vector<16x8xf32> to vector<2x8x8xf32>
    %593 = vector.extract_strided_slice %521 {offsets = [2, 0, 0], sizes = [1, 32, 8], strides = [1, 1, 1]} : vector<4x32x8xf32> to vector<1x32x8xf32>
    %594 = vector.shape_cast %593 : vector<1x32x8xf32> to vector<32x8xf32>
    %cst_230 = arith.constant dense<0.000000e+00> : vector<16x8xf32>
    %595 = tpu.matmul %1, %594, %cst_230 {dimension_numbers = #tpu.dot_dimension_numbers<[1], [0], [0], [1], [0, 0, 1, 1], [], []>} : vector<16x32xf32>, vector<32x8xf32>, vector<16x8xf32> -> vector<16x8xf32>
    %596 = vector.shape_cast %595 : vector<16x8xf32> to vector<2x8x8xf32>
    %597 = vector.extract_strided_slice %523 {offsets = [2, 0, 0], sizes = [1, 32, 8], strides = [1, 1, 1]} : vector<4x32x8xf32> to vector<1x32x8xf32>
    %598 = vector.shape_cast %597 : vector<1x32x8xf32> to vector<32x8xf32>
    %cst_231 = arith.constant dense<0.000000e+00> : vector<16x8xf32>
    %599 = tpu.matmul %1, %598, %cst_231 {dimension_numbers = #tpu.dot_dimension_numbers<[1], [0], [0], [1], [0, 0, 1, 1], [], []>} : vector<16x32xf32>, vector<32x8xf32>, vector<16x8xf32> -> vector<16x8xf32>
    %600 = vector.shape_cast %599 : vector<16x8xf32> to vector<2x8x8xf32>
    "tpu.trace_start"() <{level = 10 : i32, message = "bqd,bkd->bqk"}> : () -> ()
    %cst_232 = arith.constant dense<0.000000e+00> : vector<2x8x8xf32>
    %601 = tpu.matmul %592, %596, %cst_232 {dimension_numbers = #tpu.dot_dimension_numbers<[2], [2], [1], [1], [0, 0, 0, 1, 1, 1], [0], [0]>} : vector<2x8x8xf32>, vector<2x8x8xf32>, vector<2x8x8xf32> -> vector<2x8x8xf32>
    "tpu.trace_stop"() : () -> ()
    %602 = vector.broadcast %4 : vector<2x1x8xf32> to vector<2x8x8xf32>
    %603 = arith.addf %601, %602 : vector<2x8x8xf32>
    %cst_233 = arith.constant dense<0xFF800000> : vector<2x8xf32>
    %604 = vector.multi_reduction <maximumf>, %603, %cst_233 [2] : vector<2x8x8xf32> to vector<2x8xf32>
    %605 = vector.shape_cast %604 : vector<2x8xf32> to vector<2x8x1xf32>
    %606 = vector.broadcast %605 : vector<2x8x1xf32> to vector<2x8x8xf32>
    %607 = arith.subf %603, %606 : vector<2x8x8xf32>
    %608 = math.exp %607 : vector<2x8x8xf32>
    %cst_234 = arith.constant dense<0.000000e+00> : vector<2x8xf32>
    %609 = vector.multi_reduction <add>, %608, %cst_234 [2] : vector<2x8x8xf32> to vector<2x8xf32>
    %610 = vector.shape_cast %609 : vector<2x8xf32> to vector<2x8x1xf32>
    %611 = tpu.reciprocal %610 {approx = true} : vector<2x8x1xf32> -> vector<2x8x1xf32>
    %612 = vector.broadcast %611 : vector<2x8x1xf32> to vector<2x8x8xf32>
    %613 = arith.mulf %608, %612 : vector<2x8x8xf32>
    "tpu.trace_start"() <{level = 10 : i32, message = "bqk,bkd->bqd"}> : () -> ()
    %cst_235 = arith.constant dense<0.000000e+00> : vector<2x8x8xf32>
    %614 = tpu.matmul %613, %600, %cst_235 {dimension_numbers = #tpu.dot_dimension_numbers<[2], [1], [1], [2], [0, 0, 0, 1, 1, 2], [0], [0]>} : vector<2x8x8xf32>, vector<2x8x8xf32>, vector<2x8x8xf32> -> vector<2x8x8xf32>
    "tpu.trace_stop"() : () -> ()
    %615 = vector.shape_cast %614 : vector<2x8x8xf32> to vector<16x8xf32>
    %616 = vector.extract_strided_slice %525 {offsets = [2, 0, 0], sizes = [1, 8, 32], strides = [1, 1, 1]} : vector<4x8x32xf32> to vector<1x8x32xf32>
    %617 = vector.shape_cast %616 : vector<1x8x32xf32> to vector<8x32xf32>
    %cst_236 = arith.constant dense<0.000000e+00> : vector<16x32xf32>
    %618 = tpu.matmul %615, %617, %cst_236 {dimension_numbers = #tpu.dot_dimension_numbers<[1], [0], [0], [1], [0, 0, 1, 1], [], []>} : vector<16x8xf32>, vector<8x32xf32>, vector<16x32xf32> -> vector<16x32xf32>
    %619 = arith.addf %588, %618 : vector<16x32xf32>
    %620 = vector.extract_strided_slice %519 {offsets = [3, 0, 0], sizes = [1, 32, 8], strides = [1, 1, 1]} : vector<4x32x8xf32> to vector<1x32x8xf32>
    %621 = vector.shape_cast %620 : vector<1x32x8xf32> to vector<32x8xf32>
    %cst_237 = arith.constant dense<0.000000e+00> : vector<16x8xf32>
    %622 = tpu.matmul %517, %621, %cst_237 {dimension_numbers = #tpu.dot_dimension_numbers<[1], [0], [0], [1], [0, 0, 1, 1], [], []>} : vector<16x32xf32>, vector<32x8xf32>, vector<16x8xf32> -> vector<16x8xf32>
    %623 = vector.shape_cast %622 : vector<16x8xf32> to vector<2x8x8xf32>
    %624 = vector.extract_strided_slice %521 {offsets = [3, 0, 0], sizes = [1, 32, 8], strides = [1, 1, 1]} : vector<4x32x8xf32> to vector<1x32x8xf32>
    %625 = vector.shape_cast %624 : vector<1x32x8xf32> to vector<32x8xf32>
    %cst_238 = arith.constant dense<0.000000e+00> : vector<16x8xf32>
    %626 = tpu.matmul %1, %625, %cst_238 {dimension_numbers = #tpu.dot_dimension_numbers<[1], [0], [0], [1], [0, 0, 1, 1], [], []>} : vector<16x32xf32>, vector<32x8xf32>, vector<16x8xf32> -> vector<16x8xf32>
    %627 = vector.shape_cast %626 : vector<16x8xf32> to vector<2x8x8xf32>
    %628 = vector.extract_strided_slice %523 {offsets = [3, 0, 0], sizes = [1, 32, 8], strides = [1, 1, 1]} : vector<4x32x8xf32> to vector<1x32x8xf32>
    %629 = vector.shape_cast %628 : vector<1x32x8xf32> to vector<32x8xf32>
    %cst_239 = arith.constant dense<0.000000e+00> : vector<16x8xf32>
    %630 = tpu.matmul %1, %629, %cst_239 {dimension_numbers = #tpu.dot_dimension_numbers<[1], [0], [0], [1], [0, 0, 1, 1], [], []>} : vector<16x32xf32>, vector<32x8xf32>, vector<16x8xf32> -> vector<16x8xf32>
    %631 = vector.shape_cast %630 : vector<16x8xf32> to vector<2x8x8xf32>
    "tpu.trace_start"() <{level = 10 : i32, message = "bqd,bkd->bqk"}> : () -> ()
    %cst_240 = arith.constant dense<0.000000e+00> : vector<2x8x8xf32>
    %632 = tpu.matmul %623, %627, %cst_240 {dimension_numbers = #tpu.dot_dimension_numbers<[2], [2], [1], [1], [0, 0, 0, 1, 1, 1], [0], [0]>} : vector<2x8x8xf32>, vector<2x8x8xf32>, vector<2x8x8xf32> -> vector<2x8x8xf32>
    "tpu.trace_stop"() : () -> ()
    %633 = vector.broadcast %4 : vector<2x1x8xf32> to vector<2x8x8xf32>
    %634 = arith.addf %632, %633 : vector<2x8x8xf32>
    %cst_241 = arith.constant dense<0xFF800000> : vector<2x8xf32>
    %635 = vector.multi_reduction <maximumf>, %634, %cst_241 [2] : vector<2x8x8xf32> to vector<2x8xf32>
    %636 = vector.shape_cast %635 : vector<2x8xf32> to vector<2x8x1xf32>
    %637 = vector.broadcast %636 : vector<2x8x1xf32> to vector<2x8x8xf32>
    %638 = arith.subf %634, %637 : vector<2x8x8xf32>
    %639 = math.exp %638 : vector<2x8x8xf32>
    %cst_242 = arith.constant dense<0.000000e+00> : vector<2x8xf32>
    %640 = vector.multi_reduction <add>, %639, %cst_242 [2] : vector<2x8x8xf32> to vector<2x8xf32>
    %641 = vector.shape_cast %640 : vector<2x8xf32> to vector<2x8x1xf32>
    %642 = tpu.reciprocal %641 {approx = true} : vector<2x8x1xf32> -> vector<2x8x1xf32>
    %643 = vector.broadcast %642 : vector<2x8x1xf32> to vector<2x8x8xf32>
    %644 = arith.mulf %639, %643 : vector<2x8x8xf32>
    "tpu.trace_start"() <{level = 10 : i32, message = "bqk,bkd->bqd"}> : () -> ()
    %cst_243 = arith.constant dense<0.000000e+00> : vector<2x8x8xf32>
    %645 = tpu.matmul %644, %631, %cst_243 {dimension_numbers = #tpu.dot_dimension_numbers<[2], [1], [1], [2], [0, 0, 0, 1, 1, 2], [0], [0]>} : vector<2x8x8xf32>, vector<2x8x8xf32>, vector<2x8x8xf32> -> vector<2x8x8xf32>
    "tpu.trace_stop"() : () -> ()
    %646 = vector.shape_cast %645 : vector<2x8x8xf32> to vector<16x8xf32>
    %647 = vector.extract_strided_slice %525 {offsets = [3, 0, 0], sizes = [1, 8, 32], strides = [1, 1, 1]} : vector<4x8x32xf32> to vector<1x8x32xf32>
    %648 = vector.shape_cast %647 : vector<1x8x32xf32> to vector<8x32xf32>
    %cst_244 = arith.constant dense<0.000000e+00> : vector<16x32xf32>
    %649 = tpu.matmul %646, %648, %cst_244 {dimension_numbers = #tpu.dot_dimension_numbers<[1], [0], [0], [1], [0, 0, 1, 1], [], []>} : vector<16x8xf32>, vector<8x32xf32>, vector<16x32xf32> -> vector<16x32xf32>
    %650 = arith.addf %619, %649 : vector<16x32xf32>
    %651 = arith.addf %503, %650 : vector<16x32xf32>
    %c1_245 = arith.constant 1 : index
    %c0_246 = arith.constant 0 : index
    %c0_247 = arith.constant 0 : index
    %652 = vector.load %arg15[%c1_245, %c0_246, %c0_247] : memref<2x1x32xf32, #tpu.memory_space<vmem>>, vector<1x1x32xf32>
    %653 = vector.shape_cast %652 : vector<1x1x32xf32> to vector<1x32xf32>
    %654 = arith.mulf %651, %651 : vector<16x32xf32>
    %cst_248 = arith.constant dense<0.000000e+00> : vector<16xf32>
    %655 = vector.multi_reduction <add>, %654, %cst_248 [1] : vector<16x32xf32> to vector<16xf32>
    %656 = vector.shape_cast %655 : vector<16xf32> to vector<16x1xf32>
    %cst_249 = arith.constant 3.200000e+01 : f32
    %657 = vector.broadcast %cst_249 : f32 to vector<16x1xf32>
    %658 = arith.divf %656, %657 : vector<16x1xf32>
    %cst_250 = arith.constant 9.99999997E-7 : f32
    %659 = vector.broadcast %cst_250 : f32 to vector<16x1xf32>
    %660 = arith.addf %658, %659 : vector<16x1xf32>
    %661 = math.rsqrt %660 : vector<16x1xf32>
    %662 = vector.broadcast %661 : vector<16x1xf32> to vector<16x32xf32>
    %663 = arith.mulf %651, %662 : vector<16x32xf32>
    %664 = vector.broadcast %653 : vector<1x32xf32> to vector<16x32xf32>
    %665 = arith.mulf %663, %664 : vector<16x32xf32>
    %c1_251 = arith.constant 1 : index
    %c0_252 = arith.constant 0 : index
    %c0_253 = arith.constant 0 : index
    %666 = vector.load %arg16[%c1_251, %c0_252, %c0_253] : memref<2x32x64xf32, #tpu.memory_space<vmem>>, vector<1x32x64xf32>
    %667 = vector.shape_cast %666 : vector<1x32x64xf32> to vector<32x64xf32>
    %cst_254 = arith.constant dense<0.000000e+00> : vector<16x64xf32>
    %668 = tpu.matmul %665, %667, %cst_254 {dimension_numbers = #tpu.dot_dimension_numbers<[1], [0], [0], [1], [0, 0, 1, 1], [], []>} : vector<16x32xf32>, vector<32x64xf32>, vector<16x64xf32> -> vector<16x64xf32>
    %cst_255 = arith.constant 0.000000e+00 : f32
    %669 = vector.broadcast %cst_255 : f32 to vector<16x64xf32>
    %670 = arith.maximumf %668, %669 : vector<16x64xf32>
    %c1_256 = arith.constant 1 : index
    %c0_257 = arith.constant 0 : index
    %c0_258 = arith.constant 0 : index
    %671 = vector.load %arg17[%c1_256, %c0_257, %c0_258] : memref<2x64x32xf32, #tpu.memory_space<vmem>>, vector<1x64x32xf32>
    %672 = vector.shape_cast %671 : vector<1x64x32xf32> to vector<64x32xf32>
    %cst_259 = arith.constant dense<0.000000e+00> : vector<16x32xf32>
    %673 = tpu.matmul %670, %672, %cst_259 {dimension_numbers = #tpu.dot_dimension_numbers<[1], [0], [0], [1], [0, 0, 1, 1], [], []>} : vector<16x64xf32>, vector<64x32xf32>, vector<16x32xf32> -> vector<16x32xf32>
    %674 = arith.addf %651, %673 : vector<16x32xf32>
    %c0_260 = arith.constant 0 : index
    %c0_261 = arith.constant 0 : index
    %675 = vector.load %arg18[%c0_260, %c0_261] : memref<1x32xf32, #tpu.memory_space<vmem>>, vector<1x32xf32>
    %676 = arith.mulf %674, %674 : vector<16x32xf32>
    %cst_262 = arith.constant dense<0.000000e+00> : vector<16xf32>
    %677 = vector.multi_reduction <add>, %676, %cst_262 [1] : vector<16x32xf32> to vector<16xf32>
    %678 = vector.shape_cast %677 : vector<16xf32> to vector<16x1xf32>
    %cst_263 = arith.constant 3.200000e+01 : f32
    %679 = vector.broadcast %cst_263 : f32 to vector<16x1xf32>
    %680 = arith.divf %678, %679 : vector<16x1xf32>
    %cst_264 = arith.constant 9.99999997E-7 : f32
    %681 = vector.broadcast %cst_264 : f32 to vector<16x1xf32>
    %682 = arith.addf %680, %681 : vector<16x1xf32>
    %683 = math.rsqrt %682 : vector<16x1xf32>
    %684 = vector.broadcast %683 : vector<16x1xf32> to vector<16x32xf32>
    %685 = arith.mulf %674, %684 : vector<16x32xf32>
    %686 = vector.broadcast %675 : vector<1x32xf32> to vector<16x32xf32>
    %687 = arith.mulf %685, %686 : vector<16x32xf32>
    %c0_265 = arith.constant 0 : index
    %c0_266 = arith.constant 0 : index
    %688 = vector.load %arg19[%c0_265, %c0_266] : memref<16x32xf32, #tpu.memory_space<vmem>>, vector<16x32xf32>
    tpu.vector_store %arg19[%c0_265, %c0_266], %687 {strides = array<i32>} : memref<16x32xf32, #tpu.memory_space<vmem>>, vector<16x32xf32>,
    return
  }
}

</mosaic_0001>

<bundles_post_ra>
// kernel: t5_forward.5
= control target key start
LH: loop header
LB: loop body
LE: loop exit
PB: predicated region body
PF: predicated region fallthrough
CT: control target
= control target key end

     0   :  { %10 = vsyncpa [#allocation3], 0  ;;  %vm38_vm0 = vcmask 261120   ;;  %v459_v6 = vmov 0   ;;  %s626_s0 = inlined_call_operand.vmem [shape: f32[16,32], index: 0, kind: input, shape index: {}]   ;;  %s627_s1 = inlined_call_operand.vmem [shape: f32[128,32], index: 1, kind: input, shape index: {}]   ;;  %s628_s2 = inlined_call_operand.vmem [shape: s32[16,1], index: 2, kind: input, shape index: {}]   ;;  %s629_s3 = inlined_call_operand.hbm [shape: f32[16,128], index: 3, kind: output, shape index: {0}]   ;;  %s630_s4 = inlined_call_operand.hbm [shape: f32[1,1], index: 4, kind: output, shape index: {1}]  }
   0x1   :  { %v22_v0 = vld [vmem:[%s627_s1] sm:$0xff]  ;;  %v23_v1 = vld [vmem:[%s627_s1 + $0x8] sm:$0xff]  ;;  %v24_v2 = vld [vmem:[%s627_s1 + $0x10] sm:$0xff]  ;;  %399 = vset.pattern.permute.xlu1 %v459_v6  ;;  %400 = vset.pattern.permute.xlu0 %v459_v6 }
   0x2   :  { %v345_v3 = vpack.c.bf16 %v23_v1, %v22_v0  ;;  %vm501_vm1 = vmpackc.low %vm38_vm0, %vm38_vm0  ;;  %v25_v5 = vld [vmem:[%s627_s1 + $0x18] sm:$0xff]  ;;  %v18_v8 = vld [vmem:[%s626_s0] sm:$0xff] }
   0x3   :  { %v351_v7 = vpack.c.bf16 %v25_v5, %v24_v2  ;;  %v26_v9 = vld [vmem:[%s627_s1 + $0x20] sm:$0xff]  ;;  %v27_v10 = vld [vmem:[%s627_s1 + $0x28] sm:$0xff]  ;;  %v20_v11 = vmul.f32 0.17677669, %v18_v8 }
   0x4   :  { %347 = vmatprep.subr.msk.bf16.mxu0 %vm501_vm1, %v345_v3  ;;  %v526_v12 = vld [vmem:[%s628_s2] sm:$0xff] }
   0x5   :  { %350 = vmatpush3.bf16.xpose.msk.msra.mxu0 %vm501_vm1, %v345_v3  ;;  %195 = vperm.xlu1 %399, %v526_v12  }
   0x6   :  { %353 = vmatprep.subr.msk.bf16.mxu0 %vm501_vm1, %v351_v7 }
   0x7   :  { %11 = vsyncpa [#allocation5], 0  ;;  %342 = vmatprep.mubr.msk.f32.mxu0 %vm38_vm0, %v20_v11  ;;  %v533_v13 = vld [vmem:[%s628_s2 + $0x8] sm:$0xff]  ;;  %v357_v14 = vpack.c.bf16 %v27_v10, %v26_v9  ;;  %v28_v15 = vld [vmem:[%s627_s1 + $0x30] sm:$0xff]  ;;  %v192_v40 = vlaneseq  ;;  %vm208_vm4 = vcmp.ne.s32.totalorder %v526_v12, 4294967196  ;;  %vm218_vm5 = vcmask 7168  }
   0x8   :  { %v29_v16 = vld [vmem:[%s627_s1 + $0x38] sm:$0xff]  ;;  %v30_v18 = vld [vmem:[%s627_s1 + $0x40] sm:$0xff]  ;;  %v31_v19 = vld [vmem:[%s627_s1 + $0x48] sm:$0xff]  ;;  %v460_v48 = vmov 0.0   ;;  %vm209_vm6 = vcmp.ne.s32.totalorder %v533_v13, 4294967196 }
   0x9   :  { %198 = vperm.xlu1 %399, %v533_v13   ;;  %v363_v17 = vpack.c.bf16 %v29_v16, %v28_v15  ;;  %v369_v20 = vpack.c.bf16 %v31_v19, %v30_v18  ;;  %v32_v21 = vld [vmem:[%s627_s1 + $0x50] sm:$0xff]  ;;  %v33_v22 = vld [vmem:[%s627_s1 + $0x58] sm:$0xff]  ;;  %v34_v24 = vld [vmem:[%s627_s1 + $0x60] sm:$0xff]  ;;  %v193_v42 = vand.u32 127, %v192_v40  ;;  %v290_v49 = vsel %vm208_vm4, 1.0, %v460_v48 }
   0xa   :  { %v375_v23 = vpack.c.bf16 %v33_v22, %v32_v21  ;;  %v35_v25 = vld [vmem:[%s627_s1 + $0x68] sm:$0xff]  ;;  %v36_v27 = vld [vmem:[%s627_s1 + $0x70] sm:$0xff]  ;;  %v37_v28 = vld [vmem:[%s627_s1 + $0x78] sm:$0xff]  ;;  %v228_v50 = vsel %vm218_vm5, %v290_v49, 0.0  ;;  %v291_v51 = vsel %vm209_vm6, 1.0, %v460_v48 }
   0xb   :  { %v381_v26 = vpack.c.bf16 %v35_v25, %v34_v24  ;;  %v387_v29 = vpack.c.bf16 %v37_v28, %v36_v27  ;;  %v19_v30 = vld [vmem:[%s626_s0 + $0x8] sm:$0xff]  ;;  %v229_v52 = vsel %vm218_vm5, %v291_v51, 0.0  ;;  %s461_s0 = smov [#allocation2]  }
   0xc   :  { %v21_v31 = vmul.f32 0.17677669, %v19_v30  ;;  %v230_v53 = vadd.f32 %v229_v52, %v228_v50  ;;  %s247_s1 = sshll.u32 %s461_s0, 4  ;;  %s248_s1 = int_to_ptr.vmem [resolvable:$true] %s247_s1 }
   0xd   :  { %356 = vmatpush3.bf16.xpose.msk.msra.mxu0 %vm501_vm1, %v351_v7  ;;  %s411_s28 = scalar_lea.vmem %s248_s1, 256  ;;  %p416_p1 = scmp.lt.s32.totalorder %s248_s1, %s248_s1 }
   0xe   :  { %359 = vmatprep.subr.msk.bf16.mxu0 %vm501_vm1, %v357_v14  ;;  %p412_p0 = scmp.ne.s32.totalorder %s248_s1, %s411_s28  ;;  %p417_p2 = scmp.lt.s32.totalorder %s411_s28, %s411_s28 }
  0x10   :  { %p418_p3 = por %p417_p2, %p416_p1 }
  0x12   :  { %p419_p4 = pnand %p418_p3, %p412_p0 }
  0x15   :  { %362 = vmatpush3.bf16.xpose.msk.msra.mxu0 %vm501_vm1, %v357_v14 }
  0x16   :  { %365 = vmatprep.subr.msk.bf16.mxu0 %vm501_vm1, %v363_v17 }
  0x1d   :  { %368 = vmatpush3.bf16.xpose.msk.msra.mxu0 %vm501_vm1, %v363_v17 }
  0x1e   :  { %371 = vmatprep.subr.msk.bf16.mxu0 %vm501_vm1, %v369_v20 }
  0x25   :  { %374 = vmatpush3.bf16.xpose.msk.msra.mxu0 %vm501_vm1, %v369_v20 }
  0x26   :  { %377 = vmatprep.subr.msk.bf16.mxu0 %vm501_vm1, %v375_v23 }
  0x2d   :  { %380 = vmatpush3.bf16.xpose.msk.msra.mxu0 %vm501_vm1, %v375_v23 }
  0x2e   :  { %383 = vmatprep.subr.msk.bf16.mxu0 %vm501_vm1, %v381_v26 }
  0x35   :  { %386 = vmatpush3.bf16.xpose.msk.msra.mxu0 %vm501_vm1, %v381_v26 }
  0x36   :  { %389 = vmatprep.subr.msk.bf16.mxu0 %vm501_vm1, %v387_v29 }
  0x3d   :  { %392 = vmatpush3.bf16.xpose.msk.msra.mxu0 %vm501_vm1, %v387_v29 }
  0x44   :  { %343 = vmatmul.mubr.msk.f32.vlgmr.msra.gmra.mrb[0].mxu0 %vm38_vm0, %v21_v31 }
  0x84   :  { %v196_v41 = vpop.permute.xlu1 %195 }
  0x85   :  { %vm200_vm2 = vcmp.eq.s32.totalorder %v193_v42, %v196_v41 }
  0x88   :  { %v199_v44 = vpop.permute.xlu1 %198 }
  0x89   :  { %vm201_vm3 = vcmp.eq.s32.totalorder %v193_v42, %v199_v44 }
 0x117   :  { %v344_v32 = vpop.f32.mrb[0].mxu0 }
 0x118   :  { %169 = vst [vmem:[#allocation2 + $0x8] sm:$0xff] %v344_v32  ;;  %v159_v33 = vpop.f32.mrb[1].mxu0  ;;  %v203_v47 = vsel %vm201_vm3, %v344_v32, 0.0 }
 0x119   :  { %168 = vst [vmem:[#allocation2] sm:$0xff] %v159_v33  ;;  %172 = vmax.xlane.f32.xlu0 %v159_v33  ;;  %v202_v46 = vsel %vm200_vm2, %v159_v33, 0.0 }
 0x11d   :  { %174 = vmax.xlane.f32.xlu0 %v344_v32 }
 0x1a6   :  { %v173_v34 = vpop.xlane.xlu0 %172 }
 0x1a7   :  { %v176_v35 = vsub.f32 %v159_v33, %v173_v34 }
 0x1a9   :  { %v178_v36 = vmul.f32 1.442695, %v176_v35 }
 0x1aa   :  { %v175_v37 = vpop.xlane.xlu0 %174 }
 0x1ab   :  { %401 = vpow2.f32 %v178_v36  ;;  %v177_v38 = vsub.f32 %v344_v32, %v175_v37 }
 0x1ad   :  { %v180_v39 = vmul.f32 1.442695, %v177_v38 }
 0x1af   :  { %403 = vpow2.f32 %v180_v39 }
 0x1b5   :  { %v402_v43 = vpop.eup %401 }
 0x1b6   :  { %182 = vadd.xlane.f32.xlu0 %v402_v43 }
 0x1b9   :  { %v404_v45 = vpop.eup %403 }
 0x1ba   :  { %184 = vadd.xlane.f32.xlu1 %v404_v45  ;;  %204 = vadd.xlane.f32.xlu0 %v202_v46 }
 0x1be   :  { %206 = vadd.xlane.f32.xlu0 %v203_v47 }
 0x1bf   :  { %422 = shalt.err (!%p419_p4)
}
 0x1c0   :  { %s423_s5 = scalar_lea.hbm %s629_s3, 256 }
 0x1c1   :  { %p424_p5 = scmp.ne.s32.totalorder %s629_s3, %s423_s5  ;;  %p427_p6 = scmp.lt.u32.totalorder %s423_s5, %s629_s3 }
 0x1c3   :  { %p429_p7 = pnand %p427_p6, %p424_p5 }
 0x1c5   :  { %432 = shalt.err (!%p429_p7)
}
 0x1c6   :  { %s462_s10 = smov 128   ;;  %s463_s2 = smov 8   ;;  %v231_v54 = vrot.slane %v230_v53, 4  ;;  %vm240_vm7 = vcmask 0  }
 0x1c7   :  { %253 = dma.vmem_to_hbm [thread:$0]  %s248_s1, 256, %s629_s3, [#allocation3], %s462_s10, %s462_s10, %s463_s2  }
 0x1c8   :  { %v232_v56 = vadd.f32 %v231_v54, %v230_v53  ;;  %s464_s3 = smov [#allocation4]  }
 0x1c9   :  { %s260_s13 = sshll.u32 %s464_s3, 4  ;;  %s261_s13 = int_to_ptr.vmem [resolvable:$true] %s260_s13 }
 0x1ca   :  { %v233_v58 = vrot.slane %v232_v56, 2  ;;  %s433_s14 = scalar_lea.vmem %s261_s13, 16  ;;  %s437_s15 = scalar_lea.vmem %s261_s13, 32 }
 0x1cb   :  { %p434_p8 = scmp.ne.s32.totalorder %s261_s13, %s433_s14  ;;  %p438_p9 = scmp.lt.s32.totalorder %s261_s13, %s261_s13 }
 0x1cc   :  { %v234_v59 = vadd.f32 %v233_v58, %v232_v56  ;;  %p439_p10 = scmp.lt.s32.totalorder %s437_s15, %s433_s14 }
 0x1ce   :  { %v235_v0 = vrot.slane %v234_v59, 1  ;;  %p440_p11 = por %p439_p10, %p438_p9 }
 0x1d0   :  { %v236_v5 = vadd.f32 %v235_v0, %v234_v59  ;;  %p441_p12 = pnand %p440_p11, %p434_p8 }
 0x1d2   :  { %v237_v9 = vmax.f32 %v236_v5, 1.0 }
 0x243   :  { %v183_v55 = vpop.xlane.xlu0 %182 }
 0x244   :  { %405 = vlog2.f32 %v183_v55 }
 0x247   :  { %v185_v57 = vpop.xlane.xlu1 %184  ;;  %v205_v62 = vpop.xlane.xlu0 %204 }
 0x248   :  { %407 = vlog2.f32 %v185_v57 }
 0x249   :  { %409 = vrcp.f32 %v237_v9 }
 0x24b   :  { %v207_v6 = vpop.xlane.xlu0 %206 }
 0x24e   :  { %v406_v60 = vpop.eup %405 }
 0x24f   :  { %v187_v61 = vmul.f32 0.6931472, %v406_v60 }
 0x251   :  { %v190_v63 = vadd.f32 %v187_v61, %v173_v34 }
 0x252   :  { %v408_v1 = vpop.eup %407 }
 0x253   :  { %v189_v2 = vmul.f32 0.6931472, %v408_v1  ;;  %v214_v3 = vsub.f32 %v190_v63, %v205_v62  ;;  %v410_v19 = vpop.eup %409 }
 0x255   :  { %v191_v4 = vadd.f32 %v189_v2, %v175_v37  ;;  %v216_v7 = vmul.f32 %v290_v49, %v214_v3 }
 0x257   :  { %v215_v8 = vsub.f32 %v191_v4, %v207_v6  ;;  %v219_v11 = vsel %vm218_vm5, %v216_v7, 0.0 }
 0x259   :  { %v217_v10 = vmul.f32 %v291_v51, %v215_v8 }
 0x25b   :  { %v220_v12 = vsel %vm218_vm5, %v217_v10, 0.0 }
 0x25c   :  { %v221_v13 = vadd.f32 %v220_v12, %v219_v11 }
 0x25e   :  { %v222_v14 = vrot.slane %v221_v13, 4 }
 0x260   :  { %v223_v15 = vadd.f32 %v222_v14, %v221_v13 }
 0x262   :  { %v224_v16 = vrot.slane %v223_v15, 2 }
 0x264   :  { %v225_v17 = vadd.f32 %v224_v16, %v223_v15 }
 0x266   :  { %v226_v18 = vrot.slane %v225_v17, 1 }
 0x268   :  { %v227_v20 = vadd.f32 %v226_v18, %v225_v17 }
 0x26a   :  { %v239_v21 = vmul.f32 %v410_v19, %v227_v20 }
 0x26c   :  { %241 = vst.msk [vmem:[#allocation4] sm:$0x1] %vm240_vm7, %v239_v21 }
 0x26d   :  { %444 = shalt.err (!%p441_p12)
}
 0x26e   :  { %s445_s18 = scalar_lea.hbm %s630_s4, 16 }
 0x26f   :  { %p446_p13 = scmp.ne.s32.totalorder %s630_s4, %s445_s18  ;;  %p449_p0 = scmp.lt.u32.totalorder %s445_s18, %s630_s4 }
 0x271   :  { %p451_p1 = pnand %p449_p0, %p446_p13 }
 0x273   :  { %454 = shalt.err (!%p451_p1)
}
 0x274   :  { %263 = dma.vmem_to_hbm [thread:$0]  %s261_s13, 16, %s630_s4, [#allocation5]  }
 0x275   :  { %455 = dma.done.wait [#allocation3], 256  }
 0x276   :  { %456 = vsyncadd [#allocation3], 4294967040 }
 0x277   :  { %457 = dma.done.wait [#allocation5], 16  }
 0x278   :  { %458 = vsyncadd [#allocation5], 4294967280 }
 0x279   :  { %270 = vsyncpa [#allocation3], 1 }
 0x27a   :  { %271 = vsyncpa [#allocation5], 1 }

// kernel: t5_forward.3
= control target key start
LH: loop header
LB: loop body
LE: loop exit
PB: predicated region body
PF: predicated region fallthrough
CT: control target
= control target key end

     0   :  { %vm52_vm0 = vcmask 261120   ;;  %v7033_v37 = vmov 0.0   ;;  %vm7034_vm1 = vmmov 0   ;;  %vm359_vm2 = vcmask 64512   ;;  %s7959_s0 = inlined_call_operand.vmem [shape: f32[16,32], index: 0, kind: input, shape index: {}]   ;;  %s7960_s4 = inlined_call_operand.vmem [shape: f32[2,4,32,8], index: 4, kind: input, shape index: {}]   ;;  %s7961_s6 = inlined_call_operand.vmem [shape: f32[2,4,32,8], index: 6, kind: input, shape index: {}]   ;;  %s7962_s5 = inlined_call_operand.vmem [shape: f32[2,4,32,8], index: 5, kind: input, shape index: {}]   ;;  %s7963_s3 = inlined_call_operand.vmem [shape: f32[2,1,32], index: 3, kind: input, shape index: {}]   ;;  %s7964_s1 = inlined_call_operand.vmem [shape: f32[4,8,8], index: 1, kind: input, shape index: {}]   ;;  %s7965_s2 = inlined_call_operand.vmem [shape: f32[2,1,8], index: 2, kind: input, shape index: {}]   ;;  %s7966_s7 = inlined_call_operand.vmem [shape: f32[2,4,8,32], index: 7, kind: input, shape index: {}]   ;;  %s7967_s9 = inlined_call_operand.vmem [shape: f32[2,32,64], index: 9, kind: input, shape index: {}]   ;;  %s7968_s10 = inlined_call_operand.vmem [shape: f32[2,64,32], index: 10, kind: input, shape index: {}]   ;;  %s7969_s8 = inlined_call_operand.vmem [shape: f32[2,1,32], index: 8, kind: input, shape index: {}]   ;;  %s7970_s11 = inlined_call_operand.vmem [shape: f32[1,32], index: 11, kind: input, shape index: {}]   ;;  %s7971_s12 = inlined_call_operand.vmem [shape: f32[16,32], index: 12, kind: output, shape index: {}]  }
   0x1   :  { %v7103_v0 = vld [vmem:[%s7959_s0] sm:$0xff]  ;;  %v7108_v1 = vld [vmem:[%s7959_s0 + $0x8] sm:$0xff]  ;;  %v78_v12 = vld [vmem:[%s7960_s4 + $0x10] sm:$0xff]  ;;  %vm2785_vm3 = vcmask 523264  }
   0x2   :  { %v50_v2 = vmul.f32 %v7103_v0, %v7103_v0  ;;  %v51_v3 = vmul.f32 %v7108_v1, %v7108_v1  ;;  %v76_v6 = vld [vmem:[%s7960_s4] sm:$0xff]  ;;  %v77_v7 = vld [vmem:[%s7960_s4 + $0x8] sm:$0xff]  ;;  %v79_v13 = vld [vmem:[%s7960_s4 + $0x18] sm:$0xff] }
   0x3   :  { %v6693_v8 = vpack.c.bf16 %v77_v7, %v76_v6  ;;  %v108_v9 = vld [vmem:[%s7961_s6] sm:$0xff]  ;;  %v109_v10 = vld [vmem:[%s7961_s6 + $0x8] sm:$0xff]  ;;  %v6697_v14 = vpack.c.bf16 %v79_v13, %v78_v12  ;;  %v110_v15 = vld [vmem:[%s7961_s6 + $0x10] sm:$0xff] }
   0x4   :  { %v53_v4 = vsel %vm52_vm0, %v50_v2, 0.0  ;;  %v56_v5 = vsel %vm52_vm0, %v51_v3, 0.0  ;;  %v6709_v11 = vpack.c.bf16 %v109_v10, %v108_v9  ;;  %v111_v16 = vld [vmem:[%s7961_s6 + $0x18] sm:$0xff]  ;;  %v92_v18 = vld [vmem:[%s7962_s5] sm:$0xff]  ;;  %v93_v19 = vld [vmem:[%s7962_s5 + $0x8] sm:$0xff] }
   0x5   :  { %54 = vadd.xlane.f32.xlu0 %v53_v4  ;;  %6694 = vmatprep.subr.bf16.mxu1 %v6693_v8  ;;  %v6713_v17 = vpack.c.bf16 %v111_v16, %v110_v15  ;;  %v6701_v20 = vpack.c.bf16 %v93_v19, %v92_v18  ;;  %v5712_v28 = vld [vmem:[%s7963_s3] ss:$0 sm:$0xff]  ;;  %v94_v32 = vld [vmem:[%s7962_s5 + $0x10] sm:$0xff]  ;;  %v95_v33 = vld [vmem:[%s7962_s5 + $0x18] sm:$0xff] }
   0x6   :  { %6696 = vmatpush3.bf16.msra.mxu1 %v6693_v8  ;;  %6710 = vmatprep.subr.bf16.mxu0 %v6709_v11  ;;  %v6705_v36 = vpack.c.bf16 %v95_v33, %v94_v32  ;;  %v7192_v46 = vld [vmem:[%s7964_s1] sm:$0xff]  ;;  %v97_v6 = vld [vmem:[%s7962_s5 + $0x28] sm:$0xff]  ;;  %v98_v13 = vld [vmem:[%s7962_s5 + $0x30] sm:$0xff] }
   0x7   :  { %6712 = vmatpush3.bf16.msra.mxu0 %v6709_v11  ;;  %6698 = vmatprep.subr.bf16.mxu1 %v6697_v14  ;;  %v7197_v48 = vld [vmem:[%s7965_s2 + $0x1] ss:$0 sm:$0xff]  ;;  %v7204_v52 = vld [vmem:[%s7965_s2] ss:$0 sm:$0xff]  ;;  %v81_v9 = vld [vmem:[%s7960_s4 + $0x28] sm:$0xff] }
   0x8   :  { %6714 = vmatprep.subr.bf16.mxu0 %v6713_v17  ;;  %v80_v8 = vld [vmem:[%s7960_s4 + $0x20] sm:$0xff]  ;;  %v82_v18 = vld [vmem:[%s7960_s4 + $0x30] sm:$0xff]  ;;  %v83_v19 = vld [vmem:[%s7960_s4 + $0x38] sm:$0xff] }
   0x9   :  { %57 = vadd.xlane.f32.xlu0 %v56_v5  ;;  %v96_v5 = vld [vmem:[%s7962_s5 + $0x20] sm:$0xff]  ;;  %v6717_v10 = vpack.c.bf16 %v81_v9, %v80_v8 }
   0xa   :  { %6700 = vmatpush3.bf16.msra.mxu1 %v6697_v14  ;;  %v6725_v7 = vpack.c.bf16 %v97_v6, %v96_v5  ;;  %v99_v14 = vld [vmem:[%s7962_s5 + $0x38] sm:$0xff]  ;;  %v85_v5 = vld [vmem:[%s7960_s4 + $0x48] sm:$0xff] }
   0xb   :  { %6716 = vmatpush3.bf16.msra.mxu0 %v6713_v17  ;;  %6702 = vmatprep.subr.bf16.mxu1 %v6701_v20  ;;  %v6729_v17 = vpack.c.bf16 %v99_v14, %v98_v13 }
   0xc   :  { %6212 = vmatprep.subr.mxu0 %v7033_v37 }
  0x92   :  { %v55_v21 = vpop.xlane.xlu0 %54 }
  0x93   :  { %v60_v22 = vmul.f32 0.03125, %v55_v21 }
  0x95   :  { %v62_v23 = vadd.f32 1e-06, %v60_v22  ;;  %v6721_v22 = vpack.c.bf16 %v83_v19, %v82_v18  ;;  %v118_v19 = vld [vmem:[%s7961_s6 + $0x50] sm:$0xff] }
  0x96   :  { %v58_v24 = vpop.xlane.xlu0 %57 }
  0x97   :  { %6947 = vrsqrt.f32 %v62_v23  ;;  %v61_v25 = vmul.f32 0.03125, %v58_v24  ;;  %v112_v23 = vld [vmem:[%s7961_s6 + $0x20] sm:$0xff]  ;;  %v113_v24 = vld [vmem:[%s7961_s6 + $0x28] sm:$0xff] }
  0x99   :  { %v63_v26 = vadd.f32 1e-06, %v61_v25  ;;  %v6733_v25 = vpack.c.bf16 %v113_v24, %v112_v23  ;;  %v124_v23 = vld [vmem:[%s7966_s7] sm:$0xff] }
  0x9b   :  { %6949 = vrsqrt.f32 %v63_v26  ;;  %v114_v26 = vld [vmem:[%s7961_s6 + $0x30] sm:$0xff] }
  0xa1   :  { %v6948_v27 = vpop.eup %6947 }
  0xa2   :  { %v66_v29 = vmul.f32 %v6948_v27, %v7103_v0  ;;  %v115_v27 = vld [vmem:[%s7961_s6 + $0x38] sm:$0xff] }
  0xa4   :  { %v7150_v30 = vmul.f32 %v5712_v28, %v66_v29 }
  0xa5   :  { %v6950_v31 = vpop.eup %6949 }
  0xa6   :  { %v67_v34 = vmul.f32 %v6950_v31, %v7108_v1  ;;  %6177 = vmatprep.mubr.msk.f32.mxu1 %vm52_vm0, %v7150_v30  ;;  %6199 = vmatprep.mubr.msk.f32.mxu0 %vm52_vm0, %v7150_v30 }
  0xa8   :  { %v7163_v35 = vmul.f32 %v5712_v28, %v67_v34  ;;  %v6737_v28 = vpack.c.bf16 %v115_v27, %v114_v26  ;;  %v101_v26 = vld [vmem:[%s7962_s5 + $0x48] sm:$0xff] }
  0xaa   :  { %6178 = vmatmul.mubr.msk.f32.vlgmr.msra.gmra.mrb[0].mxu1 %vm52_vm0, %v7163_v35  ;;  %6200 = vmatmul.mubr.msk.f32.vlgmr.msra.gmra.mrb[0].mxu0 %vm52_vm0, %v7163_v35 }
  0xab   :  { %6704 = vmatpush3.bf16.msra.mxu1 %v6701_v20  ;;  %6188 = vmatprep.mubr.msk.f32.mxu1 %vm52_vm0, %v7150_v30 }
  0xac   :  { %6706 = vmatprep.subr.bf16.mxu1 %v6705_v36  ;;  %6214 = vmatprep.mubr.msk.f32.mxu0 %vm7034_vm1, %v7033_v37 }
  0xaf   :  { %6708 = vmatpush3.bf16.msra.mxu1 %v6705_v36 }
  0xb0   :  { %6202 = vmatprep.subr.mxu1 %v7033_v37 }
  0xb2   :  { %6189 = vmatmul.mubr.msk.f32.vlgmr.msra.gmra.mrb[2].mxu1 %vm52_vm0, %v7163_v35 }
  0xb3   :  { %6204 = vmatprep.mubr.msk.f32.mxu1 %vm7034_vm1, %v7033_v37 }
 0x17d   :  { %v6179_v38 = vpop.f32.mrb[0].mxu1  ;;  %v6201_v39 = vpop.f32.mrb[0].mxu0 }
 0x17e   :  { %v200_v40 = vpop.f32.mrb[1].mxu1  ;;  %v350_v41 = vpop.f32.mrb[1].mxu0 }
 0x17f   :  { %6213 = vmatpush3.msra.mxu0 %v350_v41 }
 0x180   :  { %6718 = vmatprep.subr.bf16.mxu0 %v6717_v10 }
 0x185   :  { %v6190_v42 = vpop.f32.mrb[2].mxu1 }
 0x186   :  { %v275_v43 = vpop.f32.mrb[3].mxu1 }
 0x187   :  { %6203 = vmatpush3.xpose.msk.msra.mxu1 %vm359_vm2, %v275_v43 }
 0x188   :  { %6207 = vmatprep.subr.mxu1 %v7033_v37 }
 0x18a   :  { %6205 = vmatmul.mubr.msk.f32.vlgmr.msra.gmra.mrb[4].mxu1 %vm359_vm2, %v200_v40 }
 0x18b   :  { %6208 = vmatpush3.xpose.msk.msra.mxu1 %vm359_vm2, %v6190_v42  ;;  %6209 = vmatprep.mubr.msk.f32.mxu1 %vm7034_vm1, %v7033_v37  ;;  %v7285_v42 = vld [vmem:[%s7964_s1 + $0x8] sm:$0xff] }
 0x18c   :  { %6217 = vmatprep.subr.mxu1 %v7033_v37 }
 0x18e   :  { %6210 = vmatmul.mubr.msk.f32.vlgmr.msra.gmra.mrb[6].mxu1 %vm359_vm2, %v6179_v38 }
 0x18f   :  { %6218 = vmatpush3.msra.mxu1 %v6201_v39  ;;  %6219 = vmatprep.mubr.msk.f32.mxu1 %vm7034_vm1, %v7033_v37 }
 0x190   :  { %6726 = vmatprep.subr.bf16.mxu1 %v6725_v7 }
 0x25d   :  { %v432_v44 = vpop.f32.mrb[4].mxu1 }
 0x25e   :  { %v6206_v45 = vpop.f32.mrb[5].mxu1  ;;  %v433_v49 = vadd.f32 %v432_v44, %v7192_v46 }
 0x260   :  { %v524_v55 = vadd.f32 %v7204_v52, %v433_v49 }
 0x261   :  { %v508_v47 = vpop.f32.mrb[6].mxu1 }
 0x262   :  { %v509_v50 = vadd.f32 %v508_v47, %v7192_v46  ;;  %v6211_v51 = vpop.f32.mrb[7].mxu1  ;;  %v526_v56 = vsel %vm359_vm2, %v524_v55, -inf }
 0x264   :  { %v525_v53 = vadd.f32 %v7197_v48, %v509_v50 }
 0x266   :  { %v529_v54 = vsel %vm359_vm2, %v525_v53, -inf }
 0x267   :  { %530 = vmax.xlane.f32.xlu1 %v529_v54 }
 0x26b   :  { %527 = vmax.xlane.f32.xlu1 %v526_v56 }
 0x2f4   :  { %v531_v57 = vpop.xlane.xlu1 %530 }
 0x2f5   :  { %v533_v58 = vsub.f32 %v525_v53, %v531_v57 }
 0x2f7   :  { %v536_v59 = vmul.f32 1.442695, %v533_v58 }
 0x2f8   :  { %v528_v60 = vpop.xlane.xlu1 %527 }
 0x2f9   :  { %6951 = vpow2.f32 %v536_v59  ;;  %v532_v61 = vsub.f32 %v524_v55, %v528_v60 }
 0x2fb   :  { %v534_v62 = vmul.f32 1.442695, %v532_v61 }
 0x2fd   :  { %6953 = vpow2.f32 %v534_v62 }
 0x303   :  { %v6952_v63 = vpop.eup %6951 }
 0x304   :  { %v541_v2 = vsel %vm359_vm2, %v6952_v63, 0.0 }
 0x305   :  { %542 = vadd.xlane.f32.xlu0 %v541_v2 }
 0x307   :  { %v6954_v3 = vpop.eup %6953 }
 0x308   :  { %v538_v4 = vsel %vm359_vm2, %v6954_v3, 0.0 }
 0x309   :  { %539 = vadd.xlane.f32.xlu1 %v538_v4  ;;  %v84_v4 = vld [vmem:[%s7960_s4 + $0x40] sm:$0xff] }
 0x30a   :  { %v6741_v6 = vpack.c.bf16 %v85_v5, %v84_v4 }
 0x392   :  { %v543_v11 = vpop.xlane.xlu0 %542 }
 0x393   :  { %6955 = vrcp.f32 %v543_v11  ;;  %v86_v11 = vld [vmem:[%s7960_s4 + $0x50] sm:$0xff] }
 0x396   :  { %v540_v12 = vpop.xlane.xlu1 %539 }
 0x397   :  { %6957 = vrcp.f32 %v540_v12  ;;  %v87_v12 = vld [vmem:[%s7960_s4 + $0x58] sm:$0xff] }
 0x39d   :  { %v6956_v15 = vpop.eup %6955 }
 0x39e   :  { %v547_v16 = vmul.f32 %v6956_v15, %v6952_v63  ;;  %v6745_v15 = vpack.c.bf16 %v87_v12, %v86_v11  ;;  %v90_v12 = vld [vmem:[%s7960_s4 + $0x70] sm:$0xff] }
 0x3a0   :  { %6220 = vmatmul.mubr.msk.f32.vlgmr.msra.gmra.mrb[8].mxu1 %vm359_vm2, %v547_v16  ;;  %v116_v16 = vld [vmem:[%s7961_s6 + $0x40] sm:$0xff] }
 0x3a1   :  { %v6958_v20 = vpop.eup %6957  ;;  %6728 = vmatpush3.bf16.msra.mxu1 %v6725_v7  ;;  %6241 = vmatprep.mubr.msk.f32.mxu1 %vm52_vm0, %v7150_v30 }
 0x3a2   :  { %v546_v21 = vmul.f32 %v6958_v20, %v6954_v3  ;;  %6730 = vmatprep.subr.bf16.mxu1 %v6729_v17  ;;  %v119_v20 = vld [vmem:[%s7961_s6 + $0x58] sm:$0xff] }
 0x3a4   :  { %6215 = vmatmul.mubr.msk.f32.vlgmr.msra.gmra.mrb[2].mxu0 %vm359_vm2, %v546_v21  ;;  %v6761_v21 = vpack.c.bf16 %v119_v20, %v118_v19  ;;  %v120_v19 = vld [vmem:[%s7961_s6 + $0x60] sm:$0xff]  ;;  %v121_v20 = vld [vmem:[%s7961_s6 + $0x68] sm:$0xff] }
 0x3a5   :  { %6720 = vmatpush3.bf16.msra.mxu0 %v6717_v10  ;;  %6732 = vmatpush3.bf16.msra.mxu1 %v6729_v17  ;;  %v117_v17 = vld [vmem:[%s7961_s6 + $0x48] sm:$0xff] }
 0x3a6   :  { %6230 = vmatprep.mubr.msk.f32.mxu0 %vm52_vm0, %v7150_v30  ;;  %6722 = vmatprep.subr.bf16.mxu0 %v6721_v22  ;;  %v6757_v18 = vpack.c.bf16 %v117_v17, %v116_v16 }
 0x3a7   :  { %6255 = vmatprep.subr.mxu1 %v7033_v37 }
 0x3a8   :  { %6242 = vmatmul.mubr.msk.f32.vlgmr.msra.gmra.mrb[10].mxu1 %vm52_vm0, %v7163_v35 }
 0x3a9   :  { %6724 = vmatpush3.bf16.msra.mxu0 %v6721_v22  ;;  %6257 = vmatprep.mubr.msk.f32.mxu1 %vm7034_vm1, %v7033_v37  ;;  %v125_v22 = vld [vmem:[%s7966_s7 + $0x8] sm:$0xff] }
 0x3aa   :  { %6734 = vmatprep.subr.bf16.mxu0 %v6733_v25 }
 0x3ac   :  { %6231 = vmatmul.mubr.msk.f32.vlgmr.msra.gmra.mrb[4].mxu0 %vm52_vm0, %v7163_v35 }
 0x3ad   :  { %6736 = vmatpush3.bf16.msra.mxu0 %v6733_v25  ;;  %6252 = vmatprep.mubr.msk.f32.mxu0 %vm52_vm0, %v7150_v30  ;;  %v100_v25 = vld [vmem:[%s7962_s5 + $0x40] sm:$0xff] }
 0x3ae   :  { %6738 = vmatprep.subr.bf16.mxu0 %v6737_v28 }
 0x3b1   :  { %6740 = vmatpush3.bf16.msra.mxu0 %v6737_v28  ;;  %v6749_v28 = vpack.c.bf16 %v101_v26, %v100_v25  ;;  %v104_v25 = vld [vmem:[%s7962_s5 + $0x60] sm:$0xff]  ;;  %v105_v26 = vld [vmem:[%s7962_s5 + $0x68] sm:$0xff] }
 0x3b2   :  { %6265 = vmatprep.subr.mxu0 %v7033_v37 }
 0x3b4   :  { %6253 = vmatmul.mubr.msk.f32.vlgmr.msra.gmra.mrb[6].mxu0 %vm52_vm0, %v7163_v35 }
 0x3b5   :  { %6267 = vmatprep.mubr.msk.f32.mxu0 %vm7034_vm1, %v7033_v37 }
 0x473   :  { %v7268_v29 = vpop.f32.mrb[8].mxu1 }
 0x474   :  { %v6221_v31 = vpop.f32.mrb[9].mxu1 }
 0x477   :  { %v7270_v32 = vpop.f32.mrb[2].mxu0 }
 0x478   :  { %v6216_v33 = vpop.f32.mrb[3].mxu0 }
 0x47b   :  { %v6243_v34 = vpop.f32.mrb[10].mxu1 }
 0x47c   :  { %v835_v36 = vpop.f32.mrb[11].mxu1 }
 0x47d   :  { %6256 = vmatpush3.xpose.msk.msra.mxu1 %vm359_vm2, %v835_v36  ;;  %v103_v36 = vld [vmem:[%s7962_s5 + $0x58] sm:$0xff] }
 0x47e   :  { %6260 = vmatprep.subr.mxu1 %v7033_v37 }
 0x47f   :  { %v6232_v38 = vpop.f32.mrb[4].mxu0 }
 0x480   :  { %v760_v39 = vpop.f32.mrb[5].mxu0 }
 0x481   :  { %6258 = vmatmul.mubr.msk.f32.vlgmr.msra.gmra.mrb[12].mxu1 %vm359_vm2, %v760_v39 }
 0x482   :  { %6261 = vmatpush3.xpose.msk.msra.mxu1 %vm359_vm2, %v6243_v34  ;;  %6262 = vmatprep.mubr.msk.f32.mxu1 %vm7034_vm1, %v7033_v37  ;;  %v102_v34 = vld [vmem:[%s7962_s5 + $0x50] sm:$0xff] }
 0x483   :  { %6270 = vmatprep.subr.mxu1 %v7033_v37 }
 0x485   :  { %6263 = vmatmul.mubr.msk.f32.vlgmr.msra.gmra.mrb[14].mxu1 %vm359_vm2, %v6232_v38  ;;  %v6753_v38 = vpack.c.bf16 %v103_v36, %v102_v34 }
 0x486   :  { %6272 = vmatprep.mubr.msk.f32.mxu1 %vm7034_vm1, %v7033_v37 }
 0x487   :  { %v6254_v40 = vpop.f32.mrb[6].mxu0 }
 0x488   :  { %v910_v41 = vpop.f32.mrb[7].mxu0  ;;  %6271 = vmatpush3.msra.mxu1 %v6254_v40 }
 0x489   :  { %6266 = vmatpush3.msra.mxu0 %v910_v41  ;;  %6742 = vmatprep.subr.bf16.mxu1 %v6741_v6 }
 0x48a   :  { %6275 = vmatprep.subr.mxu0 %v125_v22 }
 0x554   :  { %v991_v43 = vpop.f32.mrb[12].mxu1 }
 0x555   :  { %v992_v44 = vadd.f32 %v991_v43, %v7285_v42  ;;  %v6259_v45 = vpop.f32.mrb[13].mxu1 }
 0x557   :  { %v1071_v47 = vadd.f32 %v7204_v52, %v992_v44 }
 0x558   :  { %v1067_v49 = vpop.f32.mrb[14].mxu1 }
 0x559   :  { %v1068_v50 = vadd.f32 %v1067_v49, %v7285_v42  ;;  %v6264_v51 = vpop.f32.mrb[15].mxu1  ;;  %v1073_v53 = vsel %vm359_vm2, %v1071_v47, -inf }
 0x55a   :  { %1074 = vmax.xlane.f32.xlu0 %v1073_v53 }
 0x55b   :  { %v1072_v54 = vadd.f32 %v7197_v48, %v1068_v50 }
 0x55d   :  { %v1076_v55 = vsel %vm359_vm2, %v1072_v54, -inf }
 0x55e   :  { %1077 = vmax.xlane.f32.xlu1 %v1076_v55 }
 0x5e7   :  { %v1075_v56 = vpop.xlane.xlu0 %1074 }
 0x5e8   :  { %v1079_v57 = vsub.f32 %v1071_v47, %v1075_v56 }
 0x5ea   :  { %v1081_v58 = vmul.f32 1.442695, %v1079_v57 }
 0x5eb   :  { %v1078_v59 = vpop.xlane.xlu1 %1077 }
 0x5ec   :  { %6959 = vpow2.f32 %v1081_v58  ;;  %v1080_v60 = vsub.f32 %v1072_v54, %v1078_v59 }
 0x5ee   :  { %v1083_v61 = vmul.f32 1.442695, %v1080_v60 }
 0x5f0   :  { %6961 = vpow2.f32 %v1083_v61 }
 0x5f6   :  { %v6960_v62 = vpop.eup %6959 }
 0x5f7   :  { %v1085_v63 = vsel %vm359_vm2, %v6960_v62, 0.0 }
 0x5f8   :  { %1086 = vadd.xlane.f32.xlu0 %v1085_v63 }
 0x5fa   :  { %v6962_v2 = vpop.eup %6961 }
 0x5fb   :  { %v1088_v3 = vsel %vm359_vm2, %v6962_v2, 0.0 }
 0x5fc   :  { %1089 = vadd.xlane.f32.xlu1 %v1088_v3 }
 0x685   :  { %v1087_v7 = vpop.xlane.xlu0 %1086 }
 0x686   :  { %6963 = vrcp.f32 %v1087_v7  ;;  %v89_v7 = vld [vmem:[%s7960_s4 + $0x68] sm:$0xff] }
 0x689   :  { %v1090_v8 = vpop.xlane.xlu1 %1089 }
 0x68a   :  { %6965 = vrcp.f32 %v1090_v8 }
 0x690   :  { %v6964_v9 = vpop.eup %6963 }
 0x691   :  { %v1093_v10 = vmul.f32 %v6964_v9, %v6960_v62  ;;  %v126_v9 = vld [vmem:[%s7966_s7 + $0x10] sm:$0xff] }
 0x693   :  { %6268 = vmatmul.mubr.msk.f32.vlgmr.msra.gmra.mrb[8].mxu0 %vm359_vm2, %v1093_v10 }
 0x694   :  { %v6966_v13 = vpop.eup %6965  ;;  %6276 = vmatpush3.msra.mxu0 %v125_v22  ;;  %v122_v22 = vld [vmem:[%s7961_s6 + $0x70] sm:$0xff] }
 0x695   :  { %v1094_v14 = vmul.f32 %v6966_v13, %v6962_v2  ;;  %6280 = vmatprep.subr.mxu0 %v124_v23  ;;  %v91_v13 = vld [vmem:[%s7960_s4 + $0x78] sm:$0xff] }
 0x696   :  { %v6769_v17 = vpack.c.bf16 %v91_v13, %v90_v12  ;;  %v127_v12 = vld [vmem:[%s7966_s7 + $0x18] sm:$0xff] }
 0x697   :  { %6273 = vmatmul.mubr.msk.f32.vlgmr.msra.gmra.mrb[16].mxu1 %vm359_vm2, %v1094_v14 }
 0x698   :  { %6744 = vmatpush3.bf16.msra.mxu1 %v6741_v6  ;;  %6293 = vmatprep.mubr.msk.f32.mxu1 %vm52_vm0, %v7150_v30  ;;  %v88_v6 = vld [vmem:[%s7960_s4 + $0x60] sm:$0xff] }
 0x699   :  { %6746 = vmatprep.subr.bf16.mxu1 %v6745_v15  ;;  %v6765_v8 = vpack.c.bf16 %v89_v7, %v88_v6 }
 0x69c   :  { %6748 = vmatpush3.bf16.msra.mxu1 %v6745_v15 }
 0x69d   :  { %6758 = vmatprep.subr.bf16.mxu1 %v6757_v18 }
 0x69f   :  { %6294 = vmatmul.mubr.msk.f32.vlgmr.msra.gmra.mrb[18].mxu1 %vm52_vm0, %v7163_v35 }
 0x6a0   :  { %6760 = vmatpush3.bf16.msra.mxu1 %v6757_v18  ;;  %6315 = vmatprep.mubr.msk.f32.mxu1 %vm52_vm0, %v7150_v30 }
 0x6a1   :  { %6762 = vmatprep.subr.bf16.mxu1 %v6761_v21 }
 0x6a4   :  { %6764 = vmatpush3.bf16.msra.mxu1 %v6761_v21  ;;  %v6781_v21 = vpack.c.bf16 %v121_v20, %v120_v19 }
 0x6a5   :  { %6323 = vmatprep.subr.mxu1 %v7033_v37 }
 0x6a7   :  { %6316 = vmatmul.mubr.msk.f32.vlgmr.msra.gmra.mrb[20].mxu1 %vm52_vm0, %v7163_v35 }
 0x6a8   :  { %6325 = vmatprep.mubr.msk.f32.mxu1 %vm7034_vm1, %v7033_v37 }
 0x766   :  { %v1164_v24 = vpop.f32.mrb[8].mxu0 }
 0x767   :  { %v6269_v27 = vpop.f32.mrb[9].mxu0  ;;  %6277 = vmatprep.mubr.msk.f32.mxu0 %vm359_vm2, %v1164_v24 }
 0x768   :  { %v6773_v27 = vpack.c.bf16 %v105_v26, %v104_v25  ;;  %v2692_v25 = vld [vmem:[%s7967_s9 + $0x10] sm:$0xff] }
 0x76a   :  { %v1237_v31 = vpop.f32.mrb[16].mxu1 }
 0x76b   :  { %v6274_v33 = vpop.f32.mrb[17].mxu1  ;;  %6278 = vmatmul.mubr.msk.f32.vlgmr.msra.gmra.mrb[10].mxu0 %vm359_vm2, %v1237_v31  ;;  %v107_v31 = vld [vmem:[%s7962_s5 + $0x78] sm:$0xff] }
 0x76c   :  { %6281 = vmatpush3.msra.mxu0 %v124_v23  ;;  %6282 = vmatprep.mubr.msk.f32.mxu0 %vm359_vm2, %v7270_v32  ;;  %v123_v23 = vld [vmem:[%s7961_s6 + $0x78] sm:$0xff] }
 0x76d   :  { %6750 = vmatprep.subr.bf16.mxu0 %v6749_v28  ;;  %v6785_v24 = vpack.c.bf16 %v123_v23, %v122_v22 }
 0x772   :  { %v6295_v39 = vpop.f32.mrb[18].mxu1 }
 0x773   :  { %v1469_v40 = vpop.f32.mrb[19].mxu1  ;;  %6283 = vmatmul.mubr.msk.f32.vlgmr.msra.gmra.mrb[10].mxu0 %vm359_vm2, %v7268_v29  ;;  %v7376_v29 = vld [vmem:[%s7964_s1 + $0x10] sm:$0xff] }
 0x774   :  { %6752 = vmatpush3.bf16.msra.mxu0 %v6749_v28  ;;  %6304 = vmatprep.mubr.msk.f32.mxu0 %vm52_vm0, %v7150_v30  ;;  %v106_v28 = vld [vmem:[%s7962_s5 + $0x70] sm:$0xff] }
 0x775   :  { %6754 = vmatprep.subr.bf16.mxu0 %v6753_v38 }
 0x778   :  { %6756 = vmatpush3.bf16.msra.mxu0 %v6753_v38  ;;  %v6777_v38 = vpack.c.bf16 %v107_v31, %v106_v28  ;;  %v2777_v31 = vld [vmem:[%s7968_s10] sm:$0xff] }
 0x779   :  { %6318 = vmatprep.subr.mxu0 %v7033_v37 }
 0x77a   :  { %v6317_v32 = vpop.f32.mrb[20].mxu1 }
 0x77b   :  { %6305 = vmatmul.mubr.msk.f32.vlgmr.msra.gmra.mrb[12].mxu0 %vm52_vm0, %v7163_v35  ;;  %v1619_v41 = vpop.f32.mrb[21].mxu1 }
 0x77c   :  { %6320 = vmatprep.mubr.msk.f32.mxu0 %vm7034_vm1, %v7033_v37 }
 0x84e   :  { %v6306_v43 = vpop.f32.mrb[12].mxu0 }
 0x84f   :  { %v1544_v44 = vpop.f32.mrb[13].mxu0  ;;  %6324 = vmatpush3.xpose.msk.msra.mxu1 %vm359_vm2, %v6306_v43 }
 0x850   :  { %6319 = vmatpush3.xpose.msk.msra.mxu0 %vm359_vm2, %v1544_v44  ;;  %6333 = vmatprep.subr.mxu1 %v7033_v37 }
 0x851   :  { %6328 = vmatprep.subr.mxu0 %v7033_v37 }
 0x852   :  { %6326 = vmatmul.mubr.msk.f32.vlgmr.msra.gmra.mrb[22].mxu1 %vm359_vm2, %v6295_v39 }
 0x853   :  { %6321 = vmatmul.mubr.msk.f32.vlgmr.msra.gmra.mrb[14].mxu0 %vm359_vm2, %v1469_v40  ;;  %6334 = vmatpush3.msra.mxu1 %v6317_v32 }
 0x854   :  { %6329 = vmatpush3.msra.mxu0 %v1619_v41  ;;  %6335 = vmatprep.mubr.msk.f32.mxu1 %vm7034_vm1, %v7033_v37 }
 0x855   :  { %6330 = vmatprep.mubr.msk.f32.mxu0 %vm7034_vm1, %v7033_v37  ;;  %6766 = vmatprep.subr.bf16.mxu1 %v6765_v8 }
 0x856   :  { %6338 = vmatprep.subr.mxu0 %v126_v9 }
 0x925   :  { %v1776_v45 = vpop.f32.mrb[22].mxu1 }
 0x926   :  { %v1777_v47 = vadd.f32 %v1776_v45, %v7376_v29  ;;  %v1700_v49 = vpop.f32.mrb[14].mxu0  ;;  %v6327_v50 = vpop.f32.mrb[23].mxu1 }
 0x927   :  { %v1701_v51 = vadd.f32 %v1700_v49, %v7376_v29  ;;  %v6322_v53 = vpop.f32.mrb[15].mxu0 }
 0x928   :  { %v1781_v54 = vadd.f32 %v7197_v48, %v1777_v47 }
 0x929   :  { %v1780_v55 = vadd.f32 %v7204_v52, %v1701_v51 }
 0x92a   :  { %v1785_v56 = vsel %vm359_vm2, %v1781_v54, -inf }
 0x92b   :  { %1786 = vmax.xlane.f32.xlu1 %v1785_v56  ;;  %v1782_v57 = vsel %vm359_vm2, %v1780_v55, -inf }
 0x92c   :  { %1783 = vmax.xlane.f32.xlu0 %v1782_v57 }
 0x9b8   :  { %v1787_v58 = vpop.xlane.xlu1 %1786 }
 0x9b9   :  { %v1789_v59 = vsub.f32 %v1781_v54, %v1787_v58  ;;  %v1784_v60 = vpop.xlane.xlu0 %1783 }
 0x9ba   :  { %v1788_v61 = vsub.f32 %v1780_v55, %v1784_v60 }
 0x9bb   :  { %v1792_v62 = vmul.f32 1.442695, %v1789_v59 }
 0x9bc   :  { %v1790_v63 = vmul.f32 1.442695, %v1788_v61 }
 0x9bd   :  { %6967 = vpow2.f32 %v1792_v62 }
 0x9be   :  { %6969 = vpow2.f32 %v1790_v63 }
 0x9c7   :  { %v6968_v2 = vpop.eup %6967 }
 0x9c8   :  { %v6970_v3 = vpop.eup %6969  ;;  %v1797_v4 = vsel %vm359_vm2, %v6968_v2, 0.0 }
 0x9c9   :  { %1798 = vadd.xlane.f32.xlu1 %v1797_v4  ;;  %v1794_v5 = vsel %vm359_vm2, %v6970_v3, 0.0 }
 0x9ca   :  { %1795 = vadd.xlane.f32.xlu0 %v1794_v5 }
 0xa56   :  { %v1799_v10 = vpop.xlane.xlu1 %1798 }
 0xa57   :  { %6971 = vrcp.f32 %v1799_v10  ;;  %v1796_v11 = vpop.xlane.xlu0 %1795 }
 0xa58   :  { %6973 = vrcp.f32 %v1796_v11 }
 0xa61   :  { %v6972_v14 = vpop.eup %6971 }
 0xa62   :  { %v6974_v15 = vpop.eup %6973  ;;  %v1803_v16 = vmul.f32 %v6972_v14, %v6968_v2 }
 0xa63   :  { %v1802_v18 = vmul.f32 %v6974_v15, %v6970_v3 }
 0xa64   :  { %6336 = vmatmul.mubr.msk.f32.vlgmr.msra.gmra.mrb[24].mxu1 %vm359_vm2, %v1803_v16 }
 0xa65   :  { %6768 = vmatpush3.bf16.msra.mxu1 %v6765_v8  ;;  %6331 = vmatmul.mubr.msk.f32.vlgmr.msra.gmra.mrb[16].mxu0 %vm359_vm2, %v1802_v18 }
 0xa66   :  { %6351 = vmatprep.mubr.msk.f32.mxu1 %vm52_vm0, %v7150_v30  ;;  %6770 = vmatprep.subr.bf16.mxu1 %v6769_v17 }
 0xa67   :  { %6339 = vmatpush3.msra.mxu0 %v126_v9 }
 0xa68   :  { %6774 = vmatprep.subr.bf16.mxu0 %v6773_v27 }
 0xa69   :  { %6772 = vmatpush3.bf16.msra.mxu1 %v6769_v17 }
 0xa6a   :  { %6782 = vmatprep.subr.bf16.mxu1 %v6781_v21 }
 0xa6c   :  { %6352 = vmatmul.mubr.msk.f32.vlgmr.msra.gmra.mrb[26].mxu1 %vm52_vm0, %v7163_v35 }
 0xa6d   :  { %6784 = vmatpush3.bf16.msra.mxu1 %v6781_v21  ;;  %6373 = vmatprep.mubr.msk.f32.mxu1 %vm52_vm0, %v7150_v30 }
 0xa6e   :  { %6786 = vmatprep.subr.bf16.mxu1 %v6785_v24 }
 0xa71   :  { %6788 = vmatpush3.bf16.msra.mxu1 %v6785_v24 }
 0xa72   :  { %6386 = vmatprep.subr.mxu1 %v7033_v37 }
 0xa74   :  { %6374 = vmatmul.mubr.msk.f32.vlgmr.msra.gmra.mrb[28].mxu1 %vm52_vm0, %v7163_v35 }
 0xa75   :  { %6388 = vmatprep.mubr.msk.f32.mxu1 %vm7034_vm1, %v7033_v37 }
 0xb37   :  { %v1946_v33 = vpop.f32.mrb[24].mxu1 }
 0xb38   :  { %v1873_v34 = vpop.f32.mrb[16].mxu0  ;;  %v6337_v36 = vpop.f32.mrb[25].mxu1 }
 0xb39   :  { %v6332_v39 = vpop.f32.mrb[17].mxu0  ;;  %6340 = vmatprep.mubr.msk.f32.mxu0 %vm359_vm2, %v1873_v34  ;;  %v2779_v34 = vld [vmem:[%s7968_s10 + $0x10] sm:$0xff] }
 0xb3a   :  { %6341 = vmatmul.mubr.msk.f32.vlgmr.msra.gmra.mrb[10].mxu0 %vm359_vm2, %v1946_v33  ;;  %v2778_v33 = vld [vmem:[%s7968_s10 + $0x8] sm:$0xff] }
 0xb3b   :  { %6776 = vmatpush3.bf16.msra.mxu0 %v6773_v27  ;;  %6362 = vmatprep.mubr.msk.f32.mxu0 %vm52_vm0, %v7150_v30  ;;  %v7460_v30 = vld [vmem:[%s7964_s1 + $0x18] sm:$0xff]  ;;  %v6797_v36 = vpack.c.bf16 %v2778_v33, %v2777_v31 }
 0xb3c   :  { %6778 = vmatprep.subr.bf16.mxu0 %v6777_v38  ;;  %v2693_v27 = vld [vmem:[%s7967_s9 + $0x18] sm:$0xff] }
 0xb3d   :  { %v6793_v28 = vpack.c.bf16 %v2693_v27, %v2692_v25 }
 0xb3f   :  { %v6353_v40 = vpop.f32.mrb[26].mxu1  ;;  %6780 = vmatpush3.bf16.msra.mxu0 %v6777_v38  ;;  %v2780_v38 = vld [vmem:[%s7968_s10 + $0x18] sm:$0xff] }
 0xb40   :  { %v2099_v32 = vpop.f32.mrb[27].mxu1  ;;  %6376 = vmatprep.subr.mxu0 %v7033_v37  ;;  %v6801_v39 = vpack.c.bf16 %v2780_v38, %v2779_v34 }
 0xb42   :  { %6363 = vmatmul.mubr.msk.f32.vlgmr.msra.gmra.mrb[18].mxu0 %vm52_vm0, %v7163_v35 }
 0xb43   :  { %6378 = vmatprep.mubr.msk.f32.mxu0 %vm7034_vm1, %v7033_v37 }
 0xb47   :  { %v6375_v41 = vpop.f32.mrb[28].mxu1 }
 0xb48   :  { %v2249_v43 = vpop.f32.mrb[29].mxu1 }
 0xb49   :  { %6387 = vmatpush3.msra.mxu1 %v2249_v43 }
 0xc15   :  { %v6364_v44 = vpop.f32.mrb[18].mxu0 }
 0xc16   :  { %v2174_v45 = vpop.f32.mrb[19].mxu0 }
 0xc17   :  { %6377 = vmatpush3.xpose.msk.msra.mxu0 %vm359_vm2, %v2174_v45 }
 0xc18   :  { %6381 = vmatprep.subr.mxu0 %v7033_v37 }
 0xc1a   :  { %6379 = vmatmul.mubr.msk.f32.vlgmr.msra.gmra.mrb[20].mxu0 %vm359_vm2, %v2099_v32  ;;  %v2782_v32 = vld [vmem:[%s7968_s10 + $0x28] sm:$0xff] }
 0xc1b   :  { %6382 = vmatpush3.xpose.msk.msra.mxu0 %vm359_vm2, %v6364_v44  ;;  %6383 = vmatprep.mubr.msk.f32.mxu0 %vm7034_vm1, %v7033_v37 }
 0xc1c   :  { %6391 = vmatprep.subr.mxu0 %v7033_v37 }
 0xc1e   :  { %6384 = vmatmul.mubr.msk.f32.vlgmr.msra.gmra.mrb[22].mxu0 %vm359_vm2, %v6353_v40  ;;  %v2781_v40 = vld [vmem:[%s7968_s10 + $0x20] sm:$0xff] }
 0xc1f   :  { %6392 = vmatpush3.msra.mxu0 %v6375_v41  ;;  %6393 = vmatprep.mubr.msk.f32.mxu0 %vm7034_vm1, %v7033_v37  ;;  %v6805_v41 = vpack.c.bf16 %v2782_v32, %v2781_v40  ;;  %v5796_v40 = vld [vmem:[%s7962_s5 + $0x90] sm:$0xff]  ;;  %v5797_v32 = vld [vmem:[%s7962_s5 + $0x98] sm:$0xff] }
 0xc20   :  { %6396 = vmatprep.subr.mxu0 %v127_v12 }
 0xced   :  { %v2330_v35 = vpop.f32.mrb[20].mxu0 }
 0xcee   :  { %v2331_v47 = vadd.f32 %v2330_v35, %v7460_v30  ;;  %v6380_v49 = vpop.f32.mrb[21].mxu0 }
 0xcf0   :  { %v2410_v50 = vadd.f32 %v7204_v52, %v2331_v47 }
 0xcf1   :  { %v2406_v51 = vpop.f32.mrb[22].mxu0 }
 0xcf2   :  { %v2407_v53 = vadd.f32 %v2406_v51, %v7460_v30  ;;  %v6385_v54 = vpop.f32.mrb[23].mxu0  ;;  %v2412_v55 = vsel %vm359_vm2, %v2410_v50, -inf }
 0xcf3   :  { %2413 = vmax.xlane.f32.xlu0 %v2412_v55 }
 0xcf4   :  { %v2411_v56 = vadd.f32 %v7197_v48, %v2407_v53  ;;  %v5771_v53 = vld [vmem:[%s7969_s8] ss:$0 sm:$0xff] }
 0xcf6   :  { %v2415_v57 = vsel %vm359_vm2, %v2411_v56, -inf }
 0xcf7   :  { %2416 = vmax.xlane.f32.xlu1 %v2415_v57 }
 0xd80   :  { %v2414_v58 = vpop.xlane.xlu0 %2413 }
 0xd81   :  { %v2418_v59 = vsub.f32 %v2410_v50, %v2414_v58  ;;  %v2783_v58 = vld [vmem:[%s7968_s10 + $0x30] sm:$0xff] }
 0xd83   :  { %v2420_v60 = vmul.f32 1.442695, %v2418_v59  ;;  %v2784_v59 = vld [vmem:[%s7968_s10 + $0x38] sm:$0xff] }
 0xd84   :  { %v2417_v61 = vpop.xlane.xlu1 %2416 }
 0xd85   :  { %6975 = vpow2.f32 %v2420_v60  ;;  %v2419_v62 = vsub.f32 %v2411_v56, %v2417_v61  ;;  %v6809_v60 = vpack.c.bf16 %v2784_v59, %v2783_v58 }
 0xd87   :  { %v2422_v63 = vmul.f32 1.442695, %v2419_v62 }
 0xd89   :  { %6977 = vpow2.f32 %v2422_v63 }
 0xd8f   :  { %v6976_v2 = vpop.eup %6975 }
 0xd90   :  { %v2424_v3 = vsel %vm359_vm2, %v6976_v2, 0.0 }
 0xd91   :  { %2425 = vadd.xlane.f32.xlu0 %v2424_v3 }
 0xd93   :  { %v6978_v4 = vpop.eup %6977 }
 0xd94   :  { %v2427_v5 = vsel %vm359_vm2, %v6978_v4, 0.0 }
 0xd95   :  { %2428 = vadd.xlane.f32.xlu1 %v2427_v5 }
 0xe1e   :  { %v2426_v6 = vpop.xlane.xlu0 %2425 }
 0xe1f   :  { %6979 = vrcp.f32 %v2426_v6 }
 0xe22   :  { %v2429_v7 = vpop.xlane.xlu1 %2428 }
 0xe23   :  { %6981 = vrcp.f32 %v2429_v7 }
 0xe29   :  { %v6980_v8 = vpop.eup %6979 }
 0xe2a   :  { %v2432_v9 = vmul.f32 %v6980_v8, %v6976_v2 }
 0xe2c   :  { %6389 = vmatmul.mubr.msk.f32.vlgmr.msra.gmra.mrb[30].mxu1 %vm359_vm2, %v2432_v9 }
 0xe2d   :  { %v6982_v10 = vpop.eup %6981 }
 0xe2e   :  { %v2433_v11 = vmul.f32 %v6982_v10, %v6978_v4 }
 0xe30   :  { %6394 = vmatmul.mubr.msk.f32.vlgmr.msra.gmra.mrb[24].mxu0 %vm359_vm2, %v2433_v11  ;;  %v5778_v11 = vld [vmem:[%s7960_s4 + $0x80] sm:$0xff] }
 0xe31   :  { %6397 = vmatpush3.msra.mxu0 %v127_v12  ;;  %v5779_v12 = vld [vmem:[%s7960_s4 + $0x88] sm:$0xff] }
 0xe32   :  { %6798 = vmatprep.subr.bf16.mxu0 %v6797_v36 }
 0xeff   :  { %v2503_v13 = vpop.f32.mrb[30].mxu1 }
 0xf00   :  { %v6390_v14 = vpop.f32.mrb[31].mxu1  ;;  %6398 = vmatprep.mubr.msk.f32.mxu0 %vm359_vm2, %v2503_v13  ;;  %v6813_v13 = vpack.c.bf16 %v5779_v12, %v5778_v11  ;;  %v5783_v11 = vld [vmem:[%s7960_s4 + $0xa8] sm:$0xff] }
 0xf01   :  { %v5810_v14 = vld [vmem:[%s7961_s6 + $0x80] sm:$0xff] }
 0xf03   :  { %v2576_v15 = vpop.f32.mrb[24].mxu0 }
 0xf04   :  { %v6395_v16 = vpop.f32.mrb[25].mxu0  ;;  %6399 = vmatmul.mubr.msk.f32.vlgmr.msra.gmra.mrb[10].mxu0 %vm359_vm2, %v2576_v15  ;;  %v5811_v15 = vld [vmem:[%s7961_s6 + $0x88] sm:$0xff] }
 0xf05   :  { %6800 = vmatpush3.bf16.msra.mxu0 %v6797_v36  ;;  %v6829_v16 = vpack.c.bf16 %v5811_v15, %v5810_v14  ;;  %v5777_v36 = vld [vmem:[%s7963_s3 + $0x1] ss:$0 sm:$0xff]  ;;  %v5799_v14 = vld [vmem:[%s7962_s5 + $0xa8] sm:$0xff] }
 0xf06   :  { %6802 = vmatprep.subr.bf16.mxu0 %v6801_v39 }
 0xf09   :  { %6804 = vmatpush3.bf16.msra.mxu0 %v6801_v39 }
 0xf0a   :  { %6806 = vmatprep.subr.bf16.mxu0 %v6805_v41 }
 0xf0d   :  { %6808 = vmatpush3.bf16.msra.mxu0 %v6805_v41 }
 0xf0e   :  { %6810 = vmatprep.subr.bf16.mxu0 %v6809_v60 }
 0xf11   :  { %6812 = vmatpush3.bf16.msra.mxu0 %v6809_v60 }
 0xf12   :  { %6830 = vmatprep.subr.bf16.mxu0 %v6829_v16 }
 0xfd7   :  { %v6400_v17 = vpop.f32.mrb[10].mxu0 }
 0xfd8   :  { %v7478_v18 = vadd.f32 %v6400_v17, %v7108_v1  ;;  %v2652_v19 = vpop.f32.mrb[11].mxu0  ;;  %v2690_v1 = vld [vmem:[%s7967_s9] sm:$0xff]  ;;  %v5780_v17 = vld [vmem:[%s7960_s4 + $0x90] sm:$0xff] }
 0xfd9   :  { %v7481_v20 = vadd.f32 %v2652_v19, %v7103_v0  ;;  %v2691_v0 = vld [vmem:[%s7967_s9 + $0x8] sm:$0xff] }
 0xfda   :  { %v2667_v21 = vmul.f32 %v7478_v18, %v7478_v18  ;;  %v6789_v26 = vpack.c.bf16 %v2691_v0, %v2690_v1 }
 0xfdb   :  { %v2666_v22 = vmul.f32 %v7481_v20, %v7481_v20 }
 0xfdc   :  { %v2671_v23 = vsel %vm52_vm0, %v2667_v21, 0.0  ;;  %6790 = vmatprep.subr.bf16.mxu1 %v6789_v26  ;;  %v5813_v21 = vld [vmem:[%s7961_s6 + $0x98] sm:$0xff] }
 0xfdd   :  { %2672 = vadd.xlane.f32.xlu1 %v2671_v23  ;;  %v2668_v24 = vsel %vm52_vm0, %v2666_v22, 0.0  ;;  %6792 = vmatpush3.bf16.msra.mxu1 %v6789_v26  ;;  %v5794_v23 = vld [vmem:[%s7962_s5 + $0x80] sm:$0xff] }
 0xfde   :  { %2669 = vadd.xlane.f32.xlu0 %v2668_v24  ;;  %6794 = vmatprep.subr.bf16.mxu1 %v6793_v28  ;;  %v5795_v24 = vld [vmem:[%s7962_s5 + $0x88] sm:$0xff] }
 0xfdf   :  { %v6821_v1 = vpack.c.bf16 %v5795_v24, %v5794_v23  ;;  %v5800_v23 = vld [vmem:[%s7962_s5 + $0xb0] sm:$0xff]  ;;  %v5801_v24 = vld [vmem:[%s7962_s5 + $0xb8] sm:$0xff] }
 0xfe1   :  { %6796 = vmatpush3.bf16.msra.mxu1 %v6793_v28 }
 0xfe2   :  { %6814 = vmatprep.subr.bf16.mxu1 %v6813_v13 }
0x106a   :  { %v2673_v43 = vpop.xlane.xlu1 %2672 }
0x106b   :  { %v2675_v44 = vmul.f32 0.03125, %v2673_v43  ;;  %v2670_v45 = vpop.xlane.xlu0 %2669 }
0x106c   :  { %v2674_v35 = vmul.f32 0.03125, %v2670_v45 }
0x106d   :  { %v2677_v47 = vadd.f32 1e-06, %v2675_v44  ;;  %v6825_v44 = vpack.c.bf16 %v5797_v32, %v5796_v40 }
0x106e   :  { %v2676_v49 = vadd.f32 1e-06, %v2674_v35 }
0x106f   :  { %6983 = vrsqrt.f32 %v2677_v47 }
0x1070   :  { %6985 = vrsqrt.f32 %v2676_v49 }
0x1079   :  { %v6984_v50 = vpop.eup %6983 }
0x107a   :  { %v6986_v51 = vpop.eup %6985  ;;  %v2681_v54 = vmul.f32 %v6984_v50, %v7478_v18 }
0x107b   :  { %v2680_v55 = vmul.f32 %v6986_v51, %v7481_v20 }
0x107c   :  { %v2689_v57 = vmul.f32 %v5771_v53, %v2681_v54 }
0x107d   :  { %v2688_v56 = vmul.f32 %v5771_v53, %v2680_v55 }
0x107f   :  { %6409 = vmatprep.mubr.msk.f32.mxu1 %vm52_vm0, %v2688_v56 }
0x1080   :  { %6410 = vmatmul.mubr.msk.f32.vlgmr.msra.gmra.mrb[32].mxu1 %vm52_vm0, %v2689_v57 }
0x1081   :  { %6816 = vmatpush3.bf16.msra.mxu1 %v6813_v13  ;;  %v5798_v13 = vld [vmem:[%s7962_s5 + $0xa0] sm:$0xff] }
0x1082   :  { %v6845_v15 = vpack.c.bf16 %v5799_v14, %v5798_v13 }
0x1153   :  { %v6411_v61 = vpop.f32.mrb[32].mxu1 }
0x1154   :  { %v2766_v62 = vpop.f32.mrb[33].mxu1  ;;  %v2776_v2 = vmax.f32 %v6411_v61, 0.0 }
0x1155   :  { %v2775_v63 = vmax.f32 %v2766_v62, 0.0 }
0x1157   :  { %6428 = vmatprep.mubr.msk.f32.mxu0 %vm2785_vm3, %v2775_v63 }
0x1158   :  { %6429 = vmatmul.mubr.msk.f32.vlgmr.msra.gmra.mrb[26].mxu0 %vm2785_vm3, %v2776_v2 }
0x1159   :  { %6832 = vmatpush3.bf16.msra.mxu0 %v6829_v16 }
0x122b   :  { %v6430_v3 = vpop.f32.mrb[26].mxu0 }
0x122c   :  { %v7535_v4 = vadd.f32 %v6430_v3, %v7478_v18  ;;  %v2858_v5 = vpop.f32.mrb[27].mxu0  ;;  %v5781_v18 = vld [vmem:[%s7960_s4 + $0x98] sm:$0xff] }
0x122d   :  { %v7538_v6 = vadd.f32 %v2858_v5, %v7481_v20  ;;  %v6817_v19 = vpack.c.bf16 %v5781_v18, %v5780_v17  ;;  %v5812_v20 = vld [vmem:[%s7961_s6 + $0x90] sm:$0xff] }
0x122e   :  { %v2872_v7 = vmul.f32 %v7535_v4, %v7535_v4  ;;  %v6833_v22 = vpack.c.bf16 %v5813_v21, %v5812_v20  ;;  %v5784_v18 = vld [vmem:[%s7960_s4 + $0xb0] sm:$0xff] }
0x122f   :  { %v2871_v8 = vmul.f32 %v7538_v6, %v7538_v6  ;;  %6818 = vmatprep.subr.bf16.mxu1 %v6817_v19 }
0x1230   :  { %v2876_v9 = vsel %vm52_vm0, %v2872_v7, 0.0  ;;  %6820 = vmatpush3.bf16.msra.mxu1 %v6817_v19  ;;  %6834 = vmatprep.subr.bf16.mxu0 %v6833_v22  ;;  %v5785_v19 = vld [vmem:[%s7960_s4 + $0xb8] sm:$0xff] }
0x1231   :  { %2877 = vadd.xlane.f32.xlu1 %v2876_v9  ;;  %v2873_v10 = vsel %vm52_vm0, %v2871_v8, 0.0  ;;  %6836 = vmatpush3.bf16.msra.mxu0 %v6833_v22  ;;  %v6841_v22 = vpack.c.bf16 %v5785_v19, %v5784_v18 }
0x1232   :  { %2874 = vadd.xlane.f32.xlu0 %v2873_v10  ;;  %6474 = vmatprep.subr.mxu0 %v7033_v37 }
0x1233   :  { %6822 = vmatprep.subr.bf16.mxu1 %v6821_v1 }
0x12be   :  { %v2878_v0 = vpop.xlane.xlu1 %2877 }
0x12bf   :  { %v2880_v25 = vmul.f32 0.03125, %v2878_v0  ;;  %v2875_v26 = vpop.xlane.xlu0 %2874  ;;  %v5815_v0 = vld [vmem:[%s7961_s6 + $0xa8] sm:$0xff] }
0x12c0   :  { %v2879_v27 = vmul.f32 0.03125, %v2875_v26 }
0x12c1   :  { %v2882_v28 = vadd.f32 1e-06, %v2880_v25 }
0x12c2   :  { %v2881_v31 = vadd.f32 1e-06, %v2879_v27  ;;  %v6849_v27 = vpack.c.bf16 %v5801_v24, %v5800_v23  ;;  %v5820_v24 = vld [vmem:[%s7961_s6 + $0xd0] sm:$0xff] }
0x12c3   :  { %6987 = vrsqrt.f32 %v2882_v28 }
0x12c4   :  { %6989 = vrsqrt.f32 %v2881_v31  ;;  %v5816_v31 = vld [vmem:[%s7961_s6 + $0xb0] sm:$0xff] }
0x12cd   :  { %v6988_v33 = vpop.eup %6987 }
0x12ce   :  { %v6990_v34 = vpop.eup %6989  ;;  %v2886_v38 = vmul.f32 %v6988_v33, %v7535_v4  ;;  %v5817_v33 = vld [vmem:[%s7961_s6 + $0xb8] sm:$0xff] }
0x12cf   :  { %v2885_v39 = vmul.f32 %v6990_v34, %v7538_v6  ;;  %v6857_v34 = vpack.c.bf16 %v5817_v33, %v5816_v31  ;;  %v5803_v31 = vld [vmem:[%s7962_s5 + $0xc8] sm:$0xff] }
0x12d0   :  { %v7590_v43 = vmul.f32 %v5777_v36, %v2886_v38 }
0x12d1   :  { %v7588_v41 = vmul.f32 %v5777_v36, %v2885_v39 }
0x12d3   :  { %6439 = vmatprep.mubr.msk.f32.mxu1 %vm52_vm0, %v7588_v41  ;;  %6461 = vmatprep.mubr.msk.f32.mxu0 %vm52_vm0, %v7588_v41 }
0x12d4   :  { %6440 = vmatmul.mubr.msk.f32.vlgmr.msra.gmra.mrb[34].mxu1 %vm52_vm0, %v7590_v43  ;;  %6462 = vmatmul.mubr.msk.f32.vlgmr.msra.gmra.mrb[28].mxu0 %vm52_vm0, %v7590_v43 }
0x12d5   :  { %6824 = vmatpush3.bf16.msra.mxu1 %v6821_v1  ;;  %6450 = vmatprep.mubr.msk.f32.mxu1 %vm52_vm0, %v7588_v41  ;;  %v5814_v1 = vld [vmem:[%s7961_s6 + $0xa0] sm:$0xff] }
0x12d6   :  { %6826 = vmatprep.subr.bf16.mxu1 %v6825_v44  ;;  %6476 = vmatprep.mubr.msk.f32.mxu0 %vm7034_vm1, %v7033_v37  ;;  %v6853_v28 = vpack.c.bf16 %v5815_v0, %v5814_v1  ;;  %v5821_v1 = vld [vmem:[%s7961_s6 + $0xd8] sm:$0xff] }
0x12d7   :  { %v6881_v0 = vpack.c.bf16 %v5821_v1, %v5820_v24  ;;  %v5824_v1 = vld [vmem:[%s7961_s6 + $0xf0] sm:$0xff] }
0x12d9   :  { %6828 = vmatpush3.bf16.msra.mxu1 %v6825_v44 }
0x12da   :  { %6464 = vmatprep.subr.mxu1 %v7033_v37 }
0x12dc   :  { %6451 = vmatmul.mubr.msk.f32.vlgmr.msra.gmra.mrb[36].mxu1 %vm52_vm0, %v7590_v43 }
0x12dd   :  { %6466 = vmatprep.mubr.msk.f32.mxu1 %vm7034_vm1, %v7033_v37 }
0x13a7   :  { %v6441_v45 = vpop.f32.mrb[34].mxu1  ;;  %v6463_v35 = vpop.f32.mrb[28].mxu0 }
0x13a8   :  { %v3023_v47 = vpop.f32.mrb[35].mxu1  ;;  %v3173_v49 = vpop.f32.mrb[29].mxu0 }
0x13a9   :  { %6475 = vmatpush3.msra.mxu0 %v3173_v49 }
0x13af   :  { %v6452_v50 = vpop.f32.mrb[36].mxu1 }
0x13b0   :  { %v3098_v51 = vpop.f32.mrb[37].mxu1 }
0x13b1   :  { %6465 = vmatpush3.xpose.msk.msra.mxu1 %vm359_vm2, %v3098_v51 }
0x13b2   :  { %6469 = vmatprep.subr.mxu1 %v7033_v37 }
0x13b4   :  { %6467 = vmatmul.mubr.msk.f32.vlgmr.msra.gmra.mrb[38].mxu1 %vm359_vm2, %v3023_v47 }
0x13b5   :  { %6470 = vmatpush3.xpose.msk.msra.mxu1 %vm359_vm2, %v6452_v50  ;;  %6471 = vmatprep.mubr.msk.f32.mxu1 %vm7034_vm1, %v7033_v37 }
0x13b6   :  { %6479 = vmatprep.subr.mxu1 %v7033_v37 }
0x13b8   :  { %6472 = vmatmul.mubr.msk.f32.vlgmr.msra.gmra.mrb[40].mxu1 %vm359_vm2, %v6441_v45 }
0x13b9   :  { %6480 = vmatpush3.msra.mxu1 %v6463_v35  ;;  %6481 = vmatprep.mubr.msk.f32.mxu1 %vm7034_vm1, %v7033_v37 }
0x13ba   :  { %6846 = vmatprep.subr.bf16.mxu1 %v6845_v15 }
0x1487   :  { %v3254_v53 = vpop.f32.mrb[38].mxu1 }
0x1488   :  { %v3255_v54 = vadd.f32 %v3254_v53, %v7192_v46  ;;  %v6468_v55 = vpop.f32.mrb[39].mxu1 }
0x148a   :  { %v3334_v56 = vadd.f32 %v7204_v52, %v3255_v54  ;;  %v7701_v54 = vld [vmem:[%s7965_s2] ss:$0 sm:$0xff] }
0x148b   :  { %v3330_v57 = vpop.f32.mrb[40].mxu1 }
0x148c   :  { %v3331_v58 = vadd.f32 %v3330_v57, %v7192_v46  ;;  %v6473_v59 = vpop.f32.mrb[41].mxu1  ;;  %v3336_v60 = vsel %vm359_vm2, %v3334_v56, -inf }
0x148d   :  { %3337 = vmax.xlane.f32.xlu1 %v3336_v60  ;;  %v7709_v60 = vld [vmem:[%s7965_s2 + $0x1] ss:$0 sm:$0xff] }
0x148e   :  { %v3335_v61 = vadd.f32 %v7197_v48, %v3331_v58  ;;  %v5782_v48 = vld [vmem:[%s7960_s4 + $0xa0] sm:$0xff] }
0x148f   :  { %v6837_v12 = vpack.c.bf16 %v5783_v11, %v5782_v48  ;;  %v5787_v48 = vld [vmem:[%s7960_s4 + $0xc8] sm:$0xff] }
0x1490   :  { %v3339_v62 = vsel %vm359_vm2, %v3335_v61, -inf }
0x1491   :  { %3340 = vmax.xlane.f32.xlu0 %v3339_v62  ;;  %6838 = vmatprep.subr.bf16.mxu0 %v6837_v12 }
0x151a   :  { %v3338_v63 = vpop.xlane.xlu1 %3337 }
0x151b   :  { %v3342_v2 = vsub.f32 %v3334_v56, %v3338_v63 }
0x151d   :  { %v3344_v3 = vmul.f32 1.442695, %v3342_v2 }
0x151e   :  { %v3341_v5 = vpop.xlane.xlu0 %3340 }
0x151f   :  { %6991 = vpow2.f32 %v3344_v3  ;;  %v3343_v7 = vsub.f32 %v3335_v61, %v3341_v5 }
0x1521   :  { %v3346_v8 = vmul.f32 1.442695, %v3343_v7 }
0x1523   :  { %6993 = vpow2.f32 %v3346_v8 }
0x1529   :  { %v6992_v52 = vpop.eup %6991 }
0x152a   :  { %v3348_v46 = vsel %vm359_vm2, %v6992_v52, 0.0 }
0x152b   :  { %3349 = vadd.xlane.f32.xlu1 %v3348_v46 }
0x152d   :  { %v6994_v9 = vpop.eup %6993 }
0x152e   :  { %v3351_v10 = vsel %vm359_vm2, %v6994_v9, 0.0 }
0x152f   :  { %3352 = vadd.xlane.f32.xlu0 %v3351_v10  ;;  %v5786_v10 = vld [vmem:[%s7960_s4 + $0xc0] sm:$0xff] }
0x1530   :  { %v6861_v11 = vpack.c.bf16 %v5787_v48, %v5786_v10  ;;  %v5790_v10 = vld [vmem:[%s7960_s4 + $0xe0] sm:$0xff]  ;;  %v5791_v48 = vld [vmem:[%s7960_s4 + $0xe8] sm:$0xff] }
0x15b8   :  { %v3350_v16 = vpop.xlane.xlu1 %3349 }
0x15b9   :  { %6995 = vrcp.f32 %v3350_v16  ;;  %v5788_v16 = vld [vmem:[%s7960_s4 + $0xd0] sm:$0xff] }
0x15bc   :  { %v3353_v17 = vpop.xlane.xlu0 %3352 }
0x15bd   :  { %6997 = vrcp.f32 %v3353_v17  ;;  %v5789_v17 = vld [vmem:[%s7960_s4 + $0xd8] sm:$0xff] }
0x15c3   :  { %v6996_v20 = vpop.eup %6995 }
0x15c4   :  { %v3356_v21 = vmul.f32 %v6996_v20, %v6992_v52  ;;  %v6865_v20 = vpack.c.bf16 %v5789_v17, %v5788_v16  ;;  %v5793_v16 = vld [vmem:[%s7960_s4 + $0xf8] sm:$0xff] }
0x15c6   :  { %6477 = vmatmul.mubr.msk.f32.vlgmr.msra.gmra.mrb[30].mxu0 %vm359_vm2, %v3356_v21  ;;  %v5818_v21 = vld [vmem:[%s7961_s6 + $0xc0] sm:$0xff] }
0x15c7   :  { %v6998_v25 = vpop.eup %6997  ;;  %6840 = vmatpush3.bf16.msra.mxu0 %v6837_v12  ;;  %6492 = vmatprep.mubr.msk.f32.mxu0 %vm52_vm0, %v7588_v41 }
0x15c8   :  { %v3357_v26 = vmul.f32 %v6998_v25, %v6994_v9  ;;  %6842 = vmatprep.subr.bf16.mxu0 %v6841_v22  ;;  %v5827_v25 = vld [vmem:[%s7966_s7 + $0x28] sm:$0xff] }
0x15ca   :  { %6482 = vmatmul.mubr.msk.f32.vlgmr.msra.gmra.mrb[42].mxu1 %vm359_vm2, %v3357_v26  ;;  %v5826_v26 = vld [vmem:[%s7966_s7 + $0x20] sm:$0xff] }
0x15cb   :  { %6844 = vmatpush3.bf16.msra.mxu0 %v6841_v22  ;;  %6848 = vmatpush3.bf16.msra.mxu1 %v6845_v15  ;;  %v5819_v22 = vld [vmem:[%s7961_s6 + $0xc8] sm:$0xff] }
0x15cc   :  { %6503 = vmatprep.mubr.msk.f32.mxu1 %vm52_vm0, %v7588_v41  ;;  %6850 = vmatprep.subr.bf16.mxu1 %v6849_v27  ;;  %v6877_v23 = vpack.c.bf16 %v5819_v22, %v5818_v21  ;;  %v5822_v22 = vld [vmem:[%s7961_s6 + $0xe0] sm:$0xff] }
0x15cd   :  { %6854 = vmatprep.subr.bf16.mxu0 %v6853_v28 }
0x15ce   :  { %6493 = vmatmul.mubr.msk.f32.vlgmr.msra.gmra.mrb[32].mxu0 %vm52_vm0, %v7590_v43 }
0x15cf   :  { %6852 = vmatpush3.bf16.msra.mxu1 %v6849_v27  ;;  %6856 = vmatpush3.bf16.msra.mxu0 %v6853_v28  ;;  %v5802_v28 = vld [vmem:[%s7962_s5 + $0xc0] sm:$0xff] }
0x15d0   :  { %6514 = vmatprep.mubr.msk.f32.mxu0 %vm52_vm0, %v7588_v41  ;;  %6858 = vmatprep.subr.bf16.mxu0 %v6857_v34 }
0x15d1   :  { %6517 = vmatprep.subr.mxu1 %v7033_v37 }
0x15d2   :  { %6504 = vmatmul.mubr.msk.f32.vlgmr.msra.gmra.mrb[44].mxu1 %vm52_vm0, %v7590_v43 }
0x15d3   :  { %6860 = vmatpush3.bf16.msra.mxu0 %v6857_v34  ;;  %6519 = vmatprep.mubr.msk.f32.mxu1 %vm7034_vm1, %v7033_v37  ;;  %v6869_v34 = vpack.c.bf16 %v5803_v31, %v5802_v28  ;;  %v5808_v31 = vld [vmem:[%s7962_s5 + $0xf0] sm:$0xff] }
0x15d4   :  { %6527 = vmatprep.subr.mxu0 %v7033_v37 }
0x15d6   :  { %6515 = vmatmul.mubr.msk.f32.vlgmr.msra.gmra.mrb[34].mxu0 %vm52_vm0, %v7590_v43 }
0x15d7   :  { %6529 = vmatprep.mubr.msk.f32.mxu0 %vm7034_vm1, %v7033_v37 }
0x1699   :  { %v7683_v36 = vpop.f32.mrb[30].mxu0 }
0x169a   :  { %v6478_v38 = vpop.f32.mrb[31].mxu0 }
0x169d   :  { %v7685_v39 = vpop.f32.mrb[42].mxu1 }
0x169e   :  { %v6483_v40 = vpop.f32.mrb[43].mxu1 }
0x16a1   :  { %v6494_v32 = vpop.f32.mrb[32].mxu0 }
0x16a2   :  { %v3570_v44 = vpop.f32.mrb[33].mxu0 }
0x16a5   :  { %v6505_v45 = vpop.f32.mrb[44].mxu1 }
0x16a6   :  { %v3645_v35 = vpop.f32.mrb[45].mxu1 }
0x16a7   :  { %6518 = vmatpush3.xpose.msk.msra.mxu1 %vm359_vm2, %v3645_v35 }
0x16a8   :  { %6522 = vmatprep.subr.mxu1 %v7033_v37 }
0x16a9   :  { %v6516_v47 = vpop.f32.mrb[34].mxu0 }
0x16aa   :  { %v3720_v49 = vpop.f32.mrb[35].mxu0  ;;  %6520 = vmatmul.mubr.msk.f32.vlgmr.msra.gmra.mrb[46].mxu1 %vm359_vm2, %v3570_v44  ;;  %v5805_v44 = vld [vmem:[%s7962_s5 + $0xd8] sm:$0xff] }
0x16ab   :  { %6523 = vmatpush3.xpose.msk.msra.mxu1 %vm359_vm2, %v6505_v45  ;;  %6528 = vmatpush3.msra.mxu0 %v3720_v49 }
0x16ac   :  { %6524 = vmatprep.mubr.msk.f32.mxu1 %vm7034_vm1, %v7033_v37  ;;  %6532 = vmatprep.subr.mxu1 %v7033_v37 }
0x16ad   :  { %6537 = vmatprep.subr.mxu0 %v5827_v25 }
0x16ae   :  { %6525 = vmatmul.mubr.msk.f32.vlgmr.msra.gmra.mrb[48].mxu1 %vm359_vm2, %v6494_v32  ;;  %v5804_v32 = vld [vmem:[%s7962_s5 + $0xd0] sm:$0xff] }
0x16af   :  { %6533 = vmatpush3.msra.mxu1 %v6516_v47  ;;  %6534 = vmatprep.mubr.msk.f32.mxu1 %vm7034_vm1, %v7033_v37  ;;  %v6873_v45 = vpack.c.bf16 %v5805_v44, %v5804_v32 }
0x16b0   :  { %6862 = vmatprep.subr.bf16.mxu1 %v6861_v11 }
0x177d   :  { %v3801_v50 = vpop.f32.mrb[46].mxu1 }
0x177e   :  { %v3802_v51 = vadd.f32 %v3801_v50, %v7285_v42  ;;  %v6521_v53 = vpop.f32.mrb[47].mxu1 }
0x1780   :  { %v3881_v55 = vadd.f32 %v7701_v54, %v3802_v51 }
0x1781   :  { %v3877_v56 = vpop.f32.mrb[48].mxu1 }
0x1782   :  { %v3878_v57 = vadd.f32 %v3877_v56, %v7285_v42  ;;  %v6526_v58 = vpop.f32.mrb[49].mxu1  ;;  %v3883_v59 = vsel %vm359_vm2, %v3881_v55, -inf }
0x1783   :  { %3884 = vmax.xlane.f32.xlu0 %v3883_v59 }
0x1784   :  { %v3882_v61 = vadd.f32 %v7709_v60, %v3878_v57 }
0x1786   :  { %v3886_v62 = vsel %vm359_vm2, %v3882_v61, -inf }
0x1787   :  { %3887 = vmax.xlane.f32.xlu1 %v3886_v62 }
0x1810   :  { %v3885_v63 = vpop.xlane.xlu0 %3884 }
0x1811   :  { %v3889_v2 = vsub.f32 %v3881_v55, %v3885_v63 }
0x1813   :  { %v3891_v3 = vmul.f32 1.442695, %v3889_v2 }
0x1814   :  { %v3888_v5 = vpop.xlane.xlu1 %3887 }
0x1815   :  { %6999 = vpow2.f32 %v3891_v3  ;;  %v3890_v42 = vsub.f32 %v3882_v61, %v3888_v5 }
0x1817   :  { %v3893_v7 = vmul.f32 1.442695, %v3890_v42 }
0x1819   :  { %7001 = vpow2.f32 %v3893_v7 }
0x181f   :  { %v7000_v8 = vpop.eup %6999 }
0x1820   :  { %v3895_v52 = vsel %vm359_vm2, %v7000_v8, 0.0 }
0x1821   :  { %3896 = vadd.xlane.f32.xlu0 %v3895_v52 }
0x1823   :  { %v7002_v46 = vpop.eup %7001 }
0x1824   :  { %v3898_v9 = vsel %vm359_vm2, %v7002_v46, 0.0 }
0x1825   :  { %3899 = vadd.xlane.f32.xlu1 %v3898_v9 }
0x18ae   :  { %v3897_v12 = vpop.xlane.xlu0 %3896 }
0x18af   :  { %7003 = vrcp.f32 %v3897_v12  ;;  %v5828_v12 = vld [vmem:[%s7966_s7 + $0x30] sm:$0xff] }
0x18b2   :  { %v3900_v13 = vpop.xlane.xlu1 %3899 }
0x18b3   :  { %7005 = vrcp.f32 %v3900_v13 }
0x18b9   :  { %v7004_v14 = vpop.eup %7003 }
0x18ba   :  { %v3903_v15 = vmul.f32 %v7004_v14, %v7000_v8 }
0x18bc   :  { %6530 = vmatmul.mubr.msk.f32.vlgmr.msra.gmra.mrb[36].mxu0 %vm359_vm2, %v3903_v15  ;;  %v5792_v15 = vld [vmem:[%s7960_s4 + $0xf0] sm:$0xff] }
0x18bd   :  { %v7006_v18 = vpop.eup %7005  ;;  %6538 = vmatpush3.msra.mxu0 %v5827_v25 }
0x18be   :  { %v3904_v19 = vmul.f32 %v7006_v18, %v7002_v46  ;;  %6542 = vmatprep.subr.mxu0 %v5826_v26 }
0x18c0   :  { %6535 = vmatmul.mubr.msk.f32.vlgmr.msra.gmra.mrb[50].mxu1 %vm359_vm2, %v3904_v19 }
0x18c1   :  { %6864 = vmatpush3.bf16.msra.mxu1 %v6861_v11  ;;  %6555 = vmatprep.mubr.msk.f32.mxu1 %vm52_vm0, %v7588_v41  ;;  %v6885_v11 = vpack.c.bf16 %v5791_v48, %v5790_v10 }
0x18c2   :  { %6866 = vmatprep.subr.bf16.mxu1 %v6865_v20 }
0x18c5   :  { %6868 = vmatpush3.bf16.msra.mxu1 %v6865_v20  ;;  %v6889_v20 = vpack.c.bf16 %v5793_v16, %v5792_v15 }
0x18c6   :  { %6878 = vmatprep.subr.bf16.mxu1 %v6877_v23 }
0x18c8   :  { %6556 = vmatmul.mubr.msk.f32.vlgmr.msra.gmra.mrb[52].mxu1 %vm52_vm0, %v7590_v43 }
0x18c9   :  { %6880 = vmatpush3.bf16.msra.mxu1 %v6877_v23  ;;  %6577 = vmatprep.mubr.msk.f32.mxu1 %vm52_vm0, %v7588_v41  ;;  %v5823_v23 = vld [vmem:[%s7961_s6 + $0xe8] sm:$0xff] }
0x18ca   :  { %6882 = vmatprep.subr.bf16.mxu1 %v6881_v0  ;;  %v6901_v24 = vpack.c.bf16 %v5823_v23, %v5822_v22  ;;  %v5891_v23 = vld [vmem:[%s7967_s9 + $0x38] sm:$0xff] }
0x18cd   :  { %6884 = vmatpush3.bf16.msra.mxu1 %v6881_v0  ;;  %v5825_v0 = vld [vmem:[%s7961_s6 + $0xf8] sm:$0xff] }
0x18ce   :  { %6585 = vmatprep.subr.mxu1 %v7033_v37  ;;  %v6905_v25 = vpack.c.bf16 %v5825_v0, %v5824_v1  ;;  %v5894_v1 = vld [vmem:[%s7968_s10 + $0x40] sm:$0xff]  ;;  %v5895_v0 = vld [vmem:[%s7968_s10 + $0x48] sm:$0xff] }
0x18d0   :  { %6578 = vmatmul.mubr.msk.f32.vlgmr.msra.gmra.mrb[54].mxu1 %vm52_vm0, %v7590_v43 }
0x18d1   :  { %6587 = vmatprep.mubr.msk.f32.mxu1 %vm7034_vm1, %v7033_v37 }
0x198f   :  { %v3974_v27 = vpop.f32.mrb[36].mxu0 }
0x1990   :  { %v6531_v33 = vpop.f32.mrb[37].mxu0  ;;  %6539 = vmatprep.mubr.msk.f32.mxu0 %vm359_vm2, %v3974_v27  ;;  %v5807_v27 = vld [vmem:[%s7962_s5 + $0xe8] sm:$0xff] }
0x1991   :  { %v5809_v33 = vld [vmem:[%s7962_s5 + $0xf8] sm:$0xff] }
0x1992   :  { %v6897_v32 = vpack.c.bf16 %v5809_v33, %v5808_v31  ;;  %v5898_v31 = vld [vmem:[%s7968_s10 + $0x60] sm:$0xff]  ;;  %v5899_v33 = vld [vmem:[%s7968_s10 + $0x68] sm:$0xff] }
0x1993   :  { %v4047_v38 = vpop.f32.mrb[50].mxu1 }
0x1994   :  { %v6536_v40 = vpop.f32.mrb[51].mxu1  ;;  %6540 = vmatmul.mubr.msk.f32.vlgmr.msra.gmra.mrb[38].mxu0 %vm359_vm2, %v4047_v38 }
0x1995   :  { %6543 = vmatpush3.msra.mxu0 %v5826_v26  ;;  %6544 = vmatprep.mubr.msk.f32.mxu0 %vm359_vm2, %v7683_v36  ;;  %v5806_v26 = vld [vmem:[%s7962_s5 + $0xe0] sm:$0xff] }
0x1996   :  { %6870 = vmatprep.subr.bf16.mxu0 %v6869_v34  ;;  %v6893_v28 = vpack.c.bf16 %v5807_v27, %v5806_v26  ;;  %v6917_v26 = vpack.c.bf16 %v5895_v0, %v5894_v1  ;;  %v5897_v27 = vld [vmem:[%s7968_s10 + $0x58] sm:$0xff] }
0x199b   :  { %v6557_v35 = vpop.f32.mrb[52].mxu1 }
0x199c   :  { %v4279_v47 = vpop.f32.mrb[53].mxu1  ;;  %6545 = vmatmul.mubr.msk.f32.vlgmr.msra.gmra.mrb[38].mxu0 %vm359_vm2, %v7685_v39 }
0x199d   :  { %6872 = vmatpush3.bf16.msra.mxu0 %v6869_v34  ;;  %6566 = vmatprep.mubr.msk.f32.mxu0 %vm52_vm0, %v7588_v41 }
0x199e   :  { %6874 = vmatprep.subr.bf16.mxu0 %v6873_v45 }
0x19a1   :  { %6876 = vmatpush3.bf16.msra.mxu0 %v6873_v45 }
0x19a2   :  { %6580 = vmatprep.subr.mxu0 %v7033_v37 }
0x19a3   :  { %v6579_v36 = vpop.f32.mrb[54].mxu1 }
0x19a4   :  { %6567 = vmatmul.mubr.msk.f32.vlgmr.msra.gmra.mrb[40].mxu0 %vm52_vm0, %v7590_v43  ;;  %v4429_v49 = vpop.f32.mrb[55].mxu1 }
0x19a5   :  { %6582 = vmatprep.mubr.msk.f32.mxu0 %vm7034_vm1, %v7033_v37 }
0x1a77   :  { %v6568_v50 = vpop.f32.mrb[40].mxu0 }
0x1a78   :  { %v4354_v51 = vpop.f32.mrb[41].mxu0  ;;  %6586 = vmatpush3.xpose.msk.msra.mxu1 %vm359_vm2, %v6568_v50 }
0x1a79   :  { %6581 = vmatpush3.xpose.msk.msra.mxu0 %vm359_vm2, %v4354_v51  ;;  %6595 = vmatprep.subr.mxu1 %v7033_v37 }
0x1a7a   :  { %6590 = vmatprep.subr.mxu0 %v7033_v37 }
0x1a7b   :  { %6588 = vmatmul.mubr.msk.f32.vlgmr.msra.gmra.mrb[56].mxu1 %vm359_vm2, %v6557_v35 }
0x1a7c   :  { %6583 = vmatmul.mubr.msk.f32.vlgmr.msra.gmra.mrb[42].mxu0 %vm359_vm2, %v4279_v47  ;;  %6596 = vmatpush3.msra.mxu1 %v6579_v36 }
0x1a7d   :  { %6591 = vmatpush3.msra.mxu0 %v4429_v49  ;;  %6597 = vmatprep.mubr.msk.f32.mxu1 %vm7034_vm1, %v7033_v37 }
0x1a7e   :  { %6592 = vmatprep.mubr.msk.f32.mxu0 %vm7034_vm1, %v7033_v37  ;;  %6886 = vmatprep.subr.bf16.mxu1 %v6885_v11 }
0x1a7f   :  { %6600 = vmatprep.subr.mxu0 %v5828_v12 }
0x1b4e   :  { %v4586_v39 = vpop.f32.mrb[56].mxu1 }
0x1b4f   :  { %v4587_v53 = vadd.f32 %v4586_v39, %v7376_v29  ;;  %v4510_v55 = vpop.f32.mrb[42].mxu0  ;;  %v6589_v56 = vpop.f32.mrb[57].mxu1 }
0x1b50   :  { %v4511_v57 = vadd.f32 %v4510_v55, %v7376_v29  ;;  %v6584_v58 = vpop.f32.mrb[43].mxu0 }
0x1b51   :  { %v4591_v59 = vadd.f32 %v7709_v60, %v4587_v53 }
0x1b52   :  { %v4590_v61 = vadd.f32 %v7701_v54, %v4511_v57 }
0x1b53   :  { %v4595_v62 = vsel %vm359_vm2, %v4591_v59, -inf }
0x1b54   :  { %4596 = vmax.xlane.f32.xlu1 %v4595_v62  ;;  %v4592_v63 = vsel %vm359_vm2, %v4590_v61, -inf }
0x1b55   :  { %4593 = vmax.xlane.f32.xlu0 %v4592_v63 }
0x1be1   :  { %v4597_v2 = vpop.xlane.xlu1 %4596 }
0x1be2   :  { %v4599_v3 = vsub.f32 %v4591_v59, %v4597_v2  ;;  %v4594_v5 = vpop.xlane.xlu0 %4593 }
0x1be3   :  { %v4598_v42 = vsub.f32 %v4590_v61, %v4594_v5 }
0x1be4   :  { %v4602_v7 = vmul.f32 1.442695, %v4599_v3 }
0x1be5   :  { %v4600_v8 = vmul.f32 1.442695, %v4598_v42 }
0x1be6   :  { %7007 = vpow2.f32 %v4602_v7 }
0x1be7   :  { %7009 = vpow2.f32 %v4600_v8 }
0x1bf0   :  { %v7008_v29 = vpop.eup %7007 }
0x1bf1   :  { %v7010_v52 = vpop.eup %7009  ;;  %v4607_v46 = vsel %vm359_vm2, %v7008_v29, 0.0 }
0x1bf2   :  { %4608 = vadd.xlane.f32.xlu1 %v4607_v46  ;;  %v4604_v9 = vsel %vm359_vm2, %v7010_v52, 0.0 }
0x1bf3   :  { %4605 = vadd.xlane.f32.xlu0 %v4604_v9  ;;  %v5829_v9 = vld [vmem:[%s7966_s7 + $0x38] sm:$0xff] }
0x1c7f   :  { %v4609_v13 = vpop.xlane.xlu1 %4608 }
0x1c80   :  { %7011 = vrcp.f32 %v4609_v13  ;;  %v4606_v14 = vpop.xlane.xlu0 %4605 }
0x1c81   :  { %7013 = vrcp.f32 %v4606_v14 }
0x1c8a   :  { %v7012_v17 = vpop.eup %7011 }
0x1c8b   :  { %v7014_v18 = vpop.eup %7013  ;;  %v4613_v19 = vmul.f32 %v7012_v17, %v7008_v29 }
0x1c8c   :  { %v4612_v21 = vmul.f32 %v7014_v18, %v7010_v52 }
0x1c8d   :  { %6598 = vmatmul.mubr.msk.f32.vlgmr.msra.gmra.mrb[58].mxu1 %vm359_vm2, %v4613_v19 }
0x1c8e   :  { %6888 = vmatpush3.bf16.msra.mxu1 %v6885_v11  ;;  %6593 = vmatmul.mubr.msk.f32.vlgmr.msra.gmra.mrb[44].mxu0 %vm359_vm2, %v4612_v21  ;;  %v5890_v21 = vld [vmem:[%s7967_s9 + $0x30] sm:$0xff] }
0x1c8f   :  { %6613 = vmatprep.mubr.msk.f32.mxu1 %vm52_vm0, %v7588_v41  ;;  %6890 = vmatprep.subr.bf16.mxu1 %v6889_v20 }
0x1c90   :  { %6601 = vmatpush3.msra.mxu0 %v5828_v12 }
0x1c91   :  { %6894 = vmatprep.subr.bf16.mxu0 %v6893_v28 }
0x1c92   :  { %6892 = vmatpush3.bf16.msra.mxu1 %v6889_v20 }
0x1c93   :  { %6902 = vmatprep.subr.bf16.mxu1 %v6901_v24 }
0x1c95   :  { %6614 = vmatmul.mubr.msk.f32.vlgmr.msra.gmra.mrb[60].mxu1 %vm52_vm0, %v7590_v43 }
0x1c96   :  { %6904 = vmatpush3.bf16.msra.mxu1 %v6901_v24  ;;  %6635 = vmatprep.mubr.msk.f32.mxu1 %vm52_vm0, %v7588_v41  ;;  %v6913_v24 = vpack.c.bf16 %v5891_v23, %v5890_v21 }
0x1c97   :  { %6906 = vmatprep.subr.bf16.mxu1 %v6905_v25 }
0x1c9a   :  { %6908 = vmatpush3.bf16.msra.mxu1 %v6905_v25  ;;  %v5896_v25 = vld [vmem:[%s7968_s10 + $0x50] sm:$0xff] }
0x1c9b   :  { %6648 = vmatprep.subr.mxu1 %v7033_v37 }
0x1c9d   :  { %6636 = vmatmul.mubr.msk.f32.vlgmr.msra.gmra.mrb[62].mxu1 %vm52_vm0, %v7590_v43 }
0x1c9e   :  { %6650 = vmatprep.mubr.msk.f32.mxu1 %vm7034_vm1, %v7033_v37 }
0x1d60   :  { %v4756_v34 = vpop.f32.mrb[58].mxu1 }
0x1d61   :  { %v4683_v38 = vpop.f32.mrb[44].mxu0  ;;  %v6599_v40 = vpop.f32.mrb[59].mxu1 }
0x1d62   :  { %v6594_v44 = vpop.f32.mrb[45].mxu0  ;;  %6602 = vmatprep.mubr.msk.f32.mxu0 %vm359_vm2, %v4683_v38 }
0x1d63   :  { %6603 = vmatmul.mubr.msk.f32.vlgmr.msra.gmra.mrb[38].mxu0 %vm359_vm2, %v4756_v34  ;;  %v6925_v34 = vpack.c.bf16 %v5899_v33, %v5898_v31 }
0x1d64   :  { %6896 = vmatpush3.bf16.msra.mxu0 %v6893_v28  ;;  %6624 = vmatprep.mubr.msk.f32.mxu0 %vm52_vm0, %v7588_v41  ;;  %v6921_v28 = vpack.c.bf16 %v5897_v27, %v5896_v25 }
0x1d65   :  { %6898 = vmatprep.subr.bf16.mxu0 %v6897_v32 }
0x1d68   :  { %v6615_v45 = vpop.f32.mrb[60].mxu1  ;;  %6900 = vmatpush3.bf16.msra.mxu0 %v6897_v32 }
0x1d69   :  { %v4909_v35 = vpop.f32.mrb[61].mxu1  ;;  %6638 = vmatprep.subr.mxu0 %v7033_v37 }
0x1d6b   :  { %6625 = vmatmul.mubr.msk.f32.vlgmr.msra.gmra.mrb[46].mxu0 %vm52_vm0, %v7590_v43 }
0x1d6c   :  { %6640 = vmatprep.mubr.msk.f32.mxu0 %vm7034_vm1, %v7033_v37 }
0x1d70   :  { %v6637_v47 = vpop.f32.mrb[62].mxu1 }
0x1d71   :  { %v5059_v36 = vpop.f32.mrb[63].mxu1 }
0x1d72   :  { %6649 = vmatpush3.msra.mxu1 %v5059_v36 }
0x1e3e   :  { %v6626_v49 = vpop.f32.mrb[46].mxu0 }
0x1e3f   :  { %v4984_v50 = vpop.f32.mrb[47].mxu0 }
0x1e40   :  { %6639 = vmatpush3.xpose.msk.msra.mxu0 %vm359_vm2, %v4984_v50 }
0x1e41   :  { %6643 = vmatprep.subr.mxu0 %v7033_v37 }
0x1e43   :  { %6641 = vmatmul.mubr.msk.f32.vlgmr.msra.gmra.mrb[48].mxu0 %vm359_vm2, %v4909_v35 }
0x1e44   :  { %6644 = vmatpush3.xpose.msk.msra.mxu0 %vm359_vm2, %v6626_v49  ;;  %6645 = vmatprep.mubr.msk.f32.mxu0 %vm7034_vm1, %v7033_v37  ;;  %v5887_v49 = vld [vmem:[%s7969_s8 + $0x1] ss:$0 sm:$0xff] }
0x1e45   :  { %6653 = vmatprep.subr.mxu0 %v7033_v37 }
0x1e47   :  { %6646 = vmatmul.mubr.msk.f32.vlgmr.msra.gmra.mrb[50].mxu0 %vm359_vm2, %v6615_v45 }
0x1e48   :  { %6654 = vmatpush3.msra.mxu0 %v6637_v47  ;;  %6655 = vmatprep.mubr.msk.f32.mxu0 %vm7034_vm1, %v7033_v37 }
0x1e49   :  { %6658 = vmatprep.subr.mxu0 %v5829_v9 }
0x1f16   :  { %v5140_v41 = vpop.f32.mrb[48].mxu0 }
0x1f17   :  { %v5141_v43 = vadd.f32 %v5140_v41, %v7460_v30  ;;  %v6642_v51 = vpop.f32.mrb[49].mxu0 }
0x1f19   :  { %v5220_v39 = vadd.f32 %v7701_v54, %v5141_v43 }
0x1f1a   :  { %v5216_v53 = vpop.f32.mrb[50].mxu0 }
0x1f1b   :  { %v5217_v55 = vadd.f32 %v5216_v53, %v7460_v30  ;;  %v6647_v56 = vpop.f32.mrb[51].mxu0  ;;  %v5222_v57 = vsel %vm359_vm2, %v5220_v39, -inf  ;;  %v5901_v53 = vld [vmem:[%s7968_s10 + $0x78] sm:$0xff] }
0x1f1c   :  { %5223 = vmax.xlane.f32.xlu0 %v5222_v57 }
0x1f1d   :  { %v5221_v58 = vadd.f32 %v7709_v60, %v5217_v55 }
0x1f1f   :  { %v5225_v59 = vsel %vm359_vm2, %v5221_v58, -inf }
0x1f20   :  { %5226 = vmax.xlane.f32.xlu1 %v5225_v59 }
0x1fa9   :  { %v5224_v61 = vpop.xlane.xlu0 %5223 }
0x1faa   :  { %v5228_v37 = vsub.f32 %v5220_v39, %v5224_v61  ;;  %v5900_v39 = vld [vmem:[%s7968_s10 + $0x70] sm:$0xff] }
0x1fab   :  { %v6929_v55 = vpack.c.bf16 %v5901_v53, %v5900_v39 }
0x1fac   :  { %v5230_v62 = vmul.f32 1.442695, %v5228_v37 }
0x1fad   :  { %v5227_v63 = vpop.xlane.xlu1 %5226 }
0x1fae   :  { %7015 = vpow2.f32 %v5230_v62  ;;  %v5229_v2 = vsub.f32 %v5221_v58, %v5227_v63 }
0x1fb0   :  { %v5232_v3 = vmul.f32 1.442695, %v5229_v2 }
0x1fb2   :  { %7017 = vpow2.f32 %v5232_v3 }
0x1fb8   :  { %v7016_v54 = vpop.eup %7015 }
0x1fb9   :  { %v5234_v30 = vsel %vm359_vm2, %v7016_v54, 0.0 }
0x1fba   :  { %5235 = vadd.xlane.f32.xlu0 %v5234_v30 }
0x1fbc   :  { %v7018_v5 = vpop.eup %7017 }
0x1fbd   :  { %v5237_v42 = vsel %vm359_vm2, %v7018_v5, 0.0 }
0x1fbe   :  { %5238 = vadd.xlane.f32.xlu1 %v5237_v42 }
0x2047   :  { %v5236_v60 = vpop.xlane.xlu0 %5235 }
0x2048   :  { %7019 = vrcp.f32 %v5236_v60 }
0x204b   :  { %v5239_v7 = vpop.xlane.xlu1 %5238 }
0x204c   :  { %7021 = vrcp.f32 %v5239_v7 }
0x2052   :  { %v7020_v8 = vpop.eup %7019 }
0x2053   :  { %v5242_v29 = vmul.f32 %v7020_v8, %v7016_v54 }
0x2055   :  { %6651 = vmatmul.mubr.msk.f32.vlgmr.msra.gmra.mrb[64].mxu1 %vm359_vm2, %v5242_v29 }
0x2056   :  { %v7022_v52 = vpop.eup %7021 }
0x2057   :  { %v5243_v46 = vmul.f32 %v7022_v52, %v7018_v5 }
0x2059   :  { %6656 = vmatmul.mubr.msk.f32.vlgmr.msra.gmra.mrb[52].mxu0 %vm359_vm2, %v5243_v46  ;;  %v5904_v46 = vld [vmem:[%s7970_s11] ss:$0 sm:$0xff] }
0x205a   :  { %6659 = vmatpush3.msra.mxu0 %v5829_v9 }
0x205b   :  { %6918 = vmatprep.subr.bf16.mxu0 %v6917_v26 }
0x2128   :  { %v5313_v10 = vpop.f32.mrb[64].mxu1 }
0x2129   :  { %v6652_v48 = vpop.f32.mrb[65].mxu1  ;;  %6660 = vmatprep.mubr.msk.f32.mxu0 %vm359_vm2, %v5313_v10 }
0x212c   :  { %v5386_v11 = vpop.f32.mrb[52].mxu0 }
0x212d   :  { %v6657_v12 = vpop.f32.mrb[53].mxu0  ;;  %6661 = vmatmul.mubr.msk.f32.vlgmr.msra.gmra.mrb[38].mxu0 %vm359_vm2, %v5386_v11 }
0x212e   :  { %6920 = vmatpush3.bf16.msra.mxu0 %v6917_v26 }
0x212f   :  { %6922 = vmatprep.subr.bf16.mxu0 %v6921_v28 }
0x2132   :  { %6924 = vmatpush3.bf16.msra.mxu0 %v6921_v28 }
0x2133   :  { %6926 = vmatprep.subr.bf16.mxu0 %v6925_v34 }
0x2136   :  { %6928 = vmatpush3.bf16.msra.mxu0 %v6925_v34 }
0x2137   :  { %6930 = vmatprep.subr.bf16.mxu0 %v6929_v55 }
0x213a   :  { %6932 = vmatpush3.bf16.msra.mxu0 %v6929_v55 }
0x2200   :  { %v6662_v13 = vpop.f32.mrb[38].mxu0 }
0x2201   :  { %v7888_v14 = vadd.f32 %v6662_v13, %v7535_v4  ;;  %v5462_v15 = vpop.f32.mrb[39].mxu0  ;;  %v5888_v4 = vld [vmem:[%s7967_s9 + $0x20] sm:$0xff] }
0x2202   :  { %v7891_v16 = vadd.f32 %v5462_v15, %v7538_v6  ;;  %v5889_v6 = vld [vmem:[%s7967_s9 + $0x28] sm:$0xff] }
0x2203   :  { %v5478_v17 = vmul.f32 %v7888_v14, %v7888_v14  ;;  %v6909_v22 = vpack.c.bf16 %v5889_v6, %v5888_v4 }
0x2204   :  { %v5477_v18 = vmul.f32 %v7891_v16, %v7891_v16 }
0x2205   :  { %v5482_v19 = vsel %vm52_vm0, %v5478_v17, 0.0  ;;  %6910 = vmatprep.subr.bf16.mxu1 %v6909_v22 }
0x2206   :  { %5483 = vadd.xlane.f32.xlu1 %v5482_v19  ;;  %v5479_v20 = vsel %vm52_vm0, %v5477_v18, 0.0  ;;  %6912 = vmatpush3.bf16.msra.mxu1 %v6909_v22 }
0x2207   :  { %5480 = vadd.xlane.f32.xlu0 %v5479_v20  ;;  %6914 = vmatprep.subr.bf16.mxu1 %v6913_v24 }
0x220a   :  { %6916 = vmatpush3.bf16.msra.mxu1 %v6913_v24 }
0x2293   :  { %v5484_v38 = vpop.xlane.xlu1 %5483 }
0x2294   :  { %v5486_v40 = vmul.f32 0.03125, %v5484_v38  ;;  %v5481_v32 = vpop.xlane.xlu0 %5480 }
0x2295   :  { %v5485_v44 = vmul.f32 0.03125, %v5481_v32 }
0x2296   :  { %v5488_v45 = vadd.f32 1e-06, %v5486_v40 }
0x2297   :  { %v5487_v35 = vadd.f32 1e-06, %v5485_v44 }
0x2298   :  { %7023 = vrsqrt.f32 %v5488_v45 }
0x2299   :  { %7025 = vrsqrt.f32 %v5487_v35 }
0x22a2   :  { %v7024_v47 = vpop.eup %7023 }
0x22a3   :  { %v7026_v36 = vpop.eup %7025  ;;  %v5492_v50 = vmul.f32 %v7024_v47, %v7888_v14 }
0x22a4   :  { %v5491_v41 = vmul.f32 %v7026_v36, %v7891_v16 }
0x22a5   :  { %v5500_v51 = vmul.f32 %v5887_v49, %v5492_v50 }
0x22a6   :  { %v5499_v43 = vmul.f32 %v5887_v49, %v5491_v41 }
0x22a8   :  { %6671 = vmatprep.mubr.msk.f32.mxu1 %vm52_vm0, %v5499_v43 }
0x22a9   :  { %6672 = vmatmul.mubr.msk.f32.vlgmr.msra.gmra.mrb[66].mxu1 %vm52_vm0, %v5500_v51 }
0x237c   :  { %v6673_v56 = vpop.f32.mrb[66].mxu1 }
0x237d   :  { %v5578_v57 = vpop.f32.mrb[67].mxu1  ;;  %v5588_v59 = vmax.f32 %v6673_v56, 0.0 }
0x237e   :  { %v5587_v58 = vmax.f32 %v5578_v57, 0.0 }
0x2380   :  { %6690 = vmatprep.mubr.msk.f32.mxu0 %vm2785_vm3, %v5587_v58 }
0x2381   :  { %6691 = vmatmul.mubr.msk.f32.vlgmr.msra.gmra.mrb[54].mxu0 %vm2785_vm3, %v5588_v59 }
0x2454   :  { %v6692_v61 = vpop.f32.mrb[54].mxu0 }
0x2455   :  { %v5680_v37 = vadd.f32 %v6692_v61, %v7888_v14  ;;  %v5670_v62 = vpop.f32.mrb[55].mxu0 }
0x2456   :  { %v5679_v63 = vadd.f32 %v5670_v62, %v7891_v16 }
0x2457   :  { %v5683_v2 = vmul.f32 %v5680_v37, %v5680_v37 }
0x2458   :  { %v5682_v3 = vmul.f32 %v5679_v63, %v5679_v63 }
0x2459   :  { %v5687_v54 = vsel %vm52_vm0, %v5683_v2, 0.0 }
0x245a   :  { %5688 = vadd.xlane.f32.xlu1 %v5687_v54  ;;  %v5684_v30 = vsel %vm52_vm0, %v5682_v3, 0.0 }
0x245b   :  { %5685 = vadd.xlane.f32.xlu0 %v5684_v30 }
0x24e7   :  { %v5689_v5 = vpop.xlane.xlu1 %5688 }
0x24e8   :  { %v5691_v42 = vmul.f32 0.03125, %v5689_v5  ;;  %v5686_v60 = vpop.xlane.xlu0 %5685 }
0x24e9   :  { %v5690_v7 = vmul.f32 0.03125, %v5686_v60 }
0x24ea   :  { %v5693_v8 = vadd.f32 1e-06, %v5691_v42 }
0x24eb   :  { %v5692_v29 = vadd.f32 1e-06, %v5690_v7 }
0x24ec   :  { %7027 = vrsqrt.f32 %v5693_v8 }
0x24ed   :  { %7029 = vrsqrt.f32 %v5692_v29 }
0x24f6   :  { %v7028_v52 = vpop.eup %7027 }
0x24f7   :  { %v7030_v9 = vpop.eup %7029  ;;  %v5697_v10 = vmul.f32 %v7028_v52, %v5680_v37 }
0x24f8   :  { %v5696_v48 = vmul.f32 %v7030_v9, %v5679_v63 }
0x24f9   :  { %v5705_v11 = vmul.f32 %v5904_v46, %v5697_v10 }
0x24fa   :  { %v5704_v12 = vmul.f32 %v5904_v46, %v5696_v48 }
0x24fb   :  { %5707 = vst.msk [vmem:[%s7971_s12 + $0x8] sm:$0xff] %vm52_vm0, %v5705_v11 }
0x24fc   :  { %5706 = vst.msk [vmem:[%s7971_s12] sm:$0xff] %vm52_vm0, %v5704_v12 }

// kernel: t5_forward.4
= control target key start
LH: loop header
LB: loop body
LE: loop exit
PB: predicated region body
PF: predicated region fallthrough
CT: control target
= control target key end

     0   :  { %vm77_vm0 = vcmask 261120   ;;  %v13402_v37 = vmov 0.0   ;;  %vm13403_vm1 = vmmov 0   ;;  %vm384_vm2 = vcmask 64512   ;;  %s15061_s0 = inlined_call_operand.vmem [shape: f32[16,32], index: 0, kind: input, shape index: {}]   ;;  %s15062_s6 = inlined_call_operand.vmem [shape: f32[2,4,32,8], index: 6, kind: input, shape index: {}]   ;;  %s15063_s8 = inlined_call_operand.vmem [shape: f32[2,4,32,8], index: 8, kind: input, shape index: {}]   ;;  %s15064_s7 = inlined_call_operand.vmem [shape: f32[2,4,32,8], index: 7, kind: input, shape index: {}]   ;;  %s15065_s5 = inlined_call_operand.vmem [shape: f32[2,1,32], index: 5, kind: input, shape index: {}]   ;;  %s15066_s2 = inlined_call_operand.vmem [shape: f32[4,8,8], index: 2, kind: input, shape index: {}]   ;;  %s15067_s3 = inlined_call_operand.vmem [shape: f32[2,8,8], index: 3, kind: input, shape index: {}]   ;;  %s15068_s9 = inlined_call_operand.vmem [shape: f32[2,4,8,32], index: 9, kind: input, shape index: {}]   ;;  %s15069_s12 = inlined_call_operand.vmem [shape: f32[2,4,32,8], index: 12, kind: input, shape index: {}]   ;;  %s15070_s11 = inlined_call_operand.vmem [shape: f32[2,4,32,8], index: 11, kind: input, shape index: {}]   ;;  %s15071_s1 = inlined_call_operand.vmem [shape: f32[16,32], index: 1, kind: input, shape index: {}]   ;;  %s15072_s13 = inlined_call_operand.vmem [shape: f32[2,4,32,8], index: 13, kind: input, shape index: {}]   ;;  %s15073_s10 = inlined_call_operand.vmem [shape: f32[2,1,32], index: 10, kind: input, shape index: {}]   ;;  %s15074_s4 = inlined_call_operand.vmem [shape: f32[2,1,8], index: 4, kind: input, shape index: {}]   ;;  %s15075_s14 = inlined_call_operand.vmem [shape: f32[2,4,8,32], index: 14, kind: input, shape index: {}]   ;;  %s15076_s16 = inlined_call_operand.vmem [shape: f32[2,32,64], index: 16, kind: input, shape index: {}]   ;;  %s15077_s17 = inlined_call_operand.vmem [shape: f32[2,64,32], index: 17, kind: input, shape index: {}]   ;;  %s15078_s15 = inlined_call_operand.vmem [shape: f32[2,1,32], index: 15, kind: input, shape index: {}]   ;;  %s15079_s18 = inlined_call_operand.vmem [shape: f32[1,32], index: 18, kind: input, shape index: {}]   ;;  %s15080_s19 = inlined_call_operand.vmem [shape: f32[16,32], index: 19, kind: output, shape index: {}]  }
   0x1   :  { %15085 = sst [smem:[#allocation2_spill]] %s15061_s0  ;;  %v10934_v28 = vld [vmem:[%s15065_s5] ss:$0 sm:$0xff]  ;;  %v13599_v48 = vld [vmem:[%s15067_s3 + $0x8] sm:$0xff]  ;;  %vm5409_vm3 = vcmask 523264  }
   0x2   :  { %15086 = sst [smem:[#allocation3_spill]] %s15062_s6  ;;  %s15089_s20 = sld [smem:[#allocation2_spill]]  ;;  %v66_v46 = vld [vmem:[%s15066_s2] sm:$0xff] }
   0x3   :  { %15087 = sst [smem:[#allocation4_spill]] %s15063_s8  ;;  %s15090_s23 = sld [smem:[#allocation3_spill]]  ;;  %v13604_v52 = vld [vmem:[%s15067_s3] sm:$0xff] }
   0x4   :  { %15088 = sst [smem:[#allocation5_spill]] %s15064_s7  ;;  %s15091_s27 = sld [smem:[#allocation4_spill]] }
   0x5   :  { %s15092_s26 = sld [smem:[#allocation5_spill]] }
   0x8   :  { %v13507_v0 = vld [vmem:[%s15089_s20] sm:$0xff]  ;;  %v13512_v1 = vld [vmem:[%s15089_s20 + $0x8] sm:$0xff] }
   0x9   :  { %v75_v2 = vmul.f32 %v13507_v0, %v13507_v0  ;;  %v76_v3 = vmul.f32 %v13512_v1, %v13512_v1  ;;  %v101_v6 = vld [vmem:[%s15090_s23] sm:$0xff]  ;;  %v102_v7 = vld [vmem:[%s15090_s23 + $0x8] sm:$0xff]  ;;  %v103_v12 = vld [vmem:[%s15090_s23 + $0x10] sm:$0xff] }
   0xa   :  { %v12778_v8 = vpack.c.bf16 %v102_v7, %v101_v6  ;;  %v133_v9 = vld [vmem:[%s15091_s27] sm:$0xff]  ;;  %v134_v10 = vld [vmem:[%s15091_s27 + $0x8] sm:$0xff]  ;;  %v104_v13 = vld [vmem:[%s15090_s23 + $0x18] sm:$0xff] }
   0xb   :  { %v78_v4 = vsel %vm77_vm0, %v75_v2, 0.0  ;;  %v81_v5 = vsel %vm77_vm0, %v76_v3, 0.0  ;;  %v12794_v11 = vpack.c.bf16 %v134_v10, %v133_v9  ;;  %v12782_v14 = vpack.c.bf16 %v104_v13, %v103_v12  ;;  %v135_v15 = vld [vmem:[%s15091_s27 + $0x10] sm:$0xff]  ;;  %v136_v16 = vld [vmem:[%s15091_s27 + $0x18] sm:$0xff]  ;;  %v117_v18 = vld [vmem:[%s15092_s26] sm:$0xff] }
   0xc   :  { %79 = vadd.xlane.f32.xlu0 %v78_v4  ;;  %12779 = vmatprep.subr.bf16.mxu1 %v12778_v8  ;;  %v12798_v17 = vpack.c.bf16 %v136_v16, %v135_v15  ;;  %v118_v19 = vld [vmem:[%s15092_s26 + $0x8] sm:$0xff]  ;;  %v119_v32 = vld [vmem:[%s15092_s26 + $0x10] sm:$0xff]  ;;  %v120_v33 = vld [vmem:[%s15092_s26 + $0x18] sm:$0xff] }
   0xd   :  { %12781 = vmatpush3.bf16.msra.mxu1 %v12778_v8  ;;  %12795 = vmatprep.subr.bf16.mxu0 %v12794_v11  ;;  %v12786_v20 = vpack.c.bf16 %v118_v19, %v117_v18  ;;  %v12790_v36 = vpack.c.bf16 %v120_v33, %v119_v32  ;;  %v122_v6 = vld [vmem:[%s15092_s26 + $0x28] sm:$0xff]  ;;  %v105_v8 = vld [vmem:[%s15090_s23 + $0x20] sm:$0xff]  ;;  %v123_v13 = vld [vmem:[%s15092_s26 + $0x30] sm:$0xff] }
   0xe   :  { %12797 = vmatpush3.bf16.msra.mxu0 %v12794_v11  ;;  %12783 = vmatprep.subr.bf16.mxu1 %v12782_v14  ;;  %v106_v9 = vld [vmem:[%s15090_s23 + $0x28] sm:$0xff]  ;;  %v107_v18 = vld [vmem:[%s15090_s23 + $0x30] sm:$0xff]  ;;  %v108_v19 = vld [vmem:[%s15090_s23 + $0x38] sm:$0xff] }
   0xf   :  { %12799 = vmatprep.subr.bf16.mxu0 %v12798_v17  ;;  %v12802_v10 = vpack.c.bf16 %v106_v9, %v105_v8 }
  0x10   :  { %82 = vadd.xlane.f32.xlu0 %v81_v5  ;;  %v121_v5 = vld [vmem:[%s15092_s26 + $0x20] sm:$0xff] }
  0x11   :  { %12785 = vmatpush3.bf16.msra.mxu1 %v12782_v14  ;;  %v12810_v7 = vpack.c.bf16 %v122_v6, %v121_v5  ;;  %v124_v14 = vld [vmem:[%s15092_s26 + $0x38] sm:$0xff] }
  0x12   :  { %12801 = vmatpush3.bf16.msra.mxu0 %v12798_v17  ;;  %12787 = vmatprep.subr.bf16.mxu1 %v12786_v20  ;;  %v12814_v17 = vpack.c.bf16 %v124_v14, %v123_v13 }
  0x13   :  { %11833 = vmatprep.subr.mxu0 %v13402_v37 }
  0x99   :  { %v80_v21 = vpop.xlane.xlu0 %79 }
  0x9a   :  { %v85_v22 = vmul.f32 0.03125, %v80_v21 }
  0x9c   :  { %v87_v23 = vadd.f32 1e-06, %v85_v22  ;;  %v12806_v22 = vpack.c.bf16 %v108_v19, %v107_v18  ;;  %v143_v18 = vld [vmem:[%s15091_s27 + $0x50] sm:$0xff]  ;;  %v144_v19 = vld [vmem:[%s15091_s27 + $0x58] sm:$0xff] }
  0x9d   :  { %v83_v24 = vpop.xlane.xlu0 %82 }
  0x9e   :  { %13236 = vrsqrt.f32 %v87_v23  ;;  %v86_v25 = vmul.f32 0.03125, %v83_v24  ;;  %v137_v23 = vld [vmem:[%s15091_s27 + $0x20] sm:$0xff]  ;;  %v138_v24 = vld [vmem:[%s15091_s27 + $0x28] sm:$0xff] }
  0xa0   :  { %v88_v26 = vadd.f32 1e-06, %v86_v25  ;;  %v12818_v25 = vpack.c.bf16 %v138_v24, %v137_v23  ;;  %v125_v24 = vld [vmem:[%s15092_s26 + $0x40] sm:$0xff] }
  0xa2   :  { %13238 = vrsqrt.f32 %v88_v26  ;;  %v139_v26 = vld [vmem:[%s15091_s27 + $0x30] sm:$0xff] }
  0xa8   :  { %v13237_v27 = vpop.eup %13236 }
  0xa9   :  { %v91_v29 = vmul.f32 %v13237_v27, %v13507_v0  ;;  %v140_v27 = vld [vmem:[%s15091_s27 + $0x38] sm:$0xff] }
  0xab   :  { %v13554_v30 = vmul.f32 %v10934_v28, %v91_v29 }
  0xac   :  { %v13239_v31 = vpop.eup %13238 }
  0xad   :  { %v92_v34 = vmul.f32 %v13239_v31, %v13512_v1  ;;  %11798 = vmatprep.mubr.msk.f32.mxu1 %vm77_vm0, %v13554_v30  ;;  %11820 = vmatprep.mubr.msk.f32.mxu0 %vm77_vm0, %v13554_v30 }
  0xaf   :  { %v13567_v35 = vmul.f32 %v10934_v28, %v92_v34  ;;  %v12822_v28 = vpack.c.bf16 %v140_v27, %v139_v26 }
  0xb1   :  { %11799 = vmatmul.mubr.msk.f32.vlgmr.msra.gmra.mrb[0].mxu1 %vm77_vm0, %v13567_v35  ;;  %11821 = vmatmul.mubr.msk.f32.vlgmr.msra.gmra.mrb[0].mxu0 %vm77_vm0, %v13567_v35 }
  0xb2   :  { %12789 = vmatpush3.bf16.msra.mxu1 %v12786_v20  ;;  %11809 = vmatprep.mubr.msk.f32.mxu1 %vm77_vm0, %v13554_v30 }
  0xb3   :  { %12791 = vmatprep.subr.bf16.mxu1 %v12790_v36  ;;  %11835 = vmatprep.mubr.msk.f32.mxu0 %vm13403_vm1, %v13402_v37 }
  0xb6   :  { %12793 = vmatpush3.bf16.msra.mxu1 %v12790_v36 }
  0xb7   :  { %11823 = vmatprep.subr.mxu1 %v13402_v37 }
  0xb9   :  { %11810 = vmatmul.mubr.msk.f32.vlgmr.msra.gmra.mrb[2].mxu1 %vm77_vm0, %v13567_v35 }
  0xba   :  { %11825 = vmatprep.mubr.msk.f32.mxu1 %vm13403_vm1, %v13402_v37 }
 0x184   :  { %v11800_v38 = vpop.f32.mrb[0].mxu1  ;;  %v11822_v39 = vpop.f32.mrb[0].mxu0 }
 0x185   :  { %v225_v40 = vpop.f32.mrb[1].mxu1  ;;  %v375_v41 = vpop.f32.mrb[1].mxu0 }
 0x186   :  { %11834 = vmatpush3.msra.mxu0 %v375_v41 }
 0x187   :  { %12803 = vmatprep.subr.bf16.mxu0 %v12802_v10 }
 0x18c   :  { %v11811_v42 = vpop.f32.mrb[2].mxu1 }
 0x18d   :  { %v300_v43 = vpop.f32.mrb[3].mxu1 }
 0x18e   :  { %11824 = vmatpush3.xpose.msk.msra.mxu1 %vm384_vm2, %v300_v43 }
 0x18f   :  { %11828 = vmatprep.subr.mxu1 %v13402_v37 }
 0x191   :  { %11826 = vmatmul.mubr.msk.f32.vlgmr.msra.gmra.mrb[4].mxu1 %vm384_vm2, %v225_v40 }
 0x192   :  { %11829 = vmatpush3.xpose.msk.msra.mxu1 %vm384_vm2, %v11811_v42  ;;  %11830 = vmatprep.mubr.msk.f32.mxu1 %vm13403_vm1, %v13402_v37  ;;  %v67_v42 = vld [vmem:[%s15066_s2 + $0x8] sm:$0xff] }
 0x193   :  { %11838 = vmatprep.subr.mxu1 %v13402_v37 }
 0x195   :  { %11831 = vmatmul.mubr.msk.f32.vlgmr.msra.gmra.mrb[6].mxu1 %vm384_vm2, %v11800_v38 }
 0x196   :  { %11839 = vmatpush3.msra.mxu1 %v11822_v39  ;;  %11840 = vmatprep.mubr.msk.f32.mxu1 %vm13403_vm1, %v13402_v37 }
 0x197   :  { %12811 = vmatprep.subr.bf16.mxu1 %v12810_v7 }
 0x264   :  { %v457_v44 = vpop.f32.mrb[4].mxu1 }
 0x265   :  { %v11827_v45 = vpop.f32.mrb[5].mxu1  ;;  %v458_v49 = vadd.f32 %v457_v44, %v66_v46 }
 0x267   :  { %v537_v55 = vadd.f32 %v458_v49, %v13604_v52 }
 0x268   :  { %v533_v47 = vpop.f32.mrb[6].mxu1 }
 0x269   :  { %v534_v50 = vadd.f32 %v533_v47, %v66_v46  ;;  %v11832_v51 = vpop.f32.mrb[7].mxu1  ;;  %v539_v56 = vsel %vm384_vm2, %v537_v55, -inf }
 0x26b   :  { %v538_v53 = vadd.f32 %v534_v50, %v13599_v48 }
 0x26d   :  { %v542_v54 = vsel %vm384_vm2, %v538_v53, -inf }
 0x26e   :  { %543 = vmax.xlane.f32.xlu1 %v542_v54 }
 0x272   :  { %540 = vmax.xlane.f32.xlu1 %v539_v56 }
 0x2fb   :  { %v544_v57 = vpop.xlane.xlu1 %543 }
 0x2fc   :  { %v546_v58 = vsub.f32 %v538_v53, %v544_v57 }
 0x2fe   :  { %v549_v59 = vmul.f32 1.442695, %v546_v58 }
 0x2ff   :  { %v541_v60 = vpop.xlane.xlu1 %540 }
 0x300   :  { %13240 = vpow2.f32 %v549_v59  ;;  %v545_v61 = vsub.f32 %v537_v55, %v541_v60 }
 0x302   :  { %v547_v62 = vmul.f32 1.442695, %v545_v61 }
 0x304   :  { %13242 = vpow2.f32 %v547_v62 }
 0x30a   :  { %v13241_v63 = vpop.eup %13240 }
 0x30b   :  { %v554_v2 = vsel %vm384_vm2, %v13241_v63, 0.0 }
 0x30c   :  { %555 = vadd.xlane.f32.xlu0 %v554_v2 }
 0x30e   :  { %v13243_v3 = vpop.eup %13242 }
 0x30f   :  { %v551_v4 = vsel %vm384_vm2, %v13243_v3, 0.0 }
 0x310   :  { %552 = vadd.xlane.f32.xlu1 %v551_v4  ;;  %v110_v4 = vld [vmem:[%s15090_s23 + $0x48] sm:$0xff] }
 0x399   :  { %v556_v11 = vpop.xlane.xlu0 %555 }
 0x39a   :  { %13244 = vrcp.f32 %v556_v11  ;;  %v112_v11 = vld [vmem:[%s15090_s23 + $0x58] sm:$0xff] }
 0x39d   :  { %v553_v12 = vpop.xlane.xlu1 %552 }
 0x39e   :  { %13246 = vrcp.f32 %v553_v12 }
 0x3a4   :  { %v13245_v15 = vpop.eup %13244 }
 0x3a5   :  { %v560_v16 = vmul.f32 %v13245_v15, %v13241_v63  ;;  %v141_v15 = vld [vmem:[%s15091_s27 + $0x40] sm:$0xff] }
 0x3a7   :  { %11841 = vmatmul.mubr.msk.f32.vlgmr.msra.gmra.mrb[8].mxu1 %vm384_vm2, %v560_v16  ;;  %v142_v16 = vld [vmem:[%s15091_s27 + $0x48] sm:$0xff] }
 0x3a8   :  { %v13247_v20 = vpop.eup %13246  ;;  %12813 = vmatpush3.bf16.msra.mxu1 %v12810_v7  ;;  %11862 = vmatprep.mubr.msk.f32.mxu1 %vm77_vm0, %v13554_v30 }
 0x3a9   :  { %v559_v21 = vmul.f32 %v13247_v20, %v13243_v3  ;;  %12815 = vmatprep.subr.bf16.mxu1 %v12814_v17  ;;  %v109_v3 = vld [vmem:[%s15090_s23 + $0x40] sm:$0xff]  ;;  %v12846_v20 = vpack.c.bf16 %v144_v19, %v143_v18  ;;  %v147_v19 = vld [vmem:[%s15091_s27 + $0x70] sm:$0xff] }
 0x3aa   :  { %v12826_v5 = vpack.c.bf16 %v110_v4, %v109_v3  ;;  %v113_v3 = vld [vmem:[%s15090_s23 + $0x60] sm:$0xff]  ;;  %v114_v4 = vld [vmem:[%s15090_s23 + $0x68] sm:$0xff] }
 0x3ab   :  { %11836 = vmatmul.mubr.msk.f32.vlgmr.msra.gmra.mrb[2].mxu0 %vm384_vm2, %v559_v21  ;;  %v150_v21 = vld [vmem:[%s15068_s9 + $0x8] sm:$0xff] }
 0x3ac   :  { %12805 = vmatpush3.bf16.msra.mxu0 %v12802_v10  ;;  %12817 = vmatpush3.bf16.msra.mxu1 %v12814_v17  ;;  %v111_v10 = vld [vmem:[%s15090_s23 + $0x50] sm:$0xff]  ;;  %v12842_v17 = vpack.c.bf16 %v142_v16, %v141_v15  ;;  %v145_v16 = vld [vmem:[%s15091_s27 + $0x60] sm:$0xff] }
 0x3ad   :  { %11851 = vmatprep.mubr.msk.f32.mxu0 %vm77_vm0, %v13554_v30  ;;  %12807 = vmatprep.subr.bf16.mxu0 %v12806_v22  ;;  %v12830_v14 = vpack.c.bf16 %v112_v11, %v111_v10  ;;  %v116_v10 = vld [vmem:[%s15090_s23 + $0x78] sm:$0xff] }
 0x3ae   :  { %11876 = vmatprep.subr.mxu1 %v13402_v37 }
 0x3af   :  { %11863 = vmatmul.mubr.msk.f32.vlgmr.msra.gmra.mrb[10].mxu1 %vm77_vm0, %v13567_v35 }
 0x3b0   :  { %12809 = vmatpush3.bf16.msra.mxu0 %v12806_v22  ;;  %11878 = vmatprep.mubr.msk.f32.mxu1 %vm13403_vm1, %v13402_v37  ;;  %v149_v22 = vld [vmem:[%s15068_s9] sm:$0xff] }
 0x3b1   :  { %12819 = vmatprep.subr.bf16.mxu0 %v12818_v25 }
 0x3b3   :  { %11852 = vmatmul.mubr.msk.f32.vlgmr.msra.gmra.mrb[4].mxu0 %vm77_vm0, %v13567_v35 }
 0x3b4   :  { %12821 = vmatpush3.bf16.msra.mxu0 %v12818_v25  ;;  %11873 = vmatprep.mubr.msk.f32.mxu0 %vm77_vm0, %v13554_v30  ;;  %v126_v25 = vld [vmem:[%s15092_s26 + $0x48] sm:$0xff] }
 0x3b5   :  { %12823 = vmatprep.subr.bf16.mxu0 %v12822_v28  ;;  %v12834_v27 = vpack.c.bf16 %v126_v25, %v125_v24  ;;  %v131_v25 = vld [vmem:[%s15092_s26 + $0x70] sm:$0xff] }
 0x3b8   :  { %12825 = vmatpush3.bf16.msra.mxu0 %v12822_v28 }
 0x3b9   :  { %11886 = vmatprep.subr.mxu0 %v13402_v37 }
 0x3bb   :  { %11874 = vmatmul.mubr.msk.f32.vlgmr.msra.gmra.mrb[6].mxu0 %vm77_vm0, %v13567_v35 }
 0x3bc   :  { %11888 = vmatprep.mubr.msk.f32.mxu0 %vm13403_vm1, %v13402_v37 }
 0x47a   :  { %v13668_v29 = vpop.f32.mrb[8].mxu1 }
 0x47b   :  { %v11842_v31 = vpop.f32.mrb[9].mxu1 }
 0x47e   :  { %v13670_v32 = vpop.f32.mrb[2].mxu0 }
 0x47f   :  { %v11837_v33 = vpop.f32.mrb[3].mxu0 }
 0x480   :  { %v127_v33 = vld [vmem:[%s15092_s26 + $0x50] sm:$0xff] }
 0x482   :  { %v11864_v34 = vpop.f32.mrb[10].mxu1 }
 0x483   :  { %v848_v36 = vpop.f32.mrb[11].mxu1 }
 0x484   :  { %11877 = vmatpush3.xpose.msk.msra.mxu1 %vm384_vm2, %v848_v36 }
 0x485   :  { %11881 = vmatprep.subr.mxu1 %v13402_v37 }
 0x486   :  { %v11853_v38 = vpop.f32.mrb[4].mxu0 }
 0x487   :  { %v773_v39 = vpop.f32.mrb[5].mxu0 }
 0x488   :  { %11879 = vmatmul.mubr.msk.f32.vlgmr.msra.gmra.mrb[12].mxu1 %vm384_vm2, %v773_v39 }
 0x489   :  { %11882 = vmatpush3.xpose.msk.msra.mxu1 %vm384_vm2, %v11864_v34  ;;  %11883 = vmatprep.mubr.msk.f32.mxu1 %vm13403_vm1, %v13402_v37  ;;  %v128_v34 = vld [vmem:[%s15092_s26 + $0x58] sm:$0xff] }
 0x48a   :  { %11891 = vmatprep.subr.mxu1 %v13402_v37  ;;  %v12838_v36 = vpack.c.bf16 %v128_v34, %v127_v33 }
 0x48c   :  { %11884 = vmatmul.mubr.msk.f32.vlgmr.msra.gmra.mrb[14].mxu1 %vm384_vm2, %v11853_v38 }
 0x48d   :  { %11893 = vmatprep.mubr.msk.f32.mxu1 %vm13403_vm1, %v13402_v37 }
 0x48e   :  { %v11875_v40 = vpop.f32.mrb[6].mxu0 }
 0x48f   :  { %v923_v41 = vpop.f32.mrb[7].mxu0  ;;  %11892 = vmatpush3.msra.mxu1 %v11875_v40 }
 0x490   :  { %11887 = vmatpush3.msra.mxu0 %v923_v41  ;;  %12827 = vmatprep.subr.bf16.mxu1 %v12826_v5 }
 0x491   :  { %11896 = vmatprep.subr.mxu0 %v150_v21 }
 0x55b   :  { %v1004_v43 = vpop.f32.mrb[12].mxu1 }
 0x55c   :  { %v1005_v44 = vadd.f32 %v1004_v43, %v67_v42  ;;  %v11880_v45 = vpop.f32.mrb[13].mxu1 }
 0x55e   :  { %v1084_v46 = vadd.f32 %v1005_v44, %v13604_v52 }
 0x55f   :  { %v1080_v47 = vpop.f32.mrb[14].mxu1 }
 0x560   :  { %v1081_v49 = vadd.f32 %v1080_v47, %v67_v42  ;;  %v11885_v50 = vpop.f32.mrb[15].mxu1  ;;  %v1086_v51 = vsel %vm384_vm2, %v1084_v46, -inf }
 0x561   :  { %1087 = vmax.xlane.f32.xlu0 %v1086_v51 }
 0x562   :  { %v1085_v53 = vadd.f32 %v1081_v49, %v13599_v48 }
 0x564   :  { %v1089_v54 = vsel %vm384_vm2, %v1085_v53, -inf }
 0x565   :  { %1090 = vmax.xlane.f32.xlu1 %v1089_v54 }
 0x5ee   :  { %v1088_v55 = vpop.xlane.xlu0 %1087 }
 0x5ef   :  { %v1092_v56 = vsub.f32 %v1084_v46, %v1088_v55 }
 0x5f1   :  { %v1094_v57 = vmul.f32 1.442695, %v1092_v56 }
 0x5f2   :  { %v1091_v58 = vpop.xlane.xlu1 %1090 }
 0x5f3   :  { %13248 = vpow2.f32 %v1094_v57  ;;  %v1093_v59 = vsub.f32 %v1085_v53, %v1091_v58 }
 0x5f5   :  { %v1096_v60 = vmul.f32 1.442695, %v1093_v59 }
 0x5f7   :  { %13250 = vpow2.f32 %v1096_v60 }
 0x5fd   :  { %v13249_v61 = vpop.eup %13248 }
 0x5fe   :  { %v1098_v62 = vsel %vm384_vm2, %v13249_v61, 0.0 }
 0x5ff   :  { %1099 = vadd.xlane.f32.xlu0 %v1098_v62 }
 0x601   :  { %v13251_v63 = vpop.eup %13250 }
 0x602   :  { %v1101_v2 = vsel %vm384_vm2, %v13251_v63, 0.0 }
 0x603   :  { %1102 = vadd.xlane.f32.xlu1 %v1101_v2 }
 0x68c   :  { %v1100_v6 = vpop.xlane.xlu0 %1099 }
 0x68d   :  { %13252 = vrcp.f32 %v1100_v6  ;;  %v151_v6 = vld [vmem:[%s15068_s9 + $0x10] sm:$0xff] }
 0x690   :  { %v1103_v7 = vpop.xlane.xlu1 %1102 }
 0x691   :  { %13254 = vrcp.f32 %v1103_v7 }
 0x697   :  { %v13253_v8 = vpop.eup %13252 }
 0x698   :  { %v1106_v9 = vmul.f32 %v13253_v8, %v13249_v61 }
 0x69a   :  { %11889 = vmatmul.mubr.msk.f32.vlgmr.msra.gmra.mrb[8].mxu0 %vm384_vm2, %v1106_v9  ;;  %v115_v9 = vld [vmem:[%s15090_s23 + $0x70] sm:$0xff] }
 0x69b   :  { %v13255_v12 = vpop.eup %13254  ;;  %11897 = vmatpush3.msra.mxu0 %v150_v21 }
 0x69c   :  { %v1107_v13 = vmul.f32 %v13255_v12, %v13251_v63  ;;  %11901 = vmatprep.subr.mxu0 %v149_v22 }
 0x69e   :  { %11894 = vmatmul.mubr.msk.f32.vlgmr.msra.gmra.mrb[16].mxu1 %vm384_vm2, %v1107_v13 }
 0x69f   :  { %12829 = vmatpush3.bf16.msra.mxu1 %v12826_v5  ;;  %11914 = vmatprep.mubr.msk.f32.mxu1 %vm77_vm0, %v13554_v30  ;;  %v12850_v5 = vpack.c.bf16 %v114_v4, %v113_v3  ;;  %v152_v4 = vld [vmem:[%s15068_s9 + $0x18] sm:$0xff] }
 0x6a0   :  { %12831 = vmatprep.subr.bf16.mxu1 %v12830_v14 }
 0x6a3   :  { %12833 = vmatpush3.bf16.msra.mxu1 %v12830_v14  ;;  %v12854_v14 = vpack.c.bf16 %v116_v10, %v115_v9 }
 0x6a4   :  { %12843 = vmatprep.subr.bf16.mxu1 %v12842_v17 }
 0x6a6   :  { %11915 = vmatmul.mubr.msk.f32.vlgmr.msra.gmra.mrb[18].mxu1 %vm77_vm0, %v13567_v35 }
 0x6a7   :  { %12845 = vmatpush3.bf16.msra.mxu1 %v12842_v17  ;;  %11936 = vmatprep.mubr.msk.f32.mxu1 %vm77_vm0, %v13554_v30  ;;  %v146_v17 = vld [vmem:[%s15091_s27 + $0x68] sm:$0xff] }
 0x6a8   :  { %12847 = vmatprep.subr.bf16.mxu1 %v12846_v20  ;;  %v12866_v18 = vpack.c.bf16 %v146_v17, %v145_v16  ;;  %v2703_v17 = vld [vmem:[%s15070_s11] sm:$0xff] }
 0x6ab   :  { %12849 = vmatpush3.bf16.msra.mxu1 %v12846_v20  ;;  %v148_v20 = vld [vmem:[%s15091_s27 + $0x78] sm:$0xff] }
 0x6ac   :  { %11944 = vmatprep.subr.mxu1 %v13402_v37  ;;  %v12870_v21 = vpack.c.bf16 %v148_v20, %v147_v19  ;;  %v2704_v19 = vld [vmem:[%s15070_s11 + $0x8] sm:$0xff]  ;;  %v2721_v20 = vld [vmem:[%s15069_s12 + $0x10] sm:$0xff] }
 0x6ae   :  { %11937 = vmatmul.mubr.msk.f32.vlgmr.msra.gmra.mrb[20].mxu1 %vm77_vm0, %v13567_v35 }
 0x6af   :  { %11946 = vmatprep.mubr.msk.f32.mxu1 %vm13403_vm1, %v13402_v37 }
 0x76d   :  { %v1177_v23 = vpop.f32.mrb[8].mxu0 }
 0x76e   :  { %v11890_v26 = vpop.f32.mrb[9].mxu0  ;;  %11898 = vmatprep.mubr.msk.f32.mxu0 %vm384_vm2, %v1177_v23  ;;  %v130_v23 = vld [vmem:[%s15092_s26 + $0x68] sm:$0xff] }
 0x76f   :  { %v132_v26 = vld [vmem:[%s15092_s26 + $0x78] sm:$0xff] }
 0x770   :  { %v12862_v33 = vpack.c.bf16 %v132_v26, %v131_v25  ;;  %v2705_v25 = vld [vmem:[%s15070_s11 + $0x10] sm:$0xff]  ;;  %v2706_v26 = vld [vmem:[%s15070_s11 + $0x18] sm:$0xff] }
 0x771   :  { %v1250_v28 = vpop.f32.mrb[16].mxu1 }
 0x772   :  { %v11895_v31 = vpop.f32.mrb[17].mxu1  ;;  %11899 = vmatmul.mubr.msk.f32.vlgmr.msra.gmra.mrb[10].mxu0 %vm384_vm2, %v1250_v28 }
 0x773   :  { %11902 = vmatpush3.msra.mxu0 %v149_v22  ;;  %11903 = vmatprep.mubr.msk.f32.mxu0 %vm384_vm2, %v13670_v32  ;;  %v129_v22 = vld [vmem:[%s15092_s26 + $0x60] sm:$0xff] }
 0x774   :  { %12835 = vmatprep.subr.bf16.mxu0 %v12834_v27  ;;  %v12858_v24 = vpack.c.bf16 %v130_v23, %v129_v22  ;;  %v12874_v22 = vpack.c.bf16 %v2704_v19, %v2703_v17  ;;  %v2708_v17 = vld [vmem:[%s15070_s11 + $0x28] sm:$0xff] }
 0x779   :  { %v11916_v38 = vpop.f32.mrb[18].mxu1 }
 0x77a   :  { %v1482_v39 = vpop.f32.mrb[19].mxu1  ;;  %11904 = vmatmul.mubr.msk.f32.vlgmr.msra.gmra.mrb[10].mxu0 %vm384_vm2, %v13668_v29  ;;  %v68_v29 = vld [vmem:[%s15066_s2 + $0x10] sm:$0xff] }
 0x77b   :  { %12837 = vmatpush3.bf16.msra.mxu0 %v12834_v27  ;;  %11925 = vmatprep.mubr.msk.f32.mxu0 %vm77_vm0, %v13554_v30 }
 0x77c   :  { %12839 = vmatprep.subr.bf16.mxu0 %v12838_v36 }
 0x77f   :  { %12841 = vmatpush3.bf16.msra.mxu0 %v12838_v36 }
 0x780   :  { %11939 = vmatprep.subr.mxu0 %v13402_v37 }
 0x781   :  { %v11938_v32 = vpop.f32.mrb[20].mxu1 }
 0x782   :  { %11926 = vmatmul.mubr.msk.f32.vlgmr.msra.gmra.mrb[12].mxu0 %vm77_vm0, %v13567_v35  ;;  %v1632_v40 = vpop.f32.mrb[21].mxu1 }
 0x783   :  { %11941 = vmatprep.mubr.msk.f32.mxu0 %vm13403_vm1, %v13402_v37 }
 0x855   :  { %v11927_v41 = vpop.f32.mrb[12].mxu0 }
 0x856   :  { %v1557_v42 = vpop.f32.mrb[13].mxu0  ;;  %11945 = vmatpush3.xpose.msk.msra.mxu1 %vm384_vm2, %v11927_v41 }
 0x857   :  { %11940 = vmatpush3.xpose.msk.msra.mxu0 %vm384_vm2, %v1557_v42  ;;  %11954 = vmatprep.subr.mxu1 %v13402_v37 }
 0x858   :  { %11949 = vmatprep.subr.mxu0 %v13402_v37 }
 0x859   :  { %11947 = vmatmul.mubr.msk.f32.vlgmr.msra.gmra.mrb[22].mxu1 %vm384_vm2, %v11916_v38 }
 0x85a   :  { %11942 = vmatmul.mubr.msk.f32.vlgmr.msra.gmra.mrb[14].mxu0 %vm384_vm2, %v1482_v39  ;;  %11955 = vmatpush3.msra.mxu1 %v11938_v32 }
 0x85b   :  { %11950 = vmatpush3.msra.mxu0 %v1632_v40  ;;  %11956 = vmatprep.mubr.msk.f32.mxu1 %vm13403_vm1, %v13402_v37 }
 0x85c   :  { %11951 = vmatprep.mubr.msk.f32.mxu0 %vm13403_vm1, %v13402_v37  ;;  %12851 = vmatprep.subr.bf16.mxu1 %v12850_v5 }
 0x85d   :  { %11959 = vmatprep.subr.mxu0 %v151_v6 }
 0x92c   :  { %v1789_v43 = vpop.f32.mrb[22].mxu1 }
 0x92d   :  { %v1790_v44 = vadd.f32 %v1789_v43, %v68_v29  ;;  %v1713_v45 = vpop.f32.mrb[14].mxu0  ;;  %v11948_v46 = vpop.f32.mrb[23].mxu1 }
 0x92e   :  { %v1714_v47 = vadd.f32 %v1713_v45, %v68_v29  ;;  %v11943_v49 = vpop.f32.mrb[15].mxu0 }
 0x92f   :  { %v1794_v50 = vadd.f32 %v1790_v44, %v13599_v48 }
 0x930   :  { %v1793_v51 = vadd.f32 %v1714_v47, %v13604_v52 }
 0x931   :  { %v1798_v53 = vsel %vm384_vm2, %v1794_v50, -inf }
 0x932   :  { %1799 = vmax.xlane.f32.xlu1 %v1798_v53  ;;  %v1795_v54 = vsel %vm384_vm2, %v1793_v51, -inf }
 0x933   :  { %1796 = vmax.xlane.f32.xlu0 %v1795_v54 }
 0x9bf   :  { %v1800_v55 = vpop.xlane.xlu1 %1799 }
 0x9c0   :  { %v1802_v56 = vsub.f32 %v1794_v50, %v1800_v55  ;;  %v1797_v57 = vpop.xlane.xlu0 %1796 }
 0x9c1   :  { %v1801_v58 = vsub.f32 %v1793_v51, %v1797_v57 }
 0x9c2   :  { %v1805_v59 = vmul.f32 1.442695, %v1802_v56 }
 0x9c3   :  { %v1803_v60 = vmul.f32 1.442695, %v1801_v58 }
 0x9c4   :  { %13256 = vpow2.f32 %v1805_v59 }
 0x9c5   :  { %13258 = vpow2.f32 %v1803_v60 }
 0x9ce   :  { %v13257_v61 = vpop.eup %13256 }
 0x9cf   :  { %v13259_v62 = vpop.eup %13258  ;;  %v1810_v63 = vsel %vm384_vm2, %v13257_v61, 0.0 }
 0x9d0   :  { %1811 = vadd.xlane.f32.xlu1 %v1810_v63  ;;  %v1807_v2 = vsel %vm384_vm2, %v13259_v62, 0.0 }
 0x9d1   :  { %1808 = vadd.xlane.f32.xlu0 %v1807_v2 }
 0xa5d   :  { %v1812_v7 = vpop.xlane.xlu1 %1811 }
 0xa5e   :  { %13260 = vrcp.f32 %v1812_v7  ;;  %v1809_v8 = vpop.xlane.xlu0 %1808 }
 0xa5f   :  { %13262 = vrcp.f32 %v1809_v8 }
 0xa68   :  { %v13261_v11 = vpop.eup %13260 }
 0xa69   :  { %v13263_v12 = vpop.eup %13262  ;;  %v1816_v13 = vmul.f32 %v13261_v11, %v13257_v61 }
 0xa6a   :  { %v1815_v15 = vmul.f32 %v13263_v12, %v13259_v62 }
 0xa6b   :  { %11957 = vmatmul.mubr.msk.f32.vlgmr.msra.gmra.mrb[24].mxu1 %vm384_vm2, %v1816_v13 }
 0xa6c   :  { %12853 = vmatpush3.bf16.msra.mxu1 %v12850_v5  ;;  %11952 = vmatmul.mubr.msk.f32.vlgmr.msra.gmra.mrb[16].mxu0 %vm384_vm2, %v1815_v15 }
 0xa6d   :  { %11972 = vmatprep.mubr.msk.f32.mxu1 %vm77_vm0, %v13554_v30  ;;  %12855 = vmatprep.subr.bf16.mxu1 %v12854_v14 }
 0xa6e   :  { %11960 = vmatpush3.msra.mxu0 %v151_v6 }
 0xa6f   :  { %12859 = vmatprep.subr.bf16.mxu0 %v12858_v24 }
 0xa70   :  { %12857 = vmatpush3.bf16.msra.mxu1 %v12854_v14 }
 0xa71   :  { %12867 = vmatprep.subr.bf16.mxu1 %v12866_v18 }
 0xa73   :  { %11973 = vmatmul.mubr.msk.f32.vlgmr.msra.gmra.mrb[26].mxu1 %vm77_vm0, %v13567_v35 }
 0xa74   :  { %12869 = vmatpush3.bf16.msra.mxu1 %v12866_v18  ;;  %11994 = vmatprep.mubr.msk.f32.mxu1 %vm77_vm0, %v13554_v30 }
 0xa75   :  { %12871 = vmatprep.subr.bf16.mxu1 %v12870_v21 }
 0xa78   :  { %12873 = vmatpush3.bf16.msra.mxu1 %v12870_v21  ;;  %v2722_v21 = vld [vmem:[%s15069_s12 + $0x18] sm:$0xff] }
 0xa79   :  { %12007 = vmatprep.subr.mxu1 %v13402_v37  ;;  %v12886_v23 = vpack.c.bf16 %v2722_v21, %v2721_v20  ;;  %v2725_v21 = vld [vmem:[%s15069_s12 + $0x30] sm:$0xff] }
 0xa7b   :  { %11995 = vmatmul.mubr.msk.f32.vlgmr.msra.gmra.mrb[28].mxu1 %vm77_vm0, %v13567_v35 }
 0xa7c   :  { %12009 = vmatprep.mubr.msk.f32.mxu1 %vm13403_vm1, %v13402_v37 }
 0xb3e   :  { %v1959_v27 = vpop.f32.mrb[24].mxu1 }
 0xb3f   :  { %v1886_v28 = vpop.f32.mrb[16].mxu0  ;;  %v11958_v31 = vpop.f32.mrb[25].mxu1 }
 0xb40   :  { %v11953_v34 = vpop.f32.mrb[17].mxu0  ;;  %11961 = vmatprep.mubr.msk.f32.mxu0 %vm384_vm2, %v1886_v28  ;;  %v13911_v28 = vld [vmem:[%s15071_s1 + $0x8] sm:$0xff]  ;;  %v2735_v31 = vld [vmem:[%s15072_s13] sm:$0xff] }
 0xb41   :  { %11962 = vmatmul.mubr.msk.f32.vlgmr.msra.gmra.mrb[10].mxu0 %vm384_vm2, %v1959_v27  ;;  %v12878_v27 = vpack.c.bf16 %v2706_v26, %v2705_v25  ;;  %v2710_v25 = vld [vmem:[%s15070_s11 + $0x38] sm:$0xff] }
 0xb42   :  { %12861 = vmatpush3.bf16.msra.mxu0 %v12858_v24  ;;  %11983 = vmatprep.mubr.msk.f32.mxu0 %vm77_vm0, %v13554_v30  ;;  %v69_v30 = vld [vmem:[%s15066_s2 + $0x18] sm:$0xff]  ;;  %v13898_v24 = vld [vmem:[%s15071_s1] sm:$0xff] }
 0xb43   :  { %12863 = vmatprep.subr.bf16.mxu0 %v12862_v33 }
 0xb46   :  { %v11974_v36 = vpop.f32.mrb[26].mxu1  ;;  %12865 = vmatpush3.bf16.msra.mxu0 %v12862_v33  ;;  %v2736_v33 = vld [vmem:[%s15072_s13 + $0x8] sm:$0xff] }
 0xb47   :  { %v2112_v38 = vpop.f32.mrb[27].mxu1  ;;  %11997 = vmatprep.subr.mxu0 %v13402_v37  ;;  %v12890_v34 = vpack.c.bf16 %v2736_v33, %v2735_v31 }
 0xb49   :  { %11984 = vmatmul.mubr.msk.f32.vlgmr.msra.gmra.mrb[18].mxu0 %vm77_vm0, %v13567_v35 }
 0xb4a   :  { %11999 = vmatprep.mubr.msk.f32.mxu0 %vm13403_vm1, %v13402_v37 }
 0xb4e   :  { %v11996_v39 = vpop.f32.mrb[28].mxu1 }
 0xb4f   :  { %v2262_v32 = vpop.f32.mrb[29].mxu1 }
 0xb50   :  { %12008 = vmatpush3.msra.mxu1 %v2262_v32 }
 0xb51   :  { %12875 = vmatprep.subr.bf16.mxu1 %v12874_v22 }
 0xc1c   :  { %v11985_v40 = vpop.f32.mrb[18].mxu0 }
 0xc1d   :  { %v2187_v41 = vpop.f32.mrb[19].mxu0 }
 0xc1e   :  { %11998 = vmatpush3.xpose.msk.msra.mxu0 %vm384_vm2, %v2187_v41 }
 0xc1f   :  { %12002 = vmatprep.subr.mxu0 %v13402_v37 }
 0xc21   :  { %12000 = vmatmul.mubr.msk.f32.vlgmr.msra.gmra.mrb[20].mxu0 %vm384_vm2, %v2112_v38 }
 0xc22   :  { %12003 = vmatpush3.xpose.msk.msra.mxu0 %vm384_vm2, %v11985_v40  ;;  %12004 = vmatprep.mubr.msk.f32.mxu0 %vm13403_vm1, %v13402_v37 }
 0xc23   :  { %12012 = vmatprep.subr.mxu0 %v13402_v37 }
 0xc25   :  { %12005 = vmatmul.mubr.msk.f32.vlgmr.msra.gmra.mrb[22].mxu0 %vm384_vm2, %v11974_v36 }
 0xc26   :  { %12013 = vmatpush3.msra.mxu0 %v11996_v39  ;;  %12014 = vmatprep.mubr.msk.f32.mxu0 %vm13403_vm1, %v13402_v37 }
 0xc27   :  { %12017 = vmatprep.subr.mxu0 %v152_v4 }
 0xcf4   :  { %v2343_v35 = vpop.f32.mrb[20].mxu0 }
 0xcf5   :  { %v2344_v42 = vadd.f32 %v2343_v35, %v69_v30  ;;  %v12001_v29 = vpop.f32.mrb[21].mxu0 }
 0xcf7   :  { %v2423_v43 = vadd.f32 %v2344_v42, %v13604_v52  ;;  %v10991_v42 = vld [vmem:[%s15073_s10] ss:$0 sm:$0xff] }
 0xcf8   :  { %v2419_v44 = vpop.f32.mrb[22].mxu0 }
 0xcf9   :  { %v2420_v45 = vadd.f32 %v2419_v44, %v69_v30  ;;  %v12006_v46 = vpop.f32.mrb[23].mxu0  ;;  %v2425_v47 = vsel %vm384_vm2, %v2423_v43, -inf  ;;  %v2737_v44 = vld [vmem:[%s15072_s13 + $0x10] sm:$0xff] }
 0xcfa   :  { %2426 = vmax.xlane.f32.xlu0 %v2425_v47 }
 0xcfb   :  { %v2424_v49 = vadd.f32 %v2420_v45, %v13599_v48  ;;  %v2738_v45 = vld [vmem:[%s15072_s13 + $0x18] sm:$0xff] }
 0xcfd   :  { %v2428_v50 = vsel %vm384_vm2, %v2424_v49, -inf }
 0xcfe   :  { %2429 = vmax.xlane.f32.xlu1 %v2428_v50 }
 0xd87   :  { %v2427_v51 = vpop.xlane.xlu0 %2426 }
 0xd88   :  { %v2431_v53 = vsub.f32 %v2423_v43, %v2427_v51 }
 0xd8a   :  { %v2433_v54 = vmul.f32 1.442695, %v2431_v53 }
 0xd8b   :  { %v2430_v55 = vpop.xlane.xlu1 %2429 }
 0xd8c   :  { %13264 = vpow2.f32 %v2433_v54  ;;  %v2432_v56 = vsub.f32 %v2424_v49, %v2430_v55  ;;  %v12894_v49 = vpack.c.bf16 %v2738_v45, %v2737_v44  ;;  %v2741_v44 = vld [vmem:[%s15072_s13 + $0x30] sm:$0xff] }
 0xd8e   :  { %v2435_v57 = vmul.f32 1.442695, %v2432_v56 }
 0xd90   :  { %13266 = vpow2.f32 %v2435_v57  ;;  %v13963_v57 = vld [vmem:[%s15074_s4 + $0x1] ss:$0 sm:$0xff] }
 0xd96   :  { %v13265_v52 = vpop.eup %13264 }
 0xd97   :  { %v2437_v58 = vsel %vm384_vm2, %v13265_v52, 0.0 }
 0xd98   :  { %2438 = vadd.xlane.f32.xlu0 %v2437_v58 }
 0xd9a   :  { %v13267_v59 = vpop.eup %13266 }
 0xd9b   :  { %v2440_v60 = vsel %vm384_vm2, %v13267_v59, 0.0 }
 0xd9c   :  { %2441 = vadd.xlane.f32.xlu1 %v2440_v60 }
 0xe25   :  { %v2439_v48 = vpop.xlane.xlu0 %2438 }
 0xe26   :  { %13268 = vrcp.f32 %v2439_v48 }
 0xe29   :  { %v2442_v61 = vpop.xlane.xlu1 %2441 }
 0xe2a   :  { %13270 = vrcp.f32 %v2442_v61 }
 0xe30   :  { %v13269_v62 = vpop.eup %13268 }
 0xe31   :  { %v2445_v63 = vmul.f32 %v13269_v62, %v13265_v52  ;;  %v13968_v52 = vld [vmem:[%s15074_s4] ss:$0 sm:$0xff] }
 0xe33   :  { %12010 = vmatmul.mubr.msk.f32.vlgmr.msra.gmra.mrb[30].mxu1 %vm384_vm2, %v2445_v63 }
 0xe34   :  { %v13271_v2 = vpop.eup %13270  ;;  %12877 = vmatpush3.bf16.msra.mxu1 %v12874_v22  ;;  %v2726_v22 = vld [vmem:[%s15069_s12 + $0x38] sm:$0xff] }
 0xe35   :  { %v2446_v3 = vmul.f32 %v13271_v2, %v13267_v59  ;;  %12879 = vmatprep.subr.bf16.mxu1 %v12878_v27 }
 0xe37   :  { %12015 = vmatmul.mubr.msk.f32.vlgmr.msra.gmra.mrb[24].mxu0 %vm384_vm2, %v2446_v3 }
 0xe38   :  { %12018 = vmatpush3.msra.mxu0 %v152_v4  ;;  %12881 = vmatpush3.bf16.msra.mxu1 %v12878_v27 }
 0xe39   :  { %12891 = vmatprep.subr.bf16.mxu1 %v12890_v34 }
 0xf06   :  { %v2516_v5 = vpop.f32.mrb[30].mxu1 }
 0xf07   :  { %v12011_v6 = vpop.f32.mrb[31].mxu1  ;;  %12019 = vmatprep.mubr.msk.f32.mxu0 %vm384_vm2, %v2516_v5 }
 0xf0a   :  { %v2589_v7 = vpop.f32.mrb[24].mxu0 }
 0xf0b   :  { %v12016_v8 = vpop.f32.mrb[25].mxu0  ;;  %12020 = vmatmul.mubr.msk.f32.vlgmr.msra.gmra.mrb[10].mxu0 %vm384_vm2, %v2589_v7 }
 0xf0c   :  { %12041 = vmatprep.mubr.msk.f32.mxu0 %vm77_vm0, %v13898_v24 }
 0xfde   :  { %v12021_v9 = vpop.f32.mrb[10].mxu0 }
 0xfdf   :  { %v13866_v10 = vadd.f32 %v12021_v9, %v13512_v1  ;;  %v2665_v11 = vpop.f32.mrb[11].mxu0  ;;  %v2719_v1 = vld [vmem:[%s15069_s12] sm:$0xff] }
 0xfe0   :  { %v13869_v12 = vadd.f32 %v2665_v11, %v13507_v0  ;;  %v2720_v0 = vld [vmem:[%s15069_s12 + $0x8] sm:$0xff] }
 0xfe1   :  { %v2680_v13 = vmul.f32 %v13866_v10, %v13866_v10  ;;  %v12882_v18 = vpack.c.bf16 %v2720_v0, %v2719_v1  ;;  %v2707_v0 = vld [vmem:[%s15070_s11 + $0x20] sm:$0xff] }
 0xfe2   :  { %v2679_v14 = vmul.f32 %v13869_v12, %v13869_v12 }
 0xfe3   :  { %v2684_v15 = vsel %vm77_vm0, %v2680_v13, 0.0  ;;  %12883 = vmatprep.subr.bf16.mxu0 %v12882_v18 }
 0xfe4   :  { %2685 = vadd.xlane.f32.xlu1 %v2684_v15  ;;  %v2681_v16 = vsel %vm77_vm0, %v2679_v14, 0.0  ;;  %12885 = vmatpush3.bf16.msra.mxu0 %v12882_v18  ;;  %v2723_v15 = vld [vmem:[%s15069_s12 + $0x20] sm:$0xff]  ;;  %v12898_v18 = vpack.c.bf16 %v2708_v17, %v2707_v0  ;;  %v2713_v17 = vld [vmem:[%s15070_s11 + $0x50] sm:$0xff] }
 0xfe5   :  { %2682 = vadd.xlane.f32.xlu0 %v2681_v16  ;;  %12887 = vmatprep.subr.bf16.mxu0 %v12886_v23  ;;  %v2724_v16 = vld [vmem:[%s15069_s12 + $0x28] sm:$0xff] }
 0xfe6   :  { %v12906_v1 = vpack.c.bf16 %v2724_v16, %v2723_v15 }
 0xfe8   :  { %12889 = vmatpush3.bf16.msra.mxu0 %v12886_v23  ;;  %v2709_v23 = vld [vmem:[%s15070_s11 + $0x30] sm:$0xff] }
 0xfe9   :  { %12055 = vmatprep.subr.mxu0 %v13402_v37 }
 0xfeb   :  { %12042 = vmatmul.mubr.msk.f32.vlgmr.msra.gmra.mrb[26].mxu0 %vm77_vm0, %v13911_v28 }
 0xfec   :  { %12057 = vmatprep.mubr.msk.f32.mxu0 %vm13403_vm1, %v13402_v37 }
0x1071   :  { %v2686_v36 = vpop.xlane.xlu1 %2685 }
0x1072   :  { %v2688_v38 = vmul.f32 0.03125, %v2686_v36  ;;  %v2683_v39 = vpop.xlane.xlu0 %2682  ;;  %v12902_v36 = vpack.c.bf16 %v2710_v25, %v2709_v23  ;;  %v2751_v23 = vld [vmem:[%s15075_s14] sm:$0xff] }
0x1073   :  { %v2687_v32 = vmul.f32 0.03125, %v2683_v39  ;;  %v2743_v25 = vld [vmem:[%s15072_s13 + $0x40] sm:$0xff] }
0x1074   :  { %v2690_v40 = vadd.f32 1e-06, %v2688_v38 }
0x1075   :  { %v2689_v41 = vadd.f32 1e-06, %v2687_v32 }
0x1076   :  { %13272 = vrsqrt.f32 %v2690_v40 }
0x1077   :  { %13274 = vrsqrt.f32 %v2689_v41 }
0x1080   :  { %v13273_v30 = vpop.eup %13272 }
0x1081   :  { %v13275_v35 = vpop.eup %13274  ;;  %v2694_v29 = vmul.f32 %v13273_v30, %v13866_v10 }
0x1082   :  { %v2693_v43 = vmul.f32 %v13275_v35, %v13869_v12 }
0x1083   :  { %v13937_v47 = vmul.f32 %v10991_v42, %v2694_v29  ;;  %v2739_v29 = vld [vmem:[%s15072_s13 + $0x20] sm:$0xff] }
0x1084   :  { %v13935_v46 = vmul.f32 %v10991_v42, %v2693_v43  ;;  %v2740_v43 = vld [vmem:[%s15072_s13 + $0x28] sm:$0xff] }
0x1085   :  { %v12914_v45 = vpack.c.bf16 %v2740_v43, %v2739_v29  ;;  %v2729_v29 = vld [vmem:[%s15069_s12 + $0x50] sm:$0xff]  ;;  %v2730_v43 = vld [vmem:[%s15069_s12 + $0x58] sm:$0xff] }
0x1086   :  { %12030 = vmatprep.mubr.msk.f32.mxu1 %vm77_vm0, %v13935_v46 }
0x1087   :  { %12031 = vmatmul.mubr.msk.f32.vlgmr.msra.gmra.mrb[32].mxu1 %vm77_vm0, %v13937_v47 }
0x1088   :  { %12893 = vmatpush3.bf16.msra.mxu1 %v12890_v34  ;;  %12052 = vmatprep.mubr.msk.f32.mxu1 %vm77_vm0, %v13898_v24  ;;  %v12910_v34 = vpack.c.bf16 %v2726_v22, %v2725_v21  ;;  %v2752_v22 = vld [vmem:[%s15075_s14 + $0x8] sm:$0xff] }
0x1089   :  { %12895 = vmatprep.subr.bf16.mxu1 %v12894_v49 }
0x108c   :  { %12897 = vmatpush3.bf16.msra.mxu1 %v12894_v49  ;;  %v2742_v49 = vld [vmem:[%s15072_s13 + $0x38] sm:$0xff] }
0x108d   :  { %12060 = vmatprep.subr.mxu1 %v13402_v37 }
0x108f   :  { %12053 = vmatmul.mubr.msk.f32.vlgmr.msra.gmra.mrb[34].mxu1 %vm77_vm0, %v13911_v28 }
0x1090   :  { %12062 = vmatprep.mubr.msk.f32.mxu1 %vm13403_vm1, %v13402_v37 }
0x10be   :  { %v12043_v50 = vpop.f32.mrb[26].mxu0 }
0x10bf   :  { %v2908_v51 = vpop.f32.mrb[27].mxu0  ;;  %12061 = vmatpush3.xpose.msk.msra.mxu1 %vm384_vm2, %v12043_v50  ;;  %v12918_v50 = vpack.c.bf16 %v2742_v49, %v2741_v44  ;;  %v12934_v44 = vpack.c.bf16 %v2730_v43, %v2729_v29  ;;  %v2750_v29 = vld [vmem:[%s15072_s13 + $0x78] sm:$0xff] }
0x10c0   :  { %12056 = vmatpush3.xpose.msk.msra.mxu0 %vm384_vm2, %v2908_v51  ;;  %12070 = vmatprep.subr.mxu1 %v13402_v37 }
0x10c1   :  { %12065 = vmatprep.subr.mxu0 %v13402_v37 }
0x115a   :  { %v12032_v53 = vpop.f32.mrb[32].mxu1 }
0x115b   :  { %v2827_v54 = vpop.f32.mrb[33].mxu1  ;;  %12063 = vmatmul.mubr.msk.f32.vlgmr.msra.gmra.mrb[36].mxu1 %vm384_vm2, %v12032_v53 }
0x115c   :  { %12058 = vmatmul.mubr.msk.f32.vlgmr.msra.gmra.mrb[28].mxu0 %vm384_vm2, %v2827_v54  ;;  %12072 = vmatprep.mubr.msk.f32.mxu1 %vm13403_vm1, %v13402_v37 }
0x115d   :  { %12067 = vmatprep.mubr.msk.f32.mxu0 %vm13403_vm1, %v13402_v37 }
0x1162   :  { %v12054_v55 = vpop.f32.mrb[34].mxu1 }
0x1163   :  { %v2983_v56 = vpop.f32.mrb[35].mxu1  ;;  %12071 = vmatpush3.msra.mxu1 %v12054_v55 }
0x1164   :  { %12066 = vmatpush3.msra.mxu0 %v2983_v56  ;;  %12907 = vmatprep.subr.bf16.mxu1 %v12906_v1 }
0x1165   :  { %12899 = vmatprep.subr.bf16.mxu0 %v12898_v18 }
0x122e   :  { %v3152_v58 = vpop.f32.mrb[36].mxu1 }
0x122f   :  { %v3153_v59 = vadd.f32 %v13963_v57, %v3152_v58  ;;  %v3076_v60 = vpop.f32.mrb[28].mxu0  ;;  %v12064_v48 = vpop.f32.mrb[37].mxu1 }
0x1230   :  { %v3077_v61 = vadd.f32 %v13968_v52, %v3076_v60  ;;  %v12059_v62 = vpop.f32.mrb[29].mxu0 }
0x1231   :  { %v3159_v63 = vsel %vm384_vm2, %v3153_v59, -inf }
0x1232   :  { %3160 = vmax.xlane.f32.xlu0 %v3159_v63  ;;  %v3156_v2 = vsel %vm384_vm2, %v3077_v61, -inf }
0x1233   :  { %3157 = vmax.xlane.f32.xlu1 %v3156_v2 }
0x12bf   :  { %v3161_v3 = vpop.xlane.xlu0 %3160 }
0x12c0   :  { %v3163_v4 = vsub.f32 %v3153_v59, %v3161_v3  ;;  %v3158_v5 = vpop.xlane.xlu1 %3157 }
0x12c1   :  { %v3162_v6 = vsub.f32 %v3077_v61, %v3158_v5 }
0x12c2   :  { %v3166_v7 = vmul.f32 1.442695, %v3163_v4 }
0x12c3   :  { %v3164_v8 = vmul.f32 1.442695, %v3162_v6 }
0x12c4   :  { %13276 = vpow2.f32 %v3166_v7 }
0x12c5   :  { %13278 = vpow2.f32 %v3164_v8 }
0x12ce   :  { %v13277_v9 = vpop.eup %13276 }
0x12cf   :  { %v13279_v11 = vpop.eup %13278  ;;  %v3171_v13 = vsel %vm384_vm2, %v13277_v9, 0.0 }
0x12d0   :  { %3172 = vadd.xlane.f32.xlu0 %v3171_v13  ;;  %v3168_v14 = vsel %vm384_vm2, %v13279_v11, 0.0  ;;  %v2712_v13 = vld [vmem:[%s15070_s11 + $0x48] sm:$0xff] }
0x12d1   :  { %3169 = vadd.xlane.f32.xlu1 %v3168_v14 }
0x135d   :  { %v3173_v19 = vpop.xlane.xlu0 %3172 }
0x135e   :  { %13280 = vrcp.f32 %v3173_v19  ;;  %v3170_v20 = vpop.xlane.xlu1 %3169 }
0x135f   :  { %13282 = vrcp.f32 %v3170_v20 }
0x1368   :  { %v13281_v26 = vpop.eup %13280 }
0x1369   :  { %v13283_v27 = vpop.eup %13282  ;;  %v3177_v31 = vmul.f32 %v13281_v26, %v13277_v9  ;;  %v2744_v26 = vld [vmem:[%s15072_s13 + $0x48] sm:$0xff] }
0x136a   :  { %v3176_v33 = vmul.f32 %v13283_v27, %v13279_v11  ;;  %v2711_v11 = vld [vmem:[%s15070_s11 + $0x40] sm:$0xff]  ;;  %v2745_v27 = vld [vmem:[%s15072_s13 + $0x50] sm:$0xff] }
0x136b   :  { %12073 = vmatmul.mubr.msk.f32.vlgmr.msra.gmra.mrb[38].mxu1 %vm384_vm2, %v3177_v31  ;;  %v12922_v14 = vpack.c.bf16 %v2712_v13, %v2711_v11  ;;  %v12938_v31 = vpack.c.bf16 %v2744_v26, %v2743_v25  ;;  %v2716_v11 = vld [vmem:[%s15070_s11 + $0x68] sm:$0xff] }
0x136c   :  { %12909 = vmatpush3.bf16.msra.mxu1 %v12906_v1  ;;  %12068 = vmatmul.mubr.msk.f32.vlgmr.msra.gmra.mrb[30].mxu0 %vm384_vm2, %v3176_v33  ;;  %v2746_v33 = vld [vmem:[%s15072_s13 + $0x58] sm:$0xff] }
0x136d   :  { %12901 = vmatpush3.bf16.msra.mxu0 %v12898_v18  ;;  %12083 = vmatprep.mubr.msk.f32.mxu0 %vm77_vm0, %v13935_v46  ;;  %v2714_v18 = vld [vmem:[%s15070_s11 + $0x58] sm:$0xff] }
0x136e   :  { %12911 = vmatprep.subr.bf16.mxu1 %v12910_v34  ;;  %12903 = vmatprep.subr.bf16.mxu0 %v12902_v36  ;;  %v12926_v21 = vpack.c.bf16 %v2714_v18, %v2713_v17 }
0x136f   :  { %12094 = vmatprep.mubr.msk.f32.mxu1 %vm77_vm0, %v13898_v24 }
0x1370   :  { %12913 = vmatpush3.bf16.msra.mxu1 %v12910_v34  ;;  %v12942_v34 = vpack.c.bf16 %v2746_v33, %v2745_v27 }
0x1371   :  { %12905 = vmatpush3.bf16.msra.mxu0 %v12902_v36  ;;  %12108 = vmatprep.subr.mxu1 %v13402_v37 }
0x1372   :  { %12915 = vmatprep.subr.bf16.mxu0 %v12914_v45 }
0x1373   :  { %12095 = vmatmul.mubr.msk.f32.vlgmr.msra.gmra.mrb[40].mxu1 %vm77_vm0, %v13911_v28 }
0x1374   :  { %12084 = vmatmul.mubr.msk.f32.vlgmr.msra.gmra.mrb[32].mxu0 %vm77_vm0, %v13937_v47  ;;  %12110 = vmatprep.mubr.msk.f32.mxu1 %vm13403_vm1, %v13402_v37 }
0x1375   :  { %12105 = vmatprep.mubr.msk.f32.mxu0 %vm77_vm0, %v13898_v24  ;;  %12917 = vmatpush3.bf16.msra.mxu0 %v12914_v45 }
0x1376   :  { %12919 = vmatprep.subr.bf16.mxu0 %v12918_v50 }
0x1379   :  { %12921 = vmatpush3.bf16.msra.mxu0 %v12918_v50 }
0x137a   :  { %12118 = vmatprep.subr.mxu0 %v13402_v37 }
0x137c   :  { %12106 = vmatmul.mubr.msk.f32.vlgmr.msra.gmra.mrb[34].mxu0 %vm77_vm0, %v13911_v28 }
0x137d   :  { %12120 = vmatprep.mubr.msk.f32.mxu0 %vm13403_vm1, %v13402_v37 }
0x143e   :  { %v14015_v38 = vpop.f32.mrb[38].mxu1 }
0x143f   :  { %v14017_v39 = vpop.f32.mrb[30].mxu0  ;;  %v12074_v32 = vpop.f32.mrb[39].mxu1 }
0x1440   :  { %v12069_v40 = vpop.f32.mrb[31].mxu0  ;;  %v2727_v32 = vld [vmem:[%s15069_s12 + $0x40] sm:$0xff] }
0x1441   :  { %v2728_v40 = vld [vmem:[%s15069_s12 + $0x48] sm:$0xff] }
0x1446   :  { %v12096_v41 = vpop.f32.mrb[40].mxu1 }
0x1447   :  { %v12085_v30 = vpop.f32.mrb[32].mxu0  ;;  %v3465_v35 = vpop.f32.mrb[41].mxu1 }
0x1448   :  { %v3390_v42 = vpop.f32.mrb[33].mxu0  ;;  %12109 = vmatpush3.xpose.msk.msra.mxu1 %vm384_vm2, %v3465_v35 }
0x1449   :  { %12113 = vmatprep.subr.mxu1 %v13402_v37 }
0x144b   :  { %12111 = vmatmul.mubr.msk.f32.vlgmr.msra.gmra.mrb[42].mxu1 %vm384_vm2, %v3390_v42 }
0x144c   :  { %12114 = vmatpush3.xpose.msk.msra.mxu1 %vm384_vm2, %v12096_v41  ;;  %12115 = vmatprep.mubr.msk.f32.mxu1 %vm13403_vm1, %v13402_v37 }
0x144d   :  { %12123 = vmatprep.subr.mxu1 %v13402_v37 }
0x144f   :  { %12116 = vmatmul.mubr.msk.f32.vlgmr.msra.gmra.mrb[44].mxu1 %vm384_vm2, %v12085_v30  ;;  %v12107_v8 = vpop.f32.mrb[34].mxu0  ;;  %v12930_v30 = vpack.c.bf16 %v2728_v40, %v2727_v32 }
0x1450   :  { %12125 = vmatprep.mubr.msk.f32.mxu1 %vm13403_vm1, %v13402_v37  ;;  %v3540_v9 = vpop.f32.mrb[35].mxu0  ;;  %12124 = vmatpush3.msra.mxu1 %v12107_v8 }
0x1451   :  { %12119 = vmatpush3.msra.mxu0 %v3540_v9  ;;  %12923 = vmatprep.subr.bf16.mxu1 %v12922_v14  ;;  %v2715_v9 = vld [vmem:[%s15070_s11 + $0x60] sm:$0xff] }
0x1452   :  { %12128 = vmatprep.subr.mxu0 %v2752_v22  ;;  %v12946_v13 = vpack.c.bf16 %v2716_v11, %v2715_v9 }
0x151e   :  { %v3621_v51 = vpop.f32.mrb[42].mxu1 }
0x151f   :  { %v3622_v53 = vadd.f32 %v13968_v52, %v3621_v51  ;;  %v12112_v54 = vpop.f32.mrb[43].mxu1 }
0x1521   :  { %v3701_v55 = vsel %vm384_vm2, %v3622_v53, -inf }
0x1522   :  { %3702 = vmax.xlane.f32.xlu0 %v3701_v55  ;;  %v3697_v56 = vpop.f32.mrb[44].mxu1 }
0x1523   :  { %v3698_v58 = vadd.f32 %v13963_v57, %v3697_v56  ;;  %v12117_v59 = vpop.f32.mrb[45].mxu1 }
0x1525   :  { %v3704_v60 = vsel %vm384_vm2, %v3698_v58, -inf }
0x1526   :  { %3705 = vmax.xlane.f32.xlu1 %v3704_v60 }
0x15af   :  { %v3703_v48 = vpop.xlane.xlu0 %3702 }
0x15b0   :  { %v3707_v61 = vsub.f32 %v3622_v53, %v3703_v48 }
0x15b2   :  { %v3709_v62 = vmul.f32 1.442695, %v3707_v61 }
0x15b3   :  { %v3706_v63 = vpop.xlane.xlu1 %3705 }
0x15b4   :  { %13284 = vpow2.f32 %v3709_v62  ;;  %v3708_v2 = vsub.f32 %v3698_v58, %v3706_v63 }
0x15b6   :  { %v3711_v3 = vmul.f32 1.442695, %v3708_v2 }
0x15b8   :  { %13286 = vpow2.f32 %v3711_v3 }
0x15be   :  { %v13285_v4 = vpop.eup %13284 }
0x15bf   :  { %v3713_v5 = vsel %vm384_vm2, %v13285_v4, 0.0 }
0x15c0   :  { %3714 = vadd.xlane.f32.xlu0 %v3713_v5 }
0x15c2   :  { %v13287_v6 = vpop.eup %13286 }
0x15c3   :  { %v3716_v7 = vsel %vm384_vm2, %v13287_v6, 0.0 }
0x15c4   :  { %3717 = vadd.xlane.f32.xlu1 %v3716_v7 }
0x164d   :  { %v3715_v15 = vpop.xlane.xlu0 %3714 }
0x164e   :  { %13288 = vrcp.f32 %v3715_v15 }
0x1651   :  { %v3718_v16 = vpop.xlane.xlu1 %3717 }
0x1652   :  { %13290 = vrcp.f32 %v3718_v16 }
0x1658   :  { %v13289_v1 = vpop.eup %13288 }
0x1659   :  { %v3721_v0 = vmul.f32 %v13289_v1, %v13285_v4  ;;  %v2717_v1 = vld [vmem:[%s15070_s11 + $0x70] sm:$0xff] }
0x165b   :  { %12121 = vmatmul.mubr.msk.f32.vlgmr.msra.gmra.mrb[36].mxu0 %vm384_vm2, %v3721_v0  ;;  %v2718_v0 = vld [vmem:[%s15070_s11 + $0x78] sm:$0xff] }
0x165c   :  { %v13291_v19 = vpop.eup %13290  ;;  %12129 = vmatpush3.msra.mxu0 %v2752_v22  ;;  %v2731_v22 = vld [vmem:[%s15069_s12 + $0x60] sm:$0xff] }
0x165d   :  { %v3722_v20 = vmul.f32 %v13291_v19, %v13287_v6  ;;  %12133 = vmatprep.subr.mxu0 %v2751_v23 }
0x165f   :  { %12126 = vmatmul.mubr.msk.f32.vlgmr.msra.gmra.mrb[46].mxu1 %vm384_vm2, %v3722_v20  ;;  %v12950_v20 = vpack.c.bf16 %v2718_v0, %v2717_v1 }
0x1660   :  { %12925 = vmatpush3.bf16.msra.mxu1 %v12922_v14  ;;  %12146 = vmatprep.mubr.msk.f32.mxu1 %vm77_vm0, %v13935_v46  ;;  %v2753_v14 = vld [vmem:[%s15075_s14 + $0x10] sm:$0xff] }
0x1661   :  { %12927 = vmatprep.subr.bf16.mxu1 %v12926_v21 }
0x1664   :  { %12929 = vmatpush3.bf16.msra.mxu1 %v12926_v21 }
0x1665   :  { %12939 = vmatprep.subr.bf16.mxu1 %v12938_v31 }
0x1667   :  { %12147 = vmatmul.mubr.msk.f32.vlgmr.msra.gmra.mrb[48].mxu1 %vm77_vm0, %v13937_v47 }
0x1668   :  { %12168 = vmatprep.mubr.msk.f32.mxu1 %vm77_vm0, %v13898_v24  ;;  %12941 = vmatpush3.bf16.msra.mxu1 %v12938_v31 }
0x1669   :  { %12943 = vmatprep.subr.bf16.mxu1 %v12942_v34 }
0x166c   :  { %12945 = vmatpush3.bf16.msra.mxu1 %v12942_v34 }
0x166d   :  { %12176 = vmatprep.subr.mxu1 %v13402_v37 }
0x166f   :  { %12169 = vmatmul.mubr.msk.f32.vlgmr.msra.gmra.mrb[50].mxu1 %vm77_vm0, %v13911_v28 }
0x1670   :  { %12178 = vmatprep.mubr.msk.f32.mxu1 %vm13403_vm1, %v13402_v37 }
0x172e   :  { %v3792_v36 = vpop.f32.mrb[36].mxu0 }
0x172f   :  { %v12122_v41 = vpop.f32.mrb[37].mxu0  ;;  %12130 = vmatprep.mubr.msk.f32.mxu0 %vm384_vm2, %v3792_v36 }
0x1732   :  { %v3865_v35 = vpop.f32.mrb[46].mxu1 }
0x1733   :  { %v12127_v42 = vpop.f32.mrb[47].mxu1  ;;  %12131 = vmatmul.mubr.msk.f32.vlgmr.msra.gmra.mrb[38].mxu0 %vm384_vm2, %v3865_v35  ;;  %v2749_v35 = vld [vmem:[%s15072_s13 + $0x70] sm:$0xff] }
0x1734   :  { %12134 = vmatpush3.msra.mxu0 %v2751_v23  ;;  %12135 = vmatprep.mubr.msk.f32.mxu0 %vm384_vm2, %v14017_v39  ;;  %v2732_v23 = vld [vmem:[%s15069_s12 + $0x68] sm:$0xff]  ;;  %v12966_v43 = vpack.c.bf16 %v2750_v29, %v2749_v35 }
0x1735   :  { %12931 = vmatprep.subr.bf16.mxu0 %v12930_v30  ;;  %v12954_v25 = vpack.c.bf16 %v2732_v23, %v2731_v22  ;;  %v5317_v22 = vld [vmem:[%s15076_s16 + $0x18] sm:$0xff] }
0x173a   :  { %v12148_v45 = vpop.f32.mrb[48].mxu1 }
0x173b   :  { %v4097_v49 = vpop.f32.mrb[49].mxu1  ;;  %12136 = vmatmul.mubr.msk.f32.vlgmr.msra.gmra.mrb[38].mxu0 %vm384_vm2, %v14015_v38 }
0x173c   :  { %12933 = vmatpush3.bf16.msra.mxu0 %v12930_v30  ;;  %12157 = vmatprep.mubr.msk.f32.mxu0 %vm77_vm0, %v13898_v24  ;;  %v2748_v30 = vld [vmem:[%s15072_s13 + $0x68] sm:$0xff] }
0x173d   :  { %12935 = vmatprep.subr.bf16.mxu0 %v12934_v44 }
0x1740   :  { %12937 = vmatpush3.bf16.msra.mxu0 %v12934_v44 }
0x1741   :  { %12171 = vmatprep.subr.mxu0 %v13402_v37 }
0x1742   :  { %v12170_v39 = vpop.f32.mrb[50].mxu1 }
0x1743   :  { %12158 = vmatmul.mubr.msk.f32.vlgmr.msra.gmra.mrb[40].mxu0 %vm77_vm0, %v13911_v28  ;;  %v4247_v50 = vpop.f32.mrb[51].mxu1 }
0x1744   :  { %12173 = vmatprep.mubr.msk.f32.mxu0 %vm13403_vm1, %v13402_v37 }
0x1816   :  { %v12159_v51 = vpop.f32.mrb[40].mxu0 }
0x1817   :  { %v4172_v53 = vpop.f32.mrb[41].mxu0  ;;  %12177 = vmatpush3.xpose.msk.msra.mxu1 %vm384_vm2, %v12159_v51 }
0x1818   :  { %12172 = vmatpush3.xpose.msk.msra.mxu0 %vm384_vm2, %v4172_v53  ;;  %12186 = vmatprep.subr.mxu1 %v13402_v37 }
0x1819   :  { %12181 = vmatprep.subr.mxu0 %v13402_v37 }
0x181a   :  { %12179 = vmatmul.mubr.msk.f32.vlgmr.msra.gmra.mrb[52].mxu1 %vm384_vm2, %v12148_v45 }
0x181b   :  { %12174 = vmatmul.mubr.msk.f32.vlgmr.msra.gmra.mrb[42].mxu0 %vm384_vm2, %v4097_v49  ;;  %12187 = vmatpush3.msra.mxu1 %v12170_v39 }
0x181c   :  { %12182 = vmatpush3.msra.mxu0 %v4247_v50  ;;  %12188 = vmatprep.mubr.msk.f32.mxu1 %vm13403_vm1, %v13402_v37 }
0x181d   :  { %12183 = vmatprep.mubr.msk.f32.mxu0 %vm13403_vm1, %v13402_v37  ;;  %12947 = vmatprep.subr.bf16.mxu1 %v12946_v13 }
0x181e   :  { %12191 = vmatprep.subr.mxu0 %v2753_v14 }
0x18ed   :  { %v4404_v38 = vpop.f32.mrb[52].mxu1 }
0x18ee   :  { %v4405_v54 = vadd.f32 %v13963_v57, %v4404_v38  ;;  %v4328_v55 = vpop.f32.mrb[42].mxu0  ;;  %v12180_v56 = vpop.f32.mrb[53].mxu1 }
0x18ef   :  { %v4329_v58 = vadd.f32 %v13968_v52, %v4328_v55  ;;  %v12175_v59 = vpop.f32.mrb[43].mxu0 }
0x18f0   :  { %v4411_v60 = vsel %vm384_vm2, %v4405_v54, -inf }
0x18f1   :  { %4412 = vmax.xlane.f32.xlu1 %v4411_v60  ;;  %v4408_v48 = vsel %vm384_vm2, %v4329_v58, -inf }
0x18f2   :  { %4409 = vmax.xlane.f32.xlu0 %v4408_v48 }
0x197e   :  { %v4413_v61 = vpop.xlane.xlu1 %4412 }
0x197f   :  { %v4415_v62 = vsub.f32 %v4405_v54, %v4413_v61  ;;  %v4410_v63 = vpop.xlane.xlu0 %4409 }
0x1980   :  { %v4414_v2 = vsub.f32 %v4329_v58, %v4410_v63 }
0x1981   :  { %v4418_v3 = vmul.f32 1.442695, %v4415_v62 }
0x1982   :  { %v4416_v4 = vmul.f32 1.442695, %v4414_v2 }
0x1983   :  { %13292 = vpow2.f32 %v4418_v3 }
0x1984   :  { %13294 = vpow2.f32 %v4416_v4 }
0x198d   :  { %v13293_v5 = vpop.eup %13292 }
0x198e   :  { %v13295_v6 = vpop.eup %13294  ;;  %v4423_v7 = vsel %vm384_vm2, %v13293_v5, 0.0 }
0x198f   :  { %4424 = vadd.xlane.f32.xlu1 %v4423_v7  ;;  %v4420_v8 = vsel %vm384_vm2, %v13295_v6, 0.0  ;;  %v2754_v7 = vld [vmem:[%s15075_s14 + $0x18] sm:$0xff] }
0x1990   :  { %4421 = vadd.xlane.f32.xlu0 %v4420_v8 }
0x1a1c   :  { %v4425_v15 = vpop.xlane.xlu1 %4424 }
0x1a1d   :  { %13296 = vrcp.f32 %v4425_v15  ;;  %v4422_v16 = vpop.xlane.xlu0 %4421 }
0x1a1e   :  { %13298 = vrcp.f32 %v4422_v16 }
0x1a27   :  { %v13297_v17 = vpop.eup %13296 }
0x1a28   :  { %v13299_v18 = vpop.eup %13298  ;;  %v4429_v19 = vmul.f32 %v13297_v17, %v13293_v5 }
0x1a29   :  { %v4428_v21 = vmul.f32 %v13299_v18, %v13295_v6 }
0x1a2a   :  { %12189 = vmatmul.mubr.msk.f32.vlgmr.msra.gmra.mrb[54].mxu1 %vm384_vm2, %v4429_v19 }
0x1a2b   :  { %12949 = vmatpush3.bf16.msra.mxu1 %v12946_v13  ;;  %12184 = vmatmul.mubr.msk.f32.vlgmr.msra.gmra.mrb[44].mxu0 %vm384_vm2, %v4428_v21 }
0x1a2c   :  { %12204 = vmatprep.mubr.msk.f32.mxu1 %vm77_vm0, %v13935_v46  ;;  %12951 = vmatprep.subr.bf16.mxu1 %v12950_v20  ;;  %v2733_v46 = vld [vmem:[%s15069_s12 + $0x70] sm:$0xff] }
0x1a2d   :  { %12192 = vmatpush3.msra.mxu0 %v2753_v14 }
0x1a2e   :  { %12955 = vmatprep.subr.bf16.mxu0 %v12954_v25 }
0x1a2f   :  { %12953 = vmatpush3.bf16.msra.mxu1 %v12950_v20  ;;  %v5316_v20 = vld [vmem:[%s15076_s16 + $0x10] sm:$0xff] }
0x1a30   :  { %v12974_v23 = vpack.c.bf16 %v5317_v22, %v5316_v20 }
0x1a32   :  { %12205 = vmatmul.mubr.msk.f32.vlgmr.msra.gmra.mrb[56].mxu1 %vm77_vm0, %v13937_v47  ;;  %v2734_v47 = vld [vmem:[%s15069_s12 + $0x78] sm:$0xff] }
0x1a33   :  { %12226 = vmatprep.mubr.msk.f32.mxu1 %vm77_vm0, %v13898_v24  ;;  %v12958_v33 = vpack.c.bf16 %v2734_v47, %v2733_v46  ;;  %v5402_v46 = vld [vmem:[%s15077_s17 + $0x8] sm:$0xff]  ;;  %v5403_v47 = vld [vmem:[%s15077_s17 + $0x10] sm:$0xff] }
0x1afd   :  { %v4572_v26 = vpop.f32.mrb[54].mxu1 }
0x1afe   :  { %v4499_v27 = vpop.f32.mrb[44].mxu0  ;;  %v12190_v31 = vpop.f32.mrb[55].mxu1 }
0x1aff   :  { %v12185_v34 = vpop.f32.mrb[45].mxu0  ;;  %12193 = vmatprep.mubr.msk.f32.mxu0 %vm384_vm2, %v4499_v27  ;;  %v5404_v27 = vld [vmem:[%s15077_s17 + $0x18] sm:$0xff] }
0x1b00   :  { %12194 = vmatmul.mubr.msk.f32.vlgmr.msra.gmra.mrb[38].mxu0 %vm384_vm2, %v4572_v26  ;;  %v12982_v31 = vpack.c.bf16 %v5404_v27, %v5403_v47  ;;  %v5406_v34 = vld [vmem:[%s15077_s17 + $0x28] sm:$0xff] }
0x1b01   :  { %12957 = vmatpush3.bf16.msra.mxu0 %v12954_v25  ;;  %12215 = vmatprep.mubr.msk.f32.mxu0 %vm77_vm0, %v13898_v24  ;;  %v2747_v24 = vld [vmem:[%s15072_s13 + $0x60] sm:$0xff] }
0x1b02   :  { %12959 = vmatprep.subr.bf16.mxu0 %v12958_v33  ;;  %v12962_v42 = vpack.c.bf16 %v2748_v30, %v2747_v24  ;;  %v5401_v25 = vld [vmem:[%s15077_s17] sm:$0xff] }
0x1b03   :  { %v12978_v26 = vpack.c.bf16 %v5402_v46, %v5401_v25  ;;  %v11075_v25 = vld [vmem:[%s15092_s26 + $0x90] sm:$0xff]  ;;  %v11076_v46 = vld [vmem:[%s15092_s26 + $0x98] sm:$0xff] }
0x1b04   :  { %12963 = vmatprep.subr.bf16.mxu1 %v12962_v42  ;;  %v13006_v27 = vpack.c.bf16 %v11076_v46, %v11075_v25 }
0x1b05   :  { %v12206_v36 = vpop.f32.mrb[56].mxu1  ;;  %12961 = vmatpush3.bf16.msra.mxu0 %v12958_v33  ;;  %12965 = vmatpush3.bf16.msra.mxu1 %v12962_v42  ;;  %v5405_v33 = vld [vmem:[%s15077_s17 + $0x20] sm:$0xff] }
0x1b06   :  { %v4725_v32 = vpop.f32.mrb[57].mxu1  ;;  %12229 = vmatprep.subr.mxu0 %v13402_v37  ;;  %12967 = vmatprep.subr.bf16.mxu1 %v12966_v43 }
0x1b08   :  { %12216 = vmatmul.mubr.msk.f32.vlgmr.msra.gmra.mrb[46].mxu0 %vm77_vm0, %v13911_v28 }
0x1b09   :  { %12231 = vmatprep.mubr.msk.f32.mxu0 %vm13403_vm1, %v13402_v37  ;;  %12969 = vmatpush3.bf16.msra.mxu1 %v12966_v43  ;;  %v11050_v43 = vld [vmem:[%s15078_s15] ss:$0 sm:$0xff] }
0x1b0a   :  { %12239 = vmatprep.subr.mxu1 %v13402_v37 }
0x1b0c   :  { %12227 = vmatmul.mubr.msk.f32.vlgmr.msra.gmra.mrb[58].mxu1 %vm77_vm0, %v13911_v28 }
0x1b0d   :  { %12241 = vmatprep.mubr.msk.f32.mxu1 %vm13403_vm1, %v13402_v37 }
0x1bdb   :  { %v12217_v40 = vpop.f32.mrb[46].mxu0 }
0x1bdc   :  { %v4800_v41 = vpop.f32.mrb[47].mxu0 }
0x1bdd   :  { %12230 = vmatpush3.xpose.msk.msra.mxu0 %vm384_vm2, %v4800_v41 }
0x1bde   :  { %12234 = vmatprep.subr.mxu0 %v13402_v37 }
0x1be0   :  { %12232 = vmatmul.mubr.msk.f32.vlgmr.msra.gmra.mrb[48].mxu0 %vm384_vm2, %v4725_v32 }
0x1be1   :  { %12235 = vmatpush3.xpose.msk.msra.mxu0 %vm384_vm2, %v12217_v40  ;;  %12236 = vmatprep.mubr.msk.f32.mxu0 %vm13403_vm1, %v13402_v37 }
0x1be2   :  { %12244 = vmatprep.subr.mxu0 %v13402_v37 }
0x1be4   :  { %12237 = vmatmul.mubr.msk.f32.vlgmr.msra.gmra.mrb[50].mxu0 %vm384_vm2, %v12206_v36  ;;  %v12986_v36 = vpack.c.bf16 %v5406_v34, %v5405_v33 }
0x1be5   :  { %12246 = vmatprep.mubr.msk.f32.mxu0 %vm13403_vm1, %v13402_v37 }
0x1cb3   :  { %v4956_v44 = vpop.f32.mrb[48].mxu0 }
0x1cb4   :  { %v4957_v45 = vadd.f32 %v13968_v52, %v4956_v44  ;;  %v12233_v49 = vpop.f32.mrb[49].mxu0 }
0x1cb6   :  { %v5036_v39 = vsel %vm384_vm2, %v4957_v45, -inf }
0x1cb7   :  { %5037 = vmax.xlane.f32.xlu0 %v5036_v39  ;;  %v5032_v50 = vpop.f32.mrb[50].mxu0 }
0x1cb8   :  { %v5033_v51 = vadd.f32 %v13963_v57, %v5032_v50  ;;  %v12238_v53 = vpop.f32.mrb[51].mxu0  ;;  %v12228_v57 = vpop.f32.mrb[58].mxu1  ;;  %v5407_v50 = vld [vmem:[%s15077_s17 + $0x30] sm:$0xff] }
0x1cb9   :  { %v4875_v62 = vpop.f32.mrb[59].mxu1  ;;  %12245 = vmatpush3.msra.mxu0 %v12228_v57 }
0x1cba   :  { %v5039_v38 = vsel %vm384_vm2, %v5033_v51, -inf  ;;  %12240 = vmatpush3.msra.mxu1 %v4875_v62  ;;  %12249 = vmatprep.subr.mxu0 %v2754_v7  ;;  %v11057_v62 = vld [vmem:[%s15090_s23 + $0x80] sm:$0xff] }
0x1cbb   :  { %5040 = vmax.xlane.f32.xlu1 %v5039_v38 }
0x1d44   :  { %v5038_v54 = vpop.xlane.xlu0 %5037 }
0x1d45   :  { %v5042_v55 = vsub.f32 %v4957_v45, %v5038_v54 }
0x1d47   :  { %v5044_v28 = vmul.f32 1.442695, %v5042_v55 }
0x1d48   :  { %v5041_v56 = vpop.xlane.xlu1 %5040 }
0x1d49   :  { %13300 = vpow2.f32 %v5044_v28  ;;  %v5043_v58 = vsub.f32 %v5033_v51, %v5041_v56  ;;  %v5408_v51 = vld [vmem:[%s15077_s17 + $0x38] sm:$0xff] }
0x1d4a   :  { %v12990_v53 = vpack.c.bf16 %v5408_v51, %v5407_v50 }
0x1d4b   :  { %v5046_v59 = vmul.f32 1.442695, %v5043_v58 }
0x1d4d   :  { %13302 = vpow2.f32 %v5046_v59 }
0x1d53   :  { %v13301_v52 = vpop.eup %13300 }
0x1d54   :  { %v5048_v60 = vsel %vm384_vm2, %v13301_v52, 0.0 }
0x1d55   :  { %5049 = vadd.xlane.f32.xlu0 %v5048_v60 }
0x1d57   :  { %v13303_v48 = vpop.eup %13302 }
0x1d58   :  { %v5051_v61 = vsel %vm384_vm2, %v13303_v48, 0.0 }
0x1d59   :  { %5052 = vadd.xlane.f32.xlu1 %v5051_v61 }
0x1de2   :  { %v5050_v63 = vpop.xlane.xlu0 %5049 }
0x1de3   :  { %13304 = vrcp.f32 %v5050_v63  ;;  %v11058_v63 = vld [vmem:[%s15090_s23 + $0x88] sm:$0xff] }
0x1de6   :  { %v5053_v2 = vpop.xlane.xlu1 %5052 }
0x1de7   :  { %13306 = vrcp.f32 %v5053_v2  ;;  %v12994_v2 = vpack.c.bf16 %v11058_v63, %v11057_v62  ;;  %v11062_v62 = vld [vmem:[%s15090_s23 + $0xa8] sm:$0xff] }
0x1ded   :  { %v13305_v3 = vpop.eup %13304 }
0x1dee   :  { %v5056_v4 = vmul.f32 %v13305_v3, %v13301_v52  ;;  %v11089_v3 = vld [vmem:[%s15091_s27 + $0x80] sm:$0xff] }
0x1df0   :  { %12242 = vmatmul.mubr.msk.f32.vlgmr.msra.gmra.mrb[60].mxu1 %vm384_vm2, %v5056_v4  ;;  %v11090_v4 = vld [vmem:[%s15091_s27 + $0x88] sm:$0xff] }
0x1df1   :  { %v13307_v5 = vpop.eup %13306 }
0x1df2   :  { %v5057_v6 = vmul.f32 %v13307_v5, %v13303_v48  ;;  %v13010_v5 = vpack.c.bf16 %v11090_v4, %v11089_v3  ;;  %v11078_v3 = vld [vmem:[%s15092_s26 + $0xa8] sm:$0xff] }
0x1df4   :  { %12247 = vmatmul.mubr.msk.f32.vlgmr.msra.gmra.mrb[52].mxu0 %vm384_vm2, %v5057_v6  ;;  %v11059_v6 = vld [vmem:[%s15090_s23 + $0x90] sm:$0xff] }
0x1df5   :  { %12250 = vmatpush3.msra.mxu0 %v2754_v7  ;;  %v11060_v7 = vld [vmem:[%s15090_s23 + $0x98] sm:$0xff] }
0x1df6   :  { %12979 = vmatprep.subr.bf16.mxu0 %v12978_v26 }
0x1ec3   :  { %v5127_v8 = vpop.f32.mrb[60].mxu1 }
0x1ec4   :  { %v12243_v9 = vpop.f32.mrb[61].mxu1  ;;  %12251 = vmatprep.mubr.msk.f32.mxu0 %vm384_vm2, %v5127_v8  ;;  %v12998_v8 = vpack.c.bf16 %v11060_v7, %v11059_v6  ;;  %v11063_v7 = vld [vmem:[%s15090_s23 + $0xb0] sm:$0xff] }
0x1ec5   :  { %v11091_v9 = vld [vmem:[%s15091_s27 + $0x90] sm:$0xff] }
0x1ec7   :  { %v5200_v11 = vpop.f32.mrb[52].mxu0 }
0x1ec8   :  { %v12248_v13 = vpop.f32.mrb[53].mxu0  ;;  %12252 = vmatmul.mubr.msk.f32.vlgmr.msra.gmra.mrb[38].mxu0 %vm384_vm2, %v5200_v11  ;;  %v11092_v11 = vld [vmem:[%s15091_s27 + $0x98] sm:$0xff] }
0x1ec9   :  { %12981 = vmatpush3.bf16.msra.mxu0 %v12978_v26  ;;  %v13014_v13 = vpack.c.bf16 %v11092_v11, %v11091_v9 }
0x1eca   :  { %12983 = vmatprep.subr.bf16.mxu0 %v12982_v31 }
0x1ecd   :  { %12985 = vmatpush3.bf16.msra.mxu0 %v12982_v31 }
0x1ece   :  { %12987 = vmatprep.subr.bf16.mxu0 %v12986_v36 }
0x1ed1   :  { %12989 = vmatpush3.bf16.msra.mxu0 %v12986_v36 }
0x1ed2   :  { %12991 = vmatprep.subr.bf16.mxu0 %v12990_v53 }
0x1ed5   :  { %12993 = vmatpush3.bf16.msra.mxu0 %v12990_v53 }
0x1ed6   :  { %13011 = vmatprep.subr.bf16.mxu0 %v13010_v5 }
0x1f9b   :  { %v12253_v14 = vpop.f32.mrb[38].mxu0 }
0x1f9c   :  { %v14221_v15 = vadd.f32 %v12253_v14, %v13866_v10  ;;  %v5276_v16 = vpop.f32.mrb[39].mxu0  ;;  %v5314_v10 = vld [vmem:[%s15076_s16] sm:$0xff] }
0x1f9d   :  { %v14224_v1 = vadd.f32 %v5276_v16, %v13869_v12  ;;  %v5315_v12 = vld [vmem:[%s15076_s16 + $0x8] sm:$0xff]  ;;  %v11073_v14 = vld [vmem:[%s15092_s26 + $0x80] sm:$0xff] }
0x1f9e   :  { %v5291_v0 = vmul.f32 %v14221_v15, %v14221_v15  ;;  %v12970_v21 = vpack.c.bf16 %v5315_v12, %v5314_v10 }
0x1f9f   :  { %v5290_v17 = vmul.f32 %v14224_v1, %v14224_v1 }
0x1fa0   :  { %v5295_v18 = vsel %vm77_vm0, %v5291_v0, 0.0  ;;  %12971 = vmatprep.subr.bf16.mxu1 %v12970_v21 }
0x1fa1   :  { %5296 = vadd.xlane.f32.xlu1 %v5295_v18  ;;  %v5292_v19 = vsel %vm77_vm0, %v5290_v17, 0.0  ;;  %12973 = vmatpush3.bf16.msra.mxu1 %v12970_v21  ;;  %v11056_v21 = vld [vmem:[%s15065_s5 + $0x1] ss:$0 sm:$0xff] }
0x1fa2   :  { %5293 = vadd.xlane.f32.xlu0 %v5292_v19  ;;  %12975 = vmatprep.subr.bf16.mxu1 %v12974_v23 }
0x1fa5   :  { %12977 = vmatpush3.bf16.msra.mxu1 %v12974_v23 }
0x1fa6   :  { %12995 = vmatprep.subr.bf16.mxu1 %v12994_v2 }
0x202e   :  { %v5297_v32 = vpop.xlane.xlu1 %5296 }
0x202f   :  { %v5299_v40 = vmul.f32 0.03125, %v5297_v32  ;;  %v5294_v41 = vpop.xlane.xlu0 %5293 }
0x2030   :  { %v5298_v24 = vmul.f32 0.03125, %v5294_v41 }
0x2031   :  { %v5301_v30 = vadd.f32 1e-06, %v5299_v40 }
0x2032   :  { %v5300_v35 = vadd.f32 1e-06, %v5298_v24  ;;  %v13392_v24 = vld [vmem:[%s15066_s2] sm:$0xff] }
0x2033   :  { %13308 = vrsqrt.f32 %v5301_v30 }
0x2034   :  { %13310 = vrsqrt.f32 %v5300_v35 }
0x203d   :  { %v13309_v42 = vpop.eup %13308 }
0x203e   :  { %v13311_v29 = vpop.eup %13310  ;;  %v5305_v44 = vmul.f32 %v13309_v42, %v14221_v15  ;;  %v14368_v42 = vld [vmem:[%s15067_s3] sm:$0xff] }
0x203f   :  { %v5304_v45 = vmul.f32 %v13311_v29, %v14224_v1 }
0x2040   :  { %v5313_v39 = vmul.f32 %v11050_v43, %v5305_v44 }
0x2041   :  { %v5312_v49 = vmul.f32 %v11050_v43, %v5304_v45 }
0x2043   :  { %12262 = vmatprep.mubr.msk.f32.mxu1 %vm77_vm0, %v5312_v49 }
0x2044   :  { %12263 = vmatmul.mubr.msk.f32.vlgmr.msra.gmra.mrb[62].mxu1 %vm77_vm0, %v5313_v39  ;;  %v14375_v39 = vld [vmem:[%s15067_s3 + $0x8] sm:$0xff] }
0x2045   :  { %12997 = vmatpush3.bf16.msra.mxu1 %v12994_v2  ;;  %v11077_v2 = vld [vmem:[%s15092_s26 + $0xa0] sm:$0xff] }
0x2046   :  { %12999 = vmatprep.subr.bf16.mxu1 %v12998_v8  ;;  %v13026_v4 = vpack.c.bf16 %v11078_v3, %v11077_v2 }
0x2049   :  { %13001 = vmatpush3.bf16.msra.mxu1 %v12998_v8  ;;  %v11064_v8 = vld [vmem:[%s15090_s23 + $0xb8] sm:$0xff] }
0x2117   :  { %v12264_v38 = vpop.f32.mrb[62].mxu1 }
0x2118   :  { %v5390_v54 = vpop.f32.mrb[63].mxu1  ;;  %v5400_v28 = vmax.f32 %v12264_v38, 0.0 }
0x2119   :  { %v5399_v55 = vmax.f32 %v5390_v54, 0.0 }
0x211b   :  { %12281 = vmatprep.mubr.msk.f32.mxu0 %vm5409_vm3, %v5399_v55 }
0x211c   :  { %12282 = vmatmul.mubr.msk.f32.vlgmr.msra.gmra.mrb[54].mxu0 %vm5409_vm3, %v5400_v28 }
0x211d   :  { %13013 = vmatpush3.bf16.msra.mxu0 %v13010_v5 }
0x211e   :  { %13015 = vmatprep.subr.bf16.mxu0 %v13014_v13 }
0x2121   :  { %13017 = vmatpush3.bf16.msra.mxu0 %v13014_v13  ;;  %v13022_v13 = vpack.c.bf16 %v11064_v8, %v11063_v7 }
0x2122   :  { %12327 = vmatprep.subr.mxu0 %v13402_v37 }
0x21ef   :  { %v12283_v56 = vpop.f32.mrb[54].mxu0 }
0x21f0   :  { %v14278_v58 = vadd.f32 %v12283_v56, %v14221_v15  ;;  %v5482_v59 = vpop.f32.mrb[55].mxu0  ;;  %v11074_v15 = vld [vmem:[%s15092_s26 + $0x88] sm:$0xff] }
0x21f1   :  { %v14281_v52 = vadd.f32 %v5482_v59, %v14224_v1  ;;  %v13002_v16 = vpack.c.bf16 %v11074_v15, %v11073_v14  ;;  %v11079_v14 = vld [vmem:[%s15092_s26 + $0xb0] sm:$0xff]  ;;  %v11080_v15 = vld [vmem:[%s15092_s26 + $0xb8] sm:$0xff] }
0x21f2   :  { %v5496_v60 = vmul.f32 %v14278_v58, %v14278_v58 }
0x21f3   :  { %v5495_v48 = vmul.f32 %v14281_v52, %v14281_v52  ;;  %13003 = vmatprep.subr.bf16.mxu1 %v13002_v16 }
0x21f4   :  { %v5500_v61 = vsel %vm77_vm0, %v5496_v60, 0.0 }
0x21f5   :  { %5501 = vadd.xlane.f32.xlu1 %v5500_v61  ;;  %v5497_v57 = vsel %vm77_vm0, %v5495_v48, 0.0 }
0x21f6   :  { %5498 = vadd.xlane.f32.xlu0 %v5497_v57  ;;  %v11061_v57 = vld [vmem:[%s15090_s23 + $0xa0] sm:$0xff] }
0x21f7   :  { %v13018_v63 = vpack.c.bf16 %v11062_v62, %v11061_v57 }
0x2282   :  { %v5502_v1 = vpop.xlane.xlu1 %5501 }
0x2283   :  { %v5504_v0 = vmul.f32 0.03125, %v5502_v1  ;;  %v5499_v17 = vpop.xlane.xlu0 %5498  ;;  %v11094_v1 = vld [vmem:[%s15091_s27 + $0xa8] sm:$0xff] }
0x2284   :  { %v5503_v18 = vmul.f32 0.03125, %v5499_v17 }
0x2285   :  { %v5506_v19 = vadd.f32 1e-06, %v5504_v0 }
0x2286   :  { %v5505_v10 = vadd.f32 1e-06, %v5503_v18  ;;  %v13030_v18 = vpack.c.bf16 %v11080_v15, %v11079_v14  ;;  %v11099_v14 = vld [vmem:[%s15091_s27 + $0xd0] sm:$0xff]  ;;  %v11100_v15 = vld [vmem:[%s15091_s27 + $0xd8] sm:$0xff] }
0x2287   :  { %13312 = vrsqrt.f32 %v5506_v19 }
0x2288   :  { %13314 = vrsqrt.f32 %v5505_v10  ;;  %v11095_v10 = vld [vmem:[%s15091_s27 + $0xb0] sm:$0xff] }
0x2291   :  { %v13313_v12 = vpop.eup %13312 }
0x2292   :  { %v13315_v20 = vpop.eup %13314  ;;  %v5510_v22 = vmul.f32 %v13313_v12, %v14278_v58  ;;  %v11096_v12 = vld [vmem:[%s15091_s27 + $0xb8] sm:$0xff] }
0x2293   :  { %v5509_v23 = vmul.f32 %v13315_v20, %v14281_v52  ;;  %v13038_v20 = vpack.c.bf16 %v11096_v12, %v11095_v10 }
0x2294   :  { %v14333_v26 = vmul.f32 %v11056_v21, %v5510_v22 }
0x2295   :  { %v14331_v47 = vmul.f32 %v11056_v21, %v5509_v23 }
0x2297   :  { %12292 = vmatprep.mubr.msk.f32.mxu1 %vm77_vm0, %v14331_v47  ;;  %12314 = vmatprep.mubr.msk.f32.mxu0 %vm77_vm0, %v14331_v47 }
0x2298   :  { %12293 = vmatmul.mubr.msk.f32.vlgmr.msra.gmra.mrb[64].mxu1 %vm77_vm0, %v14333_v26  ;;  %12315 = vmatmul.mubr.msk.f32.vlgmr.msra.gmra.mrb[56].mxu0 %vm77_vm0, %v14333_v26 }
0x2299   :  { %13005 = vmatpush3.bf16.msra.mxu1 %v13002_v16  ;;  %12303 = vmatprep.mubr.msk.f32.mxu1 %vm77_vm0, %v14331_v47  ;;  %v11093_v16 = vld [vmem:[%s15091_s27 + $0xa0] sm:$0xff] }
0x229a   :  { %13007 = vmatprep.subr.bf16.mxu1 %v13006_v27  ;;  %12329 = vmatprep.mubr.msk.f32.mxu0 %vm13403_vm1, %v13402_v37  ;;  %v13034_v19 = vpack.c.bf16 %v11094_v1, %v11093_v16  ;;  %v13062_v16 = vpack.c.bf16 %v11100_v15, %v11099_v14  ;;  %v11106_v1 = vld [vmem:[%s15068_s9 + $0x28] sm:$0xff]  ;;  %v11103_v15 = vld [vmem:[%s15091_s27 + $0xf0] sm:$0xff] }
0x229d   :  { %13009 = vmatpush3.bf16.msra.mxu1 %v13006_v27 }
0x229e   :  { %12317 = vmatprep.subr.mxu1 %v13402_v37 }
0x22a0   :  { %12304 = vmatmul.mubr.msk.f32.vlgmr.msra.gmra.mrb[66].mxu1 %vm77_vm0, %v14333_v26 }
0x22a1   :  { %12319 = vmatprep.mubr.msk.f32.mxu1 %vm13403_vm1, %v13402_v37 }
0x236b   :  { %v12294_v31 = vpop.f32.mrb[64].mxu1  ;;  %v12316_v33 = vpop.f32.mrb[56].mxu0 }
0x236c   :  { %v5647_v34 = vpop.f32.mrb[65].mxu1  ;;  %v5797_v36 = vpop.f32.mrb[57].mxu0 }
0x236d   :  { %12328 = vmatpush3.msra.mxu0 %v5797_v36 }
0x236e   :  { %13019 = vmatprep.subr.bf16.mxu0 %v13018_v63 }
0x2373   :  { %v12305_v32 = vpop.f32.mrb[66].mxu1 }
0x2374   :  { %v5722_v40 = vpop.f32.mrb[67].mxu1 }
0x2375   :  { %12318 = vmatpush3.xpose.msk.msra.mxu1 %vm384_vm2, %v5722_v40  ;;  %v13395_v40 = vld [vmem:[%s15066_s2 + $0x8] sm:$0xff] }
0x2376   :  { %12322 = vmatprep.subr.mxu1 %v13402_v37 }
0x2378   :  { %12320 = vmatmul.mubr.msk.f32.vlgmr.msra.gmra.mrb[68].mxu1 %vm384_vm2, %v5647_v34 }
0x2379   :  { %12323 = vmatpush3.xpose.msk.msra.mxu1 %vm384_vm2, %v12305_v32  ;;  %12324 = vmatprep.mubr.msk.f32.mxu1 %vm13403_vm1, %v13402_v37 }
0x237a   :  { %12332 = vmatprep.subr.mxu1 %v13402_v37 }
0x237c   :  { %12325 = vmatmul.mubr.msk.f32.vlgmr.msra.gmra.mrb[70].mxu1 %vm384_vm2, %v12294_v31 }
0x237d   :  { %12333 = vmatpush3.msra.mxu1 %v12316_v33  ;;  %12334 = vmatprep.mubr.msk.f32.mxu1 %vm13403_vm1, %v13402_v37 }
0x237e   :  { %13027 = vmatprep.subr.bf16.mxu1 %v13026_v4 }
0x244b   :  { %v5878_v41 = vpop.f32.mrb[68].mxu1 }
0x244c   :  { %v5879_v30 = vadd.f32 %v13392_v24, %v5878_v41  ;;  %v12321_v35 = vpop.f32.mrb[69].mxu1 }
0x244e   :  { %v5958_v29 = vadd.f32 %v14368_v42, %v5879_v30 }
0x244f   :  { %v5954_v43 = vpop.f32.mrb[70].mxu1 }
0x2450   :  { %v5955_v44 = vadd.f32 %v13392_v24, %v5954_v43  ;;  %v12326_v45 = vpop.f32.mrb[71].mxu1  ;;  %v5960_v49 = vsel %vm384_vm2, %v5958_v29, -inf }
0x2451   :  { %5961 = vmax.xlane.f32.xlu1 %v5960_v49 }
0x2452   :  { %v5959_v50 = vadd.f32 %v14375_v39, %v5955_v44 }
0x2454   :  { %v5963_v51 = vsel %vm384_vm2, %v5959_v50, -inf }
0x2455   :  { %5964 = vmax.xlane.f32.xlu0 %v5963_v51 }
0x24de   :  { %v5962_v53 = vpop.xlane.xlu1 %5961 }
0x24df   :  { %v5966_v38 = vsub.f32 %v5958_v29, %v5962_v53 }
0x24e1   :  { %v5968_v54 = vmul.f32 1.442695, %v5966_v38 }
0x24e2   :  { %v5965_v55 = vpop.xlane.xlu0 %5964 }
0x24e3   :  { %13316 = vpow2.f32 %v5968_v54  ;;  %v5967_v28 = vsub.f32 %v5959_v50, %v5965_v55 }
0x24e5   :  { %v5970_v56 = vmul.f32 1.442695, %v5967_v28 }
0x24e7   :  { %13318 = vpow2.f32 %v5970_v56 }
0x24ed   :  { %v13317_v59 = vpop.eup %13316 }
0x24ee   :  { %v5972_v60 = vsel %vm384_vm2, %v13317_v59, 0.0 }
0x24ef   :  { %5973 = vadd.xlane.f32.xlu1 %v5972_v60 }
0x24f1   :  { %v13319_v48 = vpop.eup %13318 }
0x24f2   :  { %v5975_v61 = vsel %vm384_vm2, %v13319_v48, 0.0 }
0x24f3   :  { %5976 = vadd.xlane.f32.xlu0 %v5975_v61  ;;  %v11066_v61 = vld [vmem:[%s15090_s23 + $0xc8] sm:$0xff] }
0x257c   :  { %v5974_v5 = vpop.xlane.xlu1 %5973 }
0x257d   :  { %13320 = vrcp.f32 %v5974_v5  ;;  %v11068_v5 = vld [vmem:[%s15090_s23 + $0xd8] sm:$0xff] }
0x2580   :  { %v5977_v6 = vpop.xlane.xlu0 %5976 }
0x2581   :  { %13322 = vrcp.f32 %v5977_v6 }
0x2587   :  { %v13321_v9 = vpop.eup %13320 }
0x2588   :  { %v5980_v11 = vmul.f32 %v13321_v9, %v13317_v59  ;;  %v11097_v9 = vld [vmem:[%s15091_s27 + $0xc0] sm:$0xff] }
0x258a   :  { %12330 = vmatmul.mubr.msk.f32.vlgmr.msra.gmra.mrb[58].mxu0 %vm384_vm2, %v5980_v11  ;;  %v11098_v11 = vld [vmem:[%s15091_s27 + $0xc8] sm:$0xff] }
0x258b   :  { %v13323_v0 = vpop.eup %13322  ;;  %13021 = vmatpush3.bf16.msra.mxu0 %v13018_v63  ;;  %12345 = vmatprep.mubr.msk.f32.mxu0 %vm77_vm0, %v14331_v47 }
0x258c   :  { %v5981_v17 = vmul.f32 %v13323_v0, %v13319_v48  ;;  %13023 = vmatprep.subr.bf16.mxu0 %v13022_v13  ;;  %v11065_v48 = vld [vmem:[%s15090_s23 + $0xc0] sm:$0xff] }
0x258d   :  { %v13042_v57 = vpack.c.bf16 %v11066_v61, %v11065_v48  ;;  %v11105_v0 = vld [vmem:[%s15068_s9 + $0x20] sm:$0xff]  ;;  %v11070_v61 = vld [vmem:[%s15090_s23 + $0xe8] sm:$0xff] }
0x258e   :  { %12335 = vmatmul.mubr.msk.f32.vlgmr.msra.gmra.mrb[72].mxu1 %vm384_vm2, %v5981_v17  ;;  %v11069_v48 = vld [vmem:[%s15090_s23 + $0xe0] sm:$0xff] }
0x258f   :  { %13025 = vmatpush3.bf16.msra.mxu0 %v13022_v13  ;;  %13029 = vmatpush3.bf16.msra.mxu1 %v13026_v4  ;;  %v11067_v4 = vld [vmem:[%s15090_s23 + $0xd0] sm:$0xff]  ;;  %v13058_v13 = vpack.c.bf16 %v11098_v11, %v11097_v9  ;;  %v11101_v11 = vld [vmem:[%s15091_s27 + $0xe0] sm:$0xff] }
0x2590   :  { %12356 = vmatprep.mubr.msk.f32.mxu1 %vm77_vm0, %v14331_v47  ;;  %13031 = vmatprep.subr.bf16.mxu1 %v13030_v18  ;;  %v13046_v8 = vpack.c.bf16 %v11068_v5, %v11067_v4  ;;  %v11072_v4 = vld [vmem:[%s15090_s23 + $0xf8] sm:$0xff] }
0x2591   :  { %13035 = vmatprep.subr.bf16.mxu0 %v13034_v19 }
0x2592   :  { %12346 = vmatmul.mubr.msk.f32.vlgmr.msra.gmra.mrb[60].mxu0 %vm77_vm0, %v14333_v26 }
0x2593   :  { %13033 = vmatpush3.bf16.msra.mxu1 %v13030_v18  ;;  %13037 = vmatpush3.bf16.msra.mxu0 %v13034_v19  ;;  %v11081_v18 = vld [vmem:[%s15092_s26 + $0xc0] sm:$0xff]  ;;  %v11082_v19 = vld [vmem:[%s15092_s26 + $0xc8] sm:$0xff] }
0x2594   :  { %12367 = vmatprep.mubr.msk.f32.mxu0 %vm77_vm0, %v14331_v47  ;;  %13039 = vmatprep.subr.bf16.mxu0 %v13038_v20  ;;  %v13050_v12 = vpack.c.bf16 %v11082_v19, %v11081_v18  ;;  %v11087_v19 = vld [vmem:[%s15092_s26 + $0xf0] sm:$0xff] }
0x2595   :  { %12370 = vmatprep.subr.mxu1 %v13402_v37 }
0x2596   :  { %12357 = vmatmul.mubr.msk.f32.vlgmr.msra.gmra.mrb[74].mxu1 %vm77_vm0, %v14333_v26 }
0x2597   :  { %13041 = vmatpush3.bf16.msra.mxu0 %v13038_v20  ;;  %12372 = vmatprep.mubr.msk.f32.mxu1 %vm13403_vm1, %v13402_v37 }
0x2598   :  { %12380 = vmatprep.subr.mxu0 %v13402_v37 }
0x259a   :  { %12368 = vmatmul.mubr.msk.f32.vlgmr.msra.gmra.mrb[62].mxu0 %vm77_vm0, %v14333_v26 }
0x259b   :  { %12382 = vmatprep.mubr.msk.f32.mxu0 %vm13403_vm1, %v13402_v37 }
0x265d   :  { %v14437_v21 = vpop.f32.mrb[58].mxu0 }
0x265e   :  { %v12331_v22 = vpop.f32.mrb[59].mxu0 }
0x2661   :  { %v14439_v23 = vpop.f32.mrb[72].mxu1 }
0x2662   :  { %v12336_v25 = vpop.f32.mrb[73].mxu1 }
0x2663   :  { %v11083_v25 = vld [vmem:[%s15092_s26 + $0xd0] sm:$0xff] }
0x2665   :  { %v12347_v46 = vpop.f32.mrb[60].mxu0 }
0x2666   :  { %v6194_v27 = vpop.f32.mrb[61].mxu0 }
0x2669   :  { %v12358_v31 = vpop.f32.mrb[74].mxu1 }
0x266a   :  { %v6269_v33 = vpop.f32.mrb[75].mxu1 }
0x266b   :  { %12371 = vmatpush3.xpose.msk.msra.mxu1 %vm384_vm2, %v6269_v33 }
0x266c   :  { %12375 = vmatprep.subr.mxu1 %v13402_v37 }
0x266d   :  { %v12369_v34 = vpop.f32.mrb[62].mxu0 }
0x266e   :  { %v6344_v36 = vpop.f32.mrb[63].mxu0  ;;  %12373 = vmatmul.mubr.msk.f32.vlgmr.msra.gmra.mrb[76].mxu1 %vm384_vm2, %v6194_v27 }
0x266f   :  { %12376 = vmatpush3.xpose.msk.msra.mxu1 %vm384_vm2, %v12358_v31  ;;  %12381 = vmatpush3.msra.mxu0 %v6344_v36 }
0x2670   :  { %12377 = vmatprep.mubr.msk.f32.mxu1 %vm13403_vm1, %v13402_v37  ;;  %12385 = vmatprep.subr.mxu1 %v13402_v37 }
0x2671   :  { %12390 = vmatprep.subr.mxu0 %v11106_v1 }
0x2672   :  { %12378 = vmatmul.mubr.msk.f32.vlgmr.msra.gmra.mrb[78].mxu1 %vm384_vm2, %v12347_v46  ;;  %v11084_v46 = vld [vmem:[%s15092_s26 + $0xd8] sm:$0xff] }
0x2673   :  { %12386 = vmatpush3.msra.mxu1 %v12369_v34  ;;  %12387 = vmatprep.mubr.msk.f32.mxu1 %vm13403_vm1, %v13402_v37  ;;  %v13054_v27 = vpack.c.bf16 %v11084_v46, %v11083_v25 }
0x2674   :  { %13043 = vmatprep.subr.bf16.mxu1 %v13042_v57 }
0x2741   :  { %v6425_v32 = vpop.f32.mrb[76].mxu1 }
0x2742   :  { %v6426_v41 = vadd.f32 %v13395_v40, %v6425_v32  ;;  %v12374_v24 = vpop.f32.mrb[77].mxu1 }
0x2744   :  { %v6505_v30 = vadd.f32 %v14368_v42, %v6426_v41 }
0x2745   :  { %v6501_v35 = vpop.f32.mrb[78].mxu1 }
0x2746   :  { %v6502_v29 = vadd.f32 %v13395_v40, %v6501_v35  ;;  %v12379_v43 = vpop.f32.mrb[79].mxu1  ;;  %v6507_v44 = vsel %vm384_vm2, %v6505_v30, -inf  ;;  %v13396_v40 = vld [vmem:[%s15066_s2 + $0x10] sm:$0xff] }
0x2747   :  { %6508 = vmax.xlane.f32.xlu0 %v6507_v44 }
0x2748   :  { %v6506_v45 = vadd.f32 %v14375_v39, %v6502_v29 }
0x274a   :  { %v6510_v49 = vsel %vm384_vm2, %v6506_v45, -inf }
0x274b   :  { %6511 = vmax.xlane.f32.xlu1 %v6510_v49 }
0x27d4   :  { %v6509_v50 = vpop.xlane.xlu0 %6508 }
0x27d5   :  { %v6513_v51 = vsub.f32 %v6505_v30, %v6509_v50 }
0x27d7   :  { %v6515_v53 = vmul.f32 1.442695, %v6513_v51 }
0x27d8   :  { %v6512_v38 = vpop.xlane.xlu1 %6511 }
0x27d9   :  { %13324 = vpow2.f32 %v6515_v53  ;;  %v6514_v54 = vsub.f32 %v6506_v45, %v6512_v38 }
0x27db   :  { %v6517_v55 = vmul.f32 1.442695, %v6514_v54 }
0x27dd   :  { %13326 = vpow2.f32 %v6517_v55 }
0x27e3   :  { %v13325_v28 = vpop.eup %13324 }
0x27e4   :  { %v6519_v56 = vsel %vm384_vm2, %v13325_v28, 0.0 }
0x27e5   :  { %6520 = vadd.xlane.f32.xlu0 %v6519_v56 }
0x27e7   :  { %v13327_v59 = vpop.eup %13326 }
0x27e8   :  { %v6522_v60 = vsel %vm384_vm2, %v13327_v59, 0.0 }
0x27e9   :  { %6523 = vadd.xlane.f32.xlu1 %v6522_v60 }
0x2872   :  { %v6521_v62 = vpop.xlane.xlu0 %6520 }
0x2873   :  { %13328 = vrcp.f32 %v6521_v62  ;;  %v11107_v62 = vld [vmem:[%s15068_s9 + $0x30] sm:$0xff] }
0x2876   :  { %v6524_v63 = vpop.xlane.xlu1 %6523 }
0x2877   :  { %13330 = vrcp.f32 %v6524_v63 }
0x287d   :  { %v13329_v2 = vpop.eup %13328 }
0x287e   :  { %v6527_v3 = vmul.f32 %v13329_v2, %v13325_v28 }
0x2880   :  { %12383 = vmatmul.mubr.msk.f32.vlgmr.msra.gmra.mrb[64].mxu0 %vm384_vm2, %v6527_v3  ;;  %v11071_v3 = vld [vmem:[%s15090_s23 + $0xf0] sm:$0xff] }
0x2881   :  { %v13331_v6 = vpop.eup %13330  ;;  %12391 = vmatpush3.msra.mxu0 %v11106_v1 }
0x2882   :  { %v6528_v7 = vmul.f32 %v13331_v6, %v13327_v59  ;;  %12395 = vmatprep.subr.mxu0 %v11105_v0 }
0x2884   :  { %12388 = vmatmul.mubr.msk.f32.vlgmr.msra.gmra.mrb[80].mxu1 %vm384_vm2, %v6528_v7 }
0x2885   :  { %13045 = vmatpush3.bf16.msra.mxu1 %v13042_v57  ;;  %12408 = vmatprep.mubr.msk.f32.mxu1 %vm77_vm0, %v14331_v47  ;;  %v13066_v57 = vpack.c.bf16 %v11070_v61, %v11069_v48  ;;  %v11108_v61 = vld [vmem:[%s15068_s9 + $0x38] sm:$0xff] }
0x2886   :  { %13047 = vmatprep.subr.bf16.mxu1 %v13046_v8 }
0x2889   :  { %13049 = vmatpush3.bf16.msra.mxu1 %v13046_v8  ;;  %v13070_v8 = vpack.c.bf16 %v11072_v4, %v11071_v3  ;;  %v14637_v3 = vld [vmem:[%s15071_s1] sm:$0xff] }
0x288a   :  { %13059 = vmatprep.subr.bf16.mxu1 %v13058_v13 }
0x288c   :  { %12409 = vmatmul.mubr.msk.f32.vlgmr.msra.gmra.mrb[82].mxu1 %vm77_vm0, %v14333_v26 }
0x288d   :  { %13061 = vmatpush3.bf16.msra.mxu1 %v13058_v13  ;;  %12430 = vmatprep.mubr.msk.f32.mxu1 %vm77_vm0, %v14331_v47  ;;  %v11102_v13 = vld [vmem:[%s15091_s27 + $0xe8] sm:$0xff] }
0x288e   :  { %13063 = vmatprep.subr.bf16.mxu1 %v13062_v16  ;;  %v13082_v14 = vpack.c.bf16 %v11102_v13, %v11101_v11 }
0x2891   :  { %13065 = vmatpush3.bf16.msra.mxu1 %v13062_v16  ;;  %v11104_v16 = vld [vmem:[%s15091_s27 + $0xf8] sm:$0xff] }
0x2892   :  { %12438 = vmatprep.subr.mxu1 %v13402_v37  ;;  %v13086_v1 = vpack.c.bf16 %v11104_v16, %v11103_v15  ;;  %v11168_v16 = vld [vmem:[%s15070_s11 + $0x88] sm:$0xff] }
0x2894   :  { %12431 = vmatmul.mubr.msk.f32.vlgmr.msra.gmra.mrb[84].mxu1 %vm77_vm0, %v14333_v26 }
0x2895   :  { %12440 = vmatprep.mubr.msk.f32.mxu1 %vm13403_vm1, %v13402_v37 }
0x2953   :  { %v6598_v17 = vpop.f32.mrb[64].mxu0 }
0x2954   :  { %v12384_v10 = vpop.f32.mrb[65].mxu0  ;;  %12392 = vmatprep.mubr.msk.f32.mxu0 %vm384_vm2, %v6598_v17  ;;  %v11086_v17 = vld [vmem:[%s15092_s26 + $0xe8] sm:$0xff] }
0x2955   :  { %v11088_v10 = vld [vmem:[%s15092_s26 + $0xf8] sm:$0xff] }
0x2956   :  { %v13078_v25 = vpack.c.bf16 %v11088_v10, %v11087_v19  ;;  %v11169_v19 = vld [vmem:[%s15070_s11 + $0x90] sm:$0xff]  ;;  %v11170_v10 = vld [vmem:[%s15070_s11 + $0x98] sm:$0xff] }
0x2957   :  { %v6671_v20 = vpop.f32.mrb[80].mxu1 }
0x2958   :  { %v12389_v22 = vpop.f32.mrb[81].mxu1  ;;  %12393 = vmatmul.mubr.msk.f32.vlgmr.msra.gmra.mrb[66].mxu0 %vm384_vm2, %v6671_v20 }
0x2959   :  { %12396 = vmatpush3.msra.mxu0 %v11105_v0  ;;  %12397 = vmatprep.mubr.msk.f32.mxu0 %vm384_vm2, %v14437_v21  ;;  %v11085_v0 = vld [vmem:[%s15092_s26 + $0xe0] sm:$0xff] }
0x295a   :  { %13051 = vmatprep.subr.bf16.mxu0 %v13050_v12  ;;  %v13074_v18 = vpack.c.bf16 %v11086_v17, %v11085_v0  ;;  %v11186_v0 = vld [vmem:[%s15069_s12 + $0x98] sm:$0xff] }
0x295f   :  { %v12410_v31 = vpop.f32.mrb[82].mxu1 }
0x2960   :  { %v6903_v33 = vpop.f32.mrb[83].mxu1  ;;  %12398 = vmatmul.mubr.msk.f32.vlgmr.msra.gmra.mrb[66].mxu0 %vm384_vm2, %v14439_v23 }
0x2961   :  { %13053 = vmatpush3.bf16.msra.mxu0 %v13050_v12  ;;  %12419 = vmatprep.mubr.msk.f32.mxu0 %vm77_vm0, %v14331_v47 }
0x2962   :  { %13055 = vmatprep.subr.bf16.mxu0 %v13054_v27 }
0x2965   :  { %13057 = vmatpush3.bf16.msra.mxu0 %v13054_v27 }
0x2966   :  { %12433 = vmatprep.subr.mxu0 %v13402_v37 }
0x2967   :  { %v12432_v21 = vpop.f32.mrb[84].mxu1 }
0x2968   :  { %12420 = vmatmul.mubr.msk.f32.vlgmr.msra.gmra.mrb[68].mxu0 %vm77_vm0, %v14333_v26  ;;  %v7053_v34 = vpop.f32.mrb[85].mxu1 }
0x2969   :  { %12435 = vmatprep.mubr.msk.f32.mxu0 %vm13403_vm1, %v13402_v37 }
0x2a3b   :  { %v12421_v36 = vpop.f32.mrb[68].mxu0 }
0x2a3c   :  { %v6978_v32 = vpop.f32.mrb[69].mxu0  ;;  %12439 = vmatpush3.xpose.msk.msra.mxu1 %vm384_vm2, %v12421_v36 }
0x2a3d   :  { %12434 = vmatpush3.xpose.msk.msra.mxu0 %vm384_vm2, %v6978_v32  ;;  %12448 = vmatprep.subr.mxu1 %v13402_v37 }
0x2a3e   :  { %12443 = vmatprep.subr.mxu0 %v13402_v37 }
0x2a3f   :  { %12441 = vmatmul.mubr.msk.f32.vlgmr.msra.gmra.mrb[86].mxu1 %vm384_vm2, %v12410_v31 }
0x2a40   :  { %12436 = vmatmul.mubr.msk.f32.vlgmr.msra.gmra.mrb[70].mxu0 %vm384_vm2, %v6903_v33  ;;  %12449 = vmatpush3.msra.mxu1 %v12432_v21 }
0x2a41   :  { %12444 = vmatpush3.msra.mxu0 %v7053_v34  ;;  %12450 = vmatprep.mubr.msk.f32.mxu1 %vm13403_vm1, %v13402_v37 }
0x2a42   :  { %12445 = vmatprep.mubr.msk.f32.mxu0 %vm13403_vm1, %v13402_v37  ;;  %13067 = vmatprep.subr.bf16.mxu1 %v13066_v57 }
0x2a43   :  { %12453 = vmatprep.subr.mxu0 %v11107_v62 }
0x2b12   :  { %v7210_v23 = vpop.f32.mrb[86].mxu1 }
0x2b13   :  { %v7211_v41 = vadd.f32 %v13396_v40, %v7210_v23  ;;  %v7134_v24 = vpop.f32.mrb[70].mxu0  ;;  %v12442_v30 = vpop.f32.mrb[87].mxu1 }
0x2b14   :  { %v7135_v35 = vadd.f32 %v13396_v40, %v7134_v24  ;;  %v12437_v29 = vpop.f32.mrb[71].mxu0 }
0x2b15   :  { %v7215_v43 = vadd.f32 %v14375_v39, %v7211_v41 }
0x2b16   :  { %v7214_v44 = vadd.f32 %v14368_v42, %v7135_v35 }
0x2b17   :  { %v7219_v45 = vsel %vm384_vm2, %v7215_v43, -inf }
0x2b18   :  { %7220 = vmax.xlane.f32.xlu1 %v7219_v45  ;;  %v7216_v49 = vsel %vm384_vm2, %v7214_v44, -inf }
0x2b19   :  { %7217 = vmax.xlane.f32.xlu0 %v7216_v49 }
0x2ba5   :  { %v7221_v50 = vpop.xlane.xlu1 %7220 }
0x2ba6   :  { %v7223_v51 = vsub.f32 %v7215_v43, %v7221_v50  ;;  %v7218_v53 = vpop.xlane.xlu0 %7217 }
0x2ba7   :  { %v7222_v38 = vsub.f32 %v7214_v44, %v7218_v53 }
0x2ba8   :  { %v7226_v54 = vmul.f32 1.442695, %v7223_v51 }
0x2ba9   :  { %v7224_v55 = vmul.f32 1.442695, %v7222_v38 }
0x2baa   :  { %13332 = vpow2.f32 %v7226_v54 }
0x2bab   :  { %13334 = vpow2.f32 %v7224_v55 }
0x2bb4   :  { %v13333_v28 = vpop.eup %13332 }
0x2bb5   :  { %v13335_v56 = vpop.eup %13334  ;;  %v7231_v59 = vsel %vm384_vm2, %v13333_v28, 0.0 }
0x2bb6   :  { %7232 = vadd.xlane.f32.xlu1 %v7231_v59  ;;  %v7228_v60 = vsel %vm384_vm2, %v13335_v56, 0.0 }
0x2bb7   :  { %7229 = vadd.xlane.f32.xlu0 %v7228_v60 }
0x2c43   :  { %v7233_v63 = vpop.xlane.xlu1 %7232 }
0x2c44   :  { %13336 = vrcp.f32 %v7233_v63  ;;  %v7230_v2 = vpop.xlane.xlu0 %7229 }
0x2c45   :  { %13338 = vrcp.f32 %v7230_v2 }
0x2c4e   :  { %v13337_v5 = vpop.eup %13336 }
0x2c4f   :  { %v13339_v6 = vpop.eup %13338  ;;  %v7237_v7 = vmul.f32 %v13337_v5, %v13333_v28 }
0x2c50   :  { %v7236_v9 = vmul.f32 %v13339_v6, %v13335_v56 }
0x2c51   :  { %12451 = vmatmul.mubr.msk.f32.vlgmr.msra.gmra.mrb[88].mxu1 %vm384_vm2, %v7237_v7 }
0x2c52   :  { %13069 = vmatpush3.bf16.msra.mxu1 %v13066_v57  ;;  %12446 = vmatmul.mubr.msk.f32.vlgmr.msra.gmra.mrb[72].mxu0 %vm384_vm2, %v7236_v9 }
0x2c53   :  { %12466 = vmatprep.mubr.msk.f32.mxu1 %vm77_vm0, %v14331_v47  ;;  %13071 = vmatprep.subr.bf16.mxu1 %v13070_v8 }
0x2c54   :  { %12454 = vmatpush3.msra.mxu0 %v11107_v62 }
0x2c55   :  { %13075 = vmatprep.subr.bf16.mxu0 %v13074_v18 }
0x2c56   :  { %13073 = vmatpush3.bf16.msra.mxu1 %v13070_v8 }
0x2c57   :  { %13083 = vmatprep.subr.bf16.mxu1 %v13082_v14 }
0x2c59   :  { %12467 = vmatmul.mubr.msk.f32.vlgmr.msra.gmra.mrb[90].mxu1 %vm77_vm0, %v14333_v26 }
0x2c5a   :  { %13085 = vmatpush3.bf16.msra.mxu1 %v13082_v14  ;;  %12488 = vmatprep.mubr.msk.f32.mxu1 %vm77_vm0, %v14331_v47  ;;  %v11167_v14 = vld [vmem:[%s15070_s11 + $0x80] sm:$0xff] }
0x2c5b   :  { %13087 = vmatprep.subr.bf16.mxu1 %v13086_v1  ;;  %v13090_v17 = vpack.c.bf16 %v11168_v16, %v11167_v14  ;;  %v11172_v14 = vld [vmem:[%s15070_s11 + $0xa8] sm:$0xff] }
0x2c5e   :  { %13089 = vmatpush3.bf16.msra.mxu1 %v13086_v1  ;;  %v11185_v1 = vld [vmem:[%s15069_s12 + $0x90] sm:$0xff] }
0x2c5f   :  { %12501 = vmatprep.subr.mxu1 %v13402_v37 }
0x2c61   :  { %12489 = vmatmul.mubr.msk.f32.vlgmr.msra.gmra.mrb[92].mxu1 %vm77_vm0, %v14333_v26 }
0x2c62   :  { %12503 = vmatprep.mubr.msk.f32.mxu1 %vm13403_vm1, %v13402_v37 }
0x2d24   :  { %v7380_v12 = vpop.f32.mrb[88].mxu1 }
0x2d25   :  { %v7307_v20 = vpop.f32.mrb[72].mxu0  ;;  %v12452_v22 = vpop.f32.mrb[89].mxu1 }
0x2d26   :  { %v12447_v46 = vpop.f32.mrb[73].mxu0  ;;  %12455 = vmatprep.mubr.msk.f32.mxu0 %vm384_vm2, %v7307_v20  ;;  %v14681_v20 = vld [vmem:[%s15071_s1 + $0x8] sm:$0xff]  ;;  %v11199_v22 = vld [vmem:[%s15072_s13 + $0x80] sm:$0xff] }
0x2d27   :  { %12456 = vmatmul.mubr.msk.f32.vlgmr.msra.gmra.mrb[66].mxu0 %vm384_vm2, %v7380_v12  ;;  %v13094_v12 = vpack.c.bf16 %v11170_v10, %v11169_v19  ;;  %v11174_v19 = vld [vmem:[%s15070_s11 + $0xb8] sm:$0xff] }
0x2d28   :  { %13077 = vmatpush3.bf16.msra.mxu0 %v13074_v18  ;;  %12477 = vmatprep.mubr.msk.f32.mxu0 %vm77_vm0, %v14331_v47  ;;  %v13102_v18 = vpack.c.bf16 %v11186_v0, %v11185_v1  ;;  %v11189_v0 = vld [vmem:[%s15069_s12 + $0xb0] sm:$0xff] }
0x2d29   :  { %13079 = vmatprep.subr.bf16.mxu0 %v13078_v25 }
0x2d2c   :  { %v12468_v27 = vpop.f32.mrb[90].mxu1  ;;  %13081 = vmatpush3.bf16.msra.mxu0 %v13078_v25  ;;  %v11200_v25 = vld [vmem:[%s15072_s13 + $0x88] sm:$0xff] }
0x2d2d   :  { %v7533_v31 = vpop.f32.mrb[91].mxu1  ;;  %12491 = vmatprep.subr.mxu0 %v13402_v37  ;;  %v13106_v46 = vpack.c.bf16 %v11200_v25, %v11199_v22 }
0x2d2f   :  { %12478 = vmatmul.mubr.msk.f32.vlgmr.msra.gmra.mrb[74].mxu0 %vm77_vm0, %v14333_v26  ;;  %v13397_v26 = vld [vmem:[%s15066_s2 + $0x18] sm:$0xff] }
0x2d30   :  { %12493 = vmatprep.mubr.msk.f32.mxu0 %vm13403_vm1, %v13402_v37 }
0x2d34   :  { %v12490_v33 = vpop.f32.mrb[92].mxu1 }
0x2d35   :  { %v7683_v21 = vpop.f32.mrb[93].mxu1 }
0x2d36   :  { %12502 = vmatpush3.msra.mxu1 %v7683_v21 }
0x2d37   :  { %13091 = vmatprep.subr.bf16.mxu1 %v13090_v17 }
0x2e02   :  { %v12479_v34 = vpop.f32.mrb[74].mxu0 }
0x2e03   :  { %v7608_v36 = vpop.f32.mrb[75].mxu0 }
0x2e04   :  { %12492 = vmatpush3.xpose.msk.msra.mxu0 %vm384_vm2, %v7608_v36 }
0x2e05   :  { %12496 = vmatprep.subr.mxu0 %v13402_v37 }
0x2e07   :  { %12494 = vmatmul.mubr.msk.f32.vlgmr.msra.gmra.mrb[76].mxu0 %vm384_vm2, %v7533_v31 }
0x2e08   :  { %12497 = vmatpush3.xpose.msk.msra.mxu0 %vm384_vm2, %v12479_v34  ;;  %12498 = vmatprep.mubr.msk.f32.mxu0 %vm13403_vm1, %v13402_v37 }
0x2e09   :  { %12506 = vmatprep.subr.mxu0 %v13402_v37 }
0x2e0b   :  { %12499 = vmatmul.mubr.msk.f32.vlgmr.msra.gmra.mrb[78].mxu0 %vm384_vm2, %v12468_v27 }
0x2e0c   :  { %12507 = vmatpush3.msra.mxu0 %v12490_v33  ;;  %12508 = vmatprep.mubr.msk.f32.mxu0 %vm13403_vm1, %v13402_v37 }
0x2e0d   :  { %12511 = vmatprep.subr.mxu0 %v11108_v61 }
0x2eda   :  { %v7764_v47 = vpop.f32.mrb[76].mxu0 }
0x2edb   :  { %v7765_v32 = vadd.f32 %v13397_v26, %v7764_v47  ;;  %v12495_v23 = vpop.f32.mrb[77].mxu0 }
0x2edd   :  { %v7844_v40 = vadd.f32 %v14368_v42, %v7765_v32  ;;  %v11166_v32 = vld [vmem:[%s15073_s10 + $0x1] ss:$0 sm:$0xff] }
0x2ede   :  { %v7840_v41 = vpop.f32.mrb[78].mxu0 }
0x2edf   :  { %v7841_v24 = vadd.f32 %v13397_v26, %v7840_v41  ;;  %v12500_v30 = vpop.f32.mrb[79].mxu0  ;;  %v7846_v35 = vsel %vm384_vm2, %v7844_v40, -inf  ;;  %v11201_v41 = vld [vmem:[%s15072_s13 + $0x90] sm:$0xff] }
0x2ee0   :  { %7847 = vmax.xlane.f32.xlu0 %v7846_v35 }
0x2ee1   :  { %v7845_v29 = vadd.f32 %v14375_v39, %v7841_v24  ;;  %v11202_v24 = vld [vmem:[%s15072_s13 + $0x98] sm:$0xff] }
0x2ee3   :  { %v7849_v43 = vsel %vm384_vm2, %v7845_v29, -inf }
0x2ee4   :  { %7850 = vmax.xlane.f32.xlu1 %v7849_v43 }
0x2f6d   :  { %v7848_v44 = vpop.xlane.xlu0 %7847 }
0x2f6e   :  { %v7852_v45 = vsub.f32 %v7844_v40, %v7848_v44 }
0x2f70   :  { %v7854_v49 = vmul.f32 1.442695, %v7852_v45 }
0x2f71   :  { %v7851_v50 = vpop.xlane.xlu1 %7850 }
0x2f72   :  { %13340 = vpow2.f32 %v7854_v49  ;;  %v7853_v51 = vsub.f32 %v7845_v29, %v7851_v50  ;;  %v13110_v29 = vpack.c.bf16 %v11202_v24, %v11201_v41  ;;  %v11205_v41 = vld [vmem:[%s15072_s13 + $0xb0] sm:$0xff] }
0x2f74   :  { %v7856_v53 = vmul.f32 1.442695, %v7853_v51 }
0x2f76   :  { %13342 = vpow2.f32 %v7856_v53 }
0x2f7c   :  { %v13341_v42 = vpop.eup %13340 }
0x2f7d   :  { %v7858_v38 = vsel %vm384_vm2, %v13341_v42, 0.0 }
0x2f7e   :  { %7859 = vadd.xlane.f32.xlu0 %v7858_v38 }
0x2f80   :  { %v13343_v54 = vpop.eup %13342 }
0x2f81   :  { %v7861_v55 = vsel %vm384_vm2, %v13343_v54, 0.0 }
0x2f82   :  { %7862 = vadd.xlane.f32.xlu1 %v7861_v55 }
0x300b   :  { %v7860_v39 = vpop.xlane.xlu0 %7859 }
0x300c   :  { %13344 = vrcp.f32 %v7860_v39  ;;  %v14738_v39 = vld [vmem:[%s15074_s4] ss:$0 sm:$0xff] }
0x300f   :  { %v7863_v28 = vpop.xlane.xlu1 %7862 }
0x3010   :  { %13346 = vrcp.f32 %v7863_v28 }
0x3016   :  { %v13345_v56 = vpop.eup %13344 }
0x3017   :  { %v7866_v59 = vmul.f32 %v13345_v56, %v13341_v42  ;;  %v14732_v42 = vld [vmem:[%s15074_s4 + $0x1] ss:$0 sm:$0xff] }
0x3019   :  { %12504 = vmatmul.mubr.msk.f32.vlgmr.msra.gmra.mrb[94].mxu1 %vm384_vm2, %v7866_v59 }
0x301a   :  { %v13347_v60 = vpop.eup %13346  ;;  %13093 = vmatpush3.bf16.msra.mxu1 %v13090_v17  ;;  %v11190_v17 = vld [vmem:[%s15069_s12 + $0xb8] sm:$0xff] }
0x301b   :  { %v7867_v48 = vmul.f32 %v13347_v60, %v13343_v54  ;;  %13095 = vmatprep.subr.bf16.mxu1 %v13094_v12 }
0x301d   :  { %12509 = vmatmul.mubr.msk.f32.vlgmr.msra.gmra.mrb[80].mxu0 %vm384_vm2, %v7867_v48 }
0x301e   :  { %12512 = vmatpush3.msra.mxu0 %v11108_v61  ;;  %13097 = vmatpush3.bf16.msra.mxu1 %v13094_v12 }
0x301f   :  { %13107 = vmatprep.subr.bf16.mxu1 %v13106_v46 }
0x30ec   :  { %v7937_v57 = vpop.f32.mrb[94].mxu1 }
0x30ed   :  { %v12505_v62 = vpop.f32.mrb[95].mxu1  ;;  %12513 = vmatprep.mubr.msk.f32.mxu0 %vm384_vm2, %v7937_v57 }
0x30f0   :  { %v8010_v63 = vpop.f32.mrb[80].mxu0 }
0x30f1   :  { %v12510_v2 = vpop.f32.mrb[81].mxu0  ;;  %12514 = vmatmul.mubr.msk.f32.vlgmr.msra.gmra.mrb[66].mxu0 %vm384_vm2, %v8010_v63 }
0x30f2   :  { %12535 = vmatprep.mubr.msk.f32.mxu0 %vm77_vm0, %v14637_v3 }
0x31c4   :  { %v12515_v4 = vpop.f32.mrb[66].mxu0 }
0x31c5   :  { %v14642_v5 = vadd.f32 %v12515_v4, %v14278_v58  ;;  %v8086_v6 = vpop.f32.mrb[67].mxu0  ;;  %v11183_v58 = vld [vmem:[%s15069_s12 + $0x80] sm:$0xff] }
0x31c6   :  { %v14645_v7 = vadd.f32 %v8086_v6, %v14281_v52  ;;  %v11184_v52 = vld [vmem:[%s15069_s12 + $0x88] sm:$0xff] }
0x31c7   :  { %v8102_v8 = vmul.f32 %v14642_v5, %v14642_v5  ;;  %v13098_v15 = vpack.c.bf16 %v11184_v52, %v11183_v58  ;;  %v11171_v52 = vld [vmem:[%s15070_s11 + $0xa0] sm:$0xff] }
0x31c8   :  { %v8101_v9 = vmul.f32 %v14645_v7, %v14645_v7 }
0x31c9   :  { %v8106_v11 = vsel %vm77_vm0, %v8102_v8, 0.0  ;;  %13099 = vmatprep.subr.bf16.mxu0 %v13098_v15 }
0x31ca   :  { %8107 = vadd.xlane.f32.xlu1 %v8106_v11  ;;  %v8103_v13 = vsel %vm77_vm0, %v8101_v9, 0.0  ;;  %13101 = vmatpush3.bf16.msra.mxu0 %v13098_v15  ;;  %v11187_v11 = vld [vmem:[%s15069_s12 + $0xa0] sm:$0xff]  ;;  %v13114_v15 = vpack.c.bf16 %v11172_v14, %v11171_v52  ;;  %v11177_v14 = vld [vmem:[%s15070_s11 + $0xd0] sm:$0xff] }
0x31cb   :  { %8104 = vadd.xlane.f32.xlu0 %v8103_v13  ;;  %13103 = vmatprep.subr.bf16.mxu0 %v13102_v18  ;;  %v11188_v13 = vld [vmem:[%s15069_s12 + $0xa8] sm:$0xff] }
0x31cc   :  { %v13122_v58 = vpack.c.bf16 %v11188_v13, %v11187_v11 }
0x31ce   :  { %13105 = vmatpush3.bf16.msra.mxu0 %v13102_v18  ;;  %v11173_v18 = vld [vmem:[%s15070_s11 + $0xb0] sm:$0xff] }
0x31cf   :  { %12549 = vmatprep.subr.mxu0 %v13402_v37 }
0x31d1   :  { %12536 = vmatmul.mubr.msk.f32.vlgmr.msra.gmra.mrb[82].mxu0 %vm77_vm0, %v14681_v20 }
0x31d2   :  { %12551 = vmatprep.mubr.msk.f32.mxu0 %vm13403_vm1, %v13402_v37 }
0x3257   :  { %v8108_v27 = vpop.xlane.xlu1 %8107 }
0x3258   :  { %v8110_v31 = vmul.f32 0.03125, %v8108_v27  ;;  %v8105_v33 = vpop.xlane.xlu0 %8104  ;;  %v13118_v27 = vpack.c.bf16 %v11174_v19, %v11173_v18  ;;  %v11215_v18 = vld [vmem:[%s15075_s14 + $0x20] sm:$0xff] }
0x3259   :  { %v8109_v21 = vmul.f32 0.03125, %v8105_v33  ;;  %v11207_v19 = vld [vmem:[%s15072_s13 + $0xc0] sm:$0xff] }
0x325a   :  { %v8112_v34 = vadd.f32 1e-06, %v8110_v31 }
0x325b   :  { %v8111_v36 = vadd.f32 1e-06, %v8109_v21 }
0x325c   :  { %13348 = vrsqrt.f32 %v8112_v34 }
0x325d   :  { %13350 = vrsqrt.f32 %v8111_v36 }
0x3266   :  { %v13349_v47 = vpop.eup %13348 }
0x3267   :  { %v13351_v26 = vpop.eup %13350  ;;  %v8116_v23 = vmul.f32 %v13349_v47, %v14642_v5 }
0x3268   :  { %v8115_v40 = vmul.f32 %v13351_v26, %v14645_v7 }
0x3269   :  { %v14706_v35 = vmul.f32 %v11166_v32, %v8116_v23  ;;  %v11203_v23 = vld [vmem:[%s15072_s13 + $0xa0] sm:$0xff] }
0x326a   :  { %v14704_v30 = vmul.f32 %v11166_v32, %v8115_v40  ;;  %v11204_v40 = vld [vmem:[%s15072_s13 + $0xa8] sm:$0xff] }
0x326b   :  { %v13130_v24 = vpack.c.bf16 %v11204_v40, %v11203_v23  ;;  %v11193_v23 = vld [vmem:[%s15069_s12 + $0xd0] sm:$0xff]  ;;  %v11194_v40 = vld [vmem:[%s15069_s12 + $0xd8] sm:$0xff] }
0x326c   :  { %12524 = vmatprep.mubr.msk.f32.mxu1 %vm77_vm0, %v14704_v30 }
0x326d   :  { %12525 = vmatmul.mubr.msk.f32.vlgmr.msra.gmra.mrb[96].mxu1 %vm77_vm0, %v14706_v35 }
0x326e   :  { %13109 = vmatpush3.bf16.msra.mxu1 %v13106_v46  ;;  %12546 = vmatprep.mubr.msk.f32.mxu1 %vm77_vm0, %v14637_v3  ;;  %v13126_v46 = vpack.c.bf16 %v11190_v17, %v11189_v0  ;;  %v11216_v17 = vld [vmem:[%s15075_s14 + $0x28] sm:$0xff] }
0x326f   :  { %13111 = vmatprep.subr.bf16.mxu1 %v13110_v29 }
0x3272   :  { %13113 = vmatpush3.bf16.msra.mxu1 %v13110_v29  ;;  %v11206_v29 = vld [vmem:[%s15072_s13 + $0xb8] sm:$0xff] }
0x3273   :  { %12554 = vmatprep.subr.mxu1 %v13402_v37 }
0x3275   :  { %12547 = vmatmul.mubr.msk.f32.vlgmr.msra.gmra.mrb[98].mxu1 %vm77_vm0, %v14681_v20 }
0x3276   :  { %12556 = vmatprep.mubr.msk.f32.mxu1 %vm13403_vm1, %v13402_v37 }
0x32a4   :  { %v12537_v43 = vpop.f32.mrb[82].mxu0 }
0x32a5   :  { %v8328_v44 = vpop.f32.mrb[83].mxu0  ;;  %12555 = vmatpush3.xpose.msk.msra.mxu1 %vm384_vm2, %v12537_v43  ;;  %v13134_v43 = vpack.c.bf16 %v11206_v29, %v11205_v41  ;;  %v13150_v41 = vpack.c.bf16 %v11194_v40, %v11193_v23  ;;  %v11214_v23 = vld [vmem:[%s15072_s13 + $0xf8] sm:$0xff] }
0x32a6   :  { %12550 = vmatpush3.xpose.msk.msra.mxu0 %vm384_vm2, %v8328_v44  ;;  %12564 = vmatprep.subr.mxu1 %v13402_v37 }
0x32a7   :  { %12559 = vmatprep.subr.mxu0 %v13402_v37 }
0x3340   :  { %v12526_v45 = vpop.f32.mrb[96].mxu1 }
0x3341   :  { %v8253_v49 = vpop.f32.mrb[97].mxu1  ;;  %12557 = vmatmul.mubr.msk.f32.vlgmr.msra.gmra.mrb[100].mxu1 %vm384_vm2, %v12526_v45 }
0x3342   :  { %12552 = vmatmul.mubr.msk.f32.vlgmr.msra.gmra.mrb[84].mxu0 %vm384_vm2, %v8253_v49  ;;  %12566 = vmatprep.mubr.msk.f32.mxu1 %vm13403_vm1, %v13402_v37 }
0x3343   :  { %12561 = vmatprep.mubr.msk.f32.mxu0 %vm13403_vm1, %v13402_v37 }
0x3348   :  { %v12548_v50 = vpop.f32.mrb[98].mxu1 }
0x3349   :  { %v8403_v51 = vpop.f32.mrb[99].mxu1  ;;  %12565 = vmatpush3.msra.mxu1 %v12548_v50 }
0x334a   :  { %12560 = vmatpush3.msra.mxu0 %v8403_v51  ;;  %13123 = vmatprep.subr.bf16.mxu1 %v13122_v58 }
0x334b   :  { %13115 = vmatprep.subr.bf16.mxu0 %v13114_v15 }
0x3414   :  { %v8560_v53 = vpop.f32.mrb[100].mxu1 }
0x3415   :  { %v8561_v38 = vadd.f32 %v14732_v42, %v8560_v53  ;;  %v8484_v54 = vpop.f32.mrb[84].mxu0  ;;  %v12558_v55 = vpop.f32.mrb[101].mxu1 }
0x3416   :  { %v8485_v28 = vadd.f32 %v14738_v39, %v8484_v54  ;;  %v12553_v56 = vpop.f32.mrb[85].mxu0 }
0x3417   :  { %v8567_v59 = vsel %vm384_vm2, %v8561_v38, -inf }
0x3418   :  { %8568 = vmax.xlane.f32.xlu0 %v8567_v59  ;;  %v8564_v60 = vsel %vm384_vm2, %v8485_v28, -inf }
0x3419   :  { %8565 = vmax.xlane.f32.xlu1 %v8564_v60 }
0x34a5   :  { %v8569_v48 = vpop.xlane.xlu0 %8568 }
0x34a6   :  { %v8571_v61 = vsub.f32 %v8561_v38, %v8569_v48  ;;  %v8566_v57 = vpop.xlane.xlu1 %8565 }
0x34a7   :  { %v8570_v62 = vsub.f32 %v8485_v28, %v8566_v57 }
0x34a8   :  { %v8574_v63 = vmul.f32 1.442695, %v8571_v61 }
0x34a9   :  { %v8572_v2 = vmul.f32 1.442695, %v8570_v62 }
0x34aa   :  { %13352 = vpow2.f32 %v8574_v63 }
0x34ab   :  { %13354 = vpow2.f32 %v8572_v2 }
0x34b4   :  { %v13353_v4 = vpop.eup %13352 }
0x34b5   :  { %v13355_v6 = vpop.eup %13354  ;;  %v8579_v8 = vsel %vm384_vm2, %v13353_v4, 0.0 }
0x34b6   :  { %8580 = vadd.xlane.f32.xlu0 %v8579_v8  ;;  %v8576_v9 = vsel %vm384_vm2, %v13355_v6, 0.0  ;;  %v11176_v8 = vld [vmem:[%s15070_s11 + $0xc8] sm:$0xff] }
0x34b7   :  { %8577 = vadd.xlane.f32.xlu1 %v8576_v9 }
0x3543   :  { %v8581_v16 = vpop.xlane.xlu0 %8580 }
0x3544   :  { %13356 = vrcp.f32 %v8581_v16  ;;  %v8578_v1 = vpop.xlane.xlu1 %8577 }
0x3545   :  { %13358 = vrcp.f32 %v8578_v1 }
0x354e   :  { %v13357_v10 = vpop.eup %13356 }
0x354f   :  { %v13359_v12 = vpop.eup %13358  ;;  %v8585_v22 = vmul.f32 %v13357_v10, %v13353_v4  ;;  %v11208_v10 = vld [vmem:[%s15072_s13 + $0xc8] sm:$0xff] }
0x3550   :  { %v8584_v25 = vmul.f32 %v13359_v12, %v13355_v6  ;;  %v11175_v6 = vld [vmem:[%s15070_s11 + $0xc0] sm:$0xff]  ;;  %v11209_v12 = vld [vmem:[%s15072_s13 + $0xd0] sm:$0xff] }
0x3551   :  { %12567 = vmatmul.mubr.msk.f32.vlgmr.msra.gmra.mrb[102].mxu1 %vm384_vm2, %v8585_v22  ;;  %v13138_v9 = vpack.c.bf16 %v11176_v8, %v11175_v6  ;;  %v13154_v22 = vpack.c.bf16 %v11208_v10, %v11207_v19  ;;  %v11180_v6 = vld [vmem:[%s15070_s11 + $0xe8] sm:$0xff] }
0x3552   :  { %13125 = vmatpush3.bf16.msra.mxu1 %v13122_v58  ;;  %12562 = vmatmul.mubr.msk.f32.vlgmr.msra.gmra.mrb[86].mxu0 %vm384_vm2, %v8584_v25  ;;  %v11210_v25 = vld [vmem:[%s15072_s13 + $0xd8] sm:$0xff] }
0x3553   :  { %13117 = vmatpush3.bf16.msra.mxu0 %v13114_v15  ;;  %12577 = vmatprep.mubr.msk.f32.mxu0 %vm77_vm0, %v14704_v30  ;;  %v11178_v15 = vld [vmem:[%s15070_s11 + $0xd8] sm:$0xff] }
0x3554   :  { %13127 = vmatprep.subr.bf16.mxu1 %v13126_v46  ;;  %13119 = vmatprep.subr.bf16.mxu0 %v13118_v27  ;;  %v13142_v0 = vpack.c.bf16 %v11178_v15, %v11177_v14 }
0x3555   :  { %12588 = vmatprep.mubr.msk.f32.mxu1 %vm77_vm0, %v14637_v3 }
0x3556   :  { %13129 = vmatpush3.bf16.msra.mxu1 %v13126_v46  ;;  %v13158_v46 = vpack.c.bf16 %v11210_v25, %v11209_v12 }
0x3557   :  { %13121 = vmatpush3.bf16.msra.mxu0 %v13118_v27  ;;  %12602 = vmatprep.subr.mxu1 %v13402_v37 }
0x3558   :  { %13131 = vmatprep.subr.bf16.mxu0 %v13130_v24 }
0x3559   :  { %12589 = vmatmul.mubr.msk.f32.vlgmr.msra.gmra.mrb[104].mxu1 %vm77_vm0, %v14681_v20 }
0x355a   :  { %12578 = vmatmul.mubr.msk.f32.vlgmr.msra.gmra.mrb[88].mxu0 %vm77_vm0, %v14706_v35  ;;  %12604 = vmatprep.mubr.msk.f32.mxu1 %vm13403_vm1, %v13402_v37 }
0x355b   :  { %12599 = vmatprep.mubr.msk.f32.mxu0 %vm77_vm0, %v14637_v3  ;;  %13133 = vmatpush3.bf16.msra.mxu0 %v13130_v24 }
0x355c   :  { %13135 = vmatprep.subr.bf16.mxu0 %v13134_v43 }
0x355f   :  { %13137 = vmatpush3.bf16.msra.mxu0 %v13134_v43 }
0x3560   :  { %12612 = vmatprep.subr.mxu0 %v13402_v37 }
0x3562   :  { %12600 = vmatmul.mubr.msk.f32.vlgmr.msra.gmra.mrb[90].mxu0 %vm77_vm0, %v14681_v20 }
0x3563   :  { %12614 = vmatprep.mubr.msk.f32.mxu0 %vm13403_vm1, %v13402_v37 }
0x3624   :  { %v14784_v31 = vpop.f32.mrb[102].mxu1 }
0x3625   :  { %v14786_v33 = vpop.f32.mrb[86].mxu0  ;;  %v12568_v21 = vpop.f32.mrb[103].mxu1 }
0x3626   :  { %v12563_v34 = vpop.f32.mrb[87].mxu0  ;;  %v11191_v21 = vld [vmem:[%s15069_s12 + $0xc0] sm:$0xff] }
0x3627   :  { %v11192_v34 = vld [vmem:[%s15069_s12 + $0xc8] sm:$0xff] }
0x362c   :  { %v12590_v36 = vpop.f32.mrb[104].mxu1 }
0x362d   :  { %v12579_v47 = vpop.f32.mrb[88].mxu0  ;;  %v8873_v26 = vpop.f32.mrb[105].mxu1 }
0x362e   :  { %v8798_v32 = vpop.f32.mrb[89].mxu0  ;;  %12603 = vmatpush3.xpose.msk.msra.mxu1 %vm384_vm2, %v8873_v26 }
0x362f   :  { %12607 = vmatprep.subr.mxu1 %v13402_v37 }
0x3631   :  { %12605 = vmatmul.mubr.msk.f32.vlgmr.msra.gmra.mrb[106].mxu1 %vm384_vm2, %v8798_v32 }
0x3632   :  { %12608 = vmatpush3.xpose.msk.msra.mxu1 %vm384_vm2, %v12590_v36  ;;  %12609 = vmatprep.mubr.msk.f32.mxu1 %vm13403_vm1, %v13402_v37 }
0x3633   :  { %12617 = vmatprep.subr.mxu1 %v13402_v37 }
0x3635   :  { %12610 = vmatmul.mubr.msk.f32.vlgmr.msra.gmra.mrb[108].mxu1 %vm384_vm2, %v12579_v47  ;;  %v12601_v2 = vpop.f32.mrb[90].mxu0  ;;  %v13146_v47 = vpack.c.bf16 %v11192_v34, %v11191_v21 }
0x3636   :  { %12619 = vmatprep.mubr.msk.f32.mxu1 %vm13403_vm1, %v13402_v37  ;;  %v8948_v4 = vpop.f32.mrb[91].mxu0  ;;  %12618 = vmatpush3.msra.mxu1 %v12601_v2 }
0x3637   :  { %12613 = vmatpush3.msra.mxu0 %v8948_v4  ;;  %13139 = vmatprep.subr.bf16.mxu1 %v13138_v9  ;;  %v11179_v4 = vld [vmem:[%s15070_s11 + $0xe0] sm:$0xff] }
0x3638   :  { %12622 = vmatprep.subr.mxu0 %v11216_v17  ;;  %v13162_v8 = vpack.c.bf16 %v11180_v6, %v11179_v4 }
0x3704   :  { %v9029_v44 = vpop.f32.mrb[106].mxu1 }
0x3705   :  { %v9030_v45 = vadd.f32 %v14738_v39, %v9029_v44  ;;  %v12606_v49 = vpop.f32.mrb[107].mxu1 }
0x3707   :  { %v9109_v50 = vsel %vm384_vm2, %v9030_v45, -inf }
0x3708   :  { %9110 = vmax.xlane.f32.xlu0 %v9109_v50  ;;  %v9105_v51 = vpop.f32.mrb[108].mxu1 }
0x3709   :  { %v9106_v53 = vadd.f32 %v14732_v42, %v9105_v51  ;;  %v12611_v38 = vpop.f32.mrb[109].mxu1 }
0x370b   :  { %v9112_v54 = vsel %vm384_vm2, %v9106_v53, -inf }
0x370c   :  { %9113 = vmax.xlane.f32.xlu1 %v9112_v54 }
0x3795   :  { %v9111_v55 = vpop.xlane.xlu0 %9110 }
0x3796   :  { %v9115_v28 = vsub.f32 %v9030_v45, %v9111_v55 }
0x3798   :  { %v9117_v56 = vmul.f32 1.442695, %v9115_v28 }
0x3799   :  { %v9114_v59 = vpop.xlane.xlu1 %9113 }
0x379a   :  { %13360 = vpow2.f32 %v9117_v56  ;;  %v9116_v60 = vsub.f32 %v9106_v53, %v9114_v59 }
0x379c   :  { %v9119_v48 = vmul.f32 1.442695, %v9116_v60 }
0x379e   :  { %13362 = vpow2.f32 %v9119_v48 }
0x37a4   :  { %v13361_v61 = vpop.eup %13360 }
0x37a5   :  { %v9121_v57 = vsel %vm384_vm2, %v13361_v61, 0.0 }
0x37a6   :  { %9122 = vadd.xlane.f32.xlu0 %v9121_v57 }
0x37a8   :  { %v13363_v62 = vpop.eup %13362 }
0x37a9   :  { %v9124_v63 = vsel %vm384_vm2, %v13363_v62, 0.0 }
0x37aa   :  { %9125 = vadd.xlane.f32.xlu1 %v9124_v63 }
0x3833   :  { %v9123_v11 = vpop.xlane.xlu0 %9122 }
0x3834   :  { %13364 = vrcp.f32 %v9123_v11 }
0x3837   :  { %v9126_v13 = vpop.xlane.xlu1 %9125 }
0x3838   :  { %13366 = vrcp.f32 %v9126_v13 }
0x383e   :  { %v13365_v58 = vpop.eup %13364 }
0x383f   :  { %v9129_v52 = vmul.f32 %v13365_v58, %v13361_v61  ;;  %v11181_v58 = vld [vmem:[%s15070_s11 + $0xf0] sm:$0xff] }
0x3841   :  { %12615 = vmatmul.mubr.msk.f32.vlgmr.msra.gmra.mrb[92].mxu0 %vm384_vm2, %v9129_v52  ;;  %v11182_v52 = vld [vmem:[%s15070_s11 + $0xf8] sm:$0xff] }
0x3842   :  { %v13367_v16 = vpop.eup %13366  ;;  %12623 = vmatpush3.msra.mxu0 %v11216_v17  ;;  %v11195_v17 = vld [vmem:[%s15069_s12 + $0xe0] sm:$0xff] }
0x3843   :  { %v9130_v1 = vmul.f32 %v13367_v16, %v13363_v62  ;;  %12627 = vmatprep.subr.mxu0 %v11215_v18 }
0x3845   :  { %12620 = vmatmul.mubr.msk.f32.vlgmr.msra.gmra.mrb[110].mxu1 %vm384_vm2, %v9130_v1  ;;  %v13166_v1 = vpack.c.bf16 %v11182_v52, %v11181_v58 }
0x3846   :  { %13141 = vmatpush3.bf16.msra.mxu1 %v13138_v9  ;;  %12640 = vmatprep.mubr.msk.f32.mxu1 %vm77_vm0, %v14704_v30  ;;  %v11217_v9 = vld [vmem:[%s15075_s14 + $0x30] sm:$0xff] }
0x3847   :  { %13143 = vmatprep.subr.bf16.mxu1 %v13142_v0 }
0x384a   :  { %13145 = vmatpush3.bf16.msra.mxu1 %v13142_v0 }
0x384b   :  { %13155 = vmatprep.subr.bf16.mxu1 %v13154_v22 }
0x384d   :  { %12641 = vmatmul.mubr.msk.f32.vlgmr.msra.gmra.mrb[112].mxu1 %vm77_vm0, %v14706_v35 }
0x384e   :  { %12662 = vmatprep.mubr.msk.f32.mxu1 %vm77_vm0, %v14637_v3  ;;  %13157 = vmatpush3.bf16.msra.mxu1 %v13154_v22 }
0x384f   :  { %13159 = vmatprep.subr.bf16.mxu1 %v13158_v46 }
0x3852   :  { %13161 = vmatpush3.bf16.msra.mxu1 %v13158_v46 }
0x3853   :  { %12670 = vmatprep.subr.mxu1 %v13402_v37 }
0x3855   :  { %12663 = vmatmul.mubr.msk.f32.vlgmr.msra.gmra.mrb[114].mxu1 %vm77_vm0, %v14681_v20 }
0x3856   :  { %12672 = vmatprep.mubr.msk.f32.mxu1 %vm13403_vm1, %v13402_v37 }
0x3914   :  { %v9200_v27 = vpop.f32.mrb[92].mxu0 }
0x3915   :  { %v12616_v36 = vpop.f32.mrb[93].mxu0  ;;  %12624 = vmatprep.mubr.msk.f32.mxu0 %vm384_vm2, %v9200_v27 }
0x3918   :  { %v9273_v26 = vpop.f32.mrb[110].mxu1 }
0x3919   :  { %v12621_v32 = vpop.f32.mrb[111].mxu1  ;;  %12625 = vmatmul.mubr.msk.f32.vlgmr.msra.gmra.mrb[94].mxu0 %vm384_vm2, %v9273_v26  ;;  %v11213_v26 = vld [vmem:[%s15072_s13 + $0xf0] sm:$0xff] }
0x391a   :  { %12628 = vmatpush3.msra.mxu0 %v11215_v18  ;;  %12629 = vmatprep.mubr.msk.f32.mxu0 %vm384_vm2, %v14786_v33  ;;  %v11196_v18 = vld [vmem:[%s15069_s12 + $0xe8] sm:$0xff]  ;;  %v13182_v40 = vpack.c.bf16 %v11214_v23, %v11213_v26  ;;  %v11276_v23 = vld [vmem:[%s15078_s15 + $0x1] ss:$0 sm:$0xff] }
0x391b   :  { %13147 = vmatprep.subr.bf16.mxu0 %v13146_v47  ;;  %v13170_v19 = vpack.c.bf16 %v11196_v18, %v11195_v17  ;;  %v11283_v18 = vld [vmem:[%s15077_s17 + $0x40] sm:$0xff] }
0x3920   :  { %v12642_v24 = vpop.f32.mrb[112].mxu1 }
0x3921   :  { %v9505_v29 = vpop.f32.mrb[113].mxu1  ;;  %12630 = vmatmul.mubr.msk.f32.vlgmr.msra.gmra.mrb[94].mxu0 %vm384_vm2, %v14784_v31 }
0x3922   :  { %13149 = vmatpush3.bf16.msra.mxu0 %v13146_v47  ;;  %12651 = vmatprep.mubr.msk.f32.mxu0 %vm77_vm0, %v14637_v3  ;;  %v11212_v47 = vld [vmem:[%s15072_s13 + $0xe8] sm:$0xff] }
0x3923   :  { %13151 = vmatprep.subr.bf16.mxu0 %v13150_v41 }
0x3926   :  { %13153 = vmatpush3.bf16.msra.mxu0 %v13150_v41 }
0x3927   :  { %12665 = vmatprep.subr.mxu0 %v13402_v37 }
0x3928   :  { %v12664_v33 = vpop.f32.mrb[114].mxu1 }
0x3929   :  { %12652 = vmatmul.mubr.msk.f32.vlgmr.msra.gmra.mrb[96].mxu0 %vm77_vm0, %v14681_v20  ;;  %v9655_v43 = vpop.f32.mrb[115].mxu1 }
0x392a   :  { %12667 = vmatprep.mubr.msk.f32.mxu0 %vm13403_vm1, %v13402_v37 }
0x39fc   :  { %v12653_v44 = vpop.f32.mrb[96].mxu0 }
0x39fd   :  { %v9580_v45 = vpop.f32.mrb[97].mxu0  ;;  %12671 = vmatpush3.xpose.msk.msra.mxu1 %vm384_vm2, %v12653_v44 }
0x39fe   :  { %12666 = vmatpush3.xpose.msk.msra.mxu0 %vm384_vm2, %v9580_v45  ;;  %12680 = vmatprep.subr.mxu1 %v13402_v37 }
0x39ff   :  { %12675 = vmatprep.subr.mxu0 %v13402_v37 }
0x3a00   :  { %12673 = vmatmul.mubr.msk.f32.vlgmr.msra.gmra.mrb[116].mxu1 %vm384_vm2, %v12642_v24 }
0x3a01   :  { %12668 = vmatmul.mubr.msk.f32.vlgmr.msra.gmra.mrb[98].mxu0 %vm384_vm2, %v9505_v29  ;;  %12681 = vmatpush3.msra.mxu1 %v12664_v33 }
0x3a02   :  { %12676 = vmatpush3.msra.mxu0 %v9655_v43  ;;  %12682 = vmatprep.mubr.msk.f32.mxu1 %vm13403_vm1, %v13402_v37 }
0x3a03   :  { %12677 = vmatprep.mubr.msk.f32.mxu0 %vm13403_vm1, %v13402_v37  ;;  %13163 = vmatprep.subr.bf16.mxu1 %v13162_v8 }
0x3a04   :  { %12685 = vmatprep.subr.mxu0 %v11217_v9 }
0x3ad3   :  { %v9812_v31 = vpop.f32.mrb[116].mxu1 }
0x3ad4   :  { %v9813_v49 = vadd.f32 %v14732_v42, %v9812_v31  ;;  %v9736_v50 = vpop.f32.mrb[98].mxu0  ;;  %v12674_v51 = vpop.f32.mrb[117].mxu1 }
0x3ad5   :  { %v9737_v53 = vadd.f32 %v14738_v39, %v9736_v50  ;;  %v12669_v38 = vpop.f32.mrb[99].mxu0 }
0x3ad6   :  { %v9819_v54 = vsel %vm384_vm2, %v9813_v49, -inf }
0x3ad7   :  { %9820 = vmax.xlane.f32.xlu1 %v9819_v54  ;;  %v9816_v55 = vsel %vm384_vm2, %v9737_v53, -inf }
0x3ad8   :  { %9817 = vmax.xlane.f32.xlu0 %v9816_v55 }
0x3b64   :  { %v9821_v28 = vpop.xlane.xlu1 %9820 }
0x3b65   :  { %v9823_v56 = vsub.f32 %v9813_v49, %v9821_v28  ;;  %v9818_v59 = vpop.xlane.xlu0 %9817 }
0x3b66   :  { %v9822_v60 = vsub.f32 %v9737_v53, %v9818_v59 }
0x3b67   :  { %v9826_v48 = vmul.f32 1.442695, %v9823_v56 }
0x3b68   :  { %v9824_v61 = vmul.f32 1.442695, %v9822_v60 }
0x3b69   :  { %13368 = vpow2.f32 %v9826_v48 }
0x3b6a   :  { %13370 = vpow2.f32 %v9824_v61 }
0x3b73   :  { %v13369_v57 = vpop.eup %13368 }
0x3b74   :  { %v13371_v62 = vpop.eup %13370  ;;  %v9831_v63 = vsel %vm384_vm2, %v13369_v57, 0.0 }
0x3b75   :  { %9832 = vadd.xlane.f32.xlu1 %v9831_v63  ;;  %v9828_v2 = vsel %vm384_vm2, %v13371_v62, 0.0 }
0x3b76   :  { %9829 = vadd.xlane.f32.xlu0 %v9828_v2 }
0x3c02   :  { %v9833_v11 = vpop.xlane.xlu1 %9832 }
0x3c03   :  { %13372 = vrcp.f32 %v9833_v11  ;;  %v9830_v13 = vpop.xlane.xlu0 %9829 }
0x3c04   :  { %13374 = vrcp.f32 %v9830_v13 }
0x3c0d   :  { %v13373_v14 = vpop.eup %13372 }
0x3c0e   :  { %v13375_v15 = vpop.eup %13374  ;;  %v9837_v16 = vmul.f32 %v13373_v14, %v13369_v57 }
0x3c0f   :  { %v9836_v0 = vmul.f32 %v13375_v15, %v13371_v62  ;;  %v11218_v62 = vld [vmem:[%s15075_s14 + $0x38] sm:$0xff] }
0x3c10   :  { %12683 = vmatmul.mubr.msk.f32.vlgmr.msra.gmra.mrb[118].mxu1 %vm384_vm2, %v9837_v16  ;;  %v11279_v16 = vld [vmem:[%s15076_s16 + $0x30] sm:$0xff] }
0x3c11   :  { %13165 = vmatpush3.bf16.msra.mxu1 %v13162_v8  ;;  %12678 = vmatmul.mubr.msk.f32.vlgmr.msra.gmra.mrb[100].mxu0 %vm384_vm2, %v9836_v0  ;;  %v11280_v0 = vld [vmem:[%s15076_s16 + $0x38] sm:$0xff] }
0x3c12   :  { %12698 = vmatprep.mubr.msk.f32.mxu1 %vm77_vm0, %v14704_v30  ;;  %13167 = vmatprep.subr.bf16.mxu1 %v13166_v1  ;;  %v11197_v30 = vld [vmem:[%s15069_s12 + $0xf0] sm:$0xff]  ;;  %v13190_v17 = vpack.c.bf16 %v11280_v0, %v11279_v16 }
0x3c13   :  { %12686 = vmatpush3.msra.mxu0 %v11217_v9 }
0x3c14   :  { %13171 = vmatprep.subr.bf16.mxu0 %v13170_v19 }
0x3c15   :  { %13169 = vmatpush3.bf16.msra.mxu1 %v13166_v1 }
0x3c18   :  { %12699 = vmatmul.mubr.msk.f32.vlgmr.msra.gmra.mrb[120].mxu1 %vm77_vm0, %v14706_v35  ;;  %v11198_v35 = vld [vmem:[%s15069_s12 + $0xf8] sm:$0xff] }
0x3c19   :  { %12720 = vmatprep.mubr.msk.f32.mxu1 %vm77_vm0, %v14637_v3  ;;  %v13174_v25 = vpack.c.bf16 %v11198_v35, %v11197_v30  ;;  %v11285_v30 = vld [vmem:[%s15077_s17 + $0x50] sm:$0xff] }
0x3ce3   :  { %v9980_v10 = vpop.f32.mrb[118].mxu1 }
0x3ce4   :  { %v9907_v12 = vpop.f32.mrb[100].mxu0  ;;  %v12684_v22 = vpop.f32.mrb[119].mxu1 }
0x3ce5   :  { %v12679_v46 = vpop.f32.mrb[101].mxu0  ;;  %12687 = vmatprep.mubr.msk.f32.mxu0 %vm384_vm2, %v9907_v12  ;;  %v11287_v22 = vld [vmem:[%s15077_s17 + $0x60] sm:$0xff] }
0x3ce6   :  { %12688 = vmatmul.mubr.msk.f32.vlgmr.msra.gmra.mrb[94].mxu0 %vm384_vm2, %v9980_v10  ;;  %v11286_v10 = vld [vmem:[%s15077_s17 + $0x58] sm:$0xff] }
0x3ce7   :  { %13173 = vmatpush3.bf16.msra.mxu0 %v13170_v19  ;;  %12709 = vmatprep.mubr.msk.f32.mxu0 %vm77_vm0, %v14637_v3  ;;  %v11211_v3 = vld [vmem:[%s15072_s13 + $0xe0] sm:$0xff]  ;;  %v11284_v19 = vld [vmem:[%s15077_s17 + $0x48] sm:$0xff]  ;;  %v13198_v12 = vpack.c.bf16 %v11286_v10, %v11285_v30 }
0x3ce8   :  { %13175 = vmatprep.subr.bf16.mxu0 %v13174_v25  ;;  %v13178_v32 = vpack.c.bf16 %v11212_v47, %v11211_v3  ;;  %v13194_v35 = vpack.c.bf16 %v11284_v19, %v11283_v18 }
0x3cea   :  { %13179 = vmatprep.subr.bf16.mxu1 %v13178_v32 }
0x3ceb   :  { %v12700_v27 = vpop.f32.mrb[120].mxu1  ;;  %13177 = vmatpush3.bf16.msra.mxu0 %v13174_v25  ;;  %13181 = vmatpush3.bf16.msra.mxu1 %v13178_v32  ;;  %v11288_v25 = vld [vmem:[%s15077_s17 + $0x68] sm:$0xff] }
0x3cec   :  { %v10133_v21 = vpop.f32.mrb[121].mxu1  ;;  %12723 = vmatprep.subr.mxu0 %v13402_v37  ;;  %13183 = vmatprep.subr.bf16.mxu1 %v13182_v40  ;;  %v13202_v46 = vpack.c.bf16 %v11288_v25, %v11287_v22 }
0x3cee   :  { %12710 = vmatmul.mubr.msk.f32.vlgmr.msra.gmra.mrb[102].mxu0 %vm77_vm0, %v14681_v20 }
0x3cef   :  { %12725 = vmatprep.mubr.msk.f32.mxu0 %vm13403_vm1, %v13402_v37  ;;  %13185 = vmatpush3.bf16.msra.mxu1 %v13182_v40 }
0x3cf0   :  { %12733 = vmatprep.subr.mxu1 %v13402_v37 }
0x3cf2   :  { %12721 = vmatmul.mubr.msk.f32.vlgmr.msra.gmra.mrb[122].mxu1 %vm77_vm0, %v14681_v20 }
0x3cf3   :  { %12735 = vmatprep.mubr.msk.f32.mxu1 %vm13403_vm1, %v13402_v37 }
0x3dc1   :  { %v12711_v34 = vpop.f32.mrb[102].mxu0 }
0x3dc2   :  { %v10208_v36 = vpop.f32.mrb[103].mxu0 }
0x3dc3   :  { %12724 = vmatpush3.xpose.msk.msra.mxu0 %vm384_vm2, %v10208_v36 }
0x3dc4   :  { %12728 = vmatprep.subr.mxu0 %v13402_v37 }
0x3dc6   :  { %12726 = vmatmul.mubr.msk.f32.vlgmr.msra.gmra.mrb[104].mxu0 %vm384_vm2, %v10133_v21 }
0x3dc7   :  { %12729 = vmatpush3.xpose.msk.msra.mxu0 %vm384_vm2, %v12711_v34  ;;  %12730 = vmatprep.mubr.msk.f32.mxu0 %vm13403_vm1, %v13402_v37 }
0x3dc8   :  { %12738 = vmatprep.subr.mxu0 %v13402_v37 }
0x3dca   :  { %12731 = vmatmul.mubr.msk.f32.vlgmr.msra.gmra.mrb[106].mxu0 %vm384_vm2, %v12700_v27 }
0x3dcb   :  { %12740 = vmatprep.mubr.msk.f32.mxu0 %vm13403_vm1, %v13402_v37 }
0x3e99   :  { %v10364_v41 = vpop.f32.mrb[104].mxu0 }
0x3e9a   :  { %v10365_v24 = vadd.f32 %v14738_v39, %v10364_v41  ;;  %v12727_v29 = vpop.f32.mrb[105].mxu0 }
0x3e9c   :  { %v10444_v33 = vsel %vm384_vm2, %v10365_v24, -inf }
0x3e9d   :  { %10445 = vmax.xlane.f32.xlu0 %v10444_v33  ;;  %v10440_v43 = vpop.f32.mrb[106].mxu0  ;;  %v11289_v33 = vld [vmem:[%s15077_s17 + $0x70] sm:$0xff] }
0x3e9e   :  { %v10441_v44 = vadd.f32 %v14732_v42, %v10440_v43  ;;  %v12732_v45 = vpop.f32.mrb[107].mxu0  ;;  %v12722_v42 = vpop.f32.mrb[122].mxu1  ;;  %v11290_v43 = vld [vmem:[%s15077_s17 + $0x78] sm:$0xff] }
0x3e9f   :  { %v10283_v28 = vpop.f32.mrb[123].mxu1  ;;  %12739 = vmatpush3.msra.mxu0 %v12722_v42 }
0x3ea0   :  { %v10447_v31 = vsel %vm384_vm2, %v10441_v44, -inf  ;;  %12734 = vmatpush3.msra.mxu1 %v10283_v28  ;;  %12743 = vmatprep.subr.mxu0 %v11218_v62 }
0x3ea1   :  { %10448 = vmax.xlane.f32.xlu1 %v10447_v31 }
0x3f2a   :  { %v10446_v49 = vpop.xlane.xlu0 %10445 }
0x3f2b   :  { %v10450_v50 = vsub.f32 %v10365_v24, %v10446_v49 }
0x3f2d   :  { %v10452_v20 = vmul.f32 1.442695, %v10450_v50 }
0x3f2e   :  { %v10449_v51 = vpop.xlane.xlu1 %10448 }
0x3f2f   :  { %13376 = vpow2.f32 %v10452_v20  ;;  %v10451_v37 = vsub.f32 %v10441_v44, %v10449_v51  ;;  %v13206_v44 = vpack.c.bf16 %v11290_v43, %v11289_v33 }
0x3f31   :  { %v10454_v53 = vmul.f32 1.442695, %v10451_v37 }
0x3f33   :  { %13378 = vpow2.f32 %v10454_v53 }
0x3f39   :  { %v13377_v39 = vpop.eup %13376 }
0x3f3a   :  { %v10456_v38 = vsel %vm384_vm2, %v13377_v39, 0.0 }
0x3f3b   :  { %10457 = vadd.xlane.f32.xlu0 %v10456_v38 }
0x3f3d   :  { %v13379_v54 = vpop.eup %13378 }
0x3f3e   :  { %v10459_v55 = vsel %vm384_vm2, %v13379_v54, 0.0 }
0x3f3f   :  { %10460 = vadd.xlane.f32.xlu1 %v10459_v55 }
0x3fc8   :  { %v10458_v56 = vpop.xlane.xlu0 %10457 }
0x3fc9   :  { %13380 = vrcp.f32 %v10458_v56 }
0x3fcc   :  { %v10461_v59 = vpop.xlane.xlu1 %10460 }
0x3fcd   :  { %13382 = vrcp.f32 %v10461_v59 }
0x3fd3   :  { %v13381_v60 = vpop.eup %13380 }
0x3fd4   :  { %v10464_v48 = vmul.f32 %v13381_v60, %v13377_v39 }
0x3fd6   :  { %12736 = vmatmul.mubr.msk.f32.vlgmr.msra.gmra.mrb[124].mxu1 %vm384_vm2, %v10464_v48 }
0x3fd7   :  { %v13383_v61 = vpop.eup %13382 }
0x3fd8   :  { %v10465_v57 = vmul.f32 %v13383_v61, %v13379_v54 }
0x3fda   :  { %12741 = vmatmul.mubr.msk.f32.vlgmr.msra.gmra.mrb[108].mxu0 %vm384_vm2, %v10465_v57  ;;  %v11293_v57 = vld [vmem:[%s15079_s18] ss:$0 sm:$0xff] }
0x3fdb   :  { %12744 = vmatpush3.msra.mxu0 %v11218_v62 }
0x3fdc   :  { %13195 = vmatprep.subr.bf16.mxu0 %v13194_v35 }
0x40a9   :  { %v10535_v63 = vpop.f32.mrb[124].mxu1 }
0x40aa   :  { %v12737_v2 = vpop.f32.mrb[125].mxu1  ;;  %12745 = vmatprep.mubr.msk.f32.mxu0 %vm384_vm2, %v10535_v63 }
0x40ad   :  { %v10608_v4 = vpop.f32.mrb[108].mxu0 }
0x40ae   :  { %v12742_v6 = vpop.f32.mrb[109].mxu0  ;;  %12746 = vmatmul.mubr.msk.f32.vlgmr.msra.gmra.mrb[94].mxu0 %vm384_vm2, %v10608_v4 }
0x40af   :  { %13197 = vmatpush3.bf16.msra.mxu0 %v13194_v35 }
0x40b0   :  { %13199 = vmatprep.subr.bf16.mxu0 %v13198_v12 }
0x40b3   :  { %13201 = vmatpush3.bf16.msra.mxu0 %v13198_v12 }
0x40b4   :  { %13203 = vmatprep.subr.bf16.mxu0 %v13202_v46 }
0x40b7   :  { %13205 = vmatpush3.bf16.msra.mxu0 %v13202_v46 }
0x40b8   :  { %13207 = vmatprep.subr.bf16.mxu0 %v13206_v44 }
0x40bb   :  { %13209 = vmatpush3.bf16.msra.mxu0 %v13206_v44 }
0x4181   :  { %v12747_v8 = vpop.f32.mrb[94].mxu0 }
0x4182   :  { %v14990_v9 = vadd.f32 %v12747_v8, %v14642_v5  ;;  %v10684_v11 = vpop.f32.mrb[95].mxu0  ;;  %v11277_v5 = vld [vmem:[%s15076_s16 + $0x20] sm:$0xff] }
0x4183   :  { %v14993_v13 = vadd.f32 %v10684_v11, %v14645_v7  ;;  %v11278_v7 = vld [vmem:[%s15076_s16 + $0x28] sm:$0xff] }
0x4184   :  { %v10700_v58 = vmul.f32 %v14990_v9, %v14990_v9  ;;  %v13186_v1 = vpack.c.bf16 %v11278_v7, %v11277_v5 }
0x4185   :  { %v10699_v52 = vmul.f32 %v14993_v13, %v14993_v13 }
0x4186   :  { %v10704_v14 = vsel %vm77_vm0, %v10700_v58, 0.0  ;;  %13187 = vmatprep.subr.bf16.mxu1 %v13186_v1 }
0x4187   :  { %10705 = vadd.xlane.f32.xlu1 %v10704_v14  ;;  %v10701_v15 = vsel %vm77_vm0, %v10699_v52, 0.0  ;;  %13189 = vmatpush3.bf16.msra.mxu1 %v13186_v1 }
0x4188   :  { %10702 = vadd.xlane.f32.xlu0 %v10701_v15  ;;  %13191 = vmatprep.subr.bf16.mxu1 %v13190_v17 }
0x418b   :  { %13193 = vmatpush3.bf16.msra.mxu1 %v13190_v17 }
0x4214   :  { %v10706_v27 = vpop.xlane.xlu1 %10705 }
0x4215   :  { %v10708_v21 = vmul.f32 0.03125, %v10706_v27  ;;  %v10703_v34 = vpop.xlane.xlu0 %10702 }
0x4216   :  { %v10707_v36 = vmul.f32 0.03125, %v10703_v34 }
0x4217   :  { %v10710_v3 = vadd.f32 1e-06, %v10708_v21 }
0x4218   :  { %v10709_v47 = vadd.f32 1e-06, %v10707_v36 }
0x4219   :  { %13384 = vrsqrt.f32 %v10710_v3 }
0x421a   :  { %13386 = vrsqrt.f32 %v10709_v47 }
0x4223   :  { %v13385_v26 = vpop.eup %13384 }
0x4224   :  { %v13387_v32 = vpop.eup %13386  ;;  %v10714_v40 = vmul.f32 %v13385_v26, %v14990_v9 }
0x4225   :  { %v10713_v41 = vmul.f32 %v13387_v32, %v14993_v13 }
0x4226   :  { %v10722_v29 = vmul.f32 %v11276_v23, %v10714_v40 }
0x4227   :  { %v10721_v24 = vmul.f32 %v11276_v23, %v10713_v41 }
0x4229   :  { %12756 = vmatprep.mubr.msk.f32.mxu1 %vm77_vm0, %v10721_v24 }
0x422a   :  { %12757 = vmatmul.mubr.msk.f32.vlgmr.msra.gmra.mrb[126].mxu1 %vm77_vm0, %v10722_v29 }
0x42fd   :  { %v12758_v45 = vpop.f32.mrb[126].mxu1 }
0x42fe   :  { %v10800_v31 = vpop.f32.mrb[127].mxu1  ;;  %v10810_v50 = vmax.f32 %v12758_v45, 0.0 }
0x42ff   :  { %v10809_v49 = vmax.f32 %v10800_v31, 0.0 }
0x4301   :  { %12775 = vmatprep.mubr.msk.f32.mxu0 %vm5409_vm3, %v10809_v49 }
0x4302   :  { %12776 = vmatmul.mubr.msk.f32.vlgmr.msra.gmra.mrb[110].mxu0 %vm5409_vm3, %v10810_v50 }
0x43d5   :  { %v12777_v20 = vpop.f32.mrb[110].mxu0 }
0x43d6   :  { %v10902_v51 = vadd.f32 %v12777_v20, %v14990_v9  ;;  %v10892_v37 = vpop.f32.mrb[111].mxu0 }
0x43d7   :  { %v10901_v53 = vadd.f32 %v10892_v37, %v14993_v13 }
0x43d8   :  { %v10905_v39 = vmul.f32 %v10902_v51, %v10902_v51 }
0x43d9   :  { %v10904_v38 = vmul.f32 %v10901_v53, %v10901_v53 }
0x43da   :  { %v10909_v54 = vsel %vm77_vm0, %v10905_v39, 0.0 }
0x43db   :  { %10910 = vadd.xlane.f32.xlu1 %v10909_v54  ;;  %v10906_v55 = vsel %vm77_vm0, %v10904_v38, 0.0 }
0x43dc   :  { %10907 = vadd.xlane.f32.xlu0 %v10906_v55 }
0x4468   :  { %v10911_v42 = vpop.xlane.xlu1 %10910 }
0x4469   :  { %v10913_v28 = vmul.f32 0.03125, %v10911_v42  ;;  %v10908_v56 = vpop.xlane.xlu0 %10907 }
0x446a   :  { %v10912_v59 = vmul.f32 0.03125, %v10908_v56 }
0x446b   :  { %v10915_v60 = vadd.f32 1e-06, %v10913_v28 }
0x446c   :  { %v10914_v48 = vadd.f32 1e-06, %v10912_v59 }
0x446d   :  { %13388 = vrsqrt.f32 %v10915_v60 }
0x446e   :  { %13390 = vrsqrt.f32 %v10914_v48 }
0x4477   :  { %v13389_v61 = vpop.eup %13388 }
0x4478   :  { %v13391_v62 = vpop.eup %13390  ;;  %v10919_v63 = vmul.f32 %v13389_v61, %v10902_v51 }
0x4479   :  { %v10918_v2 = vmul.f32 %v13391_v62, %v10901_v53 }
0x447a   :  { %v10927_v4 = vmul.f32 %v11293_v57, %v10919_v63 }
0x447b   :  { %v10926_v6 = vmul.f32 %v11293_v57, %v10918_v2 }
0x447c   :  { %10929 = vst.msk [vmem:[%s15080_s19 + $0x8] sm:$0xff] %vm77_vm0, %v10927_v4 }
0x447d   :  { %10928 = vst.msk [vmem:[%s15080_s19] sm:$0xff] %vm77_vm0, %v10926_v6 }

</bundles_post_ra>
